<compile_context>
chip_gen: v7x
topology: tpu7x:2x2x1
jax: 0.10.0
libtpu: 0.0.40
codegen_flags: <defaults>
</compile_context>

<pallas_src>
import functools

import jax
import jax.numpy as jnp
from jax.experimental import pallas as pl
from jax.experimental.pallas import tpu as pltpu


def _qa_head_kernel(h_ref, sp_ref, ep_ref, w_ref, b_ref,
                    start_ref, end_ref, stats_ref,
                    m_s, l_s, m_e, l_e, c_s, c_e,
                    *, seq_len):
    s_idx = pl.program_id(1)
    n_s = pl.num_programs(1)

    tB, tS, H = h_ref.shape

    @pl.when(s_idx == 0)
    def _init():
        m_s[...] = jnp.full_like(m_s, -jnp.inf)
        m_e[...] = jnp.full_like(m_e, -jnp.inf)
        l_s[...] = jnp.zeros_like(l_s)
        l_e[...] = jnp.zeros_like(l_e)
        c_s[...] = jnp.zeros_like(c_s)
        c_e[...] = jnp.zeros_like(c_e)

    # ---- per-token linear head: [tB, tS, H] x [H] -> [tB, tS] (lane-dense) ----
    hf = h_ref[...].astype(jnp.float32)                      # cast per tile (input may be bf16)
    w = w_ref[...].astype(jnp.float32)                       # [2, H]
    w_start = w[0:1, :].reshape(1, 1, H)
    w_end = w[1:2, :].reshape(1, 1, H)
    start = jnp.sum(hf * w_start, axis=-1) + b_ref[0]        # [tB, tS]
    end = jnp.sum(hf * w_end, axis=-1) + b_ref[1]            # [tB, tS]

    start_ref[...] = start.astype(start_ref.dtype)
    end_ref[...] = end.astype(end_ref.dtype)

    # ---- online logsumexp over the sequence (grid) axis ----
    m_new_s = jnp.maximum(m_s[...], jnp.max(start, axis=-1, keepdims=True))
    l_s[...] = (l_s[...] * jnp.exp(m_s[...] - m_new_s)
                + jnp.sum(jnp.exp(start - m_new_s), axis=-1, keepdims=True))
    m_s[...] = m_new_s

    m_new_e = jnp.maximum(m_e[...], jnp.max(end, axis=-1, keepdims=True))
    l_e[...] = (l_e[...] * jnp.exp(m_e[...] - m_new_e)
                + jnp.sum(jnp.exp(end - m_new_e), axis=-1, keepdims=True))
    m_e[...] = m_new_e

    # ---- gather the logit at the (clamped) target position ----
    sp = jnp.clip(sp_ref[...], 0, seq_len)                   # [tB, 1], == seq_len -> ignored
    ep = jnp.clip(ep_ref[...], 0, seq_len)
    cols = jax.lax.broadcasted_iota(jnp.int32, (tB, tS), 1) + s_idx * tS
    c_s[...] += jnp.sum(jnp.where(cols == sp, start, 0.0), axis=-1, keepdims=True)
    c_e[...] += jnp.sum(jnp.where(cols == ep, end, 0.0), axis=-1, keepdims=True)

    # ---- finalize per-row loss contributions at the last sequence tile ----
    @pl.when(s_idx == n_s - 1)
    def _finalize():
        lse_s = m_s[...] + jnp.log(l_s[...])                 # [tB, 1]
        lse_e = m_e[...] + jnp.log(l_e[...])
        valid_s = (jnp.clip(sp_ref[...], 0, seq_len) < seq_len).astype(jnp.float32)
        valid_e = (jnp.clip(ep_ref[...], 0, seq_len) < seq_len).astype(jnp.float32)
        loss_s = jnp.where(valid_s > 0, lse_s - c_s[...], 0.0)
        loss_e = jnp.where(valid_e > 0, lse_e - c_e[...], 0.0)
        stats_ref[...] = jnp.concatenate([loss_s, valid_s, loss_e, valid_e], axis=-1)


def qa_head(last_hidden_state, start_positions, end_positions, weight, bias,
            *, block_b=8, block_s=128):
    """Pallas-backed forward. Returns (loss, start_logits [B,S], end_logits [B,S])."""
    B, S, H = last_hidden_state.shape
    L = weight.shape[0]
    assert L == 2, "QuestionAnsweringHead splits logits into exactly (start, end)"

    tB = min(block_b, B)
    tS = min(block_s, S)
    assert B % tB == 0 and S % tS == 0, "choose block sizes dividing B and S"
    grid = (B // tB, S // tS)

    sp2 = start_positions.reshape(B, 1).astype(jnp.int32)
    ep2 = end_positions.reshape(B, 1).astype(jnp.int32)
    w = weight.astype(jnp.float32)            # [2, H] — used row-wise; no in-kernel transpose
    b = bias.astype(jnp.float32)              # [2]    — scalars, kept in SMEM

    kernel = functools.partial(_qa_head_kernel, seq_len=S)

    grid_spec = pltpu.PrefetchScalarGridSpec(
        num_scalar_prefetch=0,
        grid=grid,
        in_specs=[
            # hidden states stream through VMEM (bf16 ok), double-buffered by Pallas
            pl.BlockSpec((tB, tS, H), lambda b_, s_: (b_, s_, 0)),
            pl.BlockSpec((tB, 1), lambda b_, s_: (b_, 0)),        # start positions
            pl.BlockSpec((tB, 1), lambda b_, s_: (b_, 0)),        # end positions
            pl.BlockSpec((L, H), lambda b_, s_: (0, 0)),          # classifier weight (resident)
            pl.BlockSpec(memory_space=pltpu.MemorySpace.SMEM),    # bias scalars
        ],
        out_specs=(
            pl.BlockSpec((tB, tS), lambda b_, s_: (b_, s_)),      # start logits (lane-dense)
            pl.BlockSpec((tB, tS), lambda b_, s_: (b_, s_)),      # end logits (lane-dense)
            pl.BlockSpec((tB, 4), lambda b_, s_: (b_, 0)),        # per-row [loss_s, valid_s, loss_e, valid_e]
        ),
        scratch_shapes=[
            pltpu.VMEM((tB, 1), jnp.float32),   # running max   (start)
            pltpu.VMEM((tB, 1), jnp.float32),   # running sumexp(start)
            pltpu.VMEM((tB, 1), jnp.float32),   # running max   (end)
            pltpu.VMEM((tB, 1), jnp.float32),   # running sumexp(end)
            pltpu.VMEM((tB, 1), jnp.float32),   # gathered target logit (start)
            pltpu.VMEM((tB, 1), jnp.float32),   # gathered target logit (end)
        ],
    )

    start_logits, end_logits, stats = pl.pallas_call(
        kernel,
        out_shape=(
            jax.ShapeDtypeStruct((B, S), jnp.float32),
            jax.ShapeDtypeStruct((B, S), jnp.float32),
            jax.ShapeDtypeStruct((B, 4), jnp.float32),
        ),
        grid_spec=grid_spec,
        compiler_params=pltpu.CompilerParams(
            dimension_semantics=("parallel", "arbitrary"),   # batch parallel (v7x 2 TCs)
            vmem_limit_bytes=32 * 1024 * 1024,               # tiles sized well under v7x's 64 MiB
        ),
    )(last_hidden_state, sp2, ep2, w, b)

    # Tiny final mean over B per-row scalars done in plain JAX so the batch grid
    # axis can stay megacore-parallel (matches torch CE mean over non-ignored rows).
    start_loss = jnp.sum(stats[:, 0]) / jnp.sum(stats[:, 1])
    end_loss = jnp.sum(stats[:, 2]) / jnp.sum(stats[:, 3])
    loss = 0.5 * (start_loss + end_loss)
    return loss, start_logits, end_logits


def _reference(last_hidden_state, start_positions, end_positions, weight, bias):
    # Pure-JAX reference mirroring the PyTorch forward.
    h = last_hidden_state.astype(jnp.float32)
    logits = jnp.sum(h[:, :, None, :] * weight[None, None, :, :], axis=-1) + bias  # [B,S,2]
    start_logits = logits[..., 0]
    end_logits = logits[..., 1]
    S = start_logits.shape[1]

    def ce(lg, pos):
        pos = jnp.clip(pos, 0, S)
        valid = pos < S
        lse = jax.scipy.special.logsumexp(lg, axis=-1)
        corr = jnp.take_along_axis(lg, jnp.minimum(pos, S - 1)[:, None], axis=1)[:, 0]
        per_row = jnp.where(valid, lse - corr, 0.0)
        return jnp.sum(per_row) / jnp.sum(valid.astype(jnp.float32))

    loss = 0.5 * (ce(start_logits, start_positions) + ce(end_logits, end_positions))
    return loss, start_logits, end_logits


if __name__ == "__main__":
    B, S, H = 16, 256, 128   # small, but gives grid (2, 2) so pipelining is exercised

    key = jax.random.PRNGKey(0)
    k_h, k_w, k_b, k_sp, k_ep = jax.random.split(key, 5)

    # bf16 activations fed straight from HBM (no wrapper upcast).
    last_hidden_state = jax.random.normal(k_h, (B, S, H), dtype=jnp.float32).astype(jnp.bfloat16)
    bound = 1.0 / (H ** 0.5)
    weight = jax.random.uniform(k_w, (2, H), minval=-bound, maxval=bound, dtype=jnp.float32)
    bias = jax.random.uniform(k_b, (2,), minval=-bound, maxval=bound, dtype=jnp.float32)
    start_positions = jax.random.randint(k_sp, (B,), 0, S, dtype=jnp.int32)
    end_positions = jax.random.randint(k_ep, (B,), 0, S, dtype=jnp.int32)
    # Exercise the clamp / ignore_index semantics.
    start_positions = start_positions.at[0].set(-7)    # clamps to 0 (still counted)
    end_positions = end_positions.at[1].set(S + 5)     # clamps to S -> ignored by CE

    loss, start_logits, end_logits = qa_head(
        last_hidden_state, start_positions, end_positions, weight, bias)
    jax.block_until_ready((loss, start_logits, end_logits))

    ref_loss, ref_start, ref_end = _reference(
        last_hidden_state, start_positions, end_positions, weight, bias)

    assert jnp.allclose(start_logits, ref_start, atol=1e-4, rtol=1e-4)
    assert jnp.allclose(end_logits, ref_end, atol=1e-4, rtol=1e-4)
    assert jnp.allclose(loss, ref_loss, atol=1e-4, rtol=1e-4)

    print("KERNEL_OK")
</pallas_src>

<mosaic_0001>
module attributes {stable_mosaic.version = 11 : i64} {
  func.func @_qa_head_kernel(%arg0: i32, %arg1: i32, %arg2: memref<8x128x128xbf16, #tpu.memory_space<vmem>>, %arg3: memref<8x1xi32, #tpu.memory_space<vmem>>, %arg4: memref<8x1xi32, #tpu.memory_space<vmem>>, %arg5: memref<2x128xf32, #tpu.memory_space<vmem>>, %arg6: memref<2xf32, #tpu.memory_space<smem>>, %arg7: memref<8x128xf32, #tpu.memory_space<vmem>>, %arg8: memref<8x128xf32, #tpu.memory_space<vmem>>, %arg9: memref<8x4xf32, #tpu.memory_space<vmem>>, %arg10: memref<8x1xf32, #tpu.memory_space<vmem>>, %arg11: memref<8x1xf32, #tpu.memory_space<vmem>>, %arg12: memref<8x1xf32, #tpu.memory_space<vmem>>, %arg13: memref<8x1xf32, #tpu.memory_space<vmem>>, %arg14: memref<8x1xf32, #tpu.memory_space<vmem>>, %arg15: memref<8x1xf32, #tpu.memory_space<vmem>>) attributes {dimension_semantics = [#tpu.dimension_semantics<parallel>, #tpu.dimension_semantics<arbitrary>], iteration_bounds = array<i64: 2, 2>, scalar_prefetch = 0 : i64, scratch_operands = 6 : i64, tpu.core_type = #tpu.core_type<tc>, window_params = [{transform_indices = @transform_0, window_bounds = array<i64: 8, 128, 128>}, {transform_indices = @transform_1, window_bounds = array<i64: 8, 1>}, {transform_indices = @transform_2, window_bounds = array<i64: 8, 1>}, {pipeline_mode = #tpu.pipeline_mode<synchronous>, transform_indices = @transform_3, window_bounds = array<i64: 2, 128>}, {transform_indices = @transform_4, window_bounds = array<i64: 2>}, {transform_indices = @transform_5, window_bounds = array<i64: 8, 128>}, {transform_indices = @transform_6, window_bounds = array<i64: 8, 128>}, {transform_indices = @transform_7, window_bounds = array<i64: 8, 4>}]} {
    %c0_i32 = arith.constant 0 : i32
    %0 = arith.cmpi eq, %arg1, %c0_i32 : i32
    %1 = arith.extui %0 : i1 to i32
    %c0_i32_0 = arith.constant 0 : i32
    %2 = arith.cmpi ne, %1, %c0_i32_0 : i32
    scf.if %2 {
      %cst_55 = arith.constant 0xFF800000 : f32
      %93 = vector.broadcast %cst_55 : f32 to vector<8x1xf32>
      %c0_56 = arith.constant 0 : index
      %c0_57 = arith.constant 0 : index
      %94 = vector.load %arg10[%c0_56, %c0_57] : memref<8x1xf32, #tpu.memory_space<vmem>>, vector<8x1xf32>
      tpu.vector_store %arg10[%c0_56, %c0_57], %93 {strides = array<i32>} : memref<8x1xf32, #tpu.memory_space<vmem>>, vector<8x1xf32>,
      %cst_58 = arith.constant 0xFF800000 : f32
      %95 = vector.broadcast %cst_58 : f32 to vector<8x1xf32>
      %c0_59 = arith.constant 0 : index
      %c0_60 = arith.constant 0 : index
      %96 = vector.load %arg12[%c0_59, %c0_60] : memref<8x1xf32, #tpu.memory_space<vmem>>, vector<8x1xf32>
      tpu.vector_store %arg12[%c0_59, %c0_60], %95 {strides = array<i32>} : memref<8x1xf32, #tpu.memory_space<vmem>>, vector<8x1xf32>,
      %cst_61 = arith.constant 0.000000e+00 : f32
      %97 = vector.broadcast %cst_61 : f32 to vector<8x1xf32>
      %c0_62 = arith.constant 0 : index
      %c0_63 = arith.constant 0 : index
      %98 = vector.load %arg11[%c0_62, %c0_63] : memref<8x1xf32, #tpu.memory_space<vmem>>, vector<8x1xf32>
      tpu.vector_store %arg11[%c0_62, %c0_63], %97 {strides = array<i32>} : memref<8x1xf32, #tpu.memory_space<vmem>>, vector<8x1xf32>,
      %cst_64 = arith.constant 0.000000e+00 : f32
      %99 = vector.broadcast %cst_64 : f32 to vector<8x1xf32>
      %c0_65 = arith.constant 0 : index
      %c0_66 = arith.constant 0 : index
      %100 = vector.load %arg13[%c0_65, %c0_66] : memref<8x1xf32, #tpu.memory_space<vmem>>, vector<8x1xf32>
      tpu.vector_store %arg13[%c0_65, %c0_66], %99 {strides = array<i32>} : memref<8x1xf32, #tpu.memory_space<vmem>>, vector<8x1xf32>,
      %cst_67 = arith.constant 0.000000e+00 : f32
      %101 = vector.broadcast %cst_67 : f32 to vector<8x1xf32>
      %c0_68 = arith.constant 0 : index
      %c0_69 = arith.constant 0 : index
      %102 = vector.load %arg14[%c0_68, %c0_69] : memref<8x1xf32, #tpu.memory_space<vmem>>, vector<8x1xf32>
      tpu.vector_store %arg14[%c0_68, %c0_69], %101 {strides = array<i32>} : memref<8x1xf32, #tpu.memory_space<vmem>>, vector<8x1xf32>,
      %cst_70 = arith.constant 0.000000e+00 : f32
      %103 = vector.broadcast %cst_70 : f32 to vector<8x1xf32>
      %c0_71 = arith.constant 0 : index
      %c0_72 = arith.constant 0 : index
      %104 = vector.load %arg15[%c0_71, %c0_72] : memref<8x1xf32, #tpu.memory_space<vmem>>, vector<8x1xf32>
      tpu.vector_store %arg15[%c0_71, %c0_72], %103 {strides = array<i32>} : memref<8x1xf32, #tpu.memory_space<vmem>>, vector<8x1xf32>,
    } else {
    }
    %c0 = arith.constant 0 : index
    %c0_1 = arith.constant 0 : index
    %c0_2 = arith.constant 0 : index
    %3 = vector.load %arg2[%c0, %c0_1, %c0_2] : memref<8x128x128xbf16, #tpu.memory_space<vmem>>, vector<8x128x128xbf16>
    %4 = arith.extf %3 : vector<8x128x128xbf16> to vector<8x128x128xf32>
    %c0_3 = arith.constant 0 : index
    %c0_4 = arith.constant 0 : index
    %5 = vector.load %arg5[%c0_3, %c0_4] : memref<2x128xf32, #tpu.memory_space<vmem>>, vector<2x128xf32>
    %6 = vector.extract_strided_slice %5 {offsets = [0, 0], sizes = [1, 128], strides = [1, 1]} : vector<2x128xf32> to vector<1x128xf32>
    %7 = vector.shape_cast %6 : vector<1x128xf32> to vector<1x1x128xf32>
    %8 = vector.extract_strided_slice %5 {offsets = [1, 0], sizes = [1, 128], strides = [1, 1]} : vector<2x128xf32> to vector<1x128xf32>
    %9 = vector.shape_cast %8 : vector<1x128xf32> to vector<1x1x128xf32>
    %10 = vector.broadcast %7 : vector<1x1x128xf32> to vector<8x128x128xf32>
    %11 = arith.mulf %4, %10 : vector<8x128x128xf32>
    %cst = arith.constant dense<0.000000e+00> : vector<8x128xf32>
    %12 = vector.multi_reduction <add>, %11, %cst [2] : vector<8x128x128xf32> to vector<8x128xf32>
    %c0_5 = arith.constant 0 : index
    %13 = memref.load %arg6[%c0_5] : memref<2xf32, #tpu.memory_space<smem>>
    %14 = vector.broadcast %13 : f32 to vector<8x128xf32>
    %15 = arith.addf %12, %14 : vector<8x128xf32>
    %16 = vector.broadcast %9 : vector<1x1x128xf32> to vector<8x128x128xf32>
    %17 = arith.mulf %4, %16 : vector<8x128x128xf32>
    %cst_6 = arith.constant dense<0.000000e+00> : vector<8x128xf32>
    %18 = vector.multi_reduction <add>, %17, %cst_6 [2] : vector<8x128x128xf32> to vector<8x128xf32>
    %c1 = arith.constant 1 : index
    %19 = memref.load %arg6[%c1] : memref<2xf32, #tpu.memory_space<smem>>
    %20 = vector.broadcast %19 : f32 to vector<8x128xf32>
    %21 = arith.addf %18, %20 : vector<8x128xf32>
    %c0_7 = arith.constant 0 : index
    %c0_8 = arith.constant 0 : index
    %22 = vector.load %arg7[%c0_7, %c0_8] : memref<8x128xf32, #tpu.memory_space<vmem>>, vector<8x128xf32>
    tpu.vector_store %arg7[%c0_7, %c0_8], %15 {strides = array<i32>} : memref<8x128xf32, #tpu.memory_space<vmem>>, vector<8x128xf32>,
    %c0_9 = arith.constant 0 : index
    %c0_10 = arith.constant 0 : index
    %23 = vector.load %arg8[%c0_9, %c0_10] : memref<8x128xf32, #tpu.memory_space<vmem>>, vector<8x128xf32>
    tpu.vector_store %arg8[%c0_9, %c0_10], %21 {strides = array<i32>} : memref<8x128xf32, #tpu.memory_space<vmem>>, vector<8x128xf32>,
    %c0_11 = arith.constant 0 : index
    %c0_12 = arith.constant 0 : index
    %24 = vector.load %arg10[%c0_11, %c0_12] : memref<8x1xf32, #tpu.memory_space<vmem>>, vector<8x1xf32>
    %cst_13 = arith.constant dense<0xFF800000> : vector<8xf32>
    %25 = vector.multi_reduction <maximumf>, %15, %cst_13 [1] : vector<8x128xf32> to vector<8xf32>
    %26 = vector.shape_cast %25 : vector<8xf32> to vector<8x1xf32>
    %27 = arith.maximumf %24, %26 : vector<8x1xf32>
    %c0_14 = arith.constant 0 : index
    %c0_15 = arith.constant 0 : index
    %28 = vector.load %arg11[%c0_14, %c0_15] : memref<8x1xf32, #tpu.memory_space<vmem>>, vector<8x1xf32>
    %c0_16 = arith.constant 0 : index
    %c0_17 = arith.constant 0 : index
    %29 = vector.load %arg10[%c0_16, %c0_17] : memref<8x1xf32, #tpu.memory_space<vmem>>, vector<8x1xf32>
    %30 = arith.subf %29, %27 : vector<8x1xf32>
    %31 = math.exp %30 : vector<8x1xf32>
    %32 = arith.mulf %28, %31 : vector<8x1xf32>
    %33 = vector.broadcast %27 : vector<8x1xf32> to vector<8x128xf32>
    %34 = arith.subf %15, %33 : vector<8x128xf32>
    %35 = math.exp %34 : vector<8x128xf32>
    %cst_18 = arith.constant dense<0.000000e+00> : vector<8xf32>
    %36 = vector.multi_reduction <add>, %35, %cst_18 [1] : vector<8x128xf32> to vector<8xf32>
    %37 = vector.shape_cast %36 : vector<8xf32> to vector<8x1xf32>
    %38 = arith.addf %32, %37 : vector<8x1xf32>
    %c0_19 = arith.constant 0 : index
    %c0_20 = arith.constant 0 : index
    %39 = vector.load %arg11[%c0_19, %c0_20] : memref<8x1xf32, #tpu.memory_space<vmem>>, vector<8x1xf32>
    tpu.vector_store %arg11[%c0_19, %c0_20], %38 {strides = array<i32>} : memref<8x1xf32, #tpu.memory_space<vmem>>, vector<8x1xf32>,
    %c0_21 = arith.constant 0 : index
    %c0_22 = arith.constant 0 : index
    %40 = vector.load %arg10[%c0_21, %c0_22] : memref<8x1xf32, #tpu.memory_space<vmem>>, vector<8x1xf32>
    tpu.vector_store %arg10[%c0_21, %c0_22], %27 {strides = array<i32>} : memref<8x1xf32, #tpu.memory_space<vmem>>, vector<8x1xf32>,
    %c0_23 = arith.constant 0 : index
    %c0_24 = arith.constant 0 : index
    %41 = vector.load %arg12[%c0_23, %c0_24] : memref<8x1xf32, #tpu.memory_space<vmem>>, vector<8x1xf32>
    %cst_25 = arith.constant dense<0xFF800000> : vector<8xf32>
    %42 = vector.multi_reduction <maximumf>, %21, %cst_25 [1] : vector<8x128xf32> to vector<8xf32>
    %43 = vector.shape_cast %42 : vector<8xf32> to vector<8x1xf32>
    %44 = arith.maximumf %41, %43 : vector<8x1xf32>
    %c0_26 = arith.constant 0 : index
    %c0_27 = arith.constant 0 : index
    %45 = vector.load %arg13[%c0_26, %c0_27] : memref<8x1xf32, #tpu.memory_space<vmem>>, vector<8x1xf32>
    %c0_28 = arith.constant 0 : index
    %c0_29 = arith.constant 0 : index
    %46 = vector.load %arg12[%c0_28, %c0_29] : memref<8x1xf32, #tpu.memory_space<vmem>>, vector<8x1xf32>
    %47 = arith.subf %46, %44 : vector<8x1xf32>
    %48 = math.exp %47 : vector<8x1xf32>
    %49 = arith.mulf %45, %48 : vector<8x1xf32>
    %50 = vector.broadcast %44 : vector<8x1xf32> to vector<8x128xf32>
    %51 = arith.subf %21, %50 : vector<8x128xf32>
    %52 = math.exp %51 : vector<8x128xf32>
    %cst_30 = arith.constant dense<0.000000e+00> : vector<8xf32>
    %53 = vector.multi_reduction <add>, %52, %cst_30 [1] : vector<8x128xf32> to vector<8xf32>
    %54 = vector.shape_cast %53 : vector<8xf32> to vector<8x1xf32>
    %55 = arith.addf %49, %54 : vector<8x1xf32>
    %c0_31 = arith.constant 0 : index
    %c0_32 = arith.constant 0 : index
    %56 = vector.load %arg13[%c0_31, %c0_32] : memref<8x1xf32, #tpu.memory_space<vmem>>, vector<8x1xf32>
    tpu.vector_store %arg13[%c0_31, %c0_32], %55 {strides = array<i32>} : memref<8x1xf32, #tpu.memory_space<vmem>>, vector<8x1xf32>,
    %c0_33 = arith.constant 0 : index
    %c0_34 = arith.constant 0 : index
    %57 = vector.load %arg12[%c0_33, %c0_34] : memref<8x1xf32, #tpu.memory_space<vmem>>, vector<8x1xf32>
    tpu.vector_store %arg12[%c0_33, %c0_34], %44 {strides = array<i32>} : memref<8x1xf32, #tpu.memory_space<vmem>>, vector<8x1xf32>,
    %c0_35 = arith.constant 0 : index
    %c0_36 = arith.constant 0 : index
    %58 = vector.load %arg3[%c0_35, %c0_36] : memref<8x1xi32, #tpu.memory_space<vmem>>, vector<8x1xi32>
    %c0_i32_37 = arith.constant 0 : i32
    %c256_i32 = arith.constant 256 : i32
    %59 = vector.broadcast %c0_i32_37 : i32 to vector<8x1xi32>
    %60 = arith.maxsi %59, %58 : vector<8x1xi32>
    %61 = vector.broadcast %c256_i32 : i32 to vector<8x1xi32>
    %62 = arith.minsi %61, %60 : vector<8x1xi32>
    %c0_38 = arith.constant 0 : index
    %c0_39 = arith.constant 0 : index
    %63 = vector.load %arg4[%c0_38, %c0_39] : memref<8x1xi32, #tpu.memory_space<vmem>>, vector<8x1xi32>
    %c0_i32_40 = arith.constant 0 : i32
    %c256_i32_41 = arith.constant 256 : i32
    %64 = vector.broadcast %c0_i32_40 : i32 to vector<8x1xi32>
    %65 = arith.maxsi %64, %63 : vector<8x1xi32>
    %66 = vector.broadcast %c256_i32_41 : i32 to vector<8x1xi32>
    %67 = arith.minsi %66, %65 : vector<8x1xi32>
    %68 = tpu.iota {dimensions = array<i32: 1>} : vector<8x128xi32>
    %c128_i32 = arith.constant 128 : i32
    %69 = arith.muli %arg1, %c128_i32 : i32
    %70 = vector.broadcast %69 : i32 to vector<8x128xi32>
    %71 = arith.addi %68, %70 : vector<8x128xi32>
    %c0_42 = arith.constant 0 : index
    %c0_43 = arith.constant 0 : index
    %72 = vector.load %arg14[%c0_42, %c0_43] : memref<8x1xf32, #tpu.memory_space<vmem>>, vector<8x1xf32>
    %73 = vector.broadcast %62 : vector<8x1xi32> to vector<8x128xi32>
    %74 = arith.cmpi eq, %71, %73 : vector<8x128xi32>
    %cst_44 = arith.constant 0.000000e+00 : f32
    %75 = vector.broadcast %cst_44 : f32 to vector<8x128xf32>
    %76 = arith.select %74, %15, %75 : vector<8x128xi1>, vector<8x128xf32>
    %cst_45 = arith.constant dense<0.000000e+00> : vector<8xf32>
    %77 = vector.multi_reduction <add>, %76, %cst_45 [1] : vector<8x128xf32> to vector<8xf32>
    %78 = vector.shape_cast %77 : vector<8xf32> to vector<8x1xf32>
    %79 = arith.addf %72, %78 : vector<8x1xf32>
    %c0_46 = arith.constant 0 : index
    %c0_47 = arith.constant 0 : index
    %80 = vector.load %arg14[%c0_46, %c0_47] : memref<8x1xf32, #tpu.memory_space<vmem>>, vector<8x1xf32>
    tpu.vector_store %arg14[%c0_46, %c0_47], %79 {strides = array<i32>} : memref<8x1xf32, #tpu.memory_space<vmem>>, vector<8x1xf32>,
    %c0_48 = arith.constant 0 : index
    %c0_49 = arith.constant 0 : index
    %81 = vector.load %arg15[%c0_48, %c0_49] : memref<8x1xf32, #tpu.memory_space<vmem>>, vector<8x1xf32>
    %82 = vector.broadcast %67 : vector<8x1xi32> to vector<8x128xi32>
    %83 = arith.cmpi eq, %71, %82 : vector<8x128xi32>
    %cst_50 = arith.constant 0.000000e+00 : f32
    %84 = vector.broadcast %cst_50 : f32 to vector<8x128xf32>
    %85 = arith.select %83, %21, %84 : vector<8x128xi1>, vector<8x128xf32>
    %cst_51 = arith.constant dense<0.000000e+00> : vector<8xf32>
    %86 = vector.multi_reduction <add>, %85, %cst_51 [1] : vector<8x128xf32> to vector<8xf32>
    %87 = vector.shape_cast %86 : vector<8xf32> to vector<8x1xf32>
    %88 = arith.addf %81, %87 : vector<8x1xf32>
    %c0_52 = arith.constant 0 : index
    %c0_53 = arith.constant 0 : index
    %89 = vector.load %arg15[%c0_52, %c0_53] : memref<8x1xf32, #tpu.memory_space<vmem>>, vector<8x1xf32>
    tpu.vector_store %arg15[%c0_52, %c0_53], %88 {strides = array<i32>} : memref<8x1xf32, #tpu.memory_space<vmem>>, vector<8x1xf32>,
    %c1_i32 = arith.constant 1 : i32
    %90 = arith.cmpi eq, %arg1, %c1_i32 : i32
    %91 = arith.extui %90 : i1 to i32
    %c0_i32_54 = arith.constant 0 : i32
    %92 = arith.cmpi ne, %91, %c0_i32_54 : i32
    scf.if %92 {
      %c0_55 = arith.constant 0 : index
      %c0_56 = arith.constant 0 : index
      %93 = vector.load %arg10[%c0_55, %c0_56] : memref<8x1xf32, #tpu.memory_space<vmem>>, vector<8x1xf32>
      %c0_57 = arith.constant 0 : index
      %c0_58 = arith.constant 0 : index
      %94 = vector.load %arg11[%c0_57, %c0_58] : memref<8x1xf32, #tpu.memory_space<vmem>>, vector<8x1xf32>
      %95 = math.log %94 : vector<8x1xf32>
      %96 = arith.addf %93, %95 : vector<8x1xf32>
      %c0_59 = arith.constant 0 : index
      %c0_60 = arith.constant 0 : index
      %97 = vector.load %arg12[%c0_59, %c0_60] : memref<8x1xf32, #tpu.memory_space<vmem>>, vector<8x1xf32>
      %c0_61 = arith.constant 0 : index
      %c0_62 = arith.constant 0 : index
      %98 = vector.load %arg13[%c0_61, %c0_62] : memref<8x1xf32, #tpu.memory_space<vmem>>, vector<8x1xf32>
      %99 = math.log %98 : vector<8x1xf32>
      %100 = arith.addf %97, %99 : vector<8x1xf32>
      %c0_63 = arith.constant 0 : index
      %c0_64 = arith.constant 0 : index
      %101 = vector.load %arg3[%c0_63, %c0_64] : memref<8x1xi32, #tpu.memory_space<vmem>>, vector<8x1xi32>
      %c0_i32_65 = arith.constant 0 : i32
      %c256_i32_66 = arith.constant 256 : i32
      %102 = vector.broadcast %c0_i32_65 : i32 to vector<8x1xi32>
      %103 = arith.maxsi %102, %101 : vector<8x1xi32>
      %104 = vector.broadcast %c256_i32_66 : i32 to vector<8x1xi32>
      %105 = arith.minsi %104, %103 : vector<8x1xi32>
      %c256_i32_67 = arith.constant 256 : i32
      %106 = vector.broadcast %c256_i32_67 : i32 to vector<8x1xi32>
      %107 = arith.cmpi slt, %105, %106 : vector<8x1xi32>
      %108 = arith.extui %107 : vector<8x1xi1> to vector<8x1xi32>
      %109 = arith.sitofp %108 : vector<8x1xi32> to vector<8x1xf32>
      %c0_68 = arith.constant 0 : index
      %c0_69 = arith.constant 0 : index
      %110 = vector.load %arg4[%c0_68, %c0_69] : memref<8x1xi32, #tpu.memory_space<vmem>>, vector<8x1xi32>
      %c0_i32_70 = arith.constant 0 : i32
      %c256_i32_71 = arith.constant 256 : i32
      %111 = vector.broadcast %c0_i32_70 : i32 to vector<8x1xi32>
      %112 = arith.maxsi %111, %110 : vector<8x1xi32>
      %113 = vector.broadcast %c256_i32_71 : i32 to vector<8x1xi32>
      %114 = arith.minsi %113, %112 : vector<8x1xi32>
      %c256_i32_72 = arith.constant 256 : i32
      %115 = vector.broadcast %c256_i32_72 : i32 to vector<8x1xi32>
      %116 = arith.cmpi slt, %114, %115 : vector<8x1xi32>
      %117 = arith.extui %116 : vector<8x1xi1> to vector<8x1xi32>
      %118 = arith.sitofp %117 : vector<8x1xi32> to vector<8x1xf32>
      %cst_73 = arith.constant 0.000000e+00 : f32
      %119 = vector.broadcast %cst_73 : f32 to vector<8x1xf32>
      %120 = arith.cmpf ogt, %109, %119 : vector<8x1xf32>
      %c0_74 = arith.constant 0 : index
      %c0_75 = arith.constant 0 : index
      %121 = vector.load %arg14[%c0_74, %c0_75] : memref<8x1xf32, #tpu.memory_space<vmem>>, vector<8x1xf32>
      %122 = arith.subf %96, %121 : vector<8x1xf32>
      %cst_76 = arith.constant 0.000000e+00 : f32
      %123 = vector.broadcast %cst_76 : f32 to vector<8x1xf32>
      %124 = arith.select %120, %122, %123 : vector<8x1xi1>, vector<8x1xf32>
      %cst_77 = arith.constant 0.000000e+00 : f32
      %125 = vector.broadcast %cst_77 : f32 to vector<8x1xf32>
      %126 = arith.cmpf ogt, %118, %125 : vector<8x1xf32>
      %c0_78 = arith.constant 0 : index
      %c0_79 = arith.constant 0 : index
      %127 = vector.load %arg15[%c0_78, %c0_79] : memref<8x1xf32, #tpu.memory_space<vmem>>, vector<8x1xf32>
      %128 = arith.subf %100, %127 : vector<8x1xf32>
      %cst_80 = arith.constant 0.000000e+00 : f32
      %129 = vector.broadcast %cst_80 : f32 to vector<8x1xf32>
      %130 = arith.select %126, %128, %129 : vector<8x1xi1>, vector<8x1xf32>
      %131 = tpu.concatenate %124, %109, %130, %118 in 1 : vector<8x1xf32>, vector<8x1xf32>, vector<8x1xf32>, vector<8x1xf32> -> vector<8x4xf32>
      %c0_81 = arith.constant 0 : index
      %c0_82 = arith.constant 0 : index
      %132 = vector.load %arg9[%c0_81, %c0_82] : memref<8x4xf32, #tpu.memory_space<vmem>>, vector<8x4xf32>
      tpu.vector_store %arg9[%c0_81, %c0_82], %131 {strides = array<i32>} : memref<8x4xf32, #tpu.memory_space<vmem>>, vector<8x4xf32>,
    } else {
    }
    return
  }
  func.func @transform_0(%arg0: i32, %arg1: i32) -> (i32, i32, i32) {
    %c0_i32 = arith.constant 0 : i32
    %c0_i32_0 = arith.constant 0 : i32
    return %arg0, %arg1, %c0_i32 : i32, i32, i32
  }
  func.func @transform_1(%arg0: i32, %arg1: i32) -> (i32, i32) {
    %c0_i32 = arith.constant 0 : i32
    %c0_i32_0 = arith.constant 0 : i32
    return %arg0, %c0_i32 : i32, i32
  }
  func.func @transform_2(%arg0: i32, %arg1: i32) -> (i32, i32) {
    %c0_i32 = arith.constant 0 : i32
    %c0_i32_0 = arith.constant 0 : i32
    return %arg0, %c0_i32 : i32, i32
  }
  func.func @transform_3(%arg0: i32, %arg1: i32) -> (i32, i32) {
    %c0_i32 = arith.constant 0 : i32
    %c0_i32_0 = arith.constant 0 : i32
    %c0_i32_1 = arith.constant 0 : i32
    return %c0_i32, %c0_i32_0 : i32, i32
  }
  func.func @transform_4(%arg0: i32, %arg1: i32) -> i32 {
    %c0_i32 = arith.constant 0 : i32
    %c0_i32_0 = arith.constant 0 : i32
    return %c0_i32 : i32
  }
  func.func @transform_5(%arg0: i32, %arg1: i32) -> (i32, i32) {
    %c0_i32 = arith.constant 0 : i32
    return %arg0, %arg1 : i32, i32
  }
  func.func @transform_6(%arg0: i32, %arg1: i32) -> (i32, i32) {
    %c0_i32 = arith.constant 0 : i32
    return %arg0, %arg1 : i32, i32
  }
  func.func @transform_7(%arg0: i32, %arg1: i32) -> (i32, i32) {
    %c0_i32 = arith.constant 0 : i32
    %c0_i32_0 = arith.constant 0 : i32
    return %arg0, %c0_i32 : i32, i32
  }
}

</mosaic_0001>

<bundles_post_ra>
// kernel: tpu_custom_call.1
= control target key start
LH: loop header
LB: loop body
LE: loop exit
PB: predicated region body
PF: predicated region fallthrough
CT: control target
= control target key end

     0   :  { %s13406_s0 = inlined_call_operand.hbm [shape: bf16[16,256,128], index: 0, kind: input, shape index: {}]   ;;  %s13407_s1 = inlined_call_operand.vmem [shape: s32[16,1], index: 1, kind: input, shape index: {}]   ;;  %s13408_s2 = inlined_call_operand.vmem [shape: s32[16,1], index: 2, kind: input, shape index: {}]   ;;  %s13409_s3 = inlined_call_operand.vmem [shape: f32[2,128], index: 3, kind: input, shape index: {}]   ;;  %s13410_s4 = inlined_call_operand.vmem [shape: f32[2], index: 4, kind: input, shape index: {}]   ;;  %s13411_s5 = inlined_call_operand.hbm [shape: f32[16,256], index: 5, kind: output, shape index: {0}]   ;;  %s13412_s6 = inlined_call_operand.hbm [shape: f32[16,256], index: 6, kind: output, shape index: {1}]   ;;  %s13413_s7 = inlined_call_operand.vmem [shape: f32[16,4], index: 7, kind: output, shape index: {2}]  }
   0x1   :  { %13946 = sst [smem:[#allocation296_spill]] %s13410_s4 }
   0x2   :  { %13 = vsyncpa [#allocation9], 0 }
   0x3   :  { %15 = vsyncpa [#allocation9 + $0x1], 0 }
   0x4   :  { %16 = vsyncpa [#allocation11], 0 }
   0x5   :  { %17 = vsyncpa [#allocation10], 0 }
   0x6   :  { %19 = vsyncpa [#allocation10 + $0x1], 0 }
   0x7   :  { %20 = vsyncpa [#allocation15], 0 }
   0x8   :  { %22 = vsyncpa [#allocation15 + $0x1], 0  ;;  %s7992_s24 = smov 0   ;;  %s7994_s25 = smov 0  }
   0x9   :  { %s7996_s26 = smov 0   ;;  %s7998_s27 = smov 0  }
   0xa   :  { %s8000_s28 = smov 0   ;;  %s8002_s29 = smov 0  }
   0xb   :  { %s8004_s30 = smov 0   ;;  %s8006_s8 = smov 0  }
   0xc LB: > { %13947 = sst [smem:[#allocation23_spill]] %s7906_s24  ;;  %s6797_s9 = sadd.s32 4294967295, %s7934_s8   ;;  %s7934_s8 = sphi %s8006_s8, %s28_s8   ;;  %s7930_s30 = sphi %s8004_s30, %s15203_s30   ;;  %s7926_s29 = sphi %s8002_s29, %s15202_s29   ;;  %s7922_s28 = sphi %s8000_s28, %s15201_s28   ;;  %s7918_s27 = sphi %s7998_s27, %s15200_s27   ;;  %s7914_s26 = sphi %s7996_s26, %s15206_s26   ;;  %s7910_s25 = sphi %s7994_s25, %s15205_s25   ;;  %s7906_s24 = sphi %s7992_s24, %s15204_s24  }
   0xd   : > { %13948 = sst [smem:[#allocation24_spill]] %s7926_s29  ;;  %s6798_s10 = sadd.s32 4294967294, %s7934_s8  }
   0xe   : > { %13949 = sst [smem:[#allocation25_spill]] %s7930_s30  ;;  %s37_s11 = sadd.s32 1, %s7926_s29 }
   0xf   : > { %s40_s12 = sadd.s32 1, %s7930_s30  ;;  %p38_p0 = scmp.ge.s32.totalorder %s37_s11, 2 }
  0x10   : > { %s49_s13 = sadd.s32 1, %s7914_s26  ;;  %p56_p1 = scmp.ne.s32.totalorder %s7914_s26, %s7910_s25 }
  0x11   : > { %p57_p2 = scmp.eq.s32.totalorder %s7934_s8, 0  ;;  %s15208_s11 = smov (%p38_p0, %s37_s11), 0 }
  0x12   : > { %13950 = sst [smem:[#allocation26_spill]] %s15208_s11  ;;  %s15210_s12 = smov (!%p38_p0, %s40_s12), %s7930_s30 }
  0x13   : > { %s45_s14 = ssub.s32 %s7926_s29, %s15208_s11  ;;  %p8045_p3 = por %p57_p2, %p56_p1 }
  0x14   : > { %p42_p4 = scmp.ge.s32.totalorder %s15210_s12, 2  ;;  %p62_p5 = scmp.ne.s32.totalorder %s7910_s25, %s7906_s24 }
  0x15   : > { %p8051_p6 = scmp.eq.s32.totalorder %s6797_s9, 0  ;;  %p182_p7 = scmp.eq.s32.totalorder %s6797_s9, 3 }
  0x16   : > { %s15212_s12 = smov (%p42_p4, %s15210_s12), 0  ;;  %p188_p10 = scmp.eq.s32.totalorder %s6798_s10, 3 }
  0x17   : > { %13953 = sst [smem:[#allocation27_spill]] %s15212_s12  ;;  %p8059_p8 = por %p8051_p6, %p62_p5 }
  0x18   : > { %p8063_p9 = por %p182_p7, %p56_p1  ;;  %s44_s19 = ssub.s32 %s7930_s30, %s15212_s12 }
  0x19   : > { %s13954_s17 = scalar_select %p8059_p8, 1, 0 }
  0x1a   : > { %s13955_s18 = scalar_select %p8063_p9, 1, 0 }
  0x1b   : > { %s46_s20 = sor.u32 %s45_s14, %s44_s19  ;;  %p6799_p11 = scmp.ge.s32.totalorder %s7934_s8, 1 }
  0x1c   : > { %p47_p12 = scmp.eq.s32.totalorder %s46_s20, 0  ;;  %p8070_p13 = por %p188_p10, %p62_p5 }
  0x1d   : > { %p249_p0 = scmp.lt.s32.totalorder %s7934_s8, 5  ;;  %s13960_s4 = sld [smem:[#allocation296_spill]] }
  0x1e   : > { %s13956_s21 = scalar_select %p8070_p13, 1, 0 }
  0x1f   : > { %s8076_s22 = scalar_select %p47_p12, %s7914_s26, %s49_s13  }
  0x20   : > { %13957 = sst [smem:[#allocation28_spill]] %s13956_s21  ;;  %p8078_p2 = pnand %p6799_p11, %p249_p0 }
  0x21   : > { %13958 = sst [smem:[#allocation29_spill]] %s8076_s22 }
  0x22   : > { %p7168_p1 = pneg %p8078_p2 }
  0x23   : > { %s265_s12 = sshll.u32 %s13960_s4, 4  ;;  %s266_s12 = int_to_ptr.vmem [resolvable:$true] %s265_s12 }
  0x24   : > { %p7169_p4 = pnand %p7168_p1, %p8051_p6  ;;  %s7785_s10 = scalar_lea.vmem %s266_s12, 16 }
  0x25   : > { %p7786_p5 = scmp.ne.s32.totalorder %s266_s12, %s7785_s10  ;;  %p7793_p13 = scmp.lt.s32.totalorder %s266_s12, %s266_s12 }
  0x26   : > { %p7787_p7 = pneg %p7169_p4  ;;  %p7794_p11 = scmp.lt.s32.totalorder %s7785_s10, %s7785_s10 }
  0x28   : > { %p7788_p10 = pnand %p7787_p7, %p7786_p5  ;;  %p7795_p0 = por %p7794_p11, %p7793_p13 }
  0x2a   : > { %p7789_p12 = pneg %p7788_p10 }
  0x2c   : > { %p7796_p9 = pnand %p7795_p0, %p7789_p12 }
  0x2e   : > { %7799 = shalt.err (!%p7796_p9)
}
  0x2f   : > { %s7936_s13 = smov [#allocation12]   ;;  %p6801_p8 = scmp.ge.s32.totalorder %s7934_s8, 4 }
  0x30   : > { %7171 = dma.vmem_to_smem (!%p7169_p4), %s266_s12, 16, %s7936_s13, [#allocation11]  }
  0x31   : > { %272 = sbr.rel (%p6801_p8) target bundleno = 72 (0x48), region = 24 }
  0x38   : > { %s276_s11 = sand.u32 1, %s7914_s26   ;;  %s6804_s14 = sshll.u32 %s7926_s29, 4 }
  0x39   : > { %s6802_s19 = sshll.u32 %s276_s11, 9  ;;  %s6831_s20 = sshll.u32 %s7930_s30, 8 }
  0x3a   : > { %s287_s9 = sadd.s32 %s6831_s20, %s6804_s14  ;;  %s280_s10 = scalar_lea.vmem [#allocation8], %s6802_s19 }
  0x3b   : > { %s302_s4 = sshll.u32 %s280_s10, 4  ;;  %s6806_s12 = sshll.u32 %s287_s9, 6  ;;  %s303_s4 = int_to_ptr.vmem [resolvable:$true] %s302_s4 }
  0x3c   : > { %s7153_s13 = scalar_select %p8045_p3, [#allocation0], [#allocation18] }
  0x3d   : > { %s7937_s22 = smov 2048   ;;  %s7938_s24 = smov 1024  }
  0x3e   : > { %7154 = sst [smem:[#allocation17]] (%p8045_p3), %s7937_s22  ;;  %s7939_s29 = smov 16  }
  0x3f   : > { %s294_s21 = sld [smem:[%s7153_s13]]   ;;  %s7940_s14 = smov 64  }
  0x40   : > { %7155 = sst [smem:[#allocation17 + $0x1]] (%p8045_p3), %s7938_s24  ;;  %s289_s9 = scalar_lea.hbm %s13406_s0, %s6806_s12 }
  0x41   : > { %7156 = sst [smem:[#allocation17 + $0x2]] (%p8045_p3), %s7939_s29  ;;  %s7941_s10 = smov 4  }
  0x42   : > { %7157 = sst [smem:[#allocation17 + $0x3]] (%p8045_p3), %s7940_s14  ;;  %s277_s30 = scalar_lea.sflag [#allocation9], %s276_s11 }
  0x43   : > { %7158 = sst [smem:[#allocation17 + $0x4]] (%p8045_p3), %s7940_s14  ;;  %s7942_s24 = smov [#allocation16]  }
  0x44   : > { %7159 = sst [smem:[#allocation17 + $0x5]] (%p8045_p3), %s7941_s10 }
  0x45   : > { %s6807_s22 = sshll.u32 %s294_s21, 26 }
  0x46   : > { %s6808_s13 = sadd.s32 134217728, %s6807_s22 }
  0x47   : > { %7160 = dma.general (%p8045_p3), %s289_s9, 8192, %s303_s4, %s277_s30, %s7942_s24, [#allocation17], %s6808_s13, 0  }
  0x48 PF: > { %341 = sbr.rel (%p8078_p2) target bundleno = 2215 (0x8a7), region = 40 }
  0x4f   : > { %s8115_s29 = sand.u32 1, %s7910_s25   ;;  %p13961_p8 = scmp.ne.s32.totalorder %s13954_s17, 0 }
  0x50   : > { %s6810_s12 = sshll.u32 %s8115_s29, 9  ;;  %s344_s14 = scalar_lea.sflag [#allocation9], %s8115_s29 }
  0x51   : > { %s8119_s19 = scalar_lea.vmem [#allocation8], %s6810_s12 }
  0x52   : > { %7889 = dma.done.wait (%p13961_p8), %s344_s14, 8192  }
  0x53   : > { %7891 = vsyncadd (%p13961_p8), %s344_s14, 4294959104 }
  0x54   : > { %7893 = dma.done.wait (%p8051_p6), [#allocation11], 16  }
  0x55   : > { %7895 = vsyncadd (%p8051_p6), [#allocation11], 4294967280 }
  0x56   : > { %356 = sfence }
  0x57   : > { %s6812_s4 = sshll.u32 %s8115_s29, 3  ;;  %p402_p3 = scmp.lt.s32.totalorder %s7922_s28, 1 }
  0x58   : > { %s8150_s13 = scalar_lea.vmem [#allocation13], %s6812_s4  ;;  %s8152_s24 = scalar_lea.vmem [#allocation14], %s6812_s4 }
  0x59   : > { %s403_s30 = scalar_select %p402_p3, %s7922_s28, 1 }
  0x5a   : > { %p6817_p6 = scmp.ne.s32.totalorder %s7918_s27, 0 }
  0x5b   : > { %s8132_s15 = sshll.u32 %s403_s30, 3  ;;  %vm418_vm0 = vcmask (!%p6817_p6), 7168   ;;  %v7943_v0 = vmov (!%p6817_p6), -inf   ;;  %v7944_v1 = vmov (!%p6817_p6), 0.0  }
  0x5c   : > { %s8138_s17 = scalar_lea.vmem %s13407_s1, %s8132_s15  ;;  %s8144_s20 = scalar_lea.vmem %s13408_s2, %s8132_s15  ;;  %419 = vst.msk [vmem:[#allocation2] sm:$0xff] (!%p6817_p6), %vm418_vm0, %v7943_v0  ;;  %420 = vst.msk [vmem:[#allocation4] sm:$0xff] (!%p6817_p6), %vm418_vm0, %v7943_v0 }
  0x5d   : > { %s413_s22 = scalar_lea.vmem %s13413_s7, %s8132_s15  ;;  %417 = sbr.rel (%p6817_p6) target bundleno = 100 (0x64), region = 52  ;;  %421 = vst.msk [vmem:[#allocation3] sm:$0xff] (!%p6817_p6), %vm418_vm0, %v7944_v1  ;;  %422 = vst.msk [vmem:[#allocation5] sm:$0xff] (!%p6817_p6), %vm418_vm0, %v7944_v1 }
  0x5e   : > { %423 = vst.msk [vmem:[#allocation6] sm:$0xff] (!%p6817_p6), %vm418_vm0, %v7944_v1  ;;  %424 = vst.msk [vmem:[#allocation7] sm:$0xff] (!%p6817_p6), %vm418_vm0, %v7944_v1 }
  0x64 PF: > { %v13492_v2 = vlaneseq  ;;  %v8156_v3 = vld [vmem:[%s8119_s19 + $0x8] sm:$0xff]   ;;  %v8159_v4 = vld [vmem:[%s8119_s19] sm:$0xff]   ;;  %v8167_v6 = vld [vmem:[%s13409_s3] sm:$0x3]  ;;  %vm1857_vm1 = vcmask 130112   ;;  %vm1864_vm2 = vcmask 195712  }
  0x65   : > { %v13497_v7 = vunpack.c.l.bf16 %v8156_v3  ;;  %v13501_v9 = vunpack.c.l.bf16 %v8159_v4  ;;  %v13498_v11 = vunpack.c.h.bf16 %v8156_v3  ;;  %v13502_v12 = vunpack.c.h.bf16 %v8159_v4  ;;  %v8181_v13 = vld [vmem:[%s8119_s19 + $0x10] sm:$0xff]   ;;  %v8198_v20 = vld [vmem:[%s8119_s19 + $0x18] sm:$0xff]   ;;  %v8209_v25 = vld [vmem:[%s8119_s19 + $0x20] sm:$0xff]   ;;  %s6818_s4 = sld [smem:[#allocation12 + $0x1]]  ;;  %s6819_s30 = sshll.u32 %s7918_s27, 7 }
  0x66   : > { %v8162_v5 = vshrl.u32 %v13492_v2, 7  ;;  %v13496_v18 = vunpack.c.h.bf16 %v8181_v13  ;;  %v13493_v19 = vunpack.c.l.bf16 %v8181_v13  ;;  %v13491_v23 = vunpack.c.h.bf16 %v8198_v20  ;;  %v8220_v30 = vld [vmem:[%s8119_s19 + $0x28] sm:$0xff]   ;;  %v8231_v35 = vld [vmem:[%s8119_s19 + $0x30] sm:$0xff]   ;;  %v8242_v40 = vld [vmem:[%s8119_s19 + $0x38] sm:$0xff]   ;;  %p6820_p9 = scmp.ne.s32.totalorder %s7918_s27, 1 }
  0x67   : > { %v13488_v24 = vunpack.c.l.bf16 %v8198_v20  ;;  %v13487_v28 = vunpack.c.h.bf16 %v8209_v25  ;;  %v13486_v29 = vunpack.c.l.bf16 %v8209_v25  ;;  %v13483_v33 = vunpack.c.h.bf16 %v8220_v30  ;;  %v8253_v45 = vld [vmem:[%s8119_s19 + $0x40] sm:$0xff]   ;;  %v8264_v50 = vld [vmem:[%s8119_s19 + $0x48] sm:$0xff]   ;;  %v8275_v55 = vld [vmem:[%s8119_s19 + $0x50] sm:$0xff]   ;;  %s7947_s21 = smov (!%p6820_p9), 1   ;;  %s7948_s23 = smov (!%p6820_p9), 3  }
  0x68   : > { %13962 = vst [vmem:[#allocation30_spill] sm:$0xff] %v8162_v5  ;;  %v8171_v8 = vsub.s32 0, %v8162_v5  ;;  %v13482_v34 = vunpack.c.l.bf16 %v8220_v30  ;;  %v13481_v38 = vunpack.c.h.bf16 %v8231_v35  ;;  %v13478_v39 = vunpack.c.l.bf16 %v8231_v35  ;;  %v8286_v60 = vld [vmem:[%s8119_s19 + $0x58] sm:$0xff]   ;;  %v8297_v1 = vld [vmem:[%s8119_s19 + $0x60] sm:$0xff]  }
  0x69   : > { %v13475_v43 = vunpack.c.h.bf16 %v8242_v40  ;;  %v13472_v44 = vunpack.c.l.bf16 %v8242_v40  ;;  %v13469_v48 = vunpack.c.h.bf16 %v8253_v45  ;;  %v13466_v49 = vunpack.c.l.bf16 %v8253_v45 }
  0x6a   : > { %13963 = vst [vmem:[#allocation31_spill] sm:$0xff] %v8171_v8  ;;  %v8176_v10 = vrot.slane %v8167_v6, %v8171_v8  ;;  %v13463_v53 = vunpack.c.h.bf16 %v8264_v50  ;;  %v13460_v54 = vunpack.c.l.bf16 %v8264_v50  ;;  %v13457_v58 = vunpack.c.h.bf16 %v8275_v55  ;;  %v8647_v8 = vld [vmem:[%s8119_s19 + $0x150] sm:$0xff]  }
  0x6b   : > { %v13454_v59 = vunpack.c.l.bf16 %v8275_v55  ;;  %v13451_v63 = vunpack.c.h.bf16 %v8286_v60  ;;  %v13448_v0 = vunpack.c.l.bf16 %v8286_v60  ;;  %13992 = vst [vmem:[#allocation60_spill] sm:$0xff] %v8647_v8  ;;  %vm1871_vm3 = vcmask 261312  }
  0x6c   : > { %v688_v14 = vmul.f32 %v13497_v7, %v8176_v10  ;;  %v686_v15 = vmul.f32 %v13501_v9, %v8176_v10  ;;  %v689_v16 = vmul.f32 %v13498_v11, %v8176_v10  ;;  %v687_v17 = vmul.f32 %v13502_v12, %v8176_v10  ;;  %v8632_v11 = vld [vmem:[%s8119_s19 + $0x148] sm:$0xff]  }
  0x6d   : > { %v691_v21 = vmul.f32 %v13496_v18, %v8176_v10  ;;  %v690_v22 = vmul.f32 %v13493_v19, %v8176_v10  ;;  %v693_v26 = vmul.f32 %v13491_v23, %v8176_v10  ;;  %v692_v27 = vmul.f32 %v13488_v24, %v8176_v10  ;;  %v8602_v24 = vld [vmem:[%s8119_s19 + $0x138] sm:$0xff]   ;;  %v8617_v19 = vld [vmem:[%s8119_s19 + $0x140] sm:$0xff]   ;;  %13991 = vst [vmem:[#allocation59_spill] sm:$0xff] %v8632_v11 }
  0x6e   : > { %818 = vadd.xlane.f32.xlu1 %v688_v14  ;;  %814 = vadd.xlane.f32.xlu0 %v686_v15  ;;  %v695_v31 = vmul.f32 %v13487_v28, %v8176_v10  ;;  %v694_v32 = vmul.f32 %v13486_v29, %v8176_v10  ;;  %v697_v36 = vmul.f32 %v13483_v33, %v8176_v10  ;;  %v8587_v33 = vld [vmem:[%s8119_s19 + $0x130] sm:$0xff]   ;;  %vm1878_vm4 = vcmask 326912  }
  0x6f   : > { %v696_v37 = vmul.f32 %v13482_v34, %v8176_v10  ;;  %v699_v41 = vmul.f32 %v13481_v38, %v8176_v10  ;;  %v698_v42 = vmul.f32 %v13478_v39, %v8176_v10  ;;  %v701_v46 = vmul.f32 %v13475_v43, %v8176_v10  ;;  %v8561_v43 = vld [vmem:[%s8119_s19 + $0x120] sm:$0xff]   ;;  %v8572_v39 = vld [vmem:[%s8119_s19 + $0x128] sm:$0xff]   ;;  %13988 = vst [vmem:[#allocation56_spill] sm:$0xff] %v8587_v33 }
  0x70   : > { %v700_v47 = vmul.f32 %v13472_v44, %v8176_v10  ;;  %v703_v51 = vmul.f32 %v13469_v48, %v8176_v10  ;;  %v702_v52 = vmul.f32 %v13466_v49, %v8176_v10  ;;  %v705_v56 = vmul.f32 %v13463_v53, %v8176_v10  ;;  %v8517_v53 = vld [vmem:[%s8119_s19 + $0x100] sm:$0xff]   ;;  %v8528_v49 = vld [vmem:[%s8119_s19 + $0x108] sm:$0xff]   ;;  %v8539_v48 = vld [vmem:[%s8119_s19 + $0x110] sm:$0xff]   ;;  %13986 = vst [vmem:[#allocation54_spill] sm:$0xff] %v8561_v43 }
  0x71   : > { %v704_v57 = vmul.f32 %v13460_v54, %v8176_v10  ;;  %v707_v61 = vmul.f32 %v13457_v58, %v8176_v10  ;;  %v706_v62 = vmul.f32 %v13454_v59, %v8176_v10  ;;  %v709_v14 = vmul.f32 %v13451_v63, %v8176_v10  ;;  %v8473_v63 = vld [vmem:[%s8119_s19 + $0xe0] sm:$0xff]   ;;  %v8484_v59 = vld [vmem:[%s8119_s19 + $0xe8] sm:$0xff]   ;;  %v8495_v58 = vld [vmem:[%s8119_s19 + $0xf0] sm:$0xff]   ;;  %13982 = vst [vmem:[#allocation50_spill] sm:$0xff] %v8517_v53 }
  0x72   : > { %820 = vadd.xlane.f32.xlu1 %v689_v16  ;;  %816 = vadd.xlane.f32.xlu0 %v687_v17  ;;  %v708_v15 = vmul.f32 %v13448_v0, %v8176_v10  ;;  %v13445_v16 = vunpack.c.h.bf16 %v8297_v1  ;;  %v13442_v17 = vunpack.c.l.bf16 %v8297_v1  ;;  %v8462_v0 = vld [vmem:[%s8119_s19 + $0xd8] sm:$0xff]   ;;  %13978 = vst [vmem:[#allocation46_spill] sm:$0xff] %v8473_v63  ;;  %13979 = vst [vmem:[#allocation47_spill] sm:$0xff] %v8484_v59  ;;  %vm1885_vm5 = vcmask 392512  }
  0x73   : > { %13977 = vst [vmem:[#allocation45_spill] sm:$0xff] %v8462_v0  ;;  %13980 = vst [vmem:[#allocation48_spill] sm:$0xff] %v8495_v58  ;;  %v8506_v54 = vld [vmem:[%s8119_s19 + $0xf8] sm:$0xff]   ;;  %vm13759_vm6 = vcmask 458112   ;;  %vm1899_vm7 = vcmask 523712   ;;  %vm13762_vm8 = vcmask 589312  }
  0x74   : > { %13981 = vst [vmem:[#allocation49_spill] sm:$0xff] %v8506_v54  ;;  %13983 = vst [vmem:[#allocation51_spill] sm:$0xff] %v8528_v49  ;;  %v8550_v44 = vld [vmem:[%s8119_s19 + $0x118] sm:$0xff]   ;;  %vm1913_vm9 = vcmask 654912   ;;  %vm13766_vm10 = vcmask 720512   ;;  %vm1927_vm11 = vcmask 786112  }
  0x75   : > { %13984 = vst [vmem:[#allocation52_spill] sm:$0xff] %v8539_v48  ;;  %13985 = vst [vmem:[#allocation53_spill] sm:$0xff] %v8550_v44  ;;  %vm13900_vm12 = vcmask 851712   ;;  %vm1941_vm13 = vcmask 917312   ;;  %vm1948_vm14 = vcmask 982912   ;;  %vm1955_vm15 = vcmask 1048512  }
  0x76   : > { %824 = vadd.xlane.f32.xlu1 %v691_v21  ;;  %822 = vadd.xlane.f32.xlu0 %v690_v22  ;;  %v8308_v21 = vld [vmem:[%s8119_s19 + $0x68] sm:$0xff]   ;;  %v711_v22 = vmul.f32 %v13445_v16, %v8176_v10  ;;  %v8451_v16 = vld [vmem:[%s8119_s19 + $0xd0] sm:$0xff]   ;;  %13987 = vst [vmem:[#allocation55_spill] sm:$0xff] %v8572_v39  ;;  %13989 = vst [vmem:[#allocation57_spill] sm:$0xff] %v8602_v24  ;;  %vm13755_vm0 = vcmask 1041409  }
  0x77   : > { %13976 = vst [vmem:[#allocation44_spill] sm:$0xff] %v8451_v16  ;;  %13990 = vst [vmem:[#allocation58_spill] sm:$0xff] %v8617_v19 }
  0x7a   : > { %828 = vadd.xlane.f32.xlu1 %v693_v26  ;;  %826 = vadd.xlane.f32.xlu0 %v692_v27  ;;  %v710_v26 = vmul.f32 %v13442_v17, %v8176_v10  ;;  %v13439_v27 = vunpack.c.h.bf16 %v8308_v21  ;;  %v8440_v17 = vld [vmem:[%s8119_s19 + $0xc8] sm:$0xff]  }
  0x7b   : > { %13975 = vst [vmem:[#allocation43_spill] sm:$0xff] %v8440_v17 }
  0x7e   : > { %832 = vadd.xlane.f32.xlu1 %v695_v31  ;;  %830 = vadd.xlane.f32.xlu0 %v694_v32  ;;  %v13436_v31 = vunpack.c.l.bf16 %v8308_v21  ;;  %v8319_v32 = vld [vmem:[%s8119_s19 + $0x70] sm:$0xff]  }
  0x7f   : > { %13964 = vst [vmem:[#allocation32_spill] sm:$0xff] %v8319_v32 }
  0x82   : > { %836 = vadd.xlane.f32.xlu1 %v697_v36  ;;  %834 = vadd.xlane.f32.xlu0 %v696_v37  ;;  %v713_v36 = vmul.f32 %v13439_v27, %v8176_v10  ;;  %v712_v37 = vmul.f32 %v13436_v31, %v8176_v10  ;;  %v8418_v31 = vld [vmem:[%s8119_s19 + $0xb8] sm:$0xff]   ;;  %v8429_v27 = vld [vmem:[%s8119_s19 + $0xc0] sm:$0xff]  }
  0x83   : > { %13973 = vst [vmem:[#allocation41_spill] sm:$0xff] %v8418_v31  ;;  %13974 = vst [vmem:[#allocation42_spill] sm:$0xff] %v8429_v27 }
  0x86   : > { %840 = vadd.xlane.f32.xlu1 %v699_v41  ;;  %838 = vadd.xlane.f32.xlu0 %v698_v42  ;;  %v13433_v41 = vunpack.c.h.bf16 %v8319_v32  ;;  %v13430_v42 = vunpack.c.l.bf16 %v8319_v32 }
  0x8a   : > { %844 = vadd.xlane.f32.xlu1 %v701_v46  ;;  %842 = vadd.xlane.f32.xlu0 %v700_v47  ;;  %v8330_v46 = vld [vmem:[%s8119_s19 + $0x78] sm:$0xff]   ;;  %v715_v47 = vmul.f32 %v13433_v41, %v8176_v10  ;;  %v8407_v41 = vld [vmem:[%s8119_s19 + $0xb0] sm:$0xff]  }
  0x8b   : > { %13965 = vst [vmem:[#allocation33_spill] sm:$0xff] %v8330_v46  ;;  %13972 = vst [vmem:[#allocation40_spill] sm:$0xff] %v8407_v41 }
  0x8e   : > { %848 = vadd.xlane.f32.xlu1 %v703_v51  ;;  %846 = vadd.xlane.f32.xlu0 %v702_v52  ;;  %v714_v51 = vmul.f32 %v13430_v42, %v8176_v10  ;;  %v13427_v52 = vunpack.c.h.bf16 %v8330_v46  ;;  %v8396_v42 = vld [vmem:[%s8119_s19 + $0xa8] sm:$0xff]  }
  0x8f   : > { %13971 = vst [vmem:[#allocation39_spill] sm:$0xff] %v8396_v42 }
  0x92   : > { %852 = vadd.xlane.f32.xlu1 %v705_v56  ;;  %850 = vadd.xlane.f32.xlu0 %v704_v57  ;;  %v13424_v56 = vunpack.c.l.bf16 %v8330_v46  ;;  %v8341_v57 = vld [vmem:[%s8119_s19 + $0x80] sm:$0xff]  }
  0x93   : > { %13966 = vst [vmem:[#allocation34_spill] sm:$0xff] %v8341_v57 }
  0x96   : > { %856 = vadd.xlane.f32.xlu1 %v707_v61  ;;  %854 = vadd.xlane.f32.xlu0 %v706_v62  ;;  %v717_v61 = vmul.f32 %v13427_v52, %v8176_v10  ;;  %v716_v62 = vmul.f32 %v13424_v56, %v8176_v10  ;;  %v8374_v56 = vld [vmem:[%s8119_s19 + $0x98] sm:$0xff]   ;;  %v8385_v52 = vld [vmem:[%s8119_s19 + $0xa0] sm:$0xff]  }
  0x97   : > { %13969 = vst [vmem:[#allocation37_spill] sm:$0xff] %v8374_v56  ;;  %13970 = vst [vmem:[#allocation38_spill] sm:$0xff] %v8385_v52 }
  0x9a   : > { %860 = vadd.xlane.f32.xlu1 %v709_v14  ;;  %858 = vadd.xlane.f32.xlu0 %v708_v15  ;;  %v13422_v14 = vunpack.c.h.bf16 %v8341_v57  ;;  %v13423_v15 = vunpack.c.l.bf16 %v8341_v57  ;;  %v8827_v57 = vld [vmem:[%s8119_s19 + $0x1b0] sm:$0xff]  }
  0x9b   : > { %14007 = vst [vmem:[#allocation75_spill] sm:$0xff] %v8827_v57 }
  0x9e   : > { %864 = vadd.xlane.f32.xlu1 %v711_v22  ;;  %862 = vadd.xlane.f32.xlu0 %v710_v26  ;;  %v8352_v22 = vld [vmem:[%s8119_s19 + $0x88] sm:$0xff]   ;;  %v719_v26 = vmul.f32 %v13422_v14, %v8176_v10 }
  0x9f   : > { %13967 = vst [vmem:[#allocation35_spill] sm:$0xff] %v8352_v22 }
  0xa2   : > { %868 = vadd.xlane.f32.xlu1 %v713_v36  ;;  %866 = vadd.xlane.f32.xlu0 %v712_v37  ;;  %v718_v36 = vmul.f32 %v13423_v15, %v8176_v10  ;;  %v13425_v37 = vunpack.c.h.bf16 %v8352_v22 }
  0xa6   : > { %872 = vadd.xlane.f32.xlu1 %v715_v47  ;;  %870 = vadd.xlane.f32.xlu0 %v714_v51  ;;  %v13426_v47 = vunpack.c.l.bf16 %v8352_v22  ;;  %v8363_v51 = vld [vmem:[%s8119_s19 + $0x90] sm:$0xff]  }
  0xa7   : > { %13968 = vst [vmem:[#allocation36_spill] sm:$0xff] %v8363_v51  ;;  %v13428_v14 = vunpack.c.h.bf16 %v8363_v51  ;;  %v13429_v15 = vunpack.c.l.bf16 %v8363_v51  ;;  %v8812_v51 = vld [vmem:[%s8119_s19 + $0x1a8] sm:$0xff]  }
  0xa8   : > { %14006 = vst [vmem:[#allocation74_spill] sm:$0xff] %v8812_v51 }
  0xaa   : > { %876 = vadd.xlane.f32.xlu1 %v717_v61  ;;  %874 = vadd.xlane.f32.xlu0 %v716_v62  ;;  %v721_v61 = vmul.f32 %v13425_v37, %v8176_v10  ;;  %v720_v62 = vmul.f32 %v13426_v47, %v8176_v10  ;;  %v13431_v37 = vunpack.c.h.bf16 %v8374_v56  ;;  %v13432_v47 = vunpack.c.l.bf16 %v8374_v56 }
  0xae   : > { %880 = vadd.xlane.f32.xlu1 %v719_v26  ;;  %878 = vadd.xlane.f32.xlu0 %v718_v36  ;;  %v723_v26 = vmul.f32 %v13428_v14, %v8176_v10  ;;  %v722_v36 = vmul.f32 %v13429_v15, %v8176_v10  ;;  %v13434_v14 = vunpack.c.h.bf16 %v8385_v52  ;;  %v13435_v15 = vunpack.c.l.bf16 %v8385_v52  ;;  %v8797_v52 = vld [vmem:[%s8119_s19 + $0x1a0] sm:$0xff]  }
  0xaf   : > { %14003 = vst [vmem:[#allocation71_spill] sm:$0xff] %v8797_v52 }
  0xb2   : > { %884 = vadd.xlane.f32.xlu1 %v721_v61  ;;  %882 = vadd.xlane.f32.xlu0 %v720_v62  ;;  %v725_v61 = vmul.f32 %v13431_v37, %v8176_v10  ;;  %v724_v62 = vmul.f32 %v13432_v47, %v8176_v10  ;;  %v13437_v37 = vunpack.c.h.bf16 %v8396_v42  ;;  %v13438_v47 = vunpack.c.l.bf16 %v8396_v42 }
  0xb6   : > { %888 = vadd.xlane.f32.xlu1 %v723_v26  ;;  %886 = vadd.xlane.f32.xlu0 %v722_v36  ;;  %v727_v26 = vmul.f32 %v13434_v14, %v8176_v10  ;;  %v726_v36 = vmul.f32 %v13435_v15, %v8176_v10  ;;  %v13440_v14 = vunpack.c.h.bf16 %v8407_v41  ;;  %v13441_v15 = vunpack.c.l.bf16 %v8407_v41  ;;  %v8782_v41 = vld [vmem:[%s8119_s19 + $0x198] sm:$0xff]  }
  0xb7   : > { %14002 = vst [vmem:[#allocation70_spill] sm:$0xff] %v8782_v41 }
  0xba   : > { %892 = vadd.xlane.f32.xlu1 %v725_v61  ;;  %890 = vadd.xlane.f32.xlu0 %v724_v62  ;;  %v729_v61 = vmul.f32 %v13437_v37, %v8176_v10  ;;  %v728_v62 = vmul.f32 %v13438_v47, %v8176_v10  ;;  %v13443_v37 = vunpack.c.h.bf16 %v8418_v31  ;;  %v13444_v47 = vunpack.c.l.bf16 %v8418_v31 }
  0xbe   : > { %896 = vadd.xlane.f32.xlu1 %v727_v26  ;;  %894 = vadd.xlane.f32.xlu0 %v726_v36  ;;  %v731_v26 = vmul.f32 %v13440_v14, %v8176_v10  ;;  %v730_v36 = vmul.f32 %v13441_v15, %v8176_v10  ;;  %v13446_v14 = vunpack.c.h.bf16 %v8429_v27  ;;  %v13447_v15 = vunpack.c.l.bf16 %v8429_v27  ;;  %v8767_v27 = vld [vmem:[%s8119_s19 + $0x190] sm:$0xff]  }
  0xbf   : > { %14001 = vst [vmem:[#allocation69_spill] sm:$0xff] %v8767_v27 }
  0xc2   : > { %900 = vadd.xlane.f32.xlu1 %v729_v61  ;;  %898 = vadd.xlane.f32.xlu0 %v728_v62  ;;  %v733_v61 = vmul.f32 %v13443_v37, %v8176_v10  ;;  %v732_v62 = vmul.f32 %v13444_v47, %v8176_v10  ;;  %v13449_v37 = vunpack.c.h.bf16 %v8440_v17  ;;  %v13450_v47 = vunpack.c.l.bf16 %v8440_v17 }
  0xc6   : > { %904 = vadd.xlane.f32.xlu1 %v731_v26  ;;  %902 = vadd.xlane.f32.xlu0 %v730_v36  ;;  %v735_v26 = vmul.f32 %v13446_v14, %v8176_v10  ;;  %v734_v36 = vmul.f32 %v13447_v15, %v8176_v10  ;;  %v13452_v14 = vunpack.c.h.bf16 %v8451_v16  ;;  %v13453_v15 = vunpack.c.l.bf16 %v8451_v16  ;;  %v8752_v16 = vld [vmem:[%s8119_s19 + $0x188] sm:$0xff]  }
  0xc7   : > { %14000 = vst [vmem:[#allocation68_spill] sm:$0xff] %v8752_v16 }
  0xca   : > { %908 = vadd.xlane.f32.xlu1 %v733_v61  ;;  %906 = vadd.xlane.f32.xlu0 %v732_v62  ;;  %v737_v61 = vmul.f32 %v13449_v37, %v8176_v10  ;;  %v736_v62 = vmul.f32 %v13450_v47, %v8176_v10  ;;  %v13455_v37 = vunpack.c.h.bf16 %v8462_v0  ;;  %v13456_v47 = vunpack.c.l.bf16 %v8462_v0 }
  0xce   : > { %912 = vadd.xlane.f32.xlu1 %v735_v26  ;;  %910 = vadd.xlane.f32.xlu0 %v734_v36  ;;  %v739_v26 = vmul.f32 %v13452_v14, %v8176_v10  ;;  %v738_v36 = vmul.f32 %v13453_v15, %v8176_v10  ;;  %v13458_v14 = vunpack.c.h.bf16 %v8473_v63  ;;  %v13459_v15 = vunpack.c.l.bf16 %v8473_v63  ;;  %v8737_v63 = vld [vmem:[%s8119_s19 + $0x180] sm:$0xff]  }
  0xcf   : > { %13999 = vst [vmem:[#allocation67_spill] sm:$0xff] %v8737_v63 }
  0xd2   : > { %916 = vadd.xlane.f32.xlu1 %v737_v61  ;;  %914 = vadd.xlane.f32.xlu0 %v736_v62  ;;  %v741_v61 = vmul.f32 %v13455_v37, %v8176_v10  ;;  %v740_v62 = vmul.f32 %v13456_v47, %v8176_v10  ;;  %v13461_v37 = vunpack.c.h.bf16 %v8484_v59  ;;  %v13462_v47 = vunpack.c.l.bf16 %v8484_v59 }
  0xd6   : > { %920 = vadd.xlane.f32.xlu1 %v739_v26  ;;  %918 = vadd.xlane.f32.xlu0 %v738_v36  ;;  %v743_v26 = vmul.f32 %v13458_v14, %v8176_v10  ;;  %v742_v36 = vmul.f32 %v13459_v15, %v8176_v10  ;;  %v13464_v14 = vunpack.c.h.bf16 %v8495_v58  ;;  %v13465_v15 = vunpack.c.l.bf16 %v8495_v58  ;;  %v8722_v58 = vld [vmem:[%s8119_s19 + $0x178] sm:$0xff]  }
  0xd7   : > { %13998 = vst [vmem:[#allocation66_spill] sm:$0xff] %v8722_v58 }
  0xda   : > { %924 = vadd.xlane.f32.xlu1 %v741_v61  ;;  %922 = vadd.xlane.f32.xlu0 %v740_v62  ;;  %v745_v61 = vmul.f32 %v13461_v37, %v8176_v10  ;;  %v744_v62 = vmul.f32 %v13462_v47, %v8176_v10  ;;  %v13467_v37 = vunpack.c.h.bf16 %v8506_v54  ;;  %v13468_v47 = vunpack.c.l.bf16 %v8506_v54 }
  0xde   : > { %928 = vadd.xlane.f32.xlu1 %v743_v26  ;;  %926 = vadd.xlane.f32.xlu0 %v742_v36  ;;  %v747_v26 = vmul.f32 %v13464_v14, %v8176_v10  ;;  %v746_v36 = vmul.f32 %v13465_v15, %v8176_v10  ;;  %v13470_v14 = vunpack.c.h.bf16 %v8517_v53  ;;  %v13471_v15 = vunpack.c.l.bf16 %v8517_v53  ;;  %v8707_v53 = vld [vmem:[%s8119_s19 + $0x170] sm:$0xff]  }
  0xdf   : > { %13997 = vst [vmem:[#allocation65_spill] sm:$0xff] %v8707_v53 }
  0xe2   : > { %932 = vadd.xlane.f32.xlu1 %v745_v61  ;;  %930 = vadd.xlane.f32.xlu0 %v744_v62  ;;  %v749_v61 = vmul.f32 %v13467_v37, %v8176_v10  ;;  %v748_v62 = vmul.f32 %v13468_v47, %v8176_v10  ;;  %v13473_v37 = vunpack.c.h.bf16 %v8528_v49  ;;  %v13474_v47 = vunpack.c.l.bf16 %v8528_v49 }
  0xe6   : > { %936 = vadd.xlane.f32.xlu1 %v747_v26  ;;  %934 = vadd.xlane.f32.xlu0 %v746_v36  ;;  %v751_v26 = vmul.f32 %v13470_v14, %v8176_v10  ;;  %v750_v36 = vmul.f32 %v13471_v15, %v8176_v10  ;;  %v13476_v14 = vunpack.c.h.bf16 %v8539_v48  ;;  %v13477_v15 = vunpack.c.l.bf16 %v8539_v48  ;;  %v8692_v48 = vld [vmem:[%s8119_s19 + $0x168] sm:$0xff]  }
  0xe7   : > { %13996 = vst [vmem:[#allocation64_spill] sm:$0xff] %v8692_v48 }
  0xea   : > { %940 = vadd.xlane.f32.xlu1 %v749_v61  ;;  %938 = vadd.xlane.f32.xlu0 %v748_v62  ;;  %v753_v61 = vmul.f32 %v13473_v37, %v8176_v10  ;;  %v752_v62 = vmul.f32 %v13474_v47, %v8176_v10  ;;  %v13479_v37 = vunpack.c.h.bf16 %v8550_v44  ;;  %v13480_v47 = vunpack.c.l.bf16 %v8550_v44 }
  0xee   : > { %944 = vadd.xlane.f32.xlu1 %v751_v26  ;;  %942 = vadd.xlane.f32.xlu0 %v750_v36  ;;  %v755_v26 = vmul.f32 %v13476_v14, %v8176_v10  ;;  %v754_v36 = vmul.f32 %v13477_v15, %v8176_v10  ;;  %v13485_v14 = vunpack.c.h.bf16 %v8561_v43  ;;  %v13484_v15 = vunpack.c.l.bf16 %v8561_v43  ;;  %v8677_v43 = vld [vmem:[%s8119_s19 + $0x160] sm:$0xff]  }
  0xef   : > { %13994 = vst [vmem:[#allocation62_spill] sm:$0xff] %v8677_v43 }
  0xf2   : > { %948 = vadd.xlane.f32.xlu1 %v753_v61  ;;  %946 = vadd.xlane.f32.xlu0 %v752_v62  ;;  %v757_v61 = vmul.f32 %v13479_v37, %v8176_v10  ;;  %v756_v62 = vmul.f32 %v13480_v47, %v8176_v10  ;;  %v13490_v37 = vunpack.c.h.bf16 %v8572_v39  ;;  %v13489_v47 = vunpack.c.l.bf16 %v8572_v39 }
  0xf6   : > { %952 = vadd.xlane.f32.xlu1 %v755_v26  ;;  %950 = vadd.xlane.f32.xlu0 %v754_v36  ;;  %v759_v26 = vmul.f32 %v13485_v14, %v8176_v10  ;;  %v758_v36 = vmul.f32 %v13484_v15, %v8176_v10  ;;  %v13495_v15 = vunpack.c.h.bf16 %v8587_v33  ;;  %v13494_v14 = vunpack.c.l.bf16 %v8587_v33  ;;  %v8662_v33 = vld [vmem:[%s8119_s19 + $0x158] sm:$0xff]  }
  0xf7   : > { %13993 = vst [vmem:[#allocation61_spill] sm:$0xff] %v8662_v33 }
  0xfa   : > { %956 = vadd.xlane.f32.xlu1 %v757_v61  ;;  %954 = vadd.xlane.f32.xlu0 %v756_v62  ;;  %v761_v61 = vmul.f32 %v13490_v37, %v8176_v10  ;;  %v760_v62 = vmul.f32 %v13489_v47, %v8176_v10  ;;  %v13500_v47 = vunpack.c.h.bf16 %v8602_v24  ;;  %v13499_v37 = vunpack.c.l.bf16 %v8602_v24 }
  0xfb   : > { %v8582_v38 = vpop.xlane.xlu1 %818  ;;  %v8584_v34 = vpop.xlane.xlu0 %814 }
  0xfe   : > { %960 = vadd.xlane.f32.xlu1 %v759_v26  ;;  %958 = vadd.xlane.f32.xlu0 %v758_v36  ;;  %v763_v26 = vmul.f32 %v13495_v15, %v8176_v10  ;;  %v762_v36 = vmul.f32 %v13494_v14, %v8176_v10  ;;  %v13506_v14 = vunpack.c.h.bf16 %v8617_v19  ;;  %v13505_v15 = vunpack.c.l.bf16 %v8617_v19 }
  0xff   : > { %v8597_v29 = vpop.xlane.xlu1 %820  ;;  %v8599_v28 = vpop.xlane.xlu0 %816 }
 0x102   : > { %964 = vadd.xlane.f32.xlu1 %v761_v61  ;;  %962 = vadd.xlane.f32.xlu0 %v760_v62  ;;  %v765_v61 = vmul.f32 %v13500_v47, %v8176_v10  ;;  %v764_v62 = vmul.f32 %v13499_v37, %v8176_v10  ;;  %v13514_v37 = vunpack.c.h.bf16 %v8632_v11  ;;  %v13513_v47 = vunpack.c.l.bf16 %v8632_v11 }
 0x103   : > { %v8612_v23 = vpop.xlane.xlu1 %824  ;;  %v8614_v2 = vpop.xlane.xlu0 %822 }
 0x106   : > { %968 = vadd.xlane.f32.xlu1 %v763_v26  ;;  %966 = vadd.xlane.f32.xlu0 %v762_v36  ;;  %v767_v26 = vmul.f32 %v13506_v14, %v8176_v10  ;;  %v766_v36 = vmul.f32 %v13505_v15, %v8176_v10  ;;  %v13522_v15 = vunpack.c.h.bf16 %v8647_v8  ;;  %v13521_v14 = vunpack.c.l.bf16 %v8647_v8 }
 0x107   : > { %v8627_v18 = vpop.xlane.xlu1 %828  ;;  %v8629_v7 = vpop.xlane.xlu0 %826 }
 0x10a   : > { %972 = vadd.xlane.f32.xlu1 %v765_v61  ;;  %970 = vadd.xlane.f32.xlu0 %v764_v62  ;;  %v769_v61 = vmul.f32 %v13514_v37, %v8176_v10  ;;  %v768_v62 = vmul.f32 %v13513_v47, %v8176_v10  ;;  %v13530_v47 = vunpack.c.h.bf16 %v8662_v33  ;;  %v13529_v37 = vunpack.c.l.bf16 %v8662_v33 }
 0x10b   : > { %v8642_v9 = vpop.xlane.xlu1 %832  ;;  %v8644_v12 = vpop.xlane.xlu0 %830 }
 0x10e   : > { %976 = vadd.xlane.f32.xlu1 %v767_v26  ;;  %974 = vadd.xlane.f32.xlu0 %v766_v36  ;;  %v771_v26 = vmul.f32 %v13522_v15, %v8176_v10  ;;  %v770_v36 = vmul.f32 %v13521_v14, %v8176_v10  ;;  %v13538_v14 = vunpack.c.h.bf16 %v8677_v43  ;;  %v13537_v15 = vunpack.c.l.bf16 %v8677_v43 }
 0x10f   : > { %v8657_v19 = vpop.xlane.xlu1 %836  ;;  %v8659_v24 = vpop.xlane.xlu0 %834 }
 0x112   : > { %980 = vadd.xlane.f32.xlu1 %v769_v61  ;;  %978 = vadd.xlane.f32.xlu0 %v768_v62  ;;  %v773_v61 = vmul.f32 %v13530_v47, %v8176_v10  ;;  %v772_v62 = vmul.f32 %v13529_v37, %v8176_v10  ;;  %v13546_v37 = vunpack.c.h.bf16 %v8692_v48  ;;  %v13545_v47 = vunpack.c.l.bf16 %v8692_v48 }
 0x113   : > { %v8672_v11 = vpop.xlane.xlu1 %840  ;;  %v8674_v39 = vpop.xlane.xlu0 %838 }
 0x116   : > { %984 = vadd.xlane.f32.xlu1 %v771_v26  ;;  %982 = vadd.xlane.f32.xlu0 %v770_v36  ;;  %v775_v26 = vmul.f32 %v13538_v14, %v8176_v10  ;;  %v774_v36 = vmul.f32 %v13537_v15, %v8176_v10  ;;  %v13554_v15 = vunpack.c.h.bf16 %v8707_v53  ;;  %v13553_v14 = vunpack.c.l.bf16 %v8707_v53 }
 0x117   : > { %v8687_v8 = vpop.xlane.xlu1 %844  ;;  %v8689_v44 = vpop.xlane.xlu0 %842 }
 0x118   : > { %13995 = vst [vmem:[#allocation63_spill] sm:$0xff] %v8687_v8  ;;  %v8872_v8 = vld [vmem:[%s8119_s19 + $0x1c8] sm:$0xff]  }
 0x119   : > { %14013 = vst [vmem:[#allocation81_spill] sm:$0xff] %v8872_v8 }
 0x11a   : > { %988 = vadd.xlane.f32.xlu1 %v773_v61  ;;  %986 = vadd.xlane.f32.xlu0 %v772_v62  ;;  %v777_v61 = vmul.f32 %v13546_v37, %v8176_v10  ;;  %v776_v62 = vmul.f32 %v13545_v47, %v8176_v10  ;;  %v13562_v47 = vunpack.c.h.bf16 %v8722_v58  ;;  %v13561_v37 = vunpack.c.l.bf16 %v8722_v58 }
 0x11b   : > { %v8702_v33 = vpop.xlane.xlu1 %848  ;;  %v8704_v49 = vpop.xlane.xlu0 %846 }
 0x11e   : > { %992 = vadd.xlane.f32.xlu1 %v775_v26  ;;  %990 = vadd.xlane.f32.xlu0 %v774_v36  ;;  %v779_v26 = vmul.f32 %v13554_v15, %v8176_v10  ;;  %v778_v36 = vmul.f32 %v13553_v14, %v8176_v10  ;;  %v13570_v14 = vunpack.c.h.bf16 %v8737_v63  ;;  %v13569_v15 = vunpack.c.l.bf16 %v8737_v63 }
 0x11f   : > { %v8717_v43 = vpop.xlane.xlu1 %852  ;;  %v8719_v54 = vpop.xlane.xlu0 %850 }
 0x122   : > { %996 = vadd.xlane.f32.xlu1 %v777_v61  ;;  %994 = vadd.xlane.f32.xlu0 %v776_v62  ;;  %v781_v61 = vmul.f32 %v13562_v47, %v8176_v10  ;;  %v780_v62 = vmul.f32 %v13561_v37, %v8176_v10  ;;  %v13578_v37 = vunpack.c.h.bf16 %v8752_v16  ;;  %v13577_v47 = vunpack.c.l.bf16 %v8752_v16 }
 0x123   : > { %v8732_v48 = vpop.xlane.xlu1 %856  ;;  %v8734_v59 = vpop.xlane.xlu0 %854 }
 0x126   : > { %1000 = vadd.xlane.f32.xlu1 %v779_v26  ;;  %998 = vadd.xlane.f32.xlu0 %v778_v36  ;;  %v783_v26 = vmul.f32 %v13570_v14, %v8176_v10  ;;  %v782_v36 = vmul.f32 %v13569_v15, %v8176_v10  ;;  %v13586_v15 = vunpack.c.h.bf16 %v8767_v27  ;;  %v13585_v14 = vunpack.c.l.bf16 %v8767_v27 }
 0x127   : > { %v8747_v53 = vpop.xlane.xlu1 %860  ;;  %v8749_v0 = vpop.xlane.xlu0 %858 }
 0x12a   : > { %1004 = vadd.xlane.f32.xlu1 %v781_v61  ;;  %1002 = vadd.xlane.f32.xlu0 %v780_v62  ;;  %v785_v61 = vmul.f32 %v13578_v37, %v8176_v10  ;;  %v784_v62 = vmul.f32 %v13577_v47, %v8176_v10  ;;  %v13594_v47 = vunpack.c.h.bf16 %v8782_v41  ;;  %v13593_v37 = vunpack.c.l.bf16 %v8782_v41 }
 0x12b   : > { %v8762_v58 = vpop.xlane.xlu1 %864  ;;  %v8764_v17 = vpop.xlane.xlu0 %862 }
 0x12e   : > { %1008 = vadd.xlane.f32.xlu1 %v783_v26  ;;  %1006 = vadd.xlane.f32.xlu0 %v782_v36  ;;  %v787_v26 = vmul.f32 %v13586_v15, %v8176_v10  ;;  %v786_v36 = vmul.f32 %v13585_v14, %v8176_v10  ;;  %v13602_v14 = vunpack.c.h.bf16 %v8797_v52  ;;  %v13601_v15 = vunpack.c.l.bf16 %v8797_v52 }
 0x12f   : > { %v8777_v63 = vpop.xlane.xlu1 %868  ;;  %v8779_v31 = vpop.xlane.xlu0 %866 }
 0x132   : > { %1012 = vadd.xlane.f32.xlu1 %v785_v61  ;;  %1010 = vadd.xlane.f32.xlu0 %v784_v62  ;;  %v789_v61 = vmul.f32 %v13594_v47, %v8176_v10  ;;  %v788_v62 = vmul.f32 %v13593_v37, %v8176_v10  ;;  %v13608_v37 = vunpack.c.h.bf16 %v8812_v51  ;;  %v13607_v47 = vunpack.c.l.bf16 %v8812_v51 }
 0x133   : > { %v8792_v16 = vpop.xlane.xlu1 %872  ;;  %v8794_v42 = vpop.xlane.xlu0 %870 }
 0x136   : > { %1016 = vadd.xlane.f32.xlu1 %v787_v26  ;;  %1014 = vadd.xlane.f32.xlu0 %v786_v36  ;;  %v791_v26 = vmul.f32 %v13602_v14, %v8176_v10  ;;  %v790_v36 = vmul.f32 %v13601_v15, %v8176_v10  ;;  %v13614_v15 = vunpack.c.h.bf16 %v8827_v57  ;;  %v13613_v14 = vunpack.c.l.bf16 %v8827_v57 }
 0x137   : > { %v8807_v27 = vpop.xlane.xlu1 %876  ;;  %v8809_v56 = vpop.xlane.xlu0 %874 }
 0x138   : > { %14004 = vst [vmem:[#allocation72_spill] sm:$0xff] %v8807_v27  ;;  %14005 = vst [vmem:[#allocation73_spill] sm:$0xff] %v8809_v56  ;;  %v8842_v27 = vld [vmem:[%s8119_s19 + $0x1b8] sm:$0xff]   ;;  %v8857_v56 = vld [vmem:[%s8119_s19 + $0x1c0] sm:$0xff]  }
 0x139   : > { %14008 = vst [vmem:[#allocation76_spill] sm:$0xff] %v8842_v27  ;;  %14010 = vst [vmem:[#allocation78_spill] sm:$0xff] %v8857_v56 }
 0x13a   : > { %1020 = vadd.xlane.f32.xlu1 %v789_v61  ;;  %1018 = vadd.xlane.f32.xlu0 %v788_v62  ;;  %v793_v61 = vmul.f32 %v13608_v37, %v8176_v10  ;;  %v792_v62 = vmul.f32 %v13607_v47, %v8176_v10  ;;  %v13618_v47 = vunpack.c.h.bf16 %v8842_v27  ;;  %v13617_v37 = vunpack.c.l.bf16 %v8842_v27 }
 0x13b   : > { %v8822_v41 = vpop.xlane.xlu1 %880  ;;  %v8824_v22 = vpop.xlane.xlu0 %878 }
 0x13e   : > { %1024 = vadd.xlane.f32.xlu1 %v791_v26  ;;  %1022 = vadd.xlane.f32.xlu0 %v790_v36  ;;  %v795_v26 = vmul.f32 %v13614_v15, %v8176_v10  ;;  %v794_v36 = vmul.f32 %v13613_v14, %v8176_v10  ;;  %v13622_v14 = vunpack.c.h.bf16 %v8857_v56  ;;  %v13621_v15 = vunpack.c.l.bf16 %v8857_v56 }
 0x13f   : > { %v8837_v52 = vpop.xlane.xlu1 %884  ;;  %v8839_v46 = vpop.xlane.xlu0 %882 }
 0x142   : > { %1028 = vadd.xlane.f32.xlu1 %v793_v61  ;;  %1026 = vadd.xlane.f32.xlu0 %v792_v62  ;;  %v797_v61 = vmul.f32 %v13618_v47, %v8176_v10  ;;  %v796_v62 = vmul.f32 %v13617_v37, %v8176_v10  ;;  %v13625_v37 = vunpack.c.h.bf16 %v8872_v8  ;;  %v13626_v47 = vunpack.c.l.bf16 %v8872_v8 }
 0x143   : > { %v8852_v51 = vpop.xlane.xlu1 %888  ;;  %v8854_v32 = vpop.xlane.xlu0 %886 }
 0x144   : > { %14009 = vst [vmem:[#allocation77_spill] sm:$0xff] %v8852_v51 }
 0x146   : > { %1032 = vadd.xlane.f32.xlu1 %v795_v26  ;;  %1030 = vadd.xlane.f32.xlu0 %v794_v36  ;;  %v799_v26 = vmul.f32 %v13622_v14, %v8176_v10  ;;  %v798_v36 = vmul.f32 %v13621_v15, %v8176_v10 }
 0x147   : > { %v8867_v57 = vpop.xlane.xlu1 %892  ;;  %v8869_v51 = vpop.xlane.xlu0 %890 }
 0x148   : > { %14011 = vst [vmem:[#allocation79_spill] sm:$0xff] %v8867_v57  ;;  %14012 = vst [vmem:[#allocation80_spill] sm:$0xff] %v8869_v51  ;;  %v8887_v51 = vld [vmem:[%s8119_s19 + $0x1d0] sm:$0xff]  }
 0x149   : > { %14016 = vst [vmem:[#allocation84_spill] sm:$0xff] %v8887_v51  ;;  %v13629_v15 = vunpack.c.h.bf16 %v8887_v51  ;;  %v13630_v14 = vunpack.c.l.bf16 %v8887_v51 }
 0x14a   : > { %1036 = vadd.xlane.f32.xlu1 %v797_v61  ;;  %1034 = vadd.xlane.f32.xlu0 %v796_v62  ;;  %v801_v61 = vmul.f32 %v13625_v37, %v8176_v10  ;;  %v800_v62 = vmul.f32 %v13626_v47, %v8176_v10 }
 0x14b   : > { %v8882_v27 = vpop.xlane.xlu1 %896  ;;  %v8884_v57 = vpop.xlane.xlu0 %894 }
 0x14c   : > { %14014 = vst [vmem:[#allocation82_spill] sm:$0xff] %v8882_v27  ;;  %14015 = vst [vmem:[#allocation83_spill] sm:$0xff] %v8884_v57  ;;  %v8902_v57 = vld [vmem:[%s8119_s19 + $0x1d8] sm:$0xff]  }
 0x14d   : > { %14019 = vst [vmem:[#allocation87_spill] sm:$0xff] %v8902_v57  ;;  %v13633_v37 = vunpack.c.h.bf16 %v8902_v57  ;;  %v13634_v47 = vunpack.c.l.bf16 %v8902_v57 }
 0x14e   : > { %1040 = vadd.xlane.f32.xlu1 %v799_v26  ;;  %1038 = vadd.xlane.f32.xlu0 %v798_v36  ;;  %v803_v26 = vmul.f32 %v13629_v15, %v8176_v10  ;;  %v802_v36 = vmul.f32 %v13630_v14, %v8176_v10 }
 0x14f   : > { %v8897_v56 = vpop.xlane.xlu1 %900  ;;  %v8899_v27 = vpop.xlane.xlu0 %898 }
 0x150   : > { %14017 = vst [vmem:[#allocation85_spill] sm:$0xff] %v8897_v56  ;;  %14018 = vst [vmem:[#allocation86_spill] sm:$0xff] %v8899_v27  ;;  %v8917_v27 = vld [vmem:[%s8119_s19 + $0x1e0] sm:$0xff]  }
 0x151   : > { %14022 = vst [vmem:[#allocation90_spill] sm:$0xff] %v8917_v27  ;;  %v13637_v15 = vunpack.c.h.bf16 %v8917_v27  ;;  %v13638_v14 = vunpack.c.l.bf16 %v8917_v27 }
 0x152   : > { %1044 = vadd.xlane.f32.xlu1 %v801_v61  ;;  %1042 = vadd.xlane.f32.xlu0 %v800_v62  ;;  %v805_v61 = vmul.f32 %v13633_v37, %v8176_v10  ;;  %v804_v62 = vmul.f32 %v13634_v47, %v8176_v10 }
 0x153   : > { %v8912_v8 = vpop.xlane.xlu1 %904  ;;  %v8914_v56 = vpop.xlane.xlu0 %902 }
 0x154   : > { %14020 = vst [vmem:[#allocation88_spill] sm:$0xff] %v8912_v8  ;;  %14021 = vst [vmem:[#allocation89_spill] sm:$0xff] %v8914_v56  ;;  %v8932_v56 = vld [vmem:[%s8119_s19 + $0x1e8] sm:$0xff]  }
 0x155   : > { %14025 = vst [vmem:[#allocation93_spill] sm:$0xff] %v8932_v56  ;;  %v13641_v37 = vunpack.c.h.bf16 %v8932_v56  ;;  %v13642_v47 = vunpack.c.l.bf16 %v8932_v56 }
 0x156   : > { %1048 = vadd.xlane.f32.xlu1 %v803_v26  ;;  %1046 = vadd.xlane.f32.xlu0 %v802_v36  ;;  %v807_v26 = vmul.f32 %v13637_v15, %v8176_v10  ;;  %v806_v36 = vmul.f32 %v13638_v14, %v8176_v10 }
 0x157   : > { %v8927_v51 = vpop.xlane.xlu1 %908  ;;  %v8929_v8 = vpop.xlane.xlu0 %906 }
 0x158   : > { %14023 = vst [vmem:[#allocation91_spill] sm:$0xff] %v8927_v51  ;;  %14024 = vst [vmem:[#allocation92_spill] sm:$0xff] %v8929_v8  ;;  %v8947_v8 = vld [vmem:[%s8119_s19 + $0x1f0] sm:$0xff]  }
 0x159   : > { %14028 = vst [vmem:[#allocation96_spill] sm:$0xff] %v8947_v8  ;;  %v13645_v15 = vunpack.c.h.bf16 %v8947_v8  ;;  %v13646_v14 = vunpack.c.l.bf16 %v8947_v8 }
 0x15a   : > { %1052 = vadd.xlane.f32.xlu1 %v805_v61  ;;  %1050 = vadd.xlane.f32.xlu0 %v804_v62  ;;  %v809_v61 = vmul.f32 %v13641_v37, %v8176_v10  ;;  %v808_v62 = vmul.f32 %v13642_v47, %v8176_v10 }
 0x15b   : > { %v8942_v57 = vpop.xlane.xlu1 %912  ;;  %v8944_v51 = vpop.xlane.xlu0 %910  ;;  %v810_v37 = vmul.f32 %v13646_v14, %v8176_v10 }
 0x15c   : > { %14026 = vst [vmem:[#allocation94_spill] sm:$0xff] %v8942_v57  ;;  %14027 = vst [vmem:[#allocation95_spill] sm:$0xff] %v8944_v51  ;;  %v8962_v51 = vld [vmem:[%s8119_s19 + $0x1f8] sm:$0xff]   ;;  %s1070_s19 = sld [smem:[#allocation12]] }
 0x15d   : > { %14031 = vst [vmem:[#allocation99_spill] sm:$0xff] %v8962_v51  ;;  %v13651_v47 = vunpack.c.h.bf16 %v8962_v51  ;;  %v13652_v56 = vunpack.c.l.bf16 %v8962_v51 }
 0x15e   : > { %1056 = vadd.xlane.f32.xlu1 %v807_v26  ;;  %1054 = vadd.xlane.f32.xlu0 %v806_v36  ;;  %v8965_v26 = vsub.s32 1, %v8162_v5  ;;  %v811_v36 = vmul.f32 %v13645_v15, %v8176_v10 }
 0x15f   : > { %v8957_v27 = vpop.xlane.xlu1 %916  ;;  %v8959_v57 = vpop.xlane.xlu0 %914  ;;  %v812_v15 = vmul.f32 %v13652_v56, %v8176_v10 }
 0x160   : > { %14029 = vst [vmem:[#allocation97_spill] sm:$0xff] %v8957_v27  ;;  %14030 = vst [vmem:[#allocation98_spill] sm:$0xff] %v8959_v57 }
 0x161   : > { %14032 = vst [vmem:[#allocation100_spill] sm:$0xff] %v8965_v26 }
 0x162   : > { %1060 = vadd.xlane.f32.xlu1 %v809_v61  ;;  %1058 = vadd.xlane.f32.xlu0 %v808_v62  ;;  %v8981_v61 = vrot.slane %v8167_v6, %v8965_v26  ;;  %v813_v62 = vmul.f32 %v13651_v47, %v8176_v10  ;;  %v14036_v6 = vunpack.c.h.bf16 %v8159_v4  ;;  %v14040_v10 = vunpack.c.h.bf16 %v8156_v3 }
 0x163   : > { %v8975_v27 = vpop.xlane.xlu1 %920  ;;  %v8977_v57 = vpop.xlane.xlu0 %918 }
 0x164   : > { %14033 = vst [vmem:[#allocation101_spill] sm:$0xff] %v8975_v27  ;;  %v1205_v26 = vmul.f32 %v14036_v6, %v8981_v61  ;;  %v1207_v56 = vmul.f32 %v14040_v10, %v8981_v61  ;;  %v14046_v10 = vlaneseq }
 0x166   : > { %1064 = vadd.xlane.f32.xlu1 %v811_v36  ;;  %1062 = vadd.xlane.f32.xlu0 %v810_v37  ;;  %v14037_v37 = vunpack.c.l.bf16 %v8159_v4  ;;  %v14044_v4 = vunpack.c.h.bf16 %v8181_v13 }
 0x167   : > { %v8989_v14 = vpop.xlane.xlu1 %924  ;;  %v8991_v8 = vpop.xlane.xlu0 %922 }
 0x168   : > { %14034 = vst [vmem:[#allocation102_spill] sm:$0xff] %v8989_v14  ;;  %14035 = vst [vmem:[#allocation103_spill] sm:$0xff] %v8991_v8  ;;  %v1204_v36 = vmul.f32 %v14037_v37, %v8981_v61  ;;  %v14045_v37 = vunpack.c.l.bf16 %v8181_v13 }
 0x16a   : > { %1068 = vadd.xlane.f32.xlu1 %v813_v62  ;;  %1066 = vadd.xlane.f32.xlu0 %v812_v15  ;;  %v14041_v15 = vunpack.c.l.bf16 %v8156_v3 }
 0x16b   : > { %v8999_v27 = vpop.xlane.xlu1 %928  ;;  %v9001_v47 = vpop.xlane.xlu0 %926 }
 0x16c   : > { %14038 = vst [vmem:[#allocation104_spill] sm:$0xff] %v8999_v27  ;;  %14039 = vst [vmem:[#allocation105_spill] sm:$0xff] %v9001_v47  ;;  %v1206_v62 = vmul.f32 %v14041_v15, %v8981_v61  ;;  %v9020_v27 = vand.u32 127, %v14046_v10 }
 0x16e   : > { %1334 = vadd.xlane.f32.xlu1 %v1205_v26  ;;  %1332 = vadd.xlane.f32.xlu0 %v1204_v36  ;;  %v1209_v26 = vmul.f32 %v14044_v4, %v8981_v61  ;;  %v1208_v36 = vmul.f32 %v14045_v37, %v8981_v61  ;;  %14047 = vst [vmem:[#allocation108_spill] sm:$0xff] %v9020_v27  ;;  %v14051_v4 = vunpack.c.l.bf16 %v8198_v20  ;;  %v1873_v47 = vadd.s32 4294967264, %v9020_v27 }
 0x16f   : > { %v9009_v51 = vpop.xlane.xlu1 %932  ;;  %v9011_v6 = vpop.xlane.xlu0 %930  ;;  %v1887_v8 = vadd.s32 4294967248, %v9020_v27 }
 0x170   : > { %14042 = vst [vmem:[#allocation106_spill] sm:$0xff] %v9009_v51  ;;  %14043 = vst [vmem:[#allocation107_spill] sm:$0xff] %v9011_v6  ;;  %v1852_v51 = vadd.s32 4294967288, %v9020_v27  ;;  %v1210_v13 = vmul.f32 %v14051_v4, %v8981_v61  ;;  %v9037_v6 = vstv %s1070_s19 }
 0x172   : > { %1338 = vadd.xlane.f32.xlu1 %v1207_v56  ;;  %1336 = vadd.xlane.f32.xlu0 %v1206_v62  ;;  %v14050_v56 = vunpack.c.h.bf16 %v8198_v20  ;;  %v14055_v20 = vunpack.c.h.bf16 %v8209_v25 }
 0x173   : > { %v9022_v3 = vpop.xlane.xlu1 %936  ;;  %v9024_v15 = vpop.xlane.xlu0 %934 }
 0x174   : > { %14048 = vst [vmem:[#allocation109_spill] sm:$0xff] %v9022_v3  ;;  %14049 = vst [vmem:[#allocation110_spill] sm:$0xff] %v9024_v15  ;;  %v1211_v62 = vmul.f32 %v14050_v56, %v8981_v61  ;;  %v1859_v3 = vadd.s32 4294967280, %v9020_v27  ;;  %v9041_v15 = vsub.s32 %v1852_v51, %v8162_v5  ;;  %v14056_v56 = vunpack.c.l.bf16 %v8209_v25 }
 0x175   : > { %v9059_v51 = vsub.s32 %v9020_v27, %v8162_v5  ;;  %v9071_v25 = vadd.f32 %v9037_v6, %v8582_v38 }
 0x176   : > { %1342 = vadd.xlane.f32.xlu1 %v1209_v26  ;;  %1340 = vadd.xlane.f32.xlu0 %v1208_v36  ;;  %v9045_v26 = vadd.f32 %v9037_v6, %v8599_v28  ;;  %v1213_v36 = vmul.f32 %v14055_v20, %v8981_v61  ;;  %v1212_v4 = vmul.f32 %v14056_v56, %v8981_v61  ;;  %v14061_v56 = vunpack.c.h.bf16 %v8220_v30 }
 0x177   : > { %v9033_v37 = vpop.xlane.xlu1 %940  ;;  %v9035_v10 = vpop.xlane.xlu0 %938  ;;  %v9063_v28 = vadd.f32 %v9037_v6, %v8584_v34  ;;  %14060 = vst [vmem:[#allocation117_spill] sm:$0xff] %v9071_v25  ;;  %v14062_v34 = vunpack.c.l.bf16 %v8220_v30 }
 0x178   : > { %14052 = vst [vmem:[#allocation111_spill] sm:$0xff] %v9033_v37  ;;  %14053 = vst [vmem:[#allocation112_spill] sm:$0xff] %v9035_v10  ;;  %v1856_v20 = vrot.slane %v9045_v26, %v9041_v15 }
 0x179   : > { %14054 = vst [vmem:[#allocation113_spill] sm:$0xff] %v9045_v26  ;;  %14059 = vst [vmem:[#allocation116_spill] sm:$0xff] %v9063_v28 }
 0x17a   : > { %1346 = vadd.xlane.f32.xlu1 %v1211_v62  ;;  %1344 = vadd.xlane.f32.xlu0 %v1210_v13  ;;  %v1866_v62 = vadd.s32 4294967272, %v9020_v27  ;;  %v9067_v13 = vsub.s32 %v1859_v3, %v8162_v5  ;;  %v1880_v3 = vadd.s32 4294967256, %v9020_v27 }
 0x17b   : > { %v9053_v10 = vpop.xlane.xlu1 %944  ;;  %v9055_v37 = vpop.xlane.xlu0 %942 }
 0x17c   : > { %14057 = vst [vmem:[#allocation114_spill] sm:$0xff] %v9053_v10  ;;  %14058 = vst [vmem:[#allocation115_spill] sm:$0xff] %v9055_v37  ;;  %v1215_v37 = vmul.f32 %v14061_v56, %v8981_v61  ;;  %v1214_v10 = vmul.f32 %v14062_v34, %v8981_v61  ;;  %v9094_v56 = vadd.f32 %v9037_v6, %v8597_v29  ;;  %v1894_v34 = vadd.s32 4294967240, %v9020_v27 }
 0x17d   : > { %v1863_v30 = vrot.slane %v9071_v25, %v9067_v13  ;;  %v14067_v29 = vunpack.c.l.bf16 %v8231_v35  ;;  %v9110_v25 = vsub.s32 %v1873_v47, %v8162_v5 }
 0x17e   : > { %1350 = vadd.xlane.f32.xlu1 %v1213_v36  ;;  %1348 = vadd.xlane.f32.xlu0 %v1212_v4  ;;  %v1851_v36 = vrot.slane %v9063_v28, %v9059_v51  ;;  %v9090_v4 = vsub.s32 %v1866_v62, %v8162_v5  ;;  %14065 = vst [vmem:[#allocation120_spill] sm:$0xff] %v9094_v56  ;;  %v14066_v62 = vunpack.c.h.bf16 %v8231_v35 }
 0x17f   : > { %v9083_v38 = vpop.xlane.xlu1 %948  ;;  %v9085_v14 = vpop.xlane.xlu0 %946  ;;  %v9122_v35 = vadd.f32 %v9037_v6, %v8614_v2  ;;  %v9139_v2 = vadd.f32 %v9037_v6, %v8719_v54 }
 0x180   : > { %14063 = vst [vmem:[#allocation118_spill] sm:$0xff] %v9083_v38  ;;  %14064 = vst [vmem:[#allocation119_spill] sm:$0xff] %v9085_v14  ;;  %v1858_v26 = vsel %vm1857_vm1, %v1856_v20, %v1851_v36  ;;  %v1217_v28 = vmul.f32 %v14066_v62, %v8981_v61  ;;  %v1216_v38 = vmul.f32 %v14067_v29, %v8981_v61  ;;  %v1908_v20 = vadd.s32 4294967224, %v9020_v27 }
 0x181   : > { %v9107_v14 = vsub.s32 %v1880_v3, %v8162_v5  ;;  %v1870_v36 = vrot.slane %v9094_v56, %v9090_v4  ;;  %14070 = vst [vmem:[#allocation123_spill] sm:$0xff] %v9122_v35  ;;  %v1901_v3 = vadd.s32 4294967232, %v9020_v27  ;;  %v1865_v47 = vsel %vm1864_vm2, %v1863_v30, %v1858_v26  ;;  %14073 = vst [vmem:[#allocation126_spill] sm:$0xff] %v9139_v2 }
 0x182   : > { %1354 = vadd.xlane.f32.xlu1 %v1215_v37  ;;  %1352 = vadd.xlane.f32.xlu0 %v1214_v10  ;;  %v9127_v62 = vsub.s32 %v1894_v34, %v8162_v5  ;;  %v9131_v29 = vadd.f32 %v9037_v6, %v8702_v33  ;;  %v14074_v26 = vunpack.c.h.bf16 %v8242_v40  ;;  %v14075_v34 = vunpack.c.l.bf16 %v8242_v40 }
 0x183   : > { %v9114_v37 = vpop.xlane.xlu1 %952  ;;  %v9116_v10 = vpop.xlane.xlu0 %950  ;;  %v9149_v56 = vadd.f32 %v9037_v6, %v8612_v23  ;;  %v9155_v54 = vsub.s32 %v1908_v20, %v8162_v5  ;;  %v1877_v40 = vrot.slane %v9122_v35, %v9110_v25  ;;  %v9167_v23 = vadd.f32 %v9037_v6, %v8629_v7 }
 0x184   : > { %14068 = vst [vmem:[#allocation121_spill] sm:$0xff] %v9114_v37  ;;  %14069 = vst [vmem:[#allocation122_spill] sm:$0xff] %v9116_v10  ;;  %v9135_v37 = vadd.f32 %v9037_v6, %v8704_v49  ;;  %v1219_v30 = vmul.f32 %v14074_v26, %v8981_v61  ;;  %v1218_v33 = vmul.f32 %v14075_v34, %v8981_v61 }
 0x185   : > { %14071 = vst [vmem:[#allocation124_spill] sm:$0xff] %v9131_v29  ;;  %14076 = vst [vmem:[#allocation127_spill] sm:$0xff] %v9149_v56  ;;  %v9152_v49 = vsub.s32 %v1887_v8, %v8162_v5  ;;  %v1872_v26 = vsel %vm1871_vm3, %v1870_v36, %v1865_v47  ;;  %v9170_v8 = vsub.s32 %v1901_v3, %v8162_v5  ;;  %v14080_v47 = vunpack.c.h.bf16 %v8253_v45 }
 0x186   : > { %14072 = vst [vmem:[#allocation125_spill] sm:$0xff] %v9135_v37  ;;  %1358 = vadd.xlane.f32.xlu1 %v1217_v28  ;;  %1356 = vadd.xlane.f32.xlu0 %v1216_v38  ;;  %v1922_v28 = vadd.s32 4294967208, %v9020_v27  ;;  %14078 = vst [vmem:[#allocation129_spill] sm:$0xff] %v9167_v23  ;;  %v1964_v20 = vrot.slane %v9131_v29, %v9041_v15  ;;  %v1960_v34 = vrot.slane %v9135_v37, %v9059_v51 }
 0x187   : > { %v9158_v38 = vpop.xlane.xlu1 %956  ;;  %v9160_v10 = vpop.xlane.xlu0 %954  ;;  %v9178_v36 = vadd.f32 %v9037_v6, %v8717_v43  ;;  %v1221_v35 = vmul.f32 %v14080_v47, %v8981_v61  ;;  %v1969_v7 = vrot.slane %v9139_v2, %v9067_v13  ;;  %v9187_v3 = vadd.f32 %v9037_v6, %v8734_v59 }
 0x188   : > { %14077 = vst [vmem:[#allocation128_spill] sm:$0xff] %v9158_v38  ;;  %v14082_v37 = vunpack.c.l.bf16 %v8253_v45  ;;  %v1884_v43 = vrot.slane %v9149_v56, %v9107_v14  ;;  %v9196_v47 = vadd.f32 %v9037_v6, %v8627_v18  ;;  %v9199_v38 = vsub.s32 %v1922_v28, %v8162_v5 }
 0x189   : > { %14079 = vst [vmem:[#allocation130_spill] sm:$0xff] %v9178_v36  ;;  %14081 = vst [vmem:[#allocation131_spill] sm:$0xff] %v9187_v3  ;;  %v1915_v2 = vadd.s32 4294967216, %v9020_v27  ;;  %v1891_v45 = vrot.slane %v9167_v23, %v9152_v49  ;;  %v14088_v18 = vunpack.c.h.bf16 %v8264_v50  ;;  %v1965_v56 = vsel %vm1857_vm1, %v1964_v20, %v1960_v34 }
 0x18a   : > { %1362 = vadd.xlane.f32.xlu1 %v1219_v30  ;;  %1360 = vadd.xlane.f32.xlu0 %v1218_v33  ;;  %v1220_v29 = vmul.f32 %v14082_v37, %v8981_v61  ;;  %14083 = vst [vmem:[#allocation132_spill] sm:$0xff] %v9196_v47  ;;  %14084 = vst [vmem:[#allocation133_spill] sm:$0xff] %v9199_v38  ;;  %v1879_v33 = vsel %vm1878_vm4, %v1877_v40, %v1872_v26  ;;  %v14090_v40 = vunpack.c.l.bf16 %v8264_v50 }
 0x18b   : > { %v9202_v59 = vpop.xlane.xlu1 %960  ;;  %v9204_v30 = vpop.xlane.xlu0 %958  ;;  %v9211_v37 = vadd.f32 %v9037_v6, %v8644_v12  ;;  %v1223_v28 = vmul.f32 %v14088_v18, %v8981_v61  ;;  %v9221_v26 = vadd.f32 %v9037_v6, %v8732_v48  ;;  %v1970_v12 = vsel %vm1864_vm2, %v1969_v7, %v1965_v56 }
 0x18c   : > { %14085 = vst [vmem:[#allocation134_spill] sm:$0xff] %v9202_v59  ;;  %14086 = vst [vmem:[#allocation135_spill] sm:$0xff] %v9204_v30  ;;  %v1974_v59 = vrot.slane %v9178_v36, %v9090_v4  ;;  %v1222_v23 = vmul.f32 %v14090_v40, %v8981_v61  ;;  %v1979_v30 = vrot.slane %v9187_v3, %v9110_v25 }
 0x18d   : > { %14087 = vst [vmem:[#allocation136_spill] sm:$0xff] %v9211_v37  ;;  %14089 = vst [vmem:[#allocation137_spill] sm:$0xff] %v9221_v26  ;;  %v9231_v20 = vadd.f32 %v9037_v6, %v8749_v0  ;;  %v1898_v48 = vrot.slane %v9196_v47, %v9127_v62  ;;  %v1886_v34 = vsel %vm1885_vm5, %v1884_v43, %v1879_v33  ;;  %v14162_v47 = vld [vmem:[#allocation95_spill] sm:$0xff] }
 0x18e   : > { %1366 = vadd.xlane.f32.xlu1 %v1221_v35  ;;  %1364 = vadd.xlane.f32.xlu0 %v1220_v29  ;;  %v9238_v50 = vadd.f32 %v9037_v6, %v8642_v9  ;;  %v9241_v56 = vsub.s32 %v1915_v2, %v8162_v5  ;;  %v1893_v0 = vsel %vm13759_vm6, %v1891_v45, %v1886_v34  ;;  %v14094_v9 = vunpack.c.h.bf16 %v8275_v55 }
 0x18f   : > { %14091 = vst [vmem:[#allocation138_spill] sm:$0xff] %v9231_v20  ;;  %v9243_v7 = vpop.xlane.xlu1 %964  ;;  %v9245_v18 = vpop.xlane.xlu0 %962  ;;  %v1905_v35 = vrot.slane %v9211_v37, %v9170_v8  ;;  %v9252_v29 = vadd.f32 %v9037_v6, %v8659_v24  ;;  %v1984_v2 = vrot.slane %v9221_v26, %v9107_v14  ;;  %v1975_v33 = vsel %vm1871_vm3, %v1974_v59, %v1970_v12 }
 0x190   : > { %14092 = vst [vmem:[#allocation139_spill] sm:$0xff] %v9238_v50  ;;  %v1225_v43 = vmul.f32 %v14094_v9, %v8981_v61  ;;  %v9262_v40 = vadd.f32 %v9037_v6, %v8747_v53  ;;  %v14096_v45 = vunpack.c.l.bf16 %v8275_v55  ;;  %v1936_v24 = vadd.s32 4294967192, %v9020_v27 }
 0x191   : > { %14093 = vst [vmem:[#allocation140_spill] sm:$0xff] %v9252_v29  ;;  %v1980_v3 = vsel %vm1878_vm4, %v1979_v30, %v1975_v33  ;;  %v1989_v9 = vrot.slane %v9231_v20, %v9152_v49  ;;  %v9273_v26 = vadd.f32 %v9037_v6, %v8764_v17  ;;  %v1912_v53 = vrot.slane %v9238_v50, %v9155_v54 }
 0x192   : > { %14095 = vst [vmem:[#allocation141_spill] sm:$0xff] %v9262_v40  ;;  %v1224_v34 = vmul.f32 %v14096_v45, %v8981_v61  ;;  %1370 = vadd.xlane.f32.xlu1 %v1223_v28  ;;  %1368 = vadd.xlane.f32.xlu0 %v1222_v23  ;;  %v1900_v59 = vsel %vm1899_vm7, %v1898_v48, %v1893_v0  ;;  %v1929_v55 = vadd.s32 4294967200, %v9020_v27  ;;  %v1950_v12 = vadd.s32 4294967176, %v9020_v27 }
 0x193   : > { %14097 = vst [vmem:[#allocation142_spill] sm:$0xff] %v9273_v26  ;;  %v9280_v45 = vpop.xlane.xlu1 %968  ;;  %v9282_v30 = vpop.xlane.xlu0 %966  ;;  %v1907_v33 = vsel %vm13762_vm8, %v1905_v35, %v1900_v59  ;;  %v9287_v17 = vadd.f32 %v9037_v6, %v8657_v19  ;;  %v1919_v23 = vrot.slane %v9252_v29, %v9241_v56  ;;  %v14100_v28 = vunpack.c.h.bf16 %v8286_v60 }
 0x194   : > { %14098 = vst [vmem:[#allocation143_spill] sm:$0xff] %v9280_v45  ;;  %v1994_v0 = vrot.slane %v9262_v40, %v9127_v62  ;;  %v1985_v20 = vsel %vm1885_vm5, %v1984_v2, %v1980_v3  ;;  %v9299_v37 = vadd.f32 %v9037_v6, %v8762_v58  ;;  %v14102_v19 = vunpack.c.l.bf16 %v8286_v60 }
 0x195   : > { %14099 = vst [vmem:[#allocation144_spill] sm:$0xff] %v9287_v17  ;;  %v1227_v48 = vmul.f32 %v14100_v28, %v8981_v61  ;;  %v1990_v59 = vsel %vm13759_vm6, %v1989_v9, %v1985_v20  ;;  %v1999_v29 = vrot.slane %v9273_v26, %v9170_v8  ;;  %v9309_v28 = vadd.f32 %v9037_v6, %v8779_v31 }
 0x196   : > { %14101 = vst [vmem:[#allocation145_spill] sm:$0xff] %v9299_v37  ;;  %v1226_v35 = vmul.f32 %v14102_v19, %v8981_v61  ;;  %1374 = vadd.xlane.f32.xlu1 %v1225_v43  ;;  %1372 = vadd.xlane.f32.xlu0 %v1224_v34  ;;  %v1914_v3 = vsel %vm1913_vm9, %v1912_v53, %v1907_v33  ;;  %v1943_v2 = vadd.s32 4294967184, %v9020_v27  ;;  %v14109_v33 = vunpack.c.h.bf16 %v8297_v1 }
 0x197   : > { %14103 = vst [vmem:[#allocation146_spill] sm:$0xff] %v9309_v28  ;;  %v9313_v58 = vsub.s32 %v1936_v24, %v8162_v5  ;;  %v9316_v60 = vsub.s32 %v1929_v55, %v8162_v5  ;;  %v9319_v20 = vpop.xlane.xlu1 %972  ;;  %v9321_v9 = vpop.xlane.xlu0 %970  ;;  %v1926_v31 = vrot.slane %v9287_v17, %v9199_v38  ;;  %v1921_v43 = vsel %vm13766_vm10, %v1919_v23, %v1914_v3 }
 0x198   : > { %14105 = vst [vmem:[#allocation148_spill] sm:$0xff] %v9319_v20  ;;  %14106 = vst [vmem:[#allocation149_spill] sm:$0xff] %v9321_v9  ;;  %v9328_v34 = vadd.f32 %v9037_v6, %v8674_v39  ;;  %v9331_v24 = vsub.s32 %v1950_v12, %v8162_v5  ;;  %v2004_v53 = vrot.slane %v9299_v37, %v9155_v54  ;;  %v14110_v27 = vunpack.c.l.bf16 %v8297_v1  ;;  %v14197_v9 = vld [vmem:[#allocation101_spill] sm:$0xff] }
 0x199   : > { %14104 = vst [vmem:[#allocation147_spill] sm:$0xff] %v9313_v58  ;;  %v1995_v55 = vsel %vm1899_vm7, %v1994_v0, %v1990_v59  ;;  %v1229_v19 = vmul.f32 %v14109_v33, %v8981_v61  ;;  %v9345_v12 = vadd.f32 %v9037_v6, %v8777_v63  ;;  %v2009_v3 = vrot.slane %v9309_v28, %v9241_v56  ;;  %v14126_v28 = vld [vmem:[#allocation73_spill] sm:$0xff] }
 0x19a   : > { %14107 = vst [vmem:[#allocation150_spill] sm:$0xff] %v9328_v34  ;;  %14108 = vst [vmem:[#allocation151_spill] sm:$0xff] %v9331_v24  ;;  %v1228_v23 = vmul.f32 %v14110_v27, %v8981_v61  ;;  %v2000_v39 = vsel %vm13762_vm8, %v1999_v29, %v1995_v55  ;;  %1378 = vadd.xlane.f32.xlu1 %v1227_v48  ;;  %1376 = vadd.xlane.f32.xlu0 %v1226_v35  ;;  %v14119_v55 = vunpack.c.h.bf16 %v8308_v21 }
 0x19b   : > { %14111 = vst [vmem:[#allocation152_spill] sm:$0xff] %v9345_v12  ;;  %v9350_v0 = vsub.s32 %v1943_v2, %v8162_v5  ;;  %v9354_v59 = vadd.f32 %v9037_v6, %v8794_v42  ;;  %v9358_v1 = vadd.f32 %v9037_v6, %v8822_v41  ;;  %v9362_v63 = vadd.f32 %v9037_v6, %v8824_v22  ;;  %v9364_v27 = vpop.xlane.xlu1 %976  ;;  %v9366_v29 = vpop.xlane.xlu0 %974 }
 0x19c   : > { %v9370_v48 = vadd.f32 %v9037_v6, %v8672_v11  ;;  %v1928_v35 = vsel %vm1927_vm11, %v1926_v31, %v1921_v43  ;;  %v1933_v42 = vrot.slane %v9328_v34, %v9316_v60  ;;  %v9377_v41 = vadd.f32 %v9037_v6, %v8839_v46 }
 0x19d   : > { %14112 = vst [vmem:[#allocation153_spill] sm:$0xff] %v9350_v0  ;;  %14113 = vst [vmem:[#allocation154_spill] sm:$0xff] %v9354_v59  ;;  %v9381_v22 = vadd.f32 %v9037_v6, %v8689_v44  ;;  %v2005_v2 = vsel %vm1913_vm9, %v2004_v53, %v2000_v39  ;;  %v1231_v11 = vmul.f32 %v14119_v55, %v8981_v61  ;;  %v14120_v31 = vunpack.c.l.bf16 %v8308_v21 }
 0x19e   : > { %14114 = vst [vmem:[#allocation155_spill] sm:$0xff] %v9358_v1  ;;  %14115 = vst [vmem:[#allocation156_spill] sm:$0xff] %v9362_v63  ;;  %v2014_v33 = vrot.slane %v9345_v12, %v9199_v38  ;;  %v2010_v46 = vsel %vm13766_vm10, %v2009_v3, %v2005_v2  ;;  %v9395_v44 = vadd.f32 %v9037_v6, %v8792_v16  ;;  %1382 = vadd.xlane.f32.xlu1 %v1229_v19 }
 0x19f   : > { %14116 = vst [vmem:[#allocation157_spill] sm:$0xff] %v9370_v48  ;;  %14117 = vst [vmem:[#allocation158_spill] sm:$0xff] %v9377_v41  ;;  %v1230_v43 = vmul.f32 %v14120_v31, %v8981_v61  ;;  %1380 = vadd.xlane.f32.xlu0 %v1228_v23  ;;  %v2019_v53 = vrot.slane %v9354_v59, %v9316_v60  ;;  %v2043_v39 = vrot.slane %v9358_v1, %v9041_v15  ;;  %v9407_v3 = vpop.xlane.xlu1 %980  ;;  %v9409_v2 = vpop.xlane.xlu0 %978 }
 0x1a0   : > { %14118 = vst [vmem:[#allocation159_spill] sm:$0xff] %v9381_v22  ;;  %14121 = vst [vmem:[#allocation160_spill] sm:$0xff] %v9395_v44  ;;  %v2039_v21 = vrot.slane %v9362_v63, %v9059_v51  ;;  %v9405_v55 = vadd.f32 %v9037_v6, %v8837_v52  ;;  %v1940_v16 = vrot.slane %v9370_v48, %v9313_v58  ;;  %v14124_v63 = vld [vmem:[#allocation63_spill] sm:$0xff] }
 0x1a1   : > { %v1935_v19 = vsel %vm13900_vm12, %v1933_v42, %v1928_v35  ;;  %v2048_v23 = vrot.slane %v9377_v41, %v9067_v13  ;;  %v9418_v31 = vadd.f32 %v9037_v6, %v8854_v32  ;;  %v9422_v52 = vadd.f32 %v9037_v6, %v14124_v63  ;;  %v14128_v35 = vld [vmem:[#allocation32_spill] sm:$0xff] }
 0x1a2   : > { %14122 = vst [vmem:[#allocation161_spill] sm:$0xff] %v9405_v55  ;;  %v1947_v59 = vrot.slane %v9381_v22, %v9350_v0  ;;  %v9428_v26 = vadd.f32 %v9037_v6, %v14126_v28  ;;  %v14129_v42 = vunpack.c.h.bf16 %v14128_v35  ;;  %v2024_v32 = vrot.slane %v9395_v44, %v9313_v58  ;;  %1386 = vadd.xlane.f32.xlu1 %v1231_v11  ;;  %v14133_v11 = vld [vmem:[#allocation72_spill] sm:$0xff] }
 0x1a3   : > { %14123 = vst [vmem:[#allocation162_spill] sm:$0xff] %v9418_v31  ;;  %14125 = vst [vmem:[#allocation63_spill] sm:$0xff] %v9422_v52  ;;  %v2015_v41 = vsel %vm1927_vm11, %v2014_v33, %v2010_v46  ;;  %1384 = vadd.xlane.f32.xlu0 %v1230_v43  ;;  %v14130_v63 = vunpack.c.l.bf16 %v14128_v35  ;;  %v2044_v28 = vsel %vm1857_vm1, %v2043_v39, %v2039_v21  ;;  %v9447_v44 = vpop.xlane.xlu1 %984  ;;  %v9449_v33 = vpop.xlane.xlu0 %982 }
 0x1a4   : > { %14127 = vst [vmem:[#allocation73_spill] sm:$0xff] %v9428_v26  ;;  %v1233_v1 = vmul.f32 %v14129_v42, %v8981_v61  ;;  %v2020_v12 = vsel %vm13900_vm12, %v2019_v53, %v2015_v41  ;;  %v2053_v22 = vrot.slane %v9405_v55, %v9090_v4  ;;  %v14131_v42 = vld [vmem:[#allocation77_spill] sm:$0xff]  ;;  %v9453_v43 = vadd.f32 %v9037_v6, %v14133_v11  ;;  %v14135_v53 = vld [vmem:[#allocation80_spill] sm:$0xff] }
 0x1a5   : > { %v1232_v5 = vmul.f32 %v14130_v63, %v8981_v61  ;;  %v9445_v37 = vadd.f32 %v9037_v6, %v14131_v42  ;;  %v2049_v46 = vsel %vm1864_vm2, %v2048_v23, %v2044_v28  ;;  %v2058_v41 = vrot.slane %v9418_v31, %v9110_v25  ;;  %v14137_v23 = vld [vmem:[#allocation33_spill] sm:$0xff] }
 0x1a6   : > { %14134 = vst [vmem:[#allocation77_spill] sm:$0xff] %v9453_v43  ;;  %v9460_v39 = vadd.f32 %v9037_v6, %v14135_v53  ;;  %v1954_v21 = vrot.slane %v9422_v52, %v9331_v24  ;;  %v1942_v35 = vsel %vm1941_vm13, %v1940_v16, %v1935_v19  ;;  %v2029_v63 = vrot.slane %v9428_v26, %v9350_v0  ;;  %v14140_v26 = vld [vmem:[#allocation79_spill] sm:$0xff] }
 0x1a7   : > { %14132 = vst [vmem:[#allocation32_spill] sm:$0xff] %v9445_v37  ;;  %v1949_v42 = vsel %vm1948_vm14, %v1947_v59, %v1942_v35  ;;  %1390 = vadd.xlane.f32.xlu1 %v1233_v1  ;;  %1388 = vadd.xlane.f32.xlu0 %v1232_v5  ;;  %v14138_v28 = vunpack.c.h.bf16 %v14137_v23  ;;  %v14139_v53 = vunpack.c.l.bf16 %v14137_v23  ;;  %v2025_v55 = vsel %vm1941_vm13, %v2024_v32, %v2020_v12  ;;  %v9482_v5 = vpop.xlane.xlu1 %988  ;;  %v9484_v1 = vpop.xlane.xlu0 %986  ;;  %v14143_v32 = vld [vmem:[#allocation83_spill] sm:$0xff] }
 0x1a8   : > { %14136 = vst [vmem:[#allocation72_spill] sm:$0xff] %v9460_v39  ;;  %v2063_v16 = vrot.slane %v9445_v37, %v9107_v14  ;;  %v2054_v19 = vsel %vm1871_vm3, %v2053_v22, %v2049_v46  ;;  %v9480_v59 = vadd.f32 %v9037_v6, %v14140_v26  ;;  %14142 = vst [vmem:[#allocation33_spill] sm:$0xff] %v9482_v5  ;;  %v14145_v46 = vld [vmem:[#allocation34_spill] sm:$0xff] }
 0x1a9   : > { %v1235_v11 = vmul.f32 %v14138_v28, %v8981_v61  ;;  %v1234_v31 = vmul.f32 %v14139_v53, %v8981_v61  ;;  %v2034_v35 = vrot.slane %v9453_v43, %v9331_v24  ;;  %v2059_v23 = vsel %vm1878_vm4, %v2058_v41, %v2054_v19  ;;  %v14148_v41 = vld [vmem:[#allocation35_spill] sm:$0xff] }
 0x1aa   : > { %14141 = vst [vmem:[#allocation80_spill] sm:$0xff] %v9480_v59  ;;  %v2068_v12 = vrot.slane %v9460_v39, %v9152_v49  ;;  %v9493_v28 = vadd.f32 %v9037_v6, %v14143_v32  ;;  %v1956_v22 = vsel %vm1955_vm15, %v1954_v21, %v1949_v42  ;;  %v2030_v26 = vsel %vm1948_vm14, %v2029_v63, %v2025_v55  ;;  %v14151_v55 = vld [vmem:[#allocation36_spill] sm:$0xff] }
 0x1ab   : > { %v14146_v53 = vunpack.c.h.bf16 %v14145_v46  ;;  %v14147_v43 = vunpack.c.l.bf16 %v14145_v46  ;;  %1394 = vadd.xlane.f32.xlu1 %v1235_v11  ;;  %1392 = vadd.xlane.f32.xlu0 %v1234_v31  ;;  %v14149_v19 = vunpack.c.h.bf16 %v14148_v41  ;;  %v14150_v21 = vunpack.c.l.bf16 %v14148_v41  ;;  %v14153_v46 = vld [vmem:[#allocation82_spill] sm:$0xff]  ;;  %v9519_v11 = vpop.xlane.xlu1 %992 }
 0x1ac   : > { %14144 = vst [vmem:[#allocation79_spill] sm:$0xff] %v9493_v28  ;;  %v14152_v63 = vunpack.c.h.bf16 %v14151_v55  ;;  %v9517_v31 = vadd.f32 %v9037_v6, %v14153_v46  ;;  %14155 = vst [vmem:[#allocation34_spill] sm:$0xff] %v9519_v11  ;;  %v14157_v41 = vunpack.c.l.bf16 %v14151_v55  ;;  %v2035_v40 = vsel %vm1955_vm15, %v2034_v35, %v2030_v26  ;;  %v14160_v46 = vld [vmem:[#allocation94_spill] sm:$0xff]  ;;  %v14164_v55 = vld [vmem:[#allocation37_spill] sm:$0xff] }
 0x1ad   : > { %v1237_v37 = vmul.f32 %v14146_v53, %v8981_v61  ;;  %v1236_v34 = vmul.f32 %v14147_v43, %v8981_v61  ;;  %v1239_v32 = vmul.f32 %v14149_v19, %v8981_v61  ;;  %v1238_v42 = vmul.f32 %v14150_v21, %v8981_v61  ;;  %v9521_v19 = vpop.xlane.xlu0 %990 }
 0x1ae   : > { %v1241_v39 = vmul.f32 %v14152_v63, %v8981_v61  ;;  %v2073_v53 = vrot.slane %v9480_v59, %v9127_v62  ;;  %v2064_v43 = vsel %vm1885_vm5, %v2063_v16, %v2059_v23  ;;  %14154 = vst [vmem:[#allocation83_spill] sm:$0xff] %v9517_v31  ;;  %14156 = vst [vmem:[#allocation35_spill] sm:$0xff] %v9521_v19  ;;  %v14158_v16 = vld [vmem:[#allocation86_spill] sm:$0xff]  ;;  %v14165_v35 = vunpack.c.h.bf16 %v14164_v55 }
 0x1af   : > { %v1240_v21 = vmul.f32 %v14157_v41, %v8981_v61  ;;  %v2069_v63 = vsel %vm13759_vm6, %v2068_v12, %v2064_v43  ;;  %v2078_v59 = vrot.slane %v9493_v28, %v9170_v8  ;;  %v9532_v23 = vadd.f32 %v9037_v6, %v14158_v16  ;;  %v14167_v41 = vld [vmem:[#allocation98_spill] sm:$0xff]  ;;  %1398 = vadd.xlane.f32.xlu1 %v1237_v37  ;;  %v9568_v37 = vpop.xlane.xlu1 %996 }
 0x1b0   : > { %v9536_v36 = vadd.f32 %v9037_v6, %v14160_v46  ;;  %v9540_v52 = vadd.f32 %v9037_v6, %v14162_v47  ;;  %v1243_v26 = vmul.f32 %v14165_v35, %v8981_v61  ;;  %v14166_v12 = vunpack.c.l.bf16 %v14164_v55  ;;  %1396 = vadd.xlane.f32.xlu0 %v1236_v34  ;;  %v14169_v46 = vld [vmem:[#allocation38_spill] sm:$0xff]  ;;  %14173 = vst [vmem:[#allocation37_spill] sm:$0xff] %v9568_v37 }
 0x1b1   : > { %14159 = vst [vmem:[#allocation36_spill] sm:$0xff] %v9532_v23  ;;  %v9550_v16 = vadd.f32 %v9037_v6, %v14167_v41  ;;  %v14170_v28 = vunpack.c.h.bf16 %v14169_v46  ;;  %v14171_v47 = vunpack.c.l.bf16 %v14169_v46  ;;  %v9563_v35 = vsel %vm13755_vm0, %v2035_v40, %v1956_v22  ;;  %v9570_v34 = vpop.xlane.xlu0 %994 }
 0x1b2   : > { %14161 = vst [vmem:[#allocation82_spill] sm:$0xff] %v9536_v36  ;;  %14163 = vst [vmem:[#allocation86_spill] sm:$0xff] %v9540_v52  ;;  %v1242_v43 = vmul.f32 %v14166_v12, %v8981_v61  ;;  %v2083_v55 = vrot.slane %v9517_v31, %v9155_v54  ;;  %v2074_v12 = vsel %vm1899_vm7, %v2073_v53, %v2069_v63  ;;  %v14179_v31 = vld [vmem:[#allocation89_spill] sm:$0xff]  ;;  %vm13769_vm0 = vcmask 1042434  }
 0x1b3   : > { %14168 = vst [vmem:[#allocation94_spill] sm:$0xff] %v9550_v16  ;;  %v9555_v48 = vmul.f32 %v14170_v28, %v8981_v61  ;;  %v9560_v17 = vmul.f32 %v14171_v47, %v8981_v61  ;;  %14172 = vst [vmem:[#allocation95_spill] sm:$0xff] %v9563_v35  ;;  %v14175_v28 = vld [vmem:[#allocation39_spill] sm:$0xff]  ;;  %v2079_v46 = vsel %vm13762_vm8, %v2078_v59, %v2074_v12  ;;  %v14177_v47 = vld [vmem:[#allocation85_spill] sm:$0xff]  ;;  %1402 = vadd.xlane.f32.xlu1 %v1239_v32 }
 0x1b4   : > { %14174 = vst [vmem:[#allocation98_spill] sm:$0xff] %v9570_v34  ;;  %v14176_v41 = vunpack.c.h.bf16 %v14175_v28  ;;  %v9580_v40 = vadd.f32 %v9037_v6, %v14177_v47  ;;  %v2088_v22 = vrot.slane %v9532_v23, %v9241_v56  ;;  %v9586_v53 = vadd.f32 %v9037_v6, %v14179_v31  ;;  %v14181_v35 = vld [vmem:[#allocation97_spill] sm:$0xff]  ;;  %1400 = vadd.xlane.f32.xlu0 %v1238_v42  ;;  %v9613_v34 = vpop.xlane.xlu1 %1000 }
 0x1b5   : > { %v2122_v63 = vrot.slane %v9536_v36, %v9041_v15  ;;  %v9594_v59 = vadd.f32 %v9037_v6, %v14181_v35  ;;  %v14183_v12 = vunpack.c.l.bf16 %v14175_v28  ;;  %v2127_v23 = vrot.slane %v9550_v16, %v9067_v13  ;;  %14187 = vst [vmem:[#allocation97_spill] sm:$0xff] %v9613_v34  ;;  %v9615_v28 = vpop.xlane.xlu0 %998  ;;  %v14193_v34 = vld [vmem:[#allocation88_spill] sm:$0xff] }
 0x1b6   : > { %v9575_v50 = vmul.f32 %v14176_v41, %v8981_v61  ;;  %14178 = vst [vmem:[#allocation38_spill] sm:$0xff] %v9580_v40  ;;  %14180 = vst [vmem:[#allocation39_spill] sm:$0xff] %v9586_v53  ;;  %v2118_v41 = vrot.slane %v9540_v52, %v9059_v51  ;;  %v9605_v31 = vadd.f32 %v9037_v6, %v8977_v57  ;;  %v14185_v52 = vld [vmem:[#allocation40_spill] sm:$0xff]  ;;  %v14190_v57 = vld [vmem:[#allocation41_spill] sm:$0xff] }
 0x1b7   : > { %14182 = vst [vmem:[#allocation85_spill] sm:$0xff] %v9594_v59  ;;  %v9599_v47 = vmul.f32 %v14183_v12, %v8981_v61  ;;  %v14186_v36 = vunpack.c.h.bf16 %v14185_v52  ;;  %v2084_v35 = vsel %vm1913_vm9, %v2083_v55, %v2079_v46  ;;  %14188 = vst [vmem:[#allocation40_spill] sm:$0xff] %v9615_v28  ;;  %v14189_v12 = vunpack.c.l.bf16 %v14185_v52  ;;  %v14195_v28 = vld [vmem:[#allocation92_spill] sm:$0xff]  ;;  %1406 = vadd.xlane.f32.xlu1 %v1241_v39 }
 0x1b8   : > { %14184 = vst [vmem:[#allocation89_spill] sm:$0xff] %v9605_v31  ;;  %v14191_v32 = vunpack.c.h.bf16 %v14190_v57  ;;  %v2093_v55 = vrot.slane %v9580_v40, %v9199_v38  ;;  %v2089_v46 = vsel %vm13766_vm10, %v2088_v22, %v2084_v35  ;;  %v9637_v52 = vadd.f32 %v9037_v6, %v14193_v34  ;;  %v14199_v35 = vld [vmem:[#allocation103_spill] sm:$0xff]  ;;  %1404 = vadd.xlane.f32.xlu0 %v1240_v21 }
 0x1b9   : > { %v9610_v37 = vmul.f32 %v14186_v36, %v8981_v61  ;;  %v9620_v16 = vmul.f32 %v14189_v12, %v8981_v61  ;;  %v14192_v36 = vunpack.c.l.bf16 %v14190_v57  ;;  %v2098_v12 = vrot.slane %v9586_v53, %v9316_v60 }
 0x1ba   : > { %v9625_v42 = vmul.f32 %v14191_v32, %v8981_v61  ;;  %14194 = vst [vmem:[#allocation41_spill] sm:$0xff] %v9637_v52  ;;  %v9643_v32 = vadd.f32 %v9037_v6, %v14195_v28  ;;  %v2123_v57 = vsel %vm1857_vm1, %v2122_v63, %v2118_v41  ;;  %v9650_v40 = vadd.f32 %v9037_v6, %v14197_v9  ;;  %v9659_v28 = vpop.xlane.xlu1 %1004  ;;  %v9661_v63 = vpop.xlane.xlu0 %1002  ;;  %v14203_v41 = vld [vmem:[#allocation42_spill] sm:$0xff] }
 0x1bb   : > { %v9630_v11 = vmul.f32 %v14192_v36, %v8981_v61  ;;  %v2132_v36 = vrot.slane %v9594_v59, %v9090_v4  ;;  %v2128_v22 = vsel %vm1864_vm2, %v2127_v23, %v2123_v57  ;;  %v2137_v34 = vrot.slane %v9605_v31, %v9110_v25  ;;  %14201 = vst [vmem:[#allocation103_spill] sm:$0xff] %v9659_v28  ;;  %v14206_v31 = vld [vmem:[#allocation43_spill] sm:$0xff] }
 0x1bc   : > { %14196 = vst [vmem:[#allocation88_spill] sm:$0xff] %v9643_v32  ;;  %14198 = vst [vmem:[#allocation92_spill] sm:$0xff] %v9650_v40  ;;  %v9657_v53 = vadd.f32 %v9037_v6, %v14199_v35  ;;  %v14204_v59 = vunpack.c.h.bf16 %v14203_v41  ;;  %v14205_v23 = vunpack.c.l.bf16 %v14203_v41  ;;  %v14207_v35 = vunpack.c.h.bf16 %v14206_v31  ;;  %1410 = vadd.xlane.f32.xlu1 %v1243_v26  ;;  %1408 = vadd.xlane.f32.xlu0 %v1242_v43 }
 0x1bd   : > { %14202 = vst [vmem:[#allocation163_spill] sm:$0xff] %v9661_v63  ;;  %v14208_v39 = vunpack.c.l.bf16 %v14206_v31  ;;  %v2103_v28 = vrot.slane %v9637_v52, %v9313_v58  ;;  %v14209_v63 = vld [vmem:[#allocation91_spill] sm:$0xff]  ;;  %v2108_v31 = vrot.slane %v9643_v32, %v9350_v0  ;;  %v2133_v52 = vsel %vm1871_vm3, %v2132_v36, %v2128_v22  ;;  %v14218_v32 = vld [vmem:[#allocation114_spill] sm:$0xff] }
 0x1be   : > { %14200 = vst [vmem:[#allocation101_spill] sm:$0xff] %v9657_v53  ;;  %v9666_v9 = vmul.f32 %v14204_v59, %v8981_v61  ;;  %v9671_v57 = vmul.f32 %v14205_v23, %v8981_v61  ;;  %v9676_v19 = vmul.f32 %v14207_v35, %v8981_v61  ;;  %v2094_v59 = vsel %vm1927_vm11, %v2093_v55, %v2089_v46  ;;  %v14211_v23 = vld [vmem:[#allocation44_spill] sm:$0xff]  ;;  %v14214_v46 = vld [vmem:[#allocation102_spill] sm:$0xff]  ;;  %v14220_v36 = vld [vmem:[#allocation115_spill] sm:$0xff]  ;;  %v9720_v22 = vpop.xlane.xlu1 %1008 }
 0x1bf   : > { %v9681_v21 = vmul.f32 %v14208_v39, %v8981_v61  ;;  %v9688_v41 = vadd.f32 %v9037_v6, %v14209_v63  ;;  %v14212_v20 = vunpack.c.h.bf16 %v14211_v23  ;;  %v2099_v35 = vsel %vm13900_vm12, %v2098_v12, %v2094_v59  ;;  %v14216_v12 = vld [vmem:[#allocation105_spill] sm:$0xff] }
 0x1c0   : > { %v2142_v39 = vrot.slane %v9650_v40, %v9107_v14  ;;  %v2138_v55 = vsel %vm1878_vm4, %v2137_v34, %v2133_v52  ;;  %v9704_v63 = vadd.f32 %v9037_v6, %v14214_v46  ;;  %v9710_v59 = vadd.f32 %v9037_v6, %v14216_v12  ;;  %v9722_v34 = vpop.xlane.xlu0 %1006  ;;  %1414 = vadd.xlane.f32.xlu1 %v9555_v48 }
 0x1c1   : > { %14210 = vst [vmem:[#allocation42_spill] sm:$0xff] %v9688_v41  ;;  %v9693_v5 = vmul.f32 %v14212_v20, %v8981_v61  ;;  %v2147_v20 = vrot.slane %v9657_v53, %v9152_v49  ;;  %v9714_v40 = vadd.f32 %v9037_v6, %v14218_v32  ;;  %v9718_v52 = vadd.f32 %v9037_v6, %v14220_v36  ;;  %v14224_v32 = vld [vmem:[#allocation119_spill] sm:$0xff]  ;;  %v14226_v36 = vld [vmem:[#allocation45_spill] sm:$0xff] }
 0x1c2   : > { %14215 = vst [vmem:[#allocation91_spill] sm:$0xff] %v9704_v63  ;;  %14217 = vst [vmem:[#allocation44_spill] sm:$0xff] %v9710_v59  ;;  %v14222_v26 = vunpack.c.l.bf16 %v14211_v23  ;;  %v2113_v46 = vrot.slane %v9688_v41, %v9331_v24  ;;  %v2104_v12 = vsel %vm1941_vm13, %v2103_v28, %v2099_v35  ;;  %v9734_v53 = vadd.f32 %v9037_v6, %v14224_v32  ;;  %v14230_v28 = vld [vmem:[#allocation46_spill] sm:$0xff] }
 0x1c3   : > { %14213 = vst [vmem:[#allocation43_spill] sm:$0xff] %v9693_v5  ;;  %14219 = vst [vmem:[#allocation102_spill] sm:$0xff] %v9714_v40  ;;  %v14227_v5 = vunpack.c.h.bf16 %v14226_v36  ;;  %v2109_v0 = vsel %vm1948_vm14, %v2108_v31, %v2104_v12  ;;  %v2143_v23 = vsel %vm1885_vm5, %v2142_v39, %v2138_v55  ;;  %v14231_v35 = vunpack.c.h.bf16 %v14230_v28  ;;  %1412 = vadd.xlane.f32.xlu0 %v9560_v17 }
 0x1c4   : > { %14221 = vst [vmem:[#allocation105_spill] sm:$0xff] %v9718_v52  ;;  %v9727_v43 = vmul.f32 %v14222_v26, %v8981_v61  ;;  %14225 = vst [vmem:[#allocation115_spill] sm:$0xff] %v9734_v53  ;;  %v14229_v26 = vunpack.c.l.bf16 %v14226_v36  ;;  %v2152_v32 = vrot.slane %v9704_v63, %v9127_v62  ;;  %v2157_v39 = vrot.slane %v9710_v59, %v9170_v8  ;;  %v14235_v36 = vld [vmem:[#allocation118_spill] sm:$0xff]  ;;  %v14243_v63 = vld [vmem:[#allocation47_spill] sm:$0xff] }
 0x1c5   : > { %v9739_v45 = vmul.f32 %v14227_v5, %v8981_v61  ;;  %v9751_v41 = vmul.f32 %v14231_v35, %v8981_v61  ;;  %v2148_v5 = vsel %vm13759_vm6, %v2147_v20, %v2143_v23  ;;  %v2201_v55 = vrot.slane %v9714_v40, %v9041_v15  ;;  %v9772_v23 = vpop.xlane.xlu1 %1012  ;;  %1418 = vadd.xlane.f32.xlu1 %v9575_v50 }
 0x1c6   : > { %14223 = vst [vmem:[#allocation114_spill] sm:$0xff] %v9727_v43  ;;  %v9746_v43 = vmul.f32 %v14229_v26, %v8981_v61  ;;  %v2197_v12 = vrot.slane %v9718_v52, %v9059_v51  ;;  %v9770_v20 = vadd.f32 %v9037_v6, %v14235_v36  ;;  %v9777_v48 = vsel %vm1955_vm15, %v2113_v46, %v2109_v0  ;;  %v14238_v26 = vld [vmem:[#allocation122_spill] sm:$0xff]  ;;  %v14241_v36 = vld [vmem:[#allocation107_spill] sm:$0xff] }
 0x1c7   : > { %14228 = vst [vmem:[#allocation119_spill] sm:$0xff] %v9739_v45  ;;  %14232 = vst [vmem:[#allocation45_spill] sm:$0xff] %v9751_v41  ;;  %v14233_v45 = vld [vmem:[#allocation104_spill] sm:$0xff]  ;;  %v2206_v17 = vrot.slane %v9734_v53, %v9067_v13  ;;  %v9783_v35 = vadd.f32 %v9037_v6, %v14238_v26  ;;  %v14240_v52 = vunpack.c.l.bf16 %v14230_v28  ;;  %v9792_v40 = vadd.f32 %v9037_v6, %v14241_v36 }
 0x1c8   : > { %v9758_v31 = vadd.f32 %v9037_v6, %v14233_v45  ;;  %14236 = vst [vmem:[#allocation104_spill] sm:$0xff] %v9770_v20  ;;  %v9774_v45 = vpop.xlane.xlu0 %1010  ;;  %14237 = vst [vmem:[#allocation118_spill] sm:$0xff] %v9777_v48  ;;  %v14244_v0 = vunpack.c.h.bf16 %v14243_v63  ;;  %v14245_v53 = vunpack.c.l.bf16 %v14243_v63  ;;  %v14247_v26 = vld [vmem:[#allocation48_spill] sm:$0xff]  ;;  %v2153_v36 = vsel %vm1899_vm7, %v2152_v32, %v2148_v5  ;;  %1416 = vadd.xlane.f32.xlu0 %v9599_v47  ;;  %v14253_v47 = vld [vmem:[#allocation106_spill] sm:$0xff] }
 0x1c9   : > { %14239 = vst [vmem:[#allocation122_spill] sm:$0xff] %v9783_v35  ;;  %v9788_v59 = vmul.f32 %v14240_v52, %v8981_v61  ;;  %14242 = vst [vmem:[#allocation107_spill] sm:$0xff] %v9792_v40  ;;  %v14248_v41 = vunpack.c.h.bf16 %v14247_v26  ;;  %v9827_v32 = vpop.xlane.xlu1 %1016  ;;  %v9833_v5 = vadd.f32 %v9037_v6, %v14253_v47  ;;  %1422 = vadd.xlane.f32.xlu1 %v9610_v37 }
 0x1ca   : > { %14234 = vst [vmem:[#allocation46_spill] sm:$0xff] %v9758_v31  ;;  %v9797_v46 = vmul.f32 %v14244_v0, %v8981_v61  ;;  %v9802_v48 = vmul.f32 %v14245_v53, %v8981_v61  ;;  %v2162_v52 = vrot.slane %v9758_v31, %v9155_v54  ;;  %v14250_v0 = vunpack.c.l.bf16 %v14247_v26 }
 0x1cb   : > { %v9807_v28 = vmul.f32 %v14248_v41, %v8981_v61  ;;  %v2158_v53 = vsel %vm13762_vm8, %v2157_v39, %v2153_v36  ;;  %v2211_v41 = vrot.slane %v9770_v20, %v9090_v4  ;;  %14254 = vst [vmem:[#allocation106_spill] sm:$0xff] %v9833_v5  ;;  %v2216_v39 = vrot.slane %v9783_v35, %v9110_v25 }
 0x1cc   : > { %14246 = vst [vmem:[#allocation47_spill] sm:$0xff] %v9802_v48  ;;  %v9817_v63 = vmul.f32 %v14250_v0, %v8981_v61  ;;  %v2202_v48 = vsel %vm1857_vm1, %v2201_v55, %v2197_v12  ;;  %v9829_v50 = vpop.xlane.xlu0 %1014  ;;  %v9840_v55 = vadd.f32 %v9037_v6, %v9160_v10  ;;  %v2167_v12 = vrot.slane %v9792_v40, %v9241_v56 }
 0x1cd   : > { %14249 = vst [vmem:[#allocation48_spill] sm:$0xff] %v9807_v28  ;;  %v14251_v28 = vld [vmem:[#allocation121_spill] sm:$0xff]  ;;  %v2207_v26 = vsel %vm1864_vm2, %v2206_v17, %v2202_v48  ;;  %v14261_v48 = vld [vmem:[#allocation50_spill] sm:$0xff]  ;;  %v2163_v10 = vsel %vm1913_vm9, %v2162_v52, %v2158_v53  ;;  %1420 = vadd.xlane.f32.xlu0 %v9620_v16  ;;  %v14270_v16 = vld [vmem:[#allocation128_spill] sm:$0xff]  ;;  %1426 = vadd.xlane.f32.xlu1 %v9625_v42 }
 0x1ce   : > { %v9825_v31 = vadd.f32 %v9037_v6, %v14251_v28  ;;  %14255 = vst [vmem:[#allocation164_spill] sm:$0xff] %v9840_v55  ;;  %v14256_v28 = vld [vmem:[#allocation49_spill] sm:$0xff]  ;;  %v14262_v17 = vunpack.c.h.bf16 %v14261_v48  ;;  %v2212_v37 = vsel %vm1871_vm3, %v2211_v41, %v2207_v26  ;;  %v9881_v53 = vadd.f32 %v9037_v6, %v14270_v16 }
 0x1cf   : > { %v14257_v36 = vunpack.c.h.bf16 %v14256_v28  ;;  %v14259_v47 = vunpack.c.l.bf16 %v14256_v28  ;;  %v14265_v28 = vld [vmem:[#allocation51_spill] sm:$0xff]  ;;  %v2168_v41 = vsel %vm13766_vm10, %v2167_v12, %v2163_v10  ;;  %v9899_v26 = vadd.f32 %v9037_v6, %v9364_v27  ;;  %v14281_v27 = vld [vmem:[#allocation52_spill] sm:$0xff] }
 0x1d0   : > { %14252 = vst [vmem:[#allocation121_spill] sm:$0xff] %v9825_v31  ;;  %v9857_v35 = vmul.f32 %v14262_v17, %v8981_v61  ;;  %v2221_v52 = vrot.slane %v9825_v31, %v9107_v14  ;;  %14271 = vst [vmem:[#allocation128_spill] sm:$0xff] %v9881_v53  ;;  %v9903_v16 = vadd.f32 %v9037_v6, %v9366_v29  ;;  %v14282_v29 = vunpack.c.h.bf16 %v14281_v27 }
 0x1d1   : > { %v9847_v0 = vmul.f32 %v14257_v36, %v8981_v61  ;;  %v9852_v20 = vmul.f32 %v14259_v47, %v8981_v61  ;;  %v14263_v36 = vunpack.c.l.bf16 %v14261_v48  ;;  %v14266_v47 = vunpack.c.h.bf16 %v14265_v28  ;;  %v9883_v48 = vpop.xlane.xlu1 %1020  ;;  %14274 = vst [vmem:[#allocation166_spill] sm:$0xff] %v9899_v26  ;;  %1424 = vadd.xlane.f32.xlu0 %v9630_v11  ;;  %1430 = vadd.xlane.f32.xlu1 %v9666_v9 }
 0x1d2   : > { %14275 = vst [vmem:[#allocation167_spill] sm:$0xff] %v9903_v16  ;;  %v9923_v12 = vmul.f32 %v14282_v29, %v8981_v61 }
 0x1d3   : > { %14258 = vst [vmem:[#allocation49_spill] sm:$0xff] %v9847_v0  ;;  %14260 = vst [vmem:[#allocation165_spill] sm:$0xff] %v9852_v20  ;;  %v9865_v40 = vmul.f32 %v14263_v36, %v8981_v61  ;;  %v9870_v20 = vmul.f32 %v14266_v47, %v8981_v61  ;;  %v14268_v0 = vld [vmem:[#allocation110_spill] sm:$0xff]  ;;  %v9885_v36 = vpop.xlane.xlu0 %1018  ;;  %v2172_v47 = vrot.slane %v9833_v5, %v9199_v38 }
 0x1d4   : > { %v9874_v17 = vadd.f32 %v9037_v6, %v14268_v0  ;;  %v2226_v0 = vrot.slane %v9840_v55, %v9152_v49  ;;  %v14278_v55 = vld [vmem:[#allocation109_spill] sm:$0xff] }
 0x1d5   : > { %14264 = vst [vmem:[#allocation50_spill] sm:$0xff] %v9865_v40  ;;  %14267 = vst [vmem:[#allocation51_spill] sm:$0xff] %v9870_v20  ;;  %v2217_v20 = vsel %vm1878_vm4, %v2216_v39, %v2212_v37  ;;  %v14272_v40 = vld [vmem:[#allocation135_spill] sm:$0xff]  ;;  %v14276_v39 = vunpack.c.l.bf16 %v14265_v28  ;;  %v9912_v5 = vadd.f32 %v9037_v6, %v14278_v55  ;;  %v2231_v55 = vrot.slane %v9881_v53, %v9127_v62  ;;  %v9934_v42 = vpop.xlane.xlu1 %1024 }
 0x1d6   : > { %14269 = vst [vmem:[#allocation110_spill] sm:$0xff] %v9874_v17  ;;  %v9894_v31 = vadd.f32 %v9037_v6, %v14272_v40  ;;  %v9916_v40 = vadd.f32 %v9037_v6, %v9409_v2  ;;  %v2177_v10 = vrot.slane %v9874_v17, %v9316_v60  ;;  %v2222_v28 = vsel %vm1885_vm5, %v2221_v52, %v2217_v20 }
 0x1d7   : > { %v9908_v37 = vmul.f32 %v14276_v39, %v8981_v61  ;;  %14279 = vst [vmem:[#allocation109_spill] sm:$0xff] %v9912_v5  ;;  %v14283_v39 = vld [vmem:[#allocation134_spill] sm:$0xff]  ;;  %v9936_v11 = vpop.xlane.xlu0 %1022  ;;  %v2227_v29 = vsel %vm13759_vm6, %v2226_v0, %v2222_v28  ;;  %v9944_v53 = vadd.f32 %v9037_v6, %v9245_v18  ;;  %v2280_v20 = vrot.slane %v9899_v26, %v9041_v15 }
 0x1d8   : > { %14273 = vst [vmem:[#allocation135_spill] sm:$0xff] %v9894_v31  ;;  %14280 = vst [vmem:[#allocation169_spill] sm:$0xff] %v9916_v40  ;;  %v9932_v2 = vadd.f32 %v9037_v6, %v14283_v39  ;;  %v2236_v17 = vrot.slane %v9894_v31, %v9170_v8  ;;  %v2276_v52 = vrot.slane %v9903_v16, %v9059_v51  ;;  %1428 = vadd.xlane.f32.xlu0 %v9671_v57  ;;  %v14289_v16 = vld [vmem:[#allocation111_spill] sm:$0xff] }
 0x1d9   : > { %14277 = vst [vmem:[#allocation168_spill] sm:$0xff] %v9908_v37  ;;  %v2173_v37 = vsel %vm1927_vm11, %v2172_v47, %v2168_v41  ;;  %14285 = vst [vmem:[#allocation134_spill] sm:$0xff] %v9944_v53  ;;  %v9952_v39 = vadd.f32 %v9037_v6, %v9407_v3  ;;  %v14287_v47 = vunpack.c.l.bf16 %v14281_v27  ;;  %v2182_v41 = vrot.slane %v9912_v5, %v9313_v58 }
 0x1da   : > { %14284 = vst [vmem:[#allocation52_spill] sm:$0xff] %v9932_v2  ;;  %v2285_v18 = vrot.slane %v9916_v40, %v9067_v13  ;;  %v9965_v28 = vadd.f32 %v9037_v6, %v9449_v33  ;;  %v2178_v3 = vsel %vm13900_vm12, %v2177_v10, %v2173_v37  ;;  %v9972_v27 = vadd.f32 %v9037_v6, %v14289_v16  ;;  %v9977_v40 = vpop.xlane.xlu1 %1028  ;;  %v14291_v33 = vld [vmem:[#allocation112_spill] sm:$0xff] }
 0x1db   : > { %14286 = vst [vmem:[#allocation170_spill] sm:$0xff] %v9952_v39  ;;  %v9957_v0 = vmul.f32 %v14287_v47, %v8981_v61  ;;  %v2241_v47 = vrot.slane %v9932_v2, %v9155_v54  ;;  %v2232_v31 = vsel %vm1899_vm7, %v2231_v55, %v2227_v29  ;;  %v9979_v26 = vpop.xlane.xlu0 %1026  ;;  %v9983_v9 = vadd.f32 %v9037_v6, %v14291_v33  ;;  %v14295_v33 = vld [vmem:[#allocation53_spill] sm:$0xff] }
 0x1dc   : > { %14288 = vst [vmem:[#allocation171_spill] sm:$0xff] %v9965_v28  ;;  %14290 = vst [vmem:[#allocation111_spill] sm:$0xff] %v9972_v27  ;;  %v2237_v57 = vsel %vm13762_vm8, %v2236_v17, %v2232_v31  ;;  %v9988_v37 = vadd.f32 %v9037_v6, %v9243_v7  ;;  %v2246_v16 = vrot.slane %v9944_v53, %v9241_v56  ;;  %v14296_v2 = vunpack.c.h.bf16 %v14295_v33 }
 0x1dd   : > { %14292 = vst [vmem:[#allocation112_spill] sm:$0xff] %v9983_v9  ;;  %v9994_v10 = vadd.f32 %v9037_v6, %v9282_v30  ;;  %v2281_v55 = vsel %vm1857_vm1, %v2280_v20, %v2276_v52  ;;  %v2290_v29 = vrot.slane %v9952_v39, %v9090_v4  ;;  %v10007_v17 = vadd.f32 %v9037_v6, %v9447_v44 }
 0x1de   : > { %14293 = vst [vmem:[#allocation172_spill] sm:$0xff] %v9988_v37  ;;  %v10002_v31 = vmul.f32 %v14296_v2, %v8981_v61  ;;  %v2286_v7 = vsel %vm1864_vm2, %v2285_v18, %v2281_v55  ;;  %v2295_v30 = vrot.slane %v9965_v28, %v9110_v25  ;;  %1434 = vadd.xlane.f32.xlu1 %v9676_v19  ;;  %v10026_v18 = vpop.xlane.xlu1 %1032 }
 0x1df   : > { %14294 = vst [vmem:[#allocation173_spill] sm:$0xff] %v9994_v10  ;;  %14297 = vst [vmem:[#allocation53_spill] sm:$0xff] %v10007_v17  ;;  %1432 = vadd.xlane.f32.xlu0 %v9681_v21  ;;  %v2242_v20 = vsel %vm1913_vm9, %v2241_v47, %v2237_v57  ;;  %v10016_v52 = vadd.f32 %v9037_v6, %v9484_v1  ;;  %v10020_v2 = vadd.f32 %v9037_v6, %v9720_v22  ;;  %v10028_v55 = vpop.xlane.xlu0 %1030  ;;  %v14301_v21 = vld [vmem:[#allocation153_spill] sm:$0xff]  ;;  %v14302_v22 = vld [vmem:[#allocation143_spill] sm:$0xff] }
 0x1e0   : > { %v10024_v44 = vadd.f32 %v9037_v6, %v9722_v34  ;;  %v2183_v19 = vsel %vm1941_vm13, %v2182_v41, %v2178_v3  ;;  %v2187_v47 = vrot.slane %v9983_v9, %v14301_v21  ;;  %v2251_v1 = vrot.slane %v9988_v37, %v9199_v38  ;;  %v14305_v37 = vld [vmem:[#allocation43_spill] sm:$0xff] }
 0x1e1   : > { %14298 = vst [vmem:[#allocation174_spill] sm:$0xff] %v10016_v52  ;;  %14299 = vst [vmem:[#allocation175_spill] sm:$0xff] %v10020_v2  ;;  %v2247_v57 = vsel %vm13766_vm10, %v2246_v16, %v2242_v20  ;;  %v10038_v28 = vadd.f32 %v9037_v6, %v14302_v22  ;;  %v2256_v34 = vrot.slane %v9994_v10, %v9316_v60  ;;  %v14306_v16 = vld [vmem:[#allocation114_spill] sm:$0xff]  ;;  %v14307_v20 = vunpack.c.l.bf16 %v14295_v33  ;;  %v14308_v10 = vld [vmem:[#allocation33_spill] sm:$0xff] }
 0x1e2   : > { %14300 = vst [vmem:[#allocation176_spill] sm:$0xff] %v10024_v44  ;;  %v2291_v53 = vsel %vm1871_vm3, %v2290_v29, %v2286_v7  ;;  %v10045_v41 = vadd.f32 %v9037_v6, %v9774_v45  ;;  %v2300_v3 = vrot.slane %v10007_v17, %v9107_v14  ;;  %1438 = vadd.xlane.f32.xlu1 %v14305_v37  ;;  %v10067_v37 = vpop.xlane.xlu1 %1036  ;;  %v14316_v17 = vld [vmem:[#allocation119_spill] sm:$0xff] }
 0x1e3   : > { %14303 = vst [vmem:[#allocation143_spill] sm:$0xff] %v10038_v28  ;;  %v2296_v39 = vsel %vm1878_vm4, %v2295_v30, %v2291_v53  ;;  %1436 = vadd.xlane.f32.xlu0 %v14306_v16  ;;  %v10055_v22 = vmul.f32 %v14307_v20, %v8981_v61  ;;  %v10059_v29 = vadd.f32 %v9037_v6, %v14308_v10  ;;  %v10069_v30 = vpop.xlane.xlu0 %1034 }
 0x1e4   : > { %14304 = vst [vmem:[#allocation177_spill] sm:$0xff] %v10045_v41  ;;  %v2305_v45 = vrot.slane %v10016_v52, %v9152_v49  ;;  %v2359_v7 = vrot.slane %v10020_v2, %v9041_v15  ;;  %v2355_v53 = vrot.slane %v10024_v44, %v9059_v51  ;;  %v10074_v16 = vsel %vm1948_vm14, %v2187_v47, %v2183_v19  ;;  %v14312_v19 = vld [vmem:[#allocation148_spill] sm:$0xff] }
 0x1e5   : > { %14309 = vst [vmem:[#allocation43_spill] sm:$0xff] %v10059_v29  ;;  %v2252_v10 = vsel %vm1927_vm11, %v2251_v1, %v2247_v57  ;;  %v10079_v20 = vadd.f32 %v9037_v6, %v9772_v23  ;;  %v2261_v52 = vrot.slane %v10038_v28, %v9313_v58  ;;  %v2364_v2 = vrot.slane %v10045_v41, %v9067_v13  ;;  %v14314_v23 = vld [vmem:[#allocation35_spill] sm:$0xff] }
 0x1e6   : > { %v2257_v44 = vsel %vm13900_vm12, %v2256_v34, %v2252_v10  ;;  %v10088_v33 = vadd.f32 %v9037_v6, %v9829_v50  ;;  %v10092_v47 = vadd.f32 %v9037_v6, %v14312_v19  ;;  %v2301_v1 = vsel %vm1885_vm5, %v2300_v3, %v2296_v39  ;;  %1442 = vadd.xlane.f32.xlu1 %v14316_v17  ;;  %v14317_v34 = vld [vmem:[#allocation149_spill] sm:$0xff]  ;;  %v1041_v39 = vpop.xlane.xlu1 %1040 }
 0x1e7   : > { %14310 = vst [vmem:[#allocation114_spill] sm:$0xff] %v10079_v20  ;;  %v10097_v57 = vadd.f32 %v9037_v6, %v14314_v23  ;;  %1440 = vadd.xlane.f32.xlu0 %v9746_v43  ;;  %v10103_v10 = vadd.f32 %v9037_v6, %v14317_v34  ;;  %v2310_v50 = vrot.slane %v10059_v29, %v9127_v62  ;;  %v1039_v3 = vpop.xlane.xlu0 %1038  ;;  %v14322_v29 = vld [vmem:[#allocation34_spill] sm:$0xff] }
 0x1e8   : > { %14311 = vst [vmem:[#allocation33_spill] sm:$0xff] %v10088_v33  ;;  %14313 = vst [vmem:[#allocation148_spill] sm:$0xff] %v10092_v47  ;;  %v2306_v19 = vsel %vm13759_vm6, %v2305_v45, %v2301_v1  ;;  %v2360_v41 = vsel %vm1857_vm1, %v2359_v7, %v2355_v53  ;;  %v2369_v23 = vrot.slane %v10079_v20, %v9090_v4 }
 0x1e9   : > { %14315 = vst [vmem:[#allocation35_spill] sm:$0xff] %v10097_v57  ;;  %14318 = vst [vmem:[#allocation119_spill] sm:$0xff] %v10103_v10  ;;  %v10113_v17 = vadd.f32 %v9037_v6, %v9827_v32  ;;  %v10116_v43 = vadd.f32 %v9037_v6, %v1041_v39  ;;  %v10119_v34 = vadd.f32 %v9037_v6, %v1039_v3 }
 0x1ea   : > { %v10123_v45 = vadd.f32 %v9037_v6, %v14322_v29  ;;  %v2365_v7 = vsel %vm1864_vm2, %v2364_v2, %v2360_v41  ;;  %v2374_v53 = vrot.slane %v10088_v33, %v9110_v25  ;;  %v10130_v1 = vadd.f32 %v9037_v6, %v9885_v36  ;;  %v14325_v29 = vld [vmem:[#allocation45_spill] sm:$0xff]  ;;  %v14326_v41 = vld [vmem:[#allocation98_spill] sm:$0xff] }
 0x1eb   : > { %14319 = vst [vmem:[#allocation149_spill] sm:$0xff] %v10113_v17  ;;  %14320 = vst [vmem:[#allocation178_spill] sm:$0xff] %v10116_v43  ;;  %v10135_v39 = vsel %vm1941_vm13, %v2261_v52, %v2257_v44  ;;  %v2315_v3 = vrot.slane %v10097_v57, %v9170_v8  ;;  %1446 = vadd.xlane.f32.xlu1 %v14325_v29  ;;  %1444 = vadd.xlane.f32.xlu0 %v9788_v59  ;;  %v1045_v44 = vpop.xlane.xlu1 %1044  ;;  %v1043_v32 = vpop.xlane.xlu0 %1042 }
 0x1ec   : > { %14321 = vst [vmem:[#allocation179_spill] sm:$0xff] %v10119_v34  ;;  %14323 = vst [vmem:[#allocation34_spill] sm:$0xff] %v10123_v45  ;;  %v2311_v2 = vsel %vm1899_vm7, %v2310_v50, %v2306_v19  ;;  %v10144_v33 = vadd.f32 %v9037_v6, %v14326_v41  ;;  %v2438_v36 = vrot.slane %v10116_v43, %v9041_v15 }
 0x1ed   : > { %14324 = vst [vmem:[#allocation180_spill] sm:$0xff] %v10130_v1  ;;  %v2434_v52 = vrot.slane %v10119_v34, %v9059_v51  ;;  %v2379_v57 = vrot.slane %v10113_v17, %v9107_v14  ;;  %v2370_v29 = vsel %vm1871_vm3, %v2369_v23, %v2365_v7  ;;  %v10154_v59 = vadd.f32 %v9037_v6, %v1045_v44  ;;  %v14332_v44 = vld [vmem:[#allocation47_spill] sm:$0xff] }
 0x1ee   : > { %14327 = vst [vmem:[#allocation45_spill] sm:$0xff] %v10144_v33  ;;  %v10157_v50 = vadd.f32 %v9037_v6, %v1043_v32  ;;  %v2320_v19 = vrot.slane %v10123_v45, %v9155_v54  ;;  %v2375_v41 = vsel %vm1878_vm4, %v2374_v53, %v2370_v29  ;;  %v10164_v34 = vadd.f32 %v9037_v6, %v9883_v48  ;;  %v14333_v53 = vld [vmem:[#allocation37_spill] sm:$0xff] }
 0x1ef   : > { %14328 = vst [vmem:[#allocation98_spill] sm:$0xff] %v10154_v59  ;;  %v2384_v43 = vrot.slane %v10130_v1, %v9152_v49  ;;  %v2316_v23 = vsel %vm13762_vm8, %v2315_v3, %v2311_v2  ;;  %v10171_v7 = vadd.f32 %v9037_v6, %v9936_v11  ;;  %1450 = vadd.xlane.f32.xlu1 %v9797_v46  ;;  %v1049_v2 = vpop.xlane.xlu1 %1048  ;;  %v1047_v1 = vpop.xlane.xlu0 %1046 }
 0x1f0   : > { %14329 = vst [vmem:[#allocation181_spill] sm:$0xff] %v10157_v50  ;;  %14330 = vst [vmem:[#allocation182_spill] sm:$0xff] %v10164_v34  ;;  %v2443_v32 = vrot.slane %v10157_v50, %v9067_v13  ;;  %1448 = vadd.xlane.f32.xlu0 %v14332_v44  ;;  %v10179_v48 = vadd.f32 %v9037_v6, %v14333_v53  ;;  %v2325_v29 = vrot.slane %v10144_v33, %v9241_v56 }
 0x1f1   : > { %14331 = vst [vmem:[#allocation183_spill] sm:$0xff] %v10171_v7  ;;  %v2439_v3 = vsel %vm1857_vm1, %v2438_v36, %v2434_v52  ;;  %v2448_v11 = vrot.slane %v10154_v59, %v9090_v4  ;;  %v2380_v50 = vsel %vm1885_vm5, %v2379_v57, %v2375_v41  ;;  %v10189_v44 = vadd.f32 %v9037_v6, %v1049_v2 }
 0x1f2   : > { %14334 = vst [vmem:[#allocation47_spill] sm:$0xff] %v10179_v48  ;;  %v2444_v46 = vsel %vm1864_vm2, %v2443_v32, %v2439_v3  ;;  %v10192_v53 = vadd.f32 %v9037_v6, %v1047_v1  ;;  %v2389_v36 = vrot.slane %v10164_v34, %v9127_v62  ;;  %v2385_v52 = vsel %vm13759_vm6, %v2384_v43, %v2380_v50  ;;  %v14339_v32 = vld [vmem:[#allocation48_spill] sm:$0xff] }
 0x1f3   : > { %14335 = vst [vmem:[#allocation37_spill] sm:$0xff] %v10189_v44  ;;  %v10201_v59 = vadd.f32 %v9037_v6, %v9934_v42  ;;  %v2394_v57 = vrot.slane %v10171_v7, %v9170_v8  ;;  %v10207_v41 = vadd.f32 %v9037_v6, %v9979_v26  ;;  %1454 = vadd.xlane.f32.xlu1 %v14339_v32  ;;  %v1053_v2 = vpop.xlane.xlu1 %1052  ;;  %v1051_v26 = vpop.xlane.xlu0 %1050  ;;  %v14342_v7 = vld [vmem:[#allocation40_spill] sm:$0xff] }
 0x1f4   : > { %14336 = vst [vmem:[#allocation184_spill] sm:$0xff] %v10192_v53  ;;  %v2453_v1 = vrot.slane %v10192_v53, %v9110_v25  ;;  %1452 = vadd.xlane.f32.xlu0 %v9817_v63  ;;  %v2330_v43 = vrot.slane %v10179_v48, %v9199_v38  ;;  %v2321_v42 = vsel %vm1913_vm9, %v2320_v19, %v2316_v23 }
 0x1f5   : > { %14337 = vst [vmem:[#allocation185_spill] sm:$0xff] %v10201_v59  ;;  %14338 = vst [vmem:[#allocation186_spill] sm:$0xff] %v10207_v41  ;;  %v2458_v50 = vrot.slane %v10189_v44, %v9107_v14  ;;  %v2449_v3 = vsel %vm1871_vm3, %v2448_v11, %v2444_v46  ;;  %v2326_v33 = vsel %vm13766_vm10, %v2325_v29, %v2321_v42 }
 0x1f6   : > { %v2454_v53 = vsel %vm1878_vm4, %v2453_v1, %v2449_v3  ;;  %v10222_v32 = vadd.f32 %v9037_v6, %v1053_v2  ;;  %v10225_v63 = vadd.f32 %v9037_v6, %v1051_v26  ;;  %v10229_v19 = vadd.f32 %v9037_v6, %v14342_v7  ;;  %v14345_v3 = vld [vmem:[#allocation49_spill] sm:$0xff] }
 0x1f7   : > { %v2399_v23 = vrot.slane %v10201_v59, %v9155_v54  ;;  %v2390_v11 = vsel %vm1899_vm7, %v2389_v36, %v2385_v52  ;;  %v10236_v29 = vadd.f32 %v9037_v6, %v9977_v40  ;;  %v2404_v1 = vrot.slane %v10207_v41, %v9241_v56  ;;  %1458 = vadd.xlane.f32.xlu1 %v14345_v3  ;;  %v14346_v7 = vld [vmem:[#allocation165_spill] sm:$0xff]  ;;  %v14352_v41 = vld [vmem:[#allocation163_spill] sm:$0xff] }
 0x1f8   : > { %14340 = vst [vmem:[#allocation48_spill] sm:$0xff] %v10222_v32  ;;  %14341 = vst [vmem:[#allocation187_spill] sm:$0xff] %v10225_v63  ;;  %v2395_v46 = vsel %vm13762_vm8, %v2394_v57, %v2390_v11  ;;  %v2463_v42 = vrot.slane %v10225_v63, %v9152_v49  ;;  %1456 = vadd.xlane.f32.xlu0 %v14346_v7  ;;  %v14347_v2 = vld [vmem:[#allocation97_spill] sm:$0xff]  ;;  %v10251_v40 = vadd.f32 %v9037_v6, %v10028_v55  ;;  %v1057_v57 = vpop.xlane.xlu1 %1056  ;;  %v1055_v11 = vpop.xlane.xlu0 %1054 }
 0x1f9   : > { %14343 = vst [vmem:[#allocation40_spill] sm:$0xff] %v10229_v19  ;;  %14344 = vst [vmem:[#allocation188_spill] sm:$0xff] %v10236_v29  ;;  %v10247_v26 = vadd.f32 %v9037_v6, %v14347_v2  ;;  %v2468_v36 = vrot.slane %v10222_v32, %v9127_v62  ;;  %v2459_v52 = vsel %vm1885_vm5, %v2458_v50, %v2454_v53 }
 0x1fa   : > { %14349 = vst [vmem:[#allocation165_spill] sm:$0xff] %v10251_v40  ;;  %v2331_v3 = vsel %vm1927_vm11, %v2330_v43, %v2326_v33  ;;  %v2464_v7 = vsel %vm13759_vm6, %v2463_v42, %v2459_v52  ;;  %v10259_v63 = vadd.f32 %v9037_v6, %v1057_v57  ;;  %v10262_v2 = vadd.f32 %v9037_v6, %v1055_v11  ;;  %v14355_v52 = vld [vmem:[#allocation50_spill] sm:$0xff] }
 0x1fb   : > { %14348 = vst [vmem:[#allocation49_spill] sm:$0xff] %v10247_v26  ;;  %v2335_v55 = vrot.slane %v10229_v19, %v9316_v60  ;;  %v10268_v32 = vadd.f32 %v9037_v6, %v14352_v41  ;;  %v2409_v53 = vrot.slane %v10236_v29, %v9199_v38  ;;  %v2400_v33 = vsel %vm1913_vm9, %v2399_v23, %v2395_v46 }
 0x1fc   : > { %14350 = vst [vmem:[#allocation97_spill] sm:$0xff] %v10259_v63  ;;  %14351 = vst [vmem:[#allocation189_spill] sm:$0xff] %v10262_v2  ;;  %v2405_v43 = vsel %vm13766_vm10, %v2404_v1, %v2400_v33  ;;  %v10276_v50 = vadd.f32 %v9037_v6, %v10026_v18  ;;  %v2473_v42 = vrot.slane %v10262_v2, %v9170_v8  ;;  %1462 = vadd.xlane.f32.xlu1 %v9857_v35  ;;  %vm13770_vm6 = vcmask 1043459   ;;  %v1061_v1 = vpop.xlane.xlu1 %1060  ;;  %v1059_v57 = vpop.xlane.xlu0 %1058  ;;  %v14359_v2 = vld [vmem:[#allocation103_spill] sm:$0xff] }
 0x1fd   : > { %14353 = vst [vmem:[#allocation163_spill] sm:$0xff] %v10268_v32  ;;  %1460 = vadd.xlane.f32.xlu0 %v14355_v52  ;;  %v2414_v41 = vrot.slane %v10251_v40, %v9316_v60  ;;  %v10286_v23 = vadd.f32 %v9037_v6, %v10069_v30  ;;  %v2478_v46 = vrot.slane %v10259_v63, %v9155_v54 }
 0x1fe   : > { %14354 = vst [vmem:[#allocation190_spill] sm:$0xff] %v10276_v50  ;;  %v2469_v18 = vsel %vm1899_vm7, %v2468_v36, %v2464_v7  ;;  %v2340_v35 = vrot.slane %v10247_v26, %v9313_v58  ;;  %v10295_v33 = vadd.f32 %v9037_v6, %v1061_v1  ;;  %v10298_v52 = vadd.f32 %v9037_v6, %v1059_v57 }
 0x1ff   : > { %14356 = vst [vmem:[#allocation50_spill] sm:$0xff] %v10286_v23  ;;  %v2474_v11 = vsel %vm13762_vm8, %v2473_v42, %v2469_v18  ;;  %v2336_v30 = vsel %vm13900_vm12, %v2335_v55, %v2331_v3  ;;  %v10303_v63 = vadd.f32 %v9037_v6, %v14359_v2  ;;  %v2345_v36 = vrot.slane %v10268_v32, %v14301_v21  ;;  %v14362_v3 = vld [vmem:[#allocation51_spill] sm:$0xff]  ;;  %v14363_v55 = vld [vmem:[#allocation168_spill] sm:$0xff] }
 0x200   : > { %14357 = vst [vmem:[#allocation191_spill] sm:$0xff] %v10295_v33  ;;  %14358 = vst [vmem:[#allocation192_spill] sm:$0xff] %v10298_v52  ;;  %v2410_v7 = vsel %vm1927_vm11, %v2409_v53, %v2405_v43  ;;  %v2419_v42 = vrot.slane %v10276_v50, %v9313_v58  ;;  %v10312_v18 = vadd.f32 %v9037_v6, %v10067_v37  ;;  %1466 = vadd.xlane.f32.xlu1 %v14362_v3  ;;  %vm2516_vm8 = vcmask 1044484   ;;  %v1065_v37 = vpop.xlane.xlu1 %1064  ;;  %v1063_v40 = vpop.xlane.xlu0 %1062 }
 0x201   : > { %14360 = vst [vmem:[#allocation103_spill] sm:$0xff] %v10303_v63  ;;  %v2483_v1 = vrot.slane %v10298_v52, %v9241_v56  ;;  %1464 = vadd.xlane.f32.xlu0 %v14363_v55  ;;  %v2415_v2 = vsel %vm13900_vm12, %v2414_v41, %v2410_v7  ;;  %v2424_v53 = vrot.slane %v10286_v23, %v14301_v21 }
 0x202   : > { %14361 = vst [vmem:[#allocation193_spill] sm:$0xff] %v10312_v18  ;;  %v2488_v43 = vrot.slane %v10295_v33, %v9199_v38  ;;  %v2479_v57 = vsel %vm1913_vm9, %v2478_v46, %v2474_v11  ;;  %v2341_v44 = vsel %vm1941_vm13, %v2340_v35, %v2336_v30  ;;  %v10327_v3 = vadd.f32 %v9037_v6, %v1065_v37 }
 0x203   : > { %v2484_v52 = vsel %vm13766_vm10, %v2483_v1, %v2479_v57  ;;  %v10330_v55 = vadd.f32 %v9037_v6, %v1063_v40  ;;  %v14366_v41 = vrot.slane %v9972_v27, %v9331_v24  ;;  %v14367_v46 = vrot.slane %v10103_v10, %v14301_v21 }
 0x204   : > { %14364 = vst [vmem:[#allocation51_spill] sm:$0xff] %v10327_v3  ;;  %v2350_v11 = vrot.slane %v10303_v63, %v9331_v24  ;;  %v2346_v30 = vsel %vm1948_vm14, %v2345_v36, %v2341_v44  ;;  %v2429_v40 = vrot.slane %v10312_v18, %v9331_v24  ;;  %v2420_v1 = vsel %vm1941_vm13, %v2419_v42, %v2415_v2  ;;  %v1069_v42 = vpop.xlane.xlu1 %1068  ;;  %v1067_v2 = vpop.xlane.xlu0 %1066 }
 0x205   : > { %14365 = vst [vmem:[#allocation168_spill] sm:$0xff] %v10330_v55  ;;  %v2193_v7 = vsel %vm1955_vm15, %v14366_v41, %v10074_v16  ;;  %v2267_v35 = vsel %vm1948_vm14, %v14367_v46, %v10135_v39  ;;  %v2493_v57 = vrot.slane %v10330_v55, %v9316_v60  ;;  %1470 = vadd.xlane.f32.xlu1 %v9923_v12  ;;  %vm13945_vm10 = vcmask 1045509   ;;  %v14368_v16 = vld [vmem:[#allocation95_spill] sm:$0xff]  ;;  %v14369_v39 = vld [vmem:[#allocation118_spill] sm:$0xff] }
 0x206   : > { %1468 = vadd.xlane.f32.xlu0 %v9957_v0  ;;  %v2513_v37 = vsel %vm13769_vm0, %v14369_v39, %v14368_v16  ;;  %v2425_v41 = vsel %vm1948_vm14, %v2424_v53, %v2420_v1  ;;  %v2498_v44 = vrot.slane %v10327_v3, %v9313_v58  ;;  %v2489_v36 = vsel %vm1927_vm11, %v2488_v43, %v2484_v52  ;;  %v14373_v53 = vld [vmem:[#allocation54_spill] sm:$0xff] }
 0x207   : > { %v14370_v46 = vrot.slane %v10092_v47, %v9331_v24  ;;  %v2494_v0 = vsel %vm13900_vm12, %v2493_v57, %v2489_v36  ;;  %v10365_v55 = vadd.f32 %v9037_v6, %v1069_v42  ;;  %v10368_v16 = vadd.f32 %v9037_v6, %v1067_v2 }
 0x208   : > { %v14374_v1 = vunpack.c.h.bf16 %v14373_v53  ;;  %v14375_v52 = vunpack.c.l.bf16 %v14373_v53  ;;  %v2351_v3 = vsel %vm1955_vm15, %v2350_v11, %v2346_v30  ;;  %v2430_v6 = vsel %vm1955_vm15, %v2429_v40, %v2425_v41  ;;  %v10385_v42 = vpop.xlane.xlu1 %1334  ;;  %v10387_v2 = vpop.xlane.xlu0 %1332  ;;  %v14376_v40 = vld [vmem:[#allocation55_spill] sm:$0xff] }
 0x209   : > { %v2272_v12 = vsel %vm1955_vm15, %v14370_v46, %v2267_v35  ;;  %14371 = vst [vmem:[#allocation95_spill] sm:$0xff] %v10365_v55  ;;  %14372 = vst [vmem:[#allocation118_spill] sm:$0xff] %v10368_v16  ;;  %v2515_v35 = vsel %vm13770_vm6, %v2193_v7, %v2513_v37  ;;  %v2508_v57 = vrot.slane %v10365_v55, %v9331_v24  ;;  %1474 = vadd.xlane.f32.xlu1 %v10002_v31  ;;  %vm13810_vm0 = vcmask 1046534  }
 0x20a   : > { %v1277_v39 = vmul.f32 %v14374_v1, %v8981_v61  ;;  %v1276_v43 = vmul.f32 %v14375_v52, %v8981_v61  ;;  %v2503_v36 = vrot.slane %v10368_v16, %v14301_v21  ;;  %1472 = vadd.xlane.f32.xlu0 %v10055_v22  ;;  %v2499_v7 = vsel %vm1941_vm13, %v2498_v44, %v2494_v0  ;;  %v14379_v1 = vld [vmem:[#allocation56_spill] sm:$0xff] }
 0x20b   : > { %v2517_v11 = vsel %vm2516_vm8, %v2272_v12, %v2515_v35  ;;  %vm13805_vm6 = vcmask 1047559   ;;  %v14377_v41 = vunpack.c.h.bf16 %v14376_v40  ;;  %v14378_v44 = vunpack.c.l.bf16 %v14376_v40  ;;  %v14385_v40 = vld [vmem:[#allocation58_spill] sm:$0xff] }
 0x20c   : > { %v2504_v30 = vsel %vm1948_vm14, %v2503_v36, %v2499_v7  ;;  %v2519_v37 = vsel %vm13945_vm10, %v2351_v3, %v2517_v11  ;;  %v10404_v53 = vpop.xlane.xlu1 %1338  ;;  %v10406_v3 = vpop.xlane.xlu0 %1336 }
 0x20d   : > { %v2509_v31 = vsel %vm1955_vm15, %v2508_v57, %v2504_v30  ;;  %v2521_v22 = vsel %vm13810_vm0, %v2430_v6, %v2519_v37  ;;  %1478 = vadd.xlane.f32.xlu1 %v1277_v39  ;;  %v1279_v46 = vmul.f32 %v14377_v41, %v8981_v61  ;;  %v1278_v0 = vmul.f32 %v14378_v44, %v8981_v61  ;;  %v14382_v6 = vld [vmem:[#allocation57_spill] sm:$0xff] }
 0x20e   : > { %1476 = vadd.xlane.f32.xlu0 %v1276_v43  ;;  %v10402_v12 = vsel %vm13805_vm6, %v2509_v31, %v2521_v22  ;;  %v14380_v39 = vunpack.c.h.bf16 %v14379_v1  ;;  %v14381_v43 = vunpack.c.l.bf16 %v14379_v1  ;;  %v14383_v7 = vunpack.c.h.bf16 %v14382_v6 }
 0x20f   : > { %2525 = vst [vmem:[%s8150_s13] sm:$0xff] %v10402_v12  ;;  %v14384_v30 = vunpack.c.l.bf16 %v14382_v6  ;;  %v14386_v41 = vunpack.c.h.bf16 %v14385_v40  ;;  %v14387_v44 = vunpack.c.l.bf16 %v14385_v40  ;;  %vm14513_vm6 = vcmask 458112  }
 0x210   : > { %v1281_v52 = vmul.f32 %v14380_v39, %v8981_v61  ;;  %v1280_v35 = vmul.f32 %v14381_v43, %v8981_v61  ;;  %v10416_v57 = vpop.xlane.xlu1 %1342  ;;  %v10418_v36 = vpop.xlane.xlu0 %1340  ;;  %v1283_v11 = vmul.f32 %v14383_v7, %v8981_v61  ;;  %vm14523_vm0 = vcmask 720512  }
 0x211   : > { %1482 = vadd.xlane.f32.xlu1 %v1279_v46  ;;  %v1282_v37 = vmul.f32 %v14384_v30, %v8981_v61  ;;  %v1285_v46 = vmul.f32 %v14386_v41, %v8981_v61 }
 0x212   : > { %1480 = vadd.xlane.f32.xlu0 %v1278_v0  ;;  %v1284_v0 = vmul.f32 %v14387_v44, %v8981_v61 }
 0x214   : > { %v10426_v31 = vpop.xlane.xlu1 %1346  ;;  %v10428_v22 = vpop.xlane.xlu0 %1344 }
 0x215   : > { %1486 = vadd.xlane.f32.xlu1 %v1281_v52  ;;  %v14388_v52 = vld [vmem:[#allocation59_spill] sm:$0xff] }
 0x216   : > { %1484 = vadd.xlane.f32.xlu0 %v1280_v35  ;;  %v14389_v43 = vunpack.c.h.bf16 %v14388_v52  ;;  %v14390_v6 = vunpack.c.l.bf16 %v14388_v52  ;;  %v14394_v52 = vld [vmem:[#allocation61_spill] sm:$0xff] }
 0x218   : > { %v10436_v1 = vpop.xlane.xlu1 %1350  ;;  %v10438_v39 = vpop.xlane.xlu0 %1348  ;;  %v1287_v35 = vmul.f32 %v14389_v43, %v8981_v61  ;;  %v1286_v7 = vmul.f32 %v14390_v6, %v8981_v61  ;;  %v14395_v6 = vunpack.c.h.bf16 %v14394_v52 }
 0x219   : > { %1490 = vadd.xlane.f32.xlu1 %v1283_v11 }
 0x21a   : > { %1488 = vadd.xlane.f32.xlu0 %v1282_v37  ;;  %v14391_v37 = vld [vmem:[#allocation60_spill] sm:$0xff]  ;;  %v1291_v16 = vmul.f32 %v14395_v6, %v8981_v61 }
 0x21b   : > { %v14392_v40 = vunpack.c.h.bf16 %v14391_v37 }
 0x21c   : > { %v10446_v11 = vpop.xlane.xlu1 %1354  ;;  %v10448_v30 = vpop.xlane.xlu0 %1352 }
 0x21d   : > { %1494 = vadd.xlane.f32.xlu1 %v1285_v46  ;;  %v1289_v41 = vmul.f32 %v14392_v40, %v8981_v61  ;;  %v14393_v46 = vunpack.c.l.bf16 %v14391_v37  ;;  %v14397_v37 = vld [vmem:[#allocation62_spill] sm:$0xff] }
 0x21e   : > { %1492 = vadd.xlane.f32.xlu0 %v1284_v0 }
 0x21f   : > { %v1288_v44 = vmul.f32 %v14393_v46, %v8981_v61  ;;  %v14398_v46 = vunpack.c.h.bf16 %v14397_v37 }
 0x220   : > { %v10456_v0 = vpop.xlane.xlu1 %1358  ;;  %v10458_v43 = vpop.xlane.xlu0 %1356 }
 0x221   : > { %1498 = vadd.xlane.f32.xlu1 %v1287_v35  ;;  %v14396_v35 = vunpack.c.l.bf16 %v14394_v52  ;;  %v1293_v33 = vmul.f32 %v14398_v46, %v8981_v61  ;;  %v14400_v52 = vld [vmem:[#allocation64_spill] sm:$0xff] }
 0x222   : > { %1496 = vadd.xlane.f32.xlu0 %v1286_v7 }
 0x223   : > { %v1290_v7 = vmul.f32 %v14396_v35, %v8981_v61  ;;  %v14401_v35 = vunpack.c.h.bf16 %v14400_v52 }
 0x224   : > { %v10466_v55 = vpop.xlane.xlu1 %1362  ;;  %v10468_v40 = vpop.xlane.xlu0 %1360 }
 0x225   : > { %1502 = vadd.xlane.f32.xlu1 %v1289_v41  ;;  %v14399_v41 = vunpack.c.l.bf16 %v14397_v37  ;;  %v1295_v18 = vmul.f32 %v14401_v35, %v8981_v61  ;;  %v14403_v37 = vld [vmem:[#allocation65_spill] sm:$0xff] }
 0x226   : > { %1500 = vadd.xlane.f32.xlu0 %v1288_v44 }
 0x227   : > { %v1292_v44 = vmul.f32 %v14399_v41, %v8981_v61  ;;  %v14404_v41 = vunpack.c.h.bf16 %v14403_v37 }
 0x228   : > { %v10476_v23 = vpop.xlane.xlu1 %1366  ;;  %v10478_v6 = vpop.xlane.xlu0 %1364 }
 0x229   : > { %1506 = vadd.xlane.f32.xlu1 %v1291_v16  ;;  %v14402_v16 = vunpack.c.l.bf16 %v14400_v52  ;;  %v1297_v29 = vmul.f32 %v14404_v41, %v8981_v61  ;;  %v14406_v52 = vld [vmem:[#allocation66_spill] sm:$0xff] }
 0x22a   : > { %1504 = vadd.xlane.f32.xlu0 %v1290_v7 }
 0x22b   : > { %v1294_v7 = vmul.f32 %v14402_v16, %v8981_v61  ;;  %v14407_v16 = vunpack.c.h.bf16 %v14406_v52 }
 0x22c   : > { %v10486_v50 = vpop.xlane.xlu1 %1370  ;;  %v10488_v46 = vpop.xlane.xlu0 %1368 }
 0x22d   : > { %1510 = vadd.xlane.f32.xlu1 %v1293_v33  ;;  %v14405_v33 = vunpack.c.l.bf16 %v14403_v37  ;;  %v1299_v59 = vmul.f32 %v14407_v16, %v8981_v61  ;;  %v14409_v37 = vld [vmem:[#allocation67_spill] sm:$0xff] }
 0x22e   : > { %1508 = vadd.xlane.f32.xlu0 %v1292_v44 }
 0x22f   : > { %v1296_v44 = vmul.f32 %v14405_v33, %v8981_v61  ;;  %v14410_v33 = vunpack.c.h.bf16 %v14409_v37 }
 0x230   : > { %v10496_v32 = vpop.xlane.xlu1 %1374  ;;  %v10498_v35 = vpop.xlane.xlu0 %1372 }
 0x231   : > { %1514 = vadd.xlane.f32.xlu1 %v1295_v18  ;;  %v14408_v18 = vunpack.c.l.bf16 %v14406_v52  ;;  %v1301_v34 = vmul.f32 %v14410_v33, %v8981_v61  ;;  %v14412_v52 = vld [vmem:[#allocation68_spill] sm:$0xff] }
 0x232   : > { %1512 = vadd.xlane.f32.xlu0 %v1294_v7 }
 0x233   : > { %v1298_v7 = vmul.f32 %v14408_v18, %v8981_v61  ;;  %v14413_v18 = vunpack.c.h.bf16 %v14412_v52 }
 0x234   : > { %v10506_v19 = vpop.xlane.xlu1 %1378  ;;  %v10508_v41 = vpop.xlane.xlu0 %1376 }
 0x235   : > { %1518 = vadd.xlane.f32.xlu1 %v1297_v29  ;;  %v14411_v29 = vunpack.c.l.bf16 %v14409_v37  ;;  %v1303_v20 = vmul.f32 %v14413_v18, %v8981_v61  ;;  %v14415_v37 = vld [vmem:[#allocation69_spill] sm:$0xff] }
 0x236   : > { %1516 = vadd.xlane.f32.xlu0 %v1296_v44 }
 0x237   : > { %v1300_v44 = vmul.f32 %v14411_v29, %v8981_v61  ;;  %v14416_v29 = vunpack.c.h.bf16 %v14415_v37 }
 0x238   : > { %v10516_v17 = vpop.xlane.xlu1 %1382  ;;  %v10518_v16 = vpop.xlane.xlu0 %1380 }
 0x239   : > { %1522 = vadd.xlane.f32.xlu1 %v1299_v59  ;;  %v14414_v59 = vunpack.c.l.bf16 %v14412_v52  ;;  %v1305_v26 = vmul.f32 %v14416_v29, %v8981_v61  ;;  %v14418_v52 = vld [vmem:[#allocation70_spill] sm:$0xff] }
 0x23a   : > { %1520 = vadd.xlane.f32.xlu0 %v1298_v7 }
 0x23b   : > { %v1302_v7 = vmul.f32 %v14414_v59, %v8981_v61  ;;  %v14419_v59 = vunpack.c.h.bf16 %v14418_v52 }
 0x23c   : > { %v10526_v63 = vpop.xlane.xlu1 %1386  ;;  %v10528_v33 = vpop.xlane.xlu0 %1384 }
 0x23d   : > { %1526 = vadd.xlane.f32.xlu1 %v1301_v34  ;;  %v14417_v34 = vunpack.c.l.bf16 %v14415_v37  ;;  %v1307_v10 = vmul.f32 %v14419_v59, %v8981_v61  ;;  %v14423_v37 = vld [vmem:[#allocation71_spill] sm:$0xff] }
 0x23e   : > { %1524 = vadd.xlane.f32.xlu0 %v1300_v44 }
 0x23f   : > { %v1304_v44 = vmul.f32 %v14417_v34, %v8981_v61  ;;  %v14424_v34 = vunpack.c.h.bf16 %v14423_v37 }
 0x240   : > { %v10536_v48 = vpop.xlane.xlu1 %1390  ;;  %v10538_v18 = vpop.xlane.xlu0 %1388 }
 0x241   : > { %1530 = vadd.xlane.f32.xlu1 %v1303_v20  ;;  %v14420_v20 = vunpack.c.l.bf16 %v14418_v52  ;;  %v1309_v47 = vmul.f32 %v14424_v34, %v8981_v61  ;;  %v14426_v52 = vld [vmem:[#allocation74_spill] sm:$0xff] }
 0x242   : > { %1528 = vadd.xlane.f32.xlu0 %v1302_v7 }
 0x243   : > { %v1306_v7 = vmul.f32 %v14420_v20, %v8981_v61  ;;  %v14427_v20 = vunpack.c.h.bf16 %v14426_v52 }
 0x244   : > { %v10546_v45 = vpop.xlane.xlu1 %1394  ;;  %v10548_v29 = vpop.xlane.xlu0 %1392 }
 0x245   : > { %1534 = vadd.xlane.f32.xlu1 %v1305_v26  ;;  %14421 = vst [vmem:[#allocation54_spill] sm:$0xff] %v10546_v45  ;;  %14422 = vst [vmem:[#allocation55_spill] sm:$0xff] %v10548_v29  ;;  %v14425_v26 = vunpack.c.l.bf16 %v14423_v37  ;;  %v1311_v9 = vmul.f32 %v14427_v20, %v8981_v61  ;;  %v14429_v37 = vld [vmem:[#allocation75_spill] sm:$0xff] }
 0x246   : > { %1532 = vadd.xlane.f32.xlu0 %v1304_v44 }
 0x247   : > { %v1308_v44 = vmul.f32 %v14425_v26, %v8981_v61  ;;  %v14430_v26 = vunpack.c.h.bf16 %v14429_v37 }
 0x248   : > { %v10556_v28 = vpop.xlane.xlu1 %1398  ;;  %v10558_v59 = vpop.xlane.xlu0 %1396 }
 0x249   : > { %1538 = vadd.xlane.f32.xlu1 %v1307_v10  ;;  %v14428_v10 = vunpack.c.l.bf16 %v14426_v52  ;;  %v1313_v5 = vmul.f32 %v14430_v26, %v8981_v61  ;;  %v14434_v52 = vld [vmem:[#allocation76_spill] sm:$0xff] }
 0x24a   : > { %1536 = vadd.xlane.f32.xlu0 %v1306_v7 }
 0x24b   : > { %v1310_v7 = vmul.f32 %v14428_v10, %v8981_v61  ;;  %v14435_v10 = vunpack.c.h.bf16 %v14434_v52 }
 0x24c   : > { %v10566_v27 = vpop.xlane.xlu1 %1402  ;;  %v10568_v34 = vpop.xlane.xlu0 %1400 }
 0x24d   : > { %1542 = vadd.xlane.f32.xlu1 %v1309_v47  ;;  %v14431_v47 = vunpack.c.l.bf16 %v14429_v37  ;;  %v1315_v29 = vmul.f32 %v14435_v10, %v8981_v61  ;;  %v14439_v37 = vld [vmem:[#allocation78_spill] sm:$0xff] }
 0x24e   : > { %1540 = vadd.xlane.f32.xlu0 %v1308_v44 }
 0x24f   : > { %v1312_v44 = vmul.f32 %v14431_v47, %v8981_v61  ;;  %v14440_v47 = vunpack.c.h.bf16 %v14439_v37 }
 0x250   : > { %v10576_v45 = vpop.xlane.xlu1 %1406  ;;  %v10578_v20 = vpop.xlane.xlu0 %1404 }
 0x251   : > { %1546 = vadd.xlane.f32.xlu1 %v1311_v9  ;;  %14432 = vst [vmem:[#allocation56_spill] sm:$0xff] %v10576_v45  ;;  %14433 = vst [vmem:[#allocation57_spill] sm:$0xff] %v10578_v20  ;;  %v14436_v9 = vunpack.c.l.bf16 %v14434_v52  ;;  %v1317_v45 = vmul.f32 %v14440_v47, %v8981_v61  ;;  %v14444_v52 = vld [vmem:[#allocation81_spill] sm:$0xff] }
 0x252   : > { %1544 = vadd.xlane.f32.xlu0 %v1310_v7 }
 0x253   : > { %v1314_v7 = vmul.f32 %v14436_v9, %v8981_v61  ;;  %v14445_v9 = vunpack.c.l.bf16 %v14444_v52 }
 0x254   : > { %v10586_v24 = vpop.xlane.xlu1 %1410  ;;  %v10588_v26 = vpop.xlane.xlu0 %1408 }
 0x255   : > { %1550 = vadd.xlane.f32.xlu1 %v1313_v5  ;;  %14437 = vst [vmem:[#allocation58_spill] sm:$0xff] %v10586_v24  ;;  %14438 = vst [vmem:[#allocation59_spill] sm:$0xff] %v10588_v26  ;;  %v14441_v5 = vunpack.c.l.bf16 %v14439_v37  ;;  %v1318_v24 = vmul.f32 %v14445_v9, %v8981_v61  ;;  %v14449_v37 = vld [vmem:[#allocation84_spill] sm:$0xff] }
 0x256   : > { %1548 = vadd.xlane.f32.xlu0 %v1312_v44 }
 0x257   : > { %v1316_v44 = vmul.f32 %v14441_v5, %v8981_v61  ;;  %v14450_v5 = vunpack.c.l.bf16 %v14449_v37 }
 0x258   : > { %v10596_v20 = vpop.xlane.xlu1 %1414  ;;  %v10598_v10 = vpop.xlane.xlu0 %1412 }
 0x259   : > { %1554 = vadd.xlane.f32.xlu1 %v1315_v29  ;;  %14442 = vst [vmem:[#allocation60_spill] sm:$0xff] %v10596_v20  ;;  %14443 = vst [vmem:[#allocation61_spill] sm:$0xff] %v10598_v10  ;;  %v14446_v29 = vunpack.c.h.bf16 %v14444_v52  ;;  %v1320_v20 = vmul.f32 %v14450_v5, %v8981_v61  ;;  %v14454_v52 = vld [vmem:[#allocation87_spill] sm:$0xff] }
 0x25a   : > { %1552 = vadd.xlane.f32.xlu0 %v1314_v7 }
 0x25b   : > { %v1319_v7 = vmul.f32 %v14446_v29, %v8981_v61  ;;  %v14455_v29 = vunpack.c.l.bf16 %v14454_v52 }
 0x25c   : > { %v10606_v26 = vpop.xlane.xlu1 %1418  ;;  %v10608_v47 = vpop.xlane.xlu0 %1416 }
 0x25d   : > { %1558 = vadd.xlane.f32.xlu1 %v1317_v45  ;;  %14447 = vst [vmem:[#allocation62_spill] sm:$0xff] %v10606_v26  ;;  %14448 = vst [vmem:[#allocation64_spill] sm:$0xff] %v10608_v47  ;;  %v14451_v45 = vunpack.c.h.bf16 %v14449_v37  ;;  %v1322_v26 = vmul.f32 %v14455_v29, %v8981_v61  ;;  %v14459_v37 = vld [vmem:[#allocation90_spill] sm:$0xff] }
 0x25e   : > { %1556 = vadd.xlane.f32.xlu0 %v1316_v44 }
 0x25f   : > { %v1321_v44 = vmul.f32 %v14451_v45, %v8981_v61  ;;  %v14460_v45 = vunpack.c.l.bf16 %v14459_v37 }
 0x260   : > { %v10616_v10 = vpop.xlane.xlu1 %1422  ;;  %v10618_v9 = vpop.xlane.xlu0 %1420 }
 0x261   : > { %1562 = vadd.xlane.f32.xlu1 %v1319_v7  ;;  %14452 = vst [vmem:[#allocation65_spill] sm:$0xff] %v10616_v10  ;;  %14453 = vst [vmem:[#allocation66_spill] sm:$0xff] %v10618_v9  ;;  %v1324_v10 = vmul.f32 %v14460_v45, %v8981_v61 }
 0x262   : > { %1560 = vadd.xlane.f32.xlu0 %v1318_v24  ;;  %v14456_v24 = vunpack.c.h.bf16 %v14454_v52  ;;  %v14464_v52 = vld [vmem:[#allocation93_spill] sm:$0xff] }
 0x264   : > { %v1323_v7 = vmul.f32 %v14456_v24, %v8981_v61  ;;  %v10626_v47 = vpop.xlane.xlu1 %1426  ;;  %v10628_v5 = vpop.xlane.xlu0 %1424  ;;  %v14465_v24 = vunpack.c.l.bf16 %v14464_v52 }
 0x265   : > { %1566 = vadd.xlane.f32.xlu1 %v1321_v44  ;;  %14457 = vst [vmem:[#allocation67_spill] sm:$0xff] %v10626_v47  ;;  %14458 = vst [vmem:[#allocation68_spill] sm:$0xff] %v10628_v5 }
 0x266   : > { %1564 = vadd.xlane.f32.xlu0 %v1320_v20  ;;  %v14461_v20 = vunpack.c.h.bf16 %v14459_v37  ;;  %v1326_v47 = vmul.f32 %v14465_v24, %v8981_v61  ;;  %v14469_v37 = vld [vmem:[#allocation96_spill] sm:$0xff] }
 0x268   : > { %v1325_v44 = vmul.f32 %v14461_v20, %v8981_v61  ;;  %v10636_v9 = vpop.xlane.xlu1 %1430  ;;  %v10638_v29 = vpop.xlane.xlu0 %1428  ;;  %v14470_v20 = vunpack.c.l.bf16 %v14469_v37 }
 0x269   : > { %1570 = vadd.xlane.f32.xlu1 %v1323_v7  ;;  %14462 = vst [vmem:[#allocation69_spill] sm:$0xff] %v10636_v9  ;;  %14463 = vst [vmem:[#allocation70_spill] sm:$0xff] %v10638_v29 }
 0x26a   : > { %1568 = vadd.xlane.f32.xlu0 %v1322_v26  ;;  %v14466_v26 = vunpack.c.h.bf16 %v14464_v52  ;;  %v1328_v29 = vmul.f32 %v14470_v20, %v8981_v61  ;;  %v14472_v52 = vld [vmem:[#allocation99_spill] sm:$0xff] }
 0x26c   : > { %v1327_v7 = vmul.f32 %v14466_v26, %v8981_v61  ;;  %v10646_v5 = vpop.xlane.xlu1 %1434  ;;  %v10648_v45 = vpop.xlane.xlu0 %1432  ;;  %v14473_v26 = vunpack.c.l.bf16 %v14472_v52 }
 0x26d   : > { %1574 = vadd.xlane.f32.xlu1 %v1325_v44  ;;  %14467 = vst [vmem:[#allocation71_spill] sm:$0xff] %v10646_v5  ;;  %14468 = vst [vmem:[#allocation74_spill] sm:$0xff] %v10648_v45 }
 0x26e   : > { %1572 = vadd.xlane.f32.xlu0 %v1324_v10  ;;  %v14471_v10 = vunpack.c.h.bf16 %v14469_v37  ;;  %v1330_v5 = vmul.f32 %v14473_v26, %v8981_v61 }
 0x270   : > { %v1329_v44 = vmul.f32 %v14471_v10, %v8981_v61  ;;  %v10656_v9 = vpop.xlane.xlu1 %1438  ;;  %v10658_v24 = vpop.xlane.xlu0 %1436 }
 0x271   : > { %1578 = vadd.xlane.f32.xlu1 %v1327_v7 }
 0x272   : > { %1576 = vadd.xlane.f32.xlu0 %v1326_v47  ;;  %v14474_v47 = vunpack.c.h.bf16 %v14472_v52 }
 0x274   : > { %v1331_v7 = vmul.f32 %v14474_v47, %v8981_v61  ;;  %v10666_v45 = vpop.xlane.xlu1 %1442  ;;  %v10668_v20 = vpop.xlane.xlu0 %1440 }
 0x275   : > { %1582 = vadd.xlane.f32.xlu1 %v1329_v44  ;;  %14475 = vst [vmem:[#allocation75_spill] sm:$0xff] %v10666_v45  ;;  %v10707_v45 = vstv %s6818_s4 }
 0x276   : > { %1580 = vadd.xlane.f32.xlu0 %v1328_v29 }
 0x278   : > { %v10670_v37 = vpop.xlane.xlu1 %1446  ;;  %v10672_v10 = vpop.xlane.xlu0 %1444 }
 0x279   : > { %1586 = vadd.xlane.f32.xlu1 %v1331_v7  ;;  %14476 = vst [vmem:[#allocation76_spill] sm:$0xff] %v10670_v37  ;;  %14477 = vst [vmem:[#allocation78_spill] sm:$0xff] %v10672_v10  ;;  %v7945_v37 = vmov 0  }
 0x27a   : > { %1584 = vadd.xlane.f32.xlu0 %v1330_v5  ;;  %7260 = vset.pattern.permute.xlu1 %v7945_v37 }
 0x27b   : > { %7261 = vset.pattern.permute.xlu0 %v7945_v37 }
 0x27c   : > { %v10675_v29 = vpop.xlane.xlu1 %1450 }
 0x27d   : > { %14478 = vst [vmem:[#allocation81_spill] sm:$0xff] %v10675_v29  ;;  %v10677_v44 = vpop.xlane.xlu0 %1448 }
 0x27e   : > { %3296 = vmax.xlane.f32.xlu0 %v10402_v12  ;;  %14479 = vst [vmem:[#allocation84_spill] sm:$0xff] %v10677_v44 }
 0x280   : > { %v10679_v26 = vpop.xlane.xlu1 %1454 }
 0x281   : > { %14480 = vst [vmem:[#allocation87_spill] sm:$0xff] %v10679_v26  ;;  %v10681_v52 = vpop.xlane.xlu0 %1452 }
 0x282   : > { %14481 = vst [vmem:[#allocation90_spill] sm:$0xff] %v10681_v52 }
 0x284   : > { %v10683_v61 = vpop.xlane.xlu1 %1458 }
 0x285   : > { %14482 = vst [vmem:[#allocation93_spill] sm:$0xff] %v10683_v61  ;;  %v10685_v47 = vpop.xlane.xlu0 %1456 }
 0x286   : > { %14483 = vst [vmem:[#allocation96_spill] sm:$0xff] %v10685_v47 }
 0x289   : > { %v10687_v5 = vpop.xlane.xlu1 %1462 }
 0x28a   : > { %v10689_v7 = vpop.xlane.xlu0 %1460 }
 0x28d   : > { %v10691_v12 = vpop.xlane.xlu1 %1466 }
 0x28e   : > { %14484 = vst [vmem:[#allocation99_spill] sm:$0xff] %v10691_v12  ;;  %v10693_v29 = vpop.xlane.xlu0 %1464 }
 0x292   : > { %v10695_v44 = vpop.xlane.xlu1 %1470 }
 0x293   : > { %14485 = vst [vmem:[#allocation194_spill] sm:$0xff] %v10695_v44  ;;  %v10697_v26 = vpop.xlane.xlu0 %1468  ;;  %v10715_v44 = vadd.f32 %v10707_v45, %v10385_v42  ;;  %v10735_v42 = vadd.f32 %v10707_v45, %v10404_v53  ;;  %v10757_v53 = vadd.f32 %v10707_v45, %v10488_v46 }
 0x294   : > { %14486 = vst [vmem:[#allocation195_spill] sm:$0xff] %v10697_v26  ;;  %v10719_v26 = vadd.f32 %v10707_v45, %v10387_v2 }
 0x295   : > { %14492 = vst [vmem:[#allocation201_spill] sm:$0xff] %v10715_v44  ;;  %14497 = vst [vmem:[#allocation206_spill] sm:$0xff] %v10735_v42 }
 0x296   : > { %v10699_v52 = vpop.xlane.xlu1 %1474  ;;  %14493 = vst [vmem:[#allocation202_spill] sm:$0xff] %v10719_v26  ;;  %14503 = vst [vmem:[#allocation212_spill] sm:$0xff] %v10757_v53 }
 0x297   : > { %14487 = vst [vmem:[#allocation196_spill] sm:$0xff] %v10699_v52  ;;  %v10701_v61 = vpop.xlane.xlu0 %1472  ;;  %v10723_v52 = vadd.f32 %v10707_v45, %v10406_v3  ;;  %v10741_v3 = vadd.f32 %v10707_v45, %v10418_v36  ;;  %v2671_v36 = vrot.slane %v10735_v42, %v9090_v4 }
 0x299   : > { %14494 = vst [vmem:[#allocation203_spill] sm:$0xff] %v10723_v52  ;;  %v2666_v2 = vrot.slane %v10723_v52, %v9067_v13  ;;  %14498 = vst [vmem:[#allocation207_spill] sm:$0xff] %v10741_v3 }
 0x29a   : > { %v10703_v47 = vpop.xlane.xlu1 %1478 }
 0x29b   : > { %14488 = vst [vmem:[#allocation197_spill] sm:$0xff] %v10703_v47  ;;  %v10705_v10 = vpop.xlane.xlu0 %1476 }
 0x29c   : > { %14489 = vst [vmem:[#allocation198_spill] sm:$0xff] %v10705_v10 }
 0x29e   : > { %v10709_v37 = vpop.xlane.xlu1 %1482 }
 0x29f   : > { %14490 = vst [vmem:[#allocation199_spill] sm:$0xff] %v10709_v37  ;;  %v10711_v12 = vpop.xlane.xlu0 %1480  ;;  %v2661_v37 = vrot.slane %v10715_v44, %v9041_v15  ;;  %v10749_v44 = vadd.f32 %v10707_v45, %v10478_v6 }
 0x2a0   : > { %14491 = vst [vmem:[#allocation200_spill] sm:$0xff] %v10711_v12  ;;  %v2657_v12 = vrot.slane %v10719_v26, %v9059_v51 }
 0x2a1   : > { %14500 = vst [vmem:[#allocation209_spill] sm:$0xff] %v10749_v44 }
 0x2a2   : > { %v10725_v47 = vpop.xlane.xlu1 %1486  ;;  %v2662_v52 = vsel %vm1857_vm1, %v2661_v37, %v2657_v12  ;;  %v2736_v12 = vrot.slane %v10749_v44, %v9059_v51  ;;  %v10779_v37 = vadd.f32 %v10707_v45, %v10486_v50  ;;  %v10796_v50 = vadd.f32 %v10707_v45, %v10426_v31 }
 0x2a3   : > { %14495 = vst [vmem:[#allocation204_spill] sm:$0xff] %v10725_v47  ;;  %v10727_v10 = vpop.xlane.xlu0 %1484  ;;  %v10745_v47 = vadd.f32 %v10707_v45, %v10476_v23  ;;  %v10764_v23 = vadd.f32 %v10707_v45, %v10416_v57  ;;  %v2667_v6 = vsel %vm1864_vm2, %v2666_v2, %v2662_v52  ;;  %v2745_v2 = vrot.slane %v10757_v53, %v9067_v13 }
 0x2a4   : > { %14496 = vst [vmem:[#allocation205_spill] sm:$0xff] %v10727_v10  ;;  %14506 = vst [vmem:[#allocation215_spill] sm:$0xff] %v10779_v37  ;;  %v2672_v44 = vsel %vm1871_vm3, %v2671_v36, %v2667_v6  ;;  %v10803_v53 = vadd.f32 %v10707_v45, %v10438_v39  ;;  %v10810_v36 = vadd.f32 %v10707_v45, %v10496_v32 }
 0x2a5   : > { %14499 = vst [vmem:[#allocation208_spill] sm:$0xff] %v10745_v47  ;;  %14504 = vst [vmem:[#allocation213_spill] sm:$0xff] %v10764_v23  ;;  %v2740_v46 = vrot.slane %v10745_v47, %v9041_v15  ;;  %v2681_v47 = vrot.slane %v10764_v23, %v9107_v14  ;;  %v2750_v23 = vrot.slane %v10779_v37, %v9090_v4 }
 0x2a6   : > { %v10751_v26 = vpop.xlane.xlu1 %1490  ;;  %14508 = vst [vmem:[#allocation217_spill] sm:$0xff] %v10796_v50  ;;  %14509 = vst [vmem:[#allocation218_spill] sm:$0xff] %v10803_v53  ;;  %v10821_v39 = vadd.f32 %v10707_v45, %v10508_v41  ;;  %v10828_v32 = vadd.f32 %v10707_v45, %v10436_v1  ;;  %v2760_v41 = vrot.slane %v10810_v36, %v9107_v14 }
 0x2a7   : > { %14501 = vst [vmem:[#allocation210_spill] sm:$0xff] %v10751_v26  ;;  %v10753_v10 = vpop.xlane.xlu0 %1488  ;;  %v2676_v26 = vrot.slane %v10741_v3, %v9110_v25  ;;  %14510 = vst [vmem:[#allocation219_spill] sm:$0xff] %v10810_v36 }
 0x2a8   : > { %14502 = vst [vmem:[#allocation211_spill] sm:$0xff] %v10753_v10  ;;  %v10771_v10 = vadd.f32 %v10707_v45, %v10428_v22  ;;  %v10789_v22 = vadd.f32 %v10707_v45, %v10498_v35  ;;  %v2741_v35 = vsel %vm1857_vm1, %v2740_v46, %v2736_v12  ;;  %14511 = vst [vmem:[#allocation220_spill] sm:$0xff] %v10821_v39 }
 0x2a9   : > { %v2677_v42 = vsel %vm1878_vm4, %v2676_v26, %v2672_v44  ;;  %v2746_v44 = vsel %vm1864_vm2, %v2745_v2, %v2741_v35  ;;  %v2691_v46 = vrot.slane %v10796_v50, %v9127_v62  ;;  %14512 = vst [vmem:[#allocation221_spill] sm:$0xff] %v10828_v32  ;;  %v2696_v2 = vrot.slane %v10803_v53, %v9170_v8  ;;  %v14550_v50 = vld [vmem:[#allocation59_spill] sm:$0xff] }
 0x2aa   : > { %14505 = vst [vmem:[#allocation214_spill] sm:$0xff] %v10771_v10  ;;  %v10781_v57 = vpop.xlane.xlu1 %1494  ;;  %14507 = vst [vmem:[#allocation216_spill] sm:$0xff] %v10789_v22  ;;  %v2686_v3 = vrot.slane %v10771_v10, %v9152_v49  ;;  %v2755_v26 = vrot.slane %v10789_v22, %v9110_v25  ;;  %v2682_v12 = vsel %vm1885_vm5, %v2681_v47, %v2677_v42 }
 0x2ab   : > { %v10783_v52 = vpop.xlane.xlu0 %1492  ;;  %v10835_v35 = vadd.f32 %v10707_v45, %v10448_v30  ;;  %v2751_v22 = vsel %vm1871_vm3, %v2750_v23, %v2746_v44  ;;  %v10842_v47 = vadd.f32 %v10707_v45, %v10506_v19  ;;  %v10853_v30 = vadd.f32 %v10707_v45, %v10518_v16 }
 0x2ac   : > { %v2687_v37 = vsel %vm14513_vm6, %v2686_v3, %v2682_v12  ;;  %v2756_v3 = vsel %vm1878_vm4, %v2755_v26, %v2751_v22  ;;  %v2765_v12 = vrot.slane %v10821_v39, %v9152_v49  ;;  %v2701_v23 = vrot.slane %v10828_v32, %v9155_v54  ;;  %v14543_v32 = vld [vmem:[#allocation74_spill] sm:$0xff] }
 0x2ad   : > { %14514 = vst [vmem:[#allocation222_spill] sm:$0xff] %v10835_v35  ;;  %14515 = vst [vmem:[#allocation223_spill] sm:$0xff] %v10842_v47  ;;  %v2692_v44 = vsel %vm1899_vm7, %v2691_v46, %v2687_v37  ;;  %v10860_v19 = vadd.f32 %v10707_v45, %v10446_v11  ;;  %vm14518_vm6 = vcmask 589312   ;;  %v2706_v22 = vrot.slane %v10835_v35, %v9241_v56  ;;  %v14559_v35 = vld [vmem:[#allocation58_spill] sm:$0xff] }
 0x2ae   : > { %v10812_v31 = vpop.xlane.xlu1 %1498  ;;  %14516 = vst [vmem:[#allocation224_spill] sm:$0xff] %v10853_v30  ;;  %v2697_v36 = vsel %vm14518_vm6, %v2696_v2, %v2692_v44  ;;  %v10867_v26 = vadd.f32 %v10707_v45, %v10458_v43  ;;  %v2770_v16 = vrot.slane %v10842_v47, %v9127_v62  ;;  %v2761_v39 = vsel %vm1885_vm5, %v2760_v41, %v2756_v3 }
 0x2af   : > { %v10814_v6 = vpop.xlane.xlu0 %1496  ;;  %14517 = vst [vmem:[#allocation225_spill] sm:$0xff] %v10860_v19  ;;  %v10874_v37 = vadd.f32 %v10707_v45, %v10516_v17  ;;  %vm14521_vm6 = vcmask 458112   ;;  %v2775_v44 = vrot.slane %v10853_v30, %v9170_v8  ;;  %v10885_v43 = vadd.f32 %v10707_v45, %v10528_v33 }
 0x2b0   : > { %14519 = vst [vmem:[#allocation226_spill] sm:$0xff] %v10867_v26  ;;  %v2766_v2 = vsel %vm14521_vm6, %v2765_v12, %v2761_v39  ;;  %v2711_v41 = vrot.slane %v10860_v19, %v9199_v38  ;;  %v2702_v3 = vsel %vm1913_vm9, %v2701_v23, %v2697_v36  ;;  %v10893_v47 = vadd.f32 %v10707_v45, %v10456_v0  ;;  %v14542_v19 = vld [vmem:[#allocation151_spill] sm:$0xff] }
 0x2b1   : > { %14520 = vst [vmem:[#allocation227_spill] sm:$0xff] %v10874_v37  ;;  %14522 = vst [vmem:[#allocation228_spill] sm:$0xff] %v10885_v43  ;;  %v2707_v17 = vsel %vm14523_vm0, %v2706_v22, %v2702_v3  ;;  %v2716_v39 = vrot.slane %v10867_v26, %v9316_v60  ;;  %v10899_v12 = vadd.f32 %v10707_v45, %v10468_v40  ;;  %vm14527_vm0 = vcmask 589312  }
 0x2b2   : > { %v10844_v1 = vpop.xlane.xlu1 %1502  ;;  %14524 = vst [vmem:[#allocation229_spill] sm:$0xff] %v10893_v47  ;;  %v2780_v33 = vrot.slane %v10874_v37, %v9155_v54  ;;  %v2771_v30 = vsel %vm1899_vm7, %v2770_v16, %v2766_v2  ;;  %v10906_v36 = vadd.f32 %v10707_v45, %v10526_v63  ;;  %v2785_v3 = vrot.slane %v10885_v43, %v9241_v56 }
 0x2b3   : > { %v10846_v42 = vpop.xlane.xlu0 %1500  ;;  %14525 = vst [vmem:[#allocation230_spill] sm:$0xff] %v10899_v12  ;;  %v2776_v22 = vsel %vm14527_vm0, %v2775_v44, %v2771_v30  ;;  %v10917_v40 = vadd.f32 %v10707_v45, %v10556_v28  ;;  %v10921_v16 = vadd.f32 %v10707_v45, %v10558_v59  ;;  %v2712_v63 = vsel %vm1927_vm11, %v2711_v41, %v2707_v17 }
 0x2b4   : > { %14526 = vst [vmem:[#allocation231_spill] sm:$0xff] %v10906_v36  ;;  %v10926_v2 = vadd.f32 %v10707_v45, %v10568_v34  ;;  %v2721_v30 = vrot.slane %v10893_v47, %v9313_v58  ;;  %v2717_v44 = vsel %vm13900_vm12, %v2716_v39, %v2712_v63  ;;  %v10933_v37 = vadd.f32 %v10707_v45, %v10538_v18  ;;  %v14540_v47 = vld [vmem:[#allocation70_spill] sm:$0xff] }
 0x2b5   : > { %14528 = vst [vmem:[#allocation232_spill] sm:$0xff] %v10917_v40  ;;  %14529 = vst [vmem:[#allocation233_spill] sm:$0xff] %v10921_v16  ;;  %v10937_v28 = vadd.f32 %v10707_v45, %v10466_v55  ;;  %v2726_v59 = vrot.slane %v10899_v12, %v14301_v21  ;;  %v2790_v34 = vrot.slane %v10906_v36, %v9199_v38  ;;  %vm14533_vm6 = vcmask 720512  }
 0x2b6   : > { %v10876_v11 = vpop.xlane.xlu1 %1506  ;;  %14530 = vst [vmem:[#allocation234_spill] sm:$0xff] %v10926_v2  ;;  %14531 = vst [vmem:[#allocation235_spill] sm:$0xff] %v10933_v37  ;;  %v2781_v41 = vsel %vm1913_vm9, %v2780_v33, %v2776_v22  ;;  %v2819_v18 = vrot.slane %v10917_v40, %v9041_v15  ;;  %v2815_v55 = vrot.slane %v10921_v16, %v9059_v51  ;;  %v14536_v22 = vld [vmem:[#allocation57_spill] sm:$0xff]  ;;  %vm14567_vm0 = vcmask 458112  }
 0x2b7   : > { %v10878_v46 = vpop.xlane.xlu0 %1504  ;;  %14532 = vst [vmem:[#allocation236_spill] sm:$0xff] %v10937_v28  ;;  %v2786_v39 = vsel %vm14533_vm6, %v2785_v3, %v2781_v41  ;;  %v10955_v63 = vadd.f32 %v10707_v45, %v10566_v27  ;;  %v10959_v36 = vadd.f32 %v10707_v45, %v10536_v48  ;;  %v2824_v33 = vrot.slane %v10926_v2, %v9067_v13  ;;  %v14538_v16 = vld [vmem:[#allocation69_spill] sm:$0xff] }
 0x2b8   : > { %v10965_v3 = vadd.f32 %v10707_v45, %v14536_v22  ;;  %v2722_v41 = vsel %vm1941_vm13, %v2721_v30, %v2717_v44  ;;  %v2795_v40 = vrot.slane %v10933_v37, %v9316_v60  ;;  %v10972_v27 = vadd.f32 %v10707_v45, %v14538_v16  ;;  %v14546_v16 = vld [vmem:[#allocation55_spill] sm:$0xff] }
 0x2b9   : > { %14534 = vst [vmem:[#allocation237_spill] sm:$0xff] %v10955_v63  ;;  %14535 = vst [vmem:[#allocation238_spill] sm:$0xff] %v10959_v36  ;;  %v10976_v48 = vadd.f32 %v10707_v45, %v14540_v47  ;;  %v2731_v2 = vrot.slane %v10937_v28, %v14542_v19  ;;  %v2727_v12 = vsel %vm1948_vm14, %v2726_v59, %v2722_v41  ;;  %v14548_v59 = vld [vmem:[#allocation56_spill] sm:$0xff]  ;;  %vm14581_vm6 = vcmask 589312  }
 0x2ba   : > { %v10908_v23 = vpop.xlane.xlu1 %1510  ;;  %14537 = vst [vmem:[#allocation57_spill] sm:$0xff] %v10965_v3  ;;  %14539 = vst [vmem:[#allocation69_spill] sm:$0xff] %v10972_v27  ;;  %v2791_v22 = vsel %vm1927_vm11, %v2790_v34, %v2786_v39  ;;  %v10984_v30 = vadd.f32 %v10707_v45, %v14543_v32  ;;  %v10992_v26 = vadd.f32 %v10707_v45, %v14546_v16 }
 0x2bb   : > { %v10910_v0 = vpop.xlane.xlu0 %1508  ;;  %14541 = vst [vmem:[#allocation70_spill] sm:$0xff] %v10976_v48  ;;  %v2820_v47 = vsel %vm1857_vm1, %v2819_v18, %v2815_v55  ;;  %v2829_v28 = vrot.slane %v10955_v63, %v9090_v4  ;;  %v10999_v34 = vadd.f32 %v10707_v45, %v14548_v59  ;;  %v2800_v32 = vrot.slane %v10959_v36, %v9313_v58  ;;  %v14552_v63 = vld [vmem:[#allocation71_spill] sm:$0xff] }
 0x2bc   : > { %14544 = vst [vmem:[#allocation74_spill] sm:$0xff] %v10984_v30  ;;  %14547 = vst [vmem:[#allocation55_spill] sm:$0xff] %v10992_v26  ;;  %v2825_v39 = vsel %vm1864_vm2, %v2824_v33, %v2820_v47  ;;  %v2834_v41 = vrot.slane %v10965_v3, %v9110_v25  ;;  %v11008_v16 = vadd.f32 %v10707_v45, %v14550_v50  ;;  %v14554_v33 = vld [vmem:[#allocation54_spill] sm:$0xff] }
 0x2bd   : > { %14549 = vst [vmem:[#allocation56_spill] sm:$0xff] %v10999_v34  ;;  %v2796_v18 = vsel %vm13900_vm12, %v2795_v40, %v2791_v22  ;;  %v2898_v55 = vrot.slane %v10972_v27, %v9041_v15  ;;  %v2894_v59 = vrot.slane %v10976_v48, %v9059_v51  ;;  %v11017_v36 = vadd.f32 %v10707_v45, %v14552_v63 }
 0x2be   : > { %v10944_v17 = vpop.xlane.xlu1 %1514  ;;  %14551 = vst [vmem:[#allocation59_spill] sm:$0xff] %v11008_v16  ;;  %v11021_v47 = vadd.f32 %v10707_v45, %v14554_v33  ;;  %v2903_v50 = vrot.slane %v10984_v30, %v9067_v13  ;;  %v11027_v40 = vadd.f32 %v10707_v45, %v10658_v24  ;;  %v11034_v48 = vsel %vm1955_vm15, %v2731_v2, %v2727_v12  ;;  %v14561_v2 = vld [vmem:[#allocation61_spill] sm:$0xff] }
 0x2bf   : > { %v10946_v43 = vpop.xlane.xlu0 %1512  ;;  %14553 = vst [vmem:[#allocation71_spill] sm:$0xff] %v11017_v36  ;;  %v2805_v63 = vrot.slane %v10992_v26, %v14301_v21  ;;  %v2839_v33 = vrot.slane %v10999_v34, %v9107_v14  ;;  %v2830_v3 = vsel %vm1871_vm3, %v2829_v28, %v2825_v39  ;;  %v2801_v30 = vsel %vm1941_vm13, %v2800_v32, %v2796_v18 }
 0x2c0   : > { %14555 = vst [vmem:[#allocation54_spill] sm:$0xff] %v11021_v47  ;;  %14556 = vst [vmem:[#allocation240_spill] sm:$0xff] %v11027_v40  ;;  %v2835_v24 = vsel %vm1878_vm4, %v2834_v41, %v2830_v3  ;;  %v11045_v53 = vadd.f32 %v10707_v45, %v14559_v35  ;;  %v2844_v12 = vrot.slane %v11008_v16, %v9152_v49  ;;  %v14582_v16 = vld [vmem:[#allocation62_spill] sm:$0xff] }
 0x2c1   : > { %v11051_v10 = vadd.f32 %v10707_v45, %v14561_v2  ;;  %v2899_v26 = vsel %vm1857_vm1, %v2898_v55, %v2894_v59  ;;  %v2908_v28 = vrot.slane %v11017_v36, %v9090_v4  ;;  %v11058_v32 = vadd.f32 %v10707_v45, %v10656_v9  ;;  %v14568_v36 = vld [vmem:[#allocation60_spill] sm:$0xff] }
 0x2c2   : > { %v10986_v44 = vpop.xlane.xlu1 %1518  ;;  %14560 = vst [vmem:[#allocation58_spill] sm:$0xff] %v11045_v53  ;;  %v2810_v35 = vrot.slane %v11021_v47, %v14542_v19  ;;  %v2904_v3 = vsel %vm1864_vm2, %v2903_v50, %v2899_v26  ;;  %v2913_v39 = vrot.slane %v11027_v40, %v9110_v25  ;;  %v11067_v41 = vadd.f32 %v10707_v45, %v10668_v20  ;;  %v14584_v47 = vld [vmem:[#allocation66_spill] sm:$0xff] }
 0x2c3   : > { %14545 = vst [vmem:[#allocation239_spill] sm:$0xff] %v10986_v44  ;;  %v10988_v37 = vpop.xlane.xlu0 %1516  ;;  %14562 = vst [vmem:[#allocation61_spill] sm:$0xff] %v11051_v10  ;;  %v2806_v59 = vsel %vm1948_vm14, %v2805_v63, %v2801_v30  ;;  %v2840_v9 = vsel %vm1885_vm5, %v2839_v33, %v2835_v24  ;;  %v11077_v2 = vadd.f32 %v10707_v45, %v10687_v5  ;;  %v14571_v63 = vld [vmem:[#allocation64_spill] sm:$0xff]  ;;  %v14603_v44 = vld [vmem:[#allocation198_spill] sm:$0xff] }
 0x2c4   : > { %14563 = vst [vmem:[#allocation243_spill] sm:$0xff] %v11058_v32  ;;  %14564 = vst [vmem:[#allocation244_spill] sm:$0xff] %v11067_v41  ;;  %v11081_v26 = vadd.f32 %v10707_v45, %v10689_v7  ;;  %v2849_v20 = vrot.slane %v11045_v53, %v9127_v62  ;;  %v2845_v50 = vsel %vm14567_vm0, %v2844_v12, %v2840_v9  ;;  %v14573_v9 = vld [vmem:[#allocation75_spill] sm:$0xff] }
 0x2c5   : > { %14565 = vst [vmem:[#allocation245_spill] sm:$0xff] %v11077_v2  ;;  %v11088_v40 = vadd.f32 %v10707_v45, %v14568_v36  ;;  %v11092_v30 = vadd.f32 %v10707_v45, %v10693_v29  ;;  %v2854_v5 = vrot.slane %v11051_v10, %v9170_v8  ;;  %v11098_v7 = vadd.f32 %v10707_v45, %v14571_v63  ;;  %v14575_v10 = vld [vmem:[#allocation78_spill] sm:$0xff] }
 0x2c6   : > { %v11029_v22 = vpop.xlane.xlu1 %1522  ;;  %14566 = vst [vmem:[#allocation246_spill] sm:$0xff] %v11081_v26  ;;  %v2918_v33 = vrot.slane %v11058_v32, %v9107_v14  ;;  %v2909_v24 = vsel %vm1871_vm3, %v2908_v28, %v2904_v3  ;;  %v2811_v12 = vsel %vm1955_vm15, %v2810_v35, %v2806_v59  ;;  %v11107_v29 = vadd.f32 %v10707_v45, %v14573_v9  ;;  %v14577_v3 = vld [vmem:[#allocation99_spill] sm:$0xff] }
 0x2c7   : > { %14557 = vst [vmem:[#allocation241_spill] sm:$0xff] %v11029_v22  ;;  %v11031_v27 = vpop.xlane.xlu0 %1520  ;;  %14569 = vst [vmem:[#allocation60_spill] sm:$0xff] %v11088_v40  ;;  %v2914_v36 = vsel %vm1878_vm4, %v2913_v39, %v2909_v24  ;;  %v2923_v53 = vrot.slane %v11067_v41, %v9152_v49  ;;  %v11117_v32 = vadd.f32 %v10707_v45, %v14575_v10  ;;  %v14579_v10 = vld [vmem:[#allocation195_spill] sm:$0xff] }
 0x2c8   : > { %14558 = vst [vmem:[#allocation242_spill] sm:$0xff] %v11031_v27  ;;  %14570 = vst [vmem:[#allocation247_spill] sm:$0xff] %v11092_v30  ;;  %v2977_v28 = vrot.slane %v11077_v2, %v9041_v15  ;;  %v2973_v35 = vrot.slane %v11081_v26, %v9059_v51  ;;  %v11125_v39 = vadd.f32 %v10707_v45, %v14577_v3  ;;  %v14601_v27 = vld [vmem:[#allocation81_spill] sm:$0xff] }
 0x2c9   : > { %14572 = vst [vmem:[#allocation64_spill] sm:$0xff] %v11098_v7  ;;  %14574 = vst [vmem:[#allocation75_spill] sm:$0xff] %v11107_v29  ;;  %v2859_v59 = vrot.slane %v11088_v40, %v9155_v54  ;;  %v2850_v24 = vsel %vm1899_vm7, %v2849_v20, %v2845_v50  ;;  %v2982_v9 = vrot.slane %v11092_v30, %v9067_v13  ;;  %v14586_v30 = vld [vmem:[#allocation76_spill] sm:$0xff] }
 0x2ca   : > { %v11069_v18 = vpop.xlane.xlu1 %1526  ;;  %14576 = vst [vmem:[#allocation78_spill] sm:$0xff] %v11117_v32  ;;  %14578 = vst [vmem:[#allocation99_spill] sm:$0xff] %v11125_v39  ;;  %v11134_v41 = vadd.f32 %v10707_v45, %v14579_v10  ;;  %v2855_v2 = vsel %vm14581_vm6, %v2854_v5, %v2850_v24  ;;  %v11139_v26 = vadd.f32 %v10707_v45, %v14582_v16  ;;  %vm14591_vm6 = vcmask 720512  }
 0x2cb   : > { %v11071_v55 = vpop.xlane.xlu0 %1524  ;;  %v2864_v3 = vrot.slane %v11098_v7, %v9241_v56  ;;  %v2919_v40 = vsel %vm1885_vm5, %v2918_v33, %v2914_v36  ;;  %v11146_v20 = vadd.f32 %v10707_v45, %v14584_v47  ;;  %v2928_v50 = vrot.slane %v11107_v29, %v9127_v62  ;;  %v14588_v7 = vld [vmem:[#allocation194_spill] sm:$0xff] }
 0x2cc   : > { %14580 = vst [vmem:[#allocation195_spill] sm:$0xff] %v11134_v41  ;;  %14583 = vst [vmem:[#allocation62_spill] sm:$0xff] %v11139_v26  ;;  %v2924_v10 = vsel %vm14567_vm0, %v2923_v53, %v2919_v40  ;;  %v11153_v5 = vadd.f32 %v10707_v45, %v14586_v30  ;;  %v2933_v33 = vrot.slane %v11117_v32, %v9170_v8  ;;  %v14594_v32 = vld [vmem:[#allocation84_spill] sm:$0xff]  ;;  %vm14598_vm0 = vcmask 589312  }
 0x2cd   : > { %14585 = vst [vmem:[#allocation66_spill] sm:$0xff] %v11146_v20  ;;  %v2978_v36 = vsel %vm1857_vm1, %v2977_v28, %v2973_v35  ;;  %v2987_v47 = vrot.slane %v11125_v39, %v9090_v4  ;;  %v11166_v29 = vadd.f32 %v10707_v45, %v14588_v7  ;;  %v2860_v53 = vsel %vm1913_vm9, %v2859_v59, %v2855_v2  ;;  %v14592_v39 = vld [vmem:[#allocation65_spill] sm:$0xff] }
 0x2ce   : > { %v11111_v34 = vpop.xlane.xlu1 %1530  ;;  %14587 = vst [vmem:[#allocation76_spill] sm:$0xff] %v11153_v5  ;;  %v2983_v40 = vsel %vm1864_vm2, %v2982_v9, %v2978_v36  ;;  %v2992_v30 = vrot.slane %v11134_v41, %v9110_v25  ;;  %v11174_v22 = vadd.f32 %v10707_v45, %v10701_v61  ;;  %v2869_v28 = vrot.slane %v11139_v26, %v9199_v38  ;;  %v14596_v9 = vld [vmem:[#allocation68_spill] sm:$0xff] }
 0x2cf   : > { %v11113_v63 = vpop.xlane.xlu0 %1528  ;;  %14589 = vst [vmem:[#allocation194_spill] sm:$0xff] %v11166_v29  ;;  %v2865_v35 = vsel %vm14591_vm6, %v2864_v3, %v2860_v53  ;;  %v11181_v7 = vadd.f32 %v10707_v45, %v14592_v39  ;;  %v11185_v2 = vadd.f32 %v10707_v45, %v14594_v32  ;;  %v2874_v59 = vrot.slane %v11146_v20, %v9316_v60  ;;  %v14599_v20 = vld [vmem:[#allocation196_spill] sm:$0xff] }
 0x2d0   : > { %14590 = vst [vmem:[#allocation248_spill] sm:$0xff] %v11174_v22  ;;  %v11191_v61 = vadd.f32 %v10707_v45, %v14596_v9  ;;  %v2938_v36 = vrot.slane %v11153_v5, %v9155_v54  ;;  %v2929_v3 = vsel %vm1899_vm7, %v2928_v50, %v2924_v10  ;;  %v2997_v32 = vrot.slane %v11166_v29, %v9107_v14  ;;  %v14609_v29 = vld [vmem:[#allocation90_spill] sm:$0xff] }
 0x2d1   : > { %14593 = vst [vmem:[#allocation65_spill] sm:$0xff] %v11181_v7  ;;  %14595 = vst [vmem:[#allocation84_spill] sm:$0xff] %v11185_v2  ;;  %v2934_v41 = vsel %vm14598_vm0, %v2933_v33, %v2929_v3  ;;  %v2988_v26 = vsel %vm1871_vm3, %v2987_v47, %v2983_v40  ;;  %v11206_v9 = vadd.f32 %v10707_v45, %v14599_v20  ;;  %vm14605_vm6 = vcmask 1041409  }
 0x2d2   : > { %v11155_v16 = vpop.xlane.xlu1 %1534  ;;  %14597 = vst [vmem:[#allocation68_spill] sm:$0xff] %v11191_v61  ;;  %v11210_v5 = vadd.f32 %v10707_v45, %v14601_v27  ;;  %v2993_v50 = vsel %vm1878_vm4, %v2992_v30, %v2988_v26  ;;  %v3002_v10 = vrot.slane %v11174_v22, %v9152_v49  ;;  %v11217_v33 = vadd.f32 %v10707_v45, %v14603_v44  ;;  %v14607_v30 = vld [vmem:[#allocation67_spill] sm:$0xff] }
 0x2d3   : > { %v11157_v24 = vpop.xlane.xlu0 %1532  ;;  %14600 = vst [vmem:[#allocation196_spill] sm:$0xff] %v11206_v9  ;;  %v11221_v47 = vsel %vm14605_vm6, %v2811_v12, %v11034_v48  ;;  %v2879_v20 = vrot.slane %v11181_v7, %v9313_v58  ;;  %v2870_v40 = vsel %vm1927_vm11, %v2869_v28, %v2865_v35  ;;  %v2943_v27 = vrot.slane %v11185_v2, %v9241_v56 }
 0x2d4   : > { %14602 = vst [vmem:[#allocation81_spill] sm:$0xff] %v11210_v5  ;;  %14604 = vst [vmem:[#allocation198_spill] sm:$0xff] %v11217_v33  ;;  %v2875_v26 = vsel %vm13900_vm12, %v2874_v59, %v2870_v40  ;;  %v11231_v3 = vadd.f32 %v10707_v45, %v14607_v30  ;;  %v2884_v44 = vrot.slane %v11191_v61, %v14301_v21  ;;  %v14611_v40 = vld [vmem:[#allocation197_spill] sm:$0xff]  ;;  %vm14613_vm0 = vcmask 458112   ;;  %v14614_v61 = vld [vmem:[#allocation200_spill] sm:$0xff] }
 0x2d5   : > { %14606 = vst [vmem:[#allocation249_spill] sm:$0xff] %v11221_v47  ;;  %v11237_v48 = vadd.f32 %v10707_v45, %v14609_v29  ;;  %v2939_v28 = vsel %vm1913_vm9, %v2938_v36, %v2934_v41  ;;  %v3007_v35 = vrot.slane %v11206_v9, %v9127_v62  ;;  %v2998_v59 = vsel %vm1885_vm5, %v2997_v32, %v2993_v50  ;;  %v14617_v9 = vld [vmem:[#allocation87_spill] sm:$0xff] }
 0x2d6   : > { %v11196_v53 = vpop.xlane.xlu1 %1538  ;;  %14608 = vst [vmem:[#allocation67_spill] sm:$0xff] %v11231_v3  ;;  %v11249_v30 = vadd.f32 %v10707_v45, %v14611_v40  ;;  %v2948_v2 = vrot.slane %v11210_v5, %v9199_v38  ;;  %v3003_v29 = vsel %vm14613_vm0, %v3002_v10, %v2998_v59  ;;  %v3012_v7 = vrot.slane %v11217_v33, %v9170_v8  ;;  %v14622_v40 = vld [vmem:[#allocation96_spill] sm:$0xff] }
 0x2d7   : > { %v11198_v39 = vpop.xlane.xlu0 %1536  ;;  %14610 = vst [vmem:[#allocation90_spill] sm:$0xff] %v11237_v48  ;;  %v11258_v41 = vadd.f32 %v10707_v45, %v14614_v61  ;;  %vm14616_vm6 = vcmask 720512   ;;  %v11263_v32 = vadd.f32 %v10707_v45, %v14617_v9  ;;  %v11267_v50 = vadd.f32 %v10707_v45, %v10781_v57 }
 0x2d8   : > { %14612 = vst [vmem:[#allocation197_spill] sm:$0xff] %v11249_v30  ;;  %v2944_v36 = vsel %vm14616_vm6, %v2943_v27, %v2939_v28  ;;  %v11271_v10 = vadd.f32 %v10707_v45, %v10783_v52  ;;  %v2880_v61 = vsel %vm1941_vm13, %v2879_v20, %v2875_v26  ;;  %v2953_v27 = vrot.slane %v11237_v48, %v9316_v60  ;;  %v14624_v26 = vld [vmem:[#allocation199_spill] sm:$0xff] }
 0x2d9   : > { %14615 = vst [vmem:[#allocation200_spill] sm:$0xff] %v11258_v41  ;;  %14618 = vst [vmem:[#allocation87_spill] sm:$0xff] %v11263_v32  ;;  %v11280_v9 = vadd.f32 %v10707_v45, %v10814_v6  ;;  %v11288_v52 = vadd.f32 %v10707_v45, %v14622_v40  ;;  %v3017_v59 = vrot.slane %v11249_v30, %v9155_v54  ;;  %vm14626_vm0 = vcmask 589312  }
 0x2da   : > { %v11239_v12 = vpop.xlane.xlu1 %1542  ;;  %14619 = vst [vmem:[#allocation250_spill] sm:$0xff] %v11267_v50  ;;  %14620 = vst [vmem:[#allocation251_spill] sm:$0xff] %v11271_v10  ;;  %v3008_v20 = vsel %vm1899_vm7, %v3007_v35, %v3003_v29  ;;  %v11295_v33 = vadd.f32 %v10707_v45, %v14624_v26  ;;  %v11298_v6 = vsel %vm1948_vm14, %v2884_v44, %v2880_v61 }
 0x2db   : > { %v11241_v22 = vpop.xlane.xlu0 %1540  ;;  %14621 = vst [vmem:[#allocation252_spill] sm:$0xff] %v11280_v9  ;;  %14623 = vst [vmem:[#allocation96_spill] sm:$0xff] %v11288_v52  ;;  %v2949_v5 = vsel %vm1927_vm11, %v2948_v2, %v2944_v36  ;;  %v3013_v48 = vsel %vm14626_vm0, %v3012_v7, %v3008_v20  ;;  %v3022_v40 = vrot.slane %v11258_v41, %v9241_v56  ;;  %v14628_v36 = vld [vmem:[#allocation205_spill] sm:$0xff]  ;;  %vm14653_vm0 = vcmask 458112  }
 0x2dc   : > { %14625 = vst [vmem:[#allocation199_spill] sm:$0xff] %v11295_v33  ;;  %v2958_v47 = vrot.slane %v11263_v32, %v9313_v58  ;;  %v3056_v35 = vrot.slane %v11267_v50, %v9041_v15  ;;  %v3052_v29 = vrot.slane %v11271_v10, %v9059_v51  ;;  %v11312_v44 = vadd.f32 %v10707_v45, %v10812_v31  ;;  %v14631_v10 = vld [vmem:[#allocation93_spill] sm:$0xff] }
 0x2dd   : > { %v2954_v2 = vsel %vm13900_vm12, %v2953_v27, %v2949_v5  ;;  %v11317_v7 = vadd.f32 %v10707_v45, %v14628_v36  ;;  %v3061_v61 = vrot.slane %v11280_v9, %v9067_v13  ;;  %v11323_v20 = vadd.f32 %v10707_v45, %v10846_v42  ;;  %v14633_v42 = vld [vmem:[#allocation204_spill] sm:$0xff] }
 0x2de   : > { %v11282_v28 = vpop.xlane.xlu1 %1546  ;;  %14627 = vst [vmem:[#allocation253_spill] sm:$0xff] %v11312_v44  ;;  %v11331_v31 = vadd.f32 %v10707_v45, %v14631_v10  ;;  %v2963_v5 = vrot.slane %v11288_v52, %v14301_v21  ;;  %v3027_v27 = vrot.slane %v11295_v33, %v9199_v38  ;;  %v3018_v36 = vsel %vm1913_vm9, %v3017_v59, %v3013_v48 }
 0x2df   : > { %v11284_v57 = vpop.xlane.xlu0 %1544  ;;  %14629 = vst [vmem:[#allocation205_spill] sm:$0xff] %v11317_v7  ;;  %14630 = vst [vmem:[#allocation254_spill] sm:$0xff] %v11323_v20  ;;  %v3023_v9 = vsel %vm14616_vm6, %v3022_v40, %v3018_v36  ;;  %v11341_v30 = vadd.f32 %v10707_v45, %v14633_v42  ;;  %v11345_v41 = vadd.f32 %v10707_v45, %v11069_v18  ;;  %vm14661_vm6 = vcmask 589312  }
 0x2e0   : > { %14632 = vst [vmem:[#allocation93_spill] sm:$0xff] %v11331_v31  ;;  %v11349_v10 = vadd.f32 %v10707_v45, %v11071_v55  ;;  %v3057_v32 = vsel %vm1857_vm1, %v3056_v35, %v3052_v29  ;;  %v3066_v33 = vrot.slane %v11312_v44, %v9090_v4  ;;  %v11356_v48 = vadd.f32 %v10707_v45, %v10844_v1  ;;  %v14645_v44 = vld [vmem:[#allocation211_spill] sm:$0xff] }
 0x2e1   : > { %14634 = vst [vmem:[#allocation204_spill] sm:$0xff] %v11341_v30  ;;  %14635 = vst [vmem:[#allocation255_spill] sm:$0xff] %v11345_v41  ;;  %v11360_v59 = vadd.f32 %v10707_v45, %v11113_v63  ;;  %v2959_v18 = vsel %vm1941_vm13, %v2958_v47, %v2954_v2  ;;  %v3032_v40 = vrot.slane %v11317_v7, %v9316_v60 }
 0x2e2   : > { %v11325_v26 = vpop.xlane.xlu1 %1550  ;;  %14636 = vst [vmem:[#allocation256_spill] sm:$0xff] %v11349_v10  ;;  %14637 = vst [vmem:[#allocation257_spill] sm:$0xff] %v11356_v48  ;;  %v3062_v55 = vsel %vm1864_vm2, %v3061_v61, %v3057_v32  ;;  %v3071_v35 = vrot.slane %v11323_v20, %v9110_v25  ;;  %v11375_v63 = vsel %vm1948_vm14, %v2963_v5, %v2959_v18 }
 0x2e3   : > { %v11327_v50 = vpop.xlane.xlu0 %1548  ;;  %14638 = vst [vmem:[#allocation258_spill] sm:$0xff] %v11360_v59  ;;  %v3028_v47 = vsel %vm1927_vm11, %v3027_v27, %v3023_v9  ;;  %v11380_v2 = vadd.f32 %v10707_v45, %v10878_v46  ;;  %v3037_v32 = vrot.slane %v11341_v30, %v9313_v58  ;;  %v3135_v61 = vrot.slane %v11345_v41, %v9041_v15  ;;  %v14642_v41 = vld [vmem:[#allocation210_spill] sm:$0xff] }
 0x2e4   : > { %v3131_v42 = vrot.slane %v11349_v10, %v9059_v51  ;;  %v11390_v1 = vadd.f32 %v10707_v45, %v11111_v34  ;;  %v3076_v9 = vrot.slane %v11356_v48, %v9107_v14  ;;  %v3067_v5 = vsel %vm1871_vm3, %v3066_v33, %v3062_v55 }
 0x2e5   : > { %14639 = vst [vmem:[#allocation259_spill] sm:$0xff] %v11380_v2  ;;  %v3140_v46 = vrot.slane %v11360_v59, %v9067_v13  ;;  %v11399_v27 = vadd.f32 %v10707_v45, %v11157_v24  ;;  %v3033_v18 = vsel %vm13900_vm12, %v3032_v40, %v3028_v47  ;;  %v11404_v10 = vadd.f32 %v10707_v45, %v14642_v41 }
 0x2e6   : > { %v11368_v29 = vpop.xlane.xlu1 %1554  ;;  %14640 = vst [vmem:[#allocation260_spill] sm:$0xff] %v11390_v1  ;;  %v3072_v34 = vsel %vm1878_vm4, %v3071_v35, %v3067_v5  ;;  %v11409_v48 = vadd.f32 %v10707_v45, %v10876_v11  ;;  %v11413_v59 = vadd.f32 %v10707_v45, %v14645_v44  ;;  %v3081_v24 = vrot.slane %v11380_v2, %v9152_v49 }
 0x2e7   : > { %v11370_v36 = vpop.xlane.xlu0 %1552  ;;  %14641 = vst [vmem:[#allocation261_spill] sm:$0xff] %v11399_v27  ;;  %14643 = vst [vmem:[#allocation210_spill] sm:$0xff] %v11404_v10  ;;  %v11425_v35 = vadd.f32 %v10707_v45, %v10910_v0  ;;  %v3136_v11 = vsel %vm1857_vm1, %v3135_v61, %v3131_v42  ;;  %v3145_v47 = vrot.slane %v11390_v1, %v9090_v4 }
 0x2e8   : > { %14644 = vst [vmem:[#allocation262_spill] sm:$0xff] %v11409_v48  ;;  %14646 = vst [vmem:[#allocation211_spill] sm:$0xff] %v11413_v59  ;;  %v11432_v44 = vadd.f32 %v10707_v45, %v11155_v16  ;;  %v3077_v5 = vsel %vm1885_vm5, %v3076_v9, %v3072_v34  ;;  %v11440_v0 = vadd.f32 %v10707_v45, %v11198_v39 }
 0x2e9   : > { %14649 = vst [vmem:[#allocation265_spill] sm:$0xff] %v11425_v35  ;;  %v3086_v61 = vrot.slane %v11409_v48, %v9127_v62  ;;  %v11446_v42 = vadd.f32 %v10707_v45, %v10908_v23  ;;  %v3082_v39 = vsel %vm14653_vm0, %v3081_v24, %v3077_v5  ;;  %v3091_v23 = vrot.slane %v11425_v35, %v9170_v8 }
 0x2ea   : > { %v1559_v33 = vpop.xlane.xlu1 %1558  ;;  %14650 = vst [vmem:[#allocation266_spill] sm:$0xff] %v11432_v44  ;;  %14651 = vst [vmem:[#allocation267_spill] sm:$0xff] %v11440_v0  ;;  %v3160_v24 = vrot.slane %v11440_v0, %v9152_v49  ;;  %v11476_v5 = vadd.f32 %v10707_v45, %v11241_v22 }
 0x2eb   : > { %v1557_v55 = vpop.xlane.xlu0 %1556  ;;  %v11418_v40 = vadd.f32 %v10707_v45, %v1559_v33  ;;  %v3141_v33 = vsel %vm1864_vm2, %v3140_v46, %v3136_v11  ;;  %14652 = vst [vmem:[#allocation268_spill] sm:$0xff] %v11446_v42  ;;  %v11453_v11 = vsel %vm1941_vm13, %v3037_v32, %v3033_v18  ;;  %v11469_v32 = vadd.f32 %v10707_v45, %v11196_v53 }
 0x2ec   : > { %v11421_v41 = vadd.f32 %v10707_v45, %v1557_v55  ;;  %v3150_v55 = vrot.slane %v11399_v27, %v9110_v25  ;;  %14657 = vst [vmem:[#allocation272_spill] sm:$0xff] %v11476_v5 }
 0x2ed   : > { %14647 = vst [vmem:[#allocation263_spill] sm:$0xff] %v11418_v40  ;;  %v3214_v16 = vrot.slane %v11418_v40, %v9041_v15  ;;  %v3155_v40 = vrot.slane %v11432_v44, %v9107_v14  ;;  %14656 = vst [vmem:[#allocation271_spill] sm:$0xff] %v11469_v32  ;;  %v11488_v44 = vadd.f32 %v10707_v45, %v10946_v43 }
 0x2ee   : > { %14648 = vst [vmem:[#allocation264_spill] sm:$0xff] %v11421_v41  ;;  %v3210_v9 = vrot.slane %v11421_v41, %v9059_v51  ;;  %v1563_v34 = vpop.xlane.xlu1 %1562  ;;  %v3146_v41 = vsel %vm1871_vm3, %v3145_v47, %v3141_v33  ;;  %v3087_v47 = vsel %vm1899_vm7, %v3086_v61, %v3082_v39  ;;  %v11503_v39 = vadd.f32 %v10707_v45, %v11239_v12 }
 0x2ef   : > { %v1561_v46 = vpop.xlane.xlu0 %1560  ;;  %v11460_v27 = vadd.f32 %v10707_v45, %v1563_v34  ;;  %v3151_v18 = vsel %vm1878_vm4, %v3150_v55, %v3146_v41  ;;  %v3096_v34 = vrot.slane %v11446_v42, %v9155_v54  ;;  %14658 = vst [vmem:[#allocation273_spill] sm:$0xff] %v11488_v44  ;;  %v3092_v61 = vsel %vm14661_vm6, %v3091_v23, %v3087_v47 }
 0x2f0   : > { %v11457_v1 = vadd.f32 %v10707_v45, %v1561_v46  ;;  %v3215_v53 = vsel %vm1857_vm1, %v3214_v16, %v3210_v9  ;;  %v3165_v16 = vrot.slane %v11469_v32, %v9127_v62  ;;  %v3156_v9 = vsel %vm1885_vm5, %v3155_v40, %v3151_v18  ;;  %14662 = vst [vmem:[#allocation276_spill] sm:$0xff] %v11503_v39 }
 0x2f1   : > { %14655 = vst [vmem:[#allocation270_spill] sm:$0xff] %v11460_v27  ;;  %v3224_v41 = vrot.slane %v11460_v27, %v9090_v4  ;;  %v3161_v43 = vsel %vm14653_vm0, %v3160_v24, %v3156_v9  ;;  %v11518_v40 = vadd.f32 %v10707_v45, %v10944_v17  ;;  %v3097_v17 = vsel %vm1913_vm9, %v3096_v34, %v3092_v61 }
 0x2f2   : > { %14654 = vst [vmem:[#allocation269_spill] sm:$0xff] %v11457_v1  ;;  %v3219_v46 = vrot.slane %v11457_v1, %v9067_v13  ;;  %v1567_v55 = vpop.xlane.xlu1 %1566  ;;  %v11553_v61 = vadd.f32 %v10707_v45, %v11327_v50  ;;  %vm14670_vm0 = vcmask 720512  }
 0x2f3   : > { %v1565_v33 = vpop.xlane.xlu0 %1564  ;;  %v11495_v0 = vadd.f32 %v10707_v45, %v1567_v55  ;;  %14664 = vst [vmem:[#allocation278_spill] sm:$0xff] %v11518_v40 }
 0x2f4   : > { %v3220_v22 = vsel %vm1864_vm2, %v3219_v46, %v3215_v53  ;;  %v11492_v1 = vadd.f32 %v10707_v45, %v1565_v33  ;;  %v3170_v46 = vrot.slane %v11476_v5, %v9170_v8  ;;  %v11510_v53 = vadd.f32 %v10707_v45, %v11284_v57  ;;  %14669 = vst [vmem:[#allocation283_spill] sm:$0xff] %v11553_v61 }
 0x2f5   : > { %14660 = vst [vmem:[#allocation275_spill] sm:$0xff] %v11495_v0  ;;  %v3225_v12 = vsel %vm1871_vm3, %v3224_v41, %v3220_v22  ;;  %v3234_v18 = vrot.slane %v11495_v0, %v9107_v14  ;;  %v3101_v57 = vrot.slane %v11488_v44, %v9241_v56  ;;  %v11535_v41 = vadd.f32 %v10707_v45, %v10988_v37 }
 0x2f6   : > { %14659 = vst [vmem:[#allocation274_spill] sm:$0xff] %v11492_v1  ;;  %14663 = vst [vmem:[#allocation277_spill] sm:$0xff] %v11510_v53  ;;  %v3229_v23 = vrot.slane %v11492_v1, %v9110_v25  ;;  %v1571_v33 = vpop.xlane.xlu1 %1570  ;;  %v3175_v22 = vrot.slane %v11503_v39, %v9155_v54  ;;  %v3166_v0 = vsel %vm1899_vm7, %v3165_v16, %v3161_v43  ;;  %v14674_v1 = vld [vmem:[#allocation239_spill] sm:$0xff] }
 0x2f7   : > { %v1569_v24 = vpop.xlane.xlu0 %1568  ;;  %v11530_v47 = vadd.f32 %v10707_v45, %v1571_v33  ;;  %14667 = vst [vmem:[#allocation281_spill] sm:$0xff] %v11535_v41  ;;  %v3171_v27 = vsel %vm14661_vm6, %v3170_v46, %v3166_v0  ;;  %v3106_v37 = vrot.slane %v11518_v40, %v9199_v38  ;;  %v3102_v46 = vsel %vm14670_vm0, %v3101_v57, %v3097_v17 }
 0x2f8   : > { %v3230_v55 = vsel %vm1878_vm4, %v3229_v23, %v3225_v12  ;;  %v11527_v9 = vadd.f32 %v10707_v45, %v1569_v24  ;;  %v11543_v23 = vadd.f32 %v10707_v45, %v11282_v28  ;;  %v3180_v12 = vrot.slane %v11510_v53, %v9241_v56 }
 0x2f9   : > { %14666 = vst [vmem:[#allocation280_spill] sm:$0xff] %v11530_v47  ;;  %v3235_v16 = vsel %vm1885_vm5, %v3234_v18, %v3230_v55  ;;  %v3244_v0 = vrot.slane %v11530_v47, %v9127_v62  ;;  %vm14671_vm6 = vcmask 458112   ;;  %v11568_v50 = vadd.f32 %v10707_v45, %v14674_v1  ;;  %v14676_v55 = vld [vmem:[#allocation242_spill] sm:$0xff] }
 0x2fa   : > { %14665 = vst [vmem:[#allocation279_spill] sm:$0xff] %v11527_v9  ;;  %14668 = vst [vmem:[#allocation282_spill] sm:$0xff] %v11543_v23  ;;  %v3239_v34 = vrot.slane %v11527_v9, %v9152_v49  ;;  %v1575_v43 = vpop.xlane.xlu1 %1574  ;;  %v3111_v18 = vrot.slane %v11535_v41, %v9316_v60  ;;  %v11574_v47 = vadd.f32 %v10707_v45, %v14676_v55 }
 0x2fb   : > { %v1573_v28 = vpop.xlane.xlu0 %1572  ;;  %v11564_v9 = vadd.f32 %v10707_v45, %v1575_v43  ;;  %14675 = vst [vmem:[#allocation239_spill] sm:$0xff] %v11568_v50  ;;  %v3176_v57 = vsel %vm1913_vm9, %v3175_v22, %v3171_v27  ;;  %v3185_v17 = vrot.slane %v11543_v23, %v9199_v38  ;;  %v11590_v43 = vadd.f32 %v10707_v45, %v11370_v36 }
 0x2fc   : > { %v3240_v24 = vsel %vm14671_vm6, %v3239_v34, %v3235_v16  ;;  %v11561_v33 = vadd.f32 %v10707_v45, %v1573_v28  ;;  %14677 = vst [vmem:[#allocation242_spill] sm:$0xff] %v11574_v47  ;;  %v3181_v34 = vsel %vm14670_vm0, %v3180_v12, %v3176_v57  ;;  %v11582_v16 = vadd.f32 %v10707_v45, %v11325_v26 }
 0x2fd   : > { %14673 = vst [vmem:[#allocation285_spill] sm:$0xff] %v11564_v9  ;;  %v3190_v28 = vrot.slane %v11553_v61, %v9316_v60  ;;  %14679 = vst [vmem:[#allocation287_spill] sm:$0xff] %v11590_v43  ;;  %v3245_v27 = vsel %vm1899_vm7, %v3244_v0, %v3240_v24  ;;  %v3254_v22 = vrot.slane %v11564_v9, %v9155_v54  ;;  %vm14680_vm6 = vcmask 589312   ;;  %v14683_v24 = vld [vmem:[#allocation241_spill] sm:$0xff] }
 0x2fe   : > { %14672 = vst [vmem:[#allocation284_spill] sm:$0xff] %v11561_v33  ;;  %14678 = vst [vmem:[#allocation286_spill] sm:$0xff] %v11582_v16  ;;  %v3249_v1 = vrot.slane %v11561_v33, %v9170_v8  ;;  %v1579_v55 = vpop.xlane.xlu1 %1578  ;;  %v3107_v26 = vsel %vm1927_vm11, %v3106_v37, %v3102_v46  ;;  %v3116_v36 = vrot.slane %v11568_v50, %v9313_v58 }
 0x2ff   : > { %v1577_v12 = vpop.xlane.xlu0 %1576  ;;  %v11601_v23 = vadd.f32 %v10707_v45, %v1579_v55  ;;  %v3112_v0 = vsel %vm13900_vm12, %v3111_v18, %v3107_v26  ;;  %v11608_v9 = vadd.f32 %v10707_v45, %v14683_v24  ;;  %v3121_v37 = vrot.slane %v11574_v47, %v14301_v21 }
 0x300   : > { %v3250_v57 = vsel %vm14680_vm6, %v3249_v1, %v3245_v27  ;;  %v11598_v33 = vadd.f32 %v10707_v45, %v1577_v12  ;;  %v3195_v46 = vrot.slane %v11582_v16, %v9313_v58  ;;  %v3186_v1 = vsel %vm1927_vm11, %v3185_v17, %v3181_v34 }
 0x301   : > { %14682 = vst [vmem:[#allocation289_spill] sm:$0xff] %v11601_v23  ;;  %14684 = vst [vmem:[#allocation241_spill] sm:$0xff] %v11608_v9  ;;  %v11617_v27 = vadd.f32 %v10707_v45, %v11368_v29  ;;  %v3191_v18 = vsel %vm13900_vm12, %v3190_v28, %v3186_v1  ;;  %v3200_v55 = vrot.slane %v11590_v43, %v14301_v21  ;;  %vm14694_vm6 = vcmask 1042434  }
 0x302   : > { %14681 = vst [vmem:[#allocation288_spill] sm:$0xff] %v11598_v33  ;;  %v3259_v12 = vrot.slane %v11598_v33, %v9241_v56  ;;  %v3255_v26 = vsel %vm1913_vm9, %v3254_v22, %v3250_v57  ;;  %v3264_v24 = vrot.slane %v11601_v23, %v9199_v38  ;;  %v1583_v39 = vpop.xlane.xlu1 %1582  ;;  %v3047_v17 = vrot.slane %v11404_v10, %v14542_v19 }
 0x303   : > { %14685 = vst [vmem:[#allocation290_spill] sm:$0xff] %v11617_v27  ;;  %v1581_v16 = vpop.xlane.xlu0 %1580  ;;  %v11634_v28 = vadd.f32 %v10707_v45, %v1583_v39  ;;  %v14688_v22 = vrot.slane %v11231_v3, %v14542_v19  ;;  %v14689_v1 = vrot.slane %v11413_v59, %v14301_v21  ;;  %v3196_v33 = vsel %vm1941_vm13, %v3195_v46, %v3191_v18 }
 0x304   : > { %v3260_v29 = vsel %vm14670_vm0, %v3259_v12, %v3255_v26  ;;  %v11631_v34 = vadd.f32 %v10707_v45, %v1581_v16  ;;  %v3126_v12 = vrot.slane %v11608_v9, %v14542_v19  ;;  %v3117_v16 = vsel %vm1941_vm13, %v3116_v36, %v3112_v0 }
 0x305   : > { %14687 = vst [vmem:[#allocation292_spill] sm:$0xff] %v11634_v28  ;;  %v2890_v57 = vsel %vm1955_vm15, %v14688_v22, %v11298_v6  ;;  %v3043_v23 = vsel %vm1948_vm14, %v14689_v1, %v11453_v11  ;;  %v3122_v39 = vsel %vm1948_vm14, %v3121_v37, %v3117_v16  ;;  %v3205_v26 = vrot.slane %v11617_v27, %v14542_v19 }
 0x306   : > { %14686 = vst [vmem:[#allocation291_spill] sm:$0xff] %v11631_v34  ;;  %v3269_v6 = vrot.slane %v11631_v34, %v9316_v60  ;;  %v14690_v22 = vrot.slane %v11331_v31, %v14542_v19  ;;  %v3201_v1 = vsel %vm1948_vm14, %v3200_v55, %v3196_v33  ;;  %v3265_v36 = vsel %vm1927_vm11, %v3264_v24, %v3260_v29  ;;  %v1587_v16 = vpop.xlane.xlu1 %1586  ;;  %v11674_v55 = vld [vmem:[#allocation2] sm:$0xff] }
 0x307   : > { %v3274_v0 = vrot.slane %v11634_v28, %v9313_v58  ;;  %v1585_v37 = vpop.xlane.xlu0 %1584  ;;  %v3048_v46 = vsel %vm1955_vm15, %v3047_v17, %v3043_v23  ;;  %v11670_v27 = vadd.f32 %v10707_v45, %v1587_v16  ;;  %v3127_v24 = vsel %vm1955_vm15, %v3126_v12, %v3122_v39 }
 0x308   : > { %v2969_v11 = vsel %vm1955_vm15, %v14690_v22, %v11375_v63  ;;  %v3270_v18 = vsel %vm13900_vm12, %v3269_v6, %v3265_v36  ;;  %v11667_v34 = vadd.f32 %v10707_v45, %v1585_v37  ;;  %v14693_v63 = vld [vmem:[#allocation249_spill] sm:$0xff]  ;;  %v3206_v17 = vsel %vm1955_vm15, %v3205_v26, %v3201_v1 }
 0x309   : > { %14692 = vst [vmem:[#allocation294_spill] sm:$0xff] %v11670_v27  ;;  %v3287_v33 = vsel %vm14694_vm6, %v2890_v57, %v14693_v63  ;;  %14695 = vst [vmem:[#allocation249_spill] sm:$0xff] %v11674_v55  ;;  %v3284_v23 = vrot.slane %v11670_v27, %v14542_v19  ;;  %vm14696_vm0 = vcmask 1043459   ;;  %v3275_v45 = vsel %vm1941_vm13, %v3274_v0, %v3270_v18  ;;  %v14700_v0 = vld [vmem:[#allocation31_spill] sm:$0xff]  ;;  %v14701_v18 = vld [vmem:[#allocation113_spill] sm:$0xff] }
 0x30a   : > { %14691 = vst [vmem:[#allocation293_spill] sm:$0xff] %v11667_v34  ;;  %v3279_v29 = vrot.slane %v11667_v34, %v14301_v21  ;;  %v3288_v6 = vsel %vm14696_vm0, %v2969_v11, %v3287_v33  ;;  %vm13942_vm12 = vcmask 7168   ;;  %vm14698_vm6 = vcmask 1046534   ;;  %v14702_v33 = vld [vmem:[#allocation116_spill] sm:$0xff] }
 0x30b   : > { %v3297_v22 = vpop.xlane.xlu0 %3296  ;;  %v3289_v57 = vsel %vm2516_vm8, %v3048_v46, %v3288_v6  ;;  %vm14699_vm0 = vcmask 1047559  }
 0x30c   : > { %v11686_v36 = vmax.f32 %v11674_v55, %v3297_v22  ;;  %v3280_v12 = vsel %vm1948_vm14, %v3279_v29, %v3275_v45  ;;  %v3290_v39 = vsel %vm13945_vm10, %v3127_v24, %v3289_v57  ;;  %v14703_v29 = vld [vmem:[#allocation117_spill] sm:$0xff] }
 0x30d   : > { %v3285_v37 = vsel %vm1955_vm15, %v3284_v23, %v3280_v12  ;;  %v3291_v16 = vsel %vm14698_vm6, %v3206_v17, %v3290_v39  ;;  %v14704_v17 = vld [vmem:[#allocation139_spill] sm:$0xff]  ;;  %v14705_v12 = vld [vmem:[#allocation120_spill] sm:$0xff]  ;;  %vm14889_vm6 = vcmask 458112  }
 0x30e   : > { %14697 = vst [vmem:[#allocation295_spill] sm:$0xff] %v11686_v36  ;;  %4889 = vst.msk [vmem:[#allocation2] sm:$0xff] %vm13942_vm12, %v11686_v36  ;;  %3306 = vperm.xlu1 %7260, %v11686_v36   ;;  %v3292_v11 = vsel %vm14699_vm0, %v3285_v37, %v3291_v16  ;;  %v14706_v16 = vld [vmem:[#allocation144_spill] sm:$0xff] }
 0x30f   : > { %3294 = vst [vmem:[%s8152_s24] sm:$0xff] %v3292_v11  ;;  %vm14890_vm0 = vmmov %vm14889_vm6 }
 0x310   : > { %vm14891_vm12 = vmmov %vm14890_vm0 }
 0x38d   : > { %v11699_v1 = vpop.permute.xlu1 %3306 }
 0x38e   : > { %v11703_v46 = vrot.slane %v11699_v1, %v14700_v0 }
 0x390   : > { %v3349_v63 = vsub.f32 %v14701_v18, %v11703_v46  ;;  %v3348_v24 = vsub.f32 %v14702_v33, %v11703_v46  ;;  %v3350_v23 = vsub.f32 %v14703_v29, %v11703_v46  ;;  %v3357_v6 = vsub.f32 %v14704_v17, %v11703_v46  ;;  %v14707_v33 = vld [vmem:[#allocation123_spill] sm:$0xff] }
 0x391   : > { %v3351_v39 = vsub.f32 %v14705_v12, %v11703_v46  ;;  %v3359_v11 = vsub.f32 %v14706_v16, %v11703_v46  ;;  %v3352_v29 = vsub.f32 %v14707_v33, %v11703_v46  ;;  %v14709_v17 = vld [vmem:[#allocation127_spill] sm:$0xff] }
 0x392   : > { %v3478_v45 = vmul.f32 1.442695, %v3349_v63  ;;  %v3476_v22 = vmul.f32 1.442695, %v3348_v24  ;;  %v3480_v57 = vmul.f32 1.442695, %v3350_v23 }
 0x393   : > { %v3494_v37 = vmul.f32 1.442695, %v3357_v6  ;;  %v3482_v18 = vmul.f32 1.442695, %v3351_v39  ;;  %v3498_v26 = vmul.f32 1.442695, %v3359_v11 }
 0x394   : > { %7262 = vpow2.f32 %v3478_v45  ;;  %v14708_v63 = vld [vmem:[#allocation157_spill] sm:$0xff]  ;;  %v3484_v23 = vmul.f32 1.442695, %v3352_v29  ;;  %v3353_v45 = vsub.f32 %v14709_v17, %v11703_v46  ;;  %v14711_v12 = vld [vmem:[#allocation63_spill] sm:$0xff] }
 0x395   : > { %7264 = vpow2.f32 %v3476_v22  ;;  %v3361_v24 = vsub.f32 %v14708_v63, %v11703_v46  ;;  %v14710_v22 = vld [vmem:[#allocation100_spill] sm:$0xff]  ;;  %v3363_v39 = vsub.f32 %v14711_v12, %v11703_v46 }
 0x396   : > { %7266 = vpow2.f32 %v3480_v57  ;;  %v11725_v6 = vrot.slane %v11699_v1, %v14710_v22  ;;  %v3486_v11 = vmul.f32 1.442695, %v3353_v45  ;;  %v14713_v63 = vld [vmem:[#allocation124_spill] sm:$0xff]  ;;  %v14715_v45 = vld [vmem:[#allocation130_spill] sm:$0xff] }
 0x397   : > { %7268 = vpow2.f32 %v3494_v37  ;;  %v3502_v57 = vmul.f32 1.442695, %v3361_v24  ;;  %v3506_v29 = vmul.f32 1.442695, %v3363_v39  ;;  %v14714_v12 = vld [vmem:[#allocation132_spill] sm:$0xff] }
 0x398   : > { %7270 = vpow2.f32 %v3482_v18  ;;  %v14712_v18 = vld [vmem:[#allocation129_spill] sm:$0xff]  ;;  %v3365_v17 = vsub.f32 %v14713_v63, %v11725_v6  ;;  %v14716_v63 = vld [vmem:[#allocation136_spill] sm:$0xff] }
 0x399   : > { %7272 = vpow2.f32 %v3498_v26  ;;  %v3354_v33 = vsub.f32 %v14712_v18, %v11703_v46 }
 0x39a   : > { %7274 = vpow2.f32 %v3484_v23  ;;  %v3510_v23 = vmul.f32 1.442695, %v3365_v17 }
 0x39b   : > { %7276 = vpow2.f32 %v3502_v57  ;;  %v3488_v24 = vmul.f32 1.442695, %v3354_v33  ;;  %v14717_v33 = vld [vmem:[#allocation137_spill] sm:$0xff] }
 0x39c   : > { %7278 = vpow2.f32 %v3486_v11 }
 0x39d   : > { %7280 = vpow2.f32 %v3506_v29 }
 0x39e   : > { %v7263_v16 = vpop.eup %7262  ;;  %7282 = vpow2.f32 %v3488_v24 }
 0x39f   : > { %v7265_v37 = vpop.eup %7264  ;;  %3864 = vperm.xlu1 %7260, %v7263_v16   ;;  %v3355_v16 = vsub.f32 %v14714_v12, %v11703_v46  ;;  %7284 = vpow2.f32 %v3510_v23 }
 0x3a0   : > { %3861 = vperm.xlu0 %7261, %v7265_v37   ;;  %v7267_v27 = vpop.eup %7266  ;;  %v3367_v37 = vsub.f32 %v14715_v45, %v11725_v6  ;;  %v14718_v45 = vld [vmem:[#allocation140_spill] sm:$0xff] }
 0x3a1   : > { %v7269_v26 = vpop.eup %7268  ;;  %v3490_v39 = vmul.f32 1.442695, %v3355_v16  ;;  %v14719_v16 = vld [vmem:[#allocation141_spill] sm:$0xff] }
 0x3a2   : > { %v7271_v18 = vpop.eup %7270  ;;  %v3514_v11 = vmul.f32 1.442695, %v3367_v37 }
 0x3a3   : > { %3867 = vperm.xlu1 %7260, %v7267_v27   ;;  %v7273_v57 = vpop.eup %7272  ;;  %v3356_v27 = vsub.f32 %v14716_v63, %v11703_v46  ;;  %7286 = vpow2.f32 %v3490_v39 }
 0x3a4   : > { %3888 = vperm.xlu0 %7261, %v7269_v26   ;;  %v3369_v26 = vsub.f32 %v14717_v33, %v11725_v6  ;;  %v7275_v12 = vpop.eup %7274  ;;  %7288 = vpow2.f32 %v3514_v11  ;;  %v14720_v33 = vld [vmem:[#allocation150_spill] sm:$0xff] }
 0x3a5   : > { %v7277_v29 = vpop.eup %7276  ;;  %v3492_v17 = vmul.f32 1.442695, %v3356_v27  ;;  %v14721_v27 = vld [vmem:[#allocation145_spill] sm:$0xff] }
 0x3a6   : > { %v3518_v24 = vmul.f32 1.442695, %v3369_v26  ;;  %v7279_v63 = vpop.eup %7278 }
 0x3a7   : > { %3870 = vperm.xlu1 %7260, %v7271_v18   ;;  %v3358_v18 = vsub.f32 %v14718_v45, %v11703_v46  ;;  %v7281_v23 = vpop.eup %7280  ;;  %7290 = vpow2.f32 %v3492_v17 }
 0x3a8   : > { %3894 = vperm.xlu0 %7261, %v7273_v57   ;;  %v3371_v57 = vsub.f32 %v14719_v16, %v11725_v6  ;;  %7292 = vpow2.f32 %v3518_v24  ;;  %v7283_v45 = vpop.eup %7282  ;;  %v14722_v16 = vld [vmem:[#allocation159_spill] sm:$0xff] }
 0x3a9   : > { %v3496_v37 = vmul.f32 1.442695, %v3358_v18  ;;  %v7285_v11 = vpop.eup %7284  ;;  %v14723_v18 = vld [vmem:[#allocation152_spill] sm:$0xff] }
 0x3aa   : > { %v3522_v39 = vmul.f32 1.442695, %v3371_v57 }
 0x3ab   : > { %3873 = vperm.xlu1 %7260, %v7275_v12   ;;  %v3360_v12 = vsub.f32 %v14720_v33, %v11703_v46  ;;  %7294 = vpow2.f32 %v3496_v37 }
 0x3ac   : > { %3900 = vperm.xlu0 %7261, %v7277_v29   ;;  %v3373_v29 = vsub.f32 %v14721_v27, %v11725_v6  ;;  %7296 = vpow2.f32 %v3522_v39  ;;  %v14724_v27 = vld [vmem:[#allocation125_spill] sm:$0xff] }
 0x3ad   : > { %v3500_v26 = vmul.f32 1.442695, %v3360_v12  ;;  %v7287_v33 = vpop.eup %7286 }
 0x3ae   : > { %v3526_v17 = vmul.f32 1.442695, %v3373_v29  ;;  %v7289_v24 = vpop.eup %7288 }
 0x3af   : > { %3876 = vperm.xlu1 %7260, %v7279_v63   ;;  %v3362_v63 = vsub.f32 %v14722_v16, %v11703_v46  ;;  %7298 = vpow2.f32 %v3500_v26  ;;  %v14726_v46 = vld [vmem:[#allocation160_spill] sm:$0xff] }
 0x3b0   : > { %3906 = vperm.xlu0 %7261, %v7281_v23   ;;  %v3375_v23 = vsub.f32 %v14723_v18, %v11725_v6  ;;  %7300 = vpow2.f32 %v3526_v17  ;;  %v3377_v39 = vsub.f32 %v14726_v46, %v11725_v6 }
 0x3b1   : > { %v3504_v57 = vmul.f32 1.442695, %v3362_v63  ;;  %v7291_v29 = vpop.eup %7290 }
 0x3b2   : > { %v3530_v12 = vmul.f32 1.442695, %v3375_v23  ;;  %v7293_v16 = vpop.eup %7292  ;;  %v3534_v17 = vmul.f32 1.442695, %v3377_v39  ;;  %v14728_v23 = vld [vmem:[#allocation77_spill] sm:$0xff] }
 0x3b3   : > { %3879 = vperm.xlu1 %7260, %v7283_v45   ;;  %v3364_v45 = vsub.f32 %v14724_v27, %v11725_v6  ;;  %7302 = vpow2.f32 %v3504_v57 }
 0x3b4   : > { %3912 = vperm.xlu0 %7261, %v7285_v11   ;;  %v14725_v11 = vld [vmem:[#allocation30_spill] sm:$0xff]  ;;  %7304 = vpow2.f32 %v3530_v12 }
 0x3b5   : > { %v13902_v37 = vsub.s32 2, %v14725_v11  ;;  %v3508_v18 = vmul.f32 1.442695, %v3364_v45  ;;  %v7295_v27 = vpop.eup %7294  ;;  %v14729_v45 = vld [vmem:[#allocation131_spill] sm:$0xff] }
 0x3b6   : > { %v7297_v46 = vpop.eup %7296 }
 0x3b7   : > { %3882 = vperm.xlu1 %7260, %v7287_v33   ;;  %v14727_v33 = vld [vmem:[#allocation126_spill] sm:$0xff]  ;;  %v11763_v63 = vrot.slane %v11699_v1, %v13902_v37  ;;  %7306 = vpow2.f32 %v3508_v18 }
 0x3b8   : > { %3918 = vperm.xlu0 %7261, %v7289_v24   ;;  %v3366_v26 = vsub.f32 %v14727_v33, %v11725_v6  ;;  %v3379_v24 = vsub.f32 %v14728_v23, %v11725_v6  ;;  %7308 = vpow2.f32 %v3534_v17  ;;  %v14730_v33 = vld [vmem:[#allocation155_spill] sm:$0xff]  ;;  %v14731_v23 = vld [vmem:[#allocation138_spill] sm:$0xff] }
 0x3b9   : > { %v3381_v37 = vsub.f32 %v14730_v33, %v11763_v63  ;;  %v7299_v28 = vpop.eup %7298  ;;  %v14733_v33 = vld [vmem:[#allocation142_spill] sm:$0xff] }
 0x3ba   : > { %v3512_v57 = vmul.f32 1.442695, %v3366_v26  ;;  %v7301_v12 = vpop.eup %7300  ;;  %v14732_v26 = vld [vmem:[#allocation161_spill] sm:$0xff] }
 0x3bb   : > { %3885 = vperm.xlu1 %7260, %v7291_v29   ;;  %v3368_v29 = vsub.f32 %v14729_v45, %v11725_v6  ;;  %v3542_v18 = vmul.f32 1.442695, %v3381_v37 }
 0x3bc   : > { %3924 = vperm.xlu0 %7261, %v7293_v16   ;;  %v3538_v16 = vmul.f32 1.442695, %v3379_v24  ;;  %7310 = vpow2.f32 %v3512_v57 }
 0x3bd   : > { %v3516_v39 = vmul.f32 1.442695, %v3368_v29  ;;  %v7303_v45 = vpop.eup %7302  ;;  %v14734_v29 = vld [vmem:[#allocation32_spill] sm:$0xff] }
 0x3be   : > { %7312 = vpow2.f32 %v3538_v16  ;;  %v7305_v17 = vpop.eup %7304 }
 0x3bf   : > { %3891 = vperm.xlu1 %7260, %v7295_v27   ;;  %v3370_v27 = vsub.f32 %v14731_v23, %v11725_v6  ;;  %7314 = vpow2.f32 %v3516_v39 }
 0x3c0   : > { %3930 = vperm.xlu0 %7261, %v7297_v46   ;;  %v3383_v46 = vsub.f32 %v14732_v26, %v11763_v63  ;;  %7316 = vpow2.f32 %v3542_v18  ;;  %v14735_v26 = vld [vmem:[#allocation146_spill] sm:$0xff] }
 0x3c1   : > { %v3520_v24 = vmul.f32 1.442695, %v3370_v27  ;;  %v7307_v23 = vpop.eup %7306  ;;  %v14736_v27 = vld [vmem:[#allocation80_spill] sm:$0xff] }
 0x3c2   : > { %v3546_v57 = vmul.f32 1.442695, %v3383_v46  ;;  %v7309_v16 = vpop.eup %7308 }
 0x3c3   : > { %3897 = vperm.xlu1 %7260, %v7299_v28   ;;  %v3372_v28 = vsub.f32 %v14733_v33, %v11725_v6  ;;  %7318 = vpow2.f32 %v3520_v24 }
 0x3c4   : > { %3936 = vperm.xlu0 %7261, %v7301_v12   ;;  %v3385_v12 = vsub.f32 %v14734_v29, %v11763_v63  ;;  %7320 = vpow2.f32 %v3546_v57  ;;  %v14737_v29 = vld [vmem:[#allocation154_spill] sm:$0xff] }
 0x3c5   : > { %v3524_v37 = vmul.f32 1.442695, %v3372_v28  ;;  %v14738_v28 = vld [vmem:[#allocation83_spill] sm:$0xff] }
 0x3c6   : > { %v3550_v39 = vmul.f32 1.442695, %v3385_v12  ;;  %v7311_v33 = vpop.eup %7310 }
 0x3c7   : > { %3903 = vperm.xlu1 %7260, %v7303_v45   ;;  %v3374_v45 = vsub.f32 %v14735_v26, %v11725_v6  ;;  %7322 = vpow2.f32 %v3524_v37 }
 0x3c8   : > { %3942 = vperm.xlu0 %7261, %v7305_v17   ;;  %v3387_v17 = vsub.f32 %v14736_v27, %v11763_v63  ;;  %v7313_v18 = vpop.eup %7312  ;;  %7324 = vpow2.f32 %v3550_v39  ;;  %v14739_v27 = vld [vmem:[#allocation73_spill] sm:$0xff] }
 0x3c9   : > { %v3528_v46 = vmul.f32 1.442695, %v3374_v45  ;;  %v7315_v26 = vpop.eup %7314  ;;  %v14740_v45 = vld [vmem:[#allocation38_spill] sm:$0xff] }
 0x3ca   : > { %v3554_v24 = vmul.f32 1.442695, %v3387_v17  ;;  %v7317_v57 = vpop.eup %7316 }
 0x3cb   : > { %3909 = vperm.xlu1 %7260, %v7307_v23   ;;  %v3376_v23 = vsub.f32 %v14737_v29, %v11725_v6  ;;  %7326 = vpow2.f32 %v3528_v46  ;;  %v13904_v46 = vsub.s32 3, %v14725_v11 }
 0x3cc   : > { %3948 = vperm.xlu0 %7261, %v7309_v16   ;;  %v3389_v16 = vsub.f32 %v14738_v28, %v11763_v63  ;;  %7328 = vpow2.f32 %v3554_v24  ;;  %v14741_v28 = vld [vmem:[#allocation156_spill] sm:$0xff] }
 0x3cd   : > { %v3532_v12 = vmul.f32 1.442695, %v3376_v23  ;;  %v7319_v29 = vpop.eup %7318 }
 0x3ce   : > { %v3558_v37 = vmul.f32 1.442695, %v3389_v16  ;;  %v7321_v39 = vpop.eup %7320 }
 0x3cf   : > { %3915 = vperm.xlu1 %7260, %v7311_v33   ;;  %v3378_v33 = vsub.f32 %v14739_v27, %v11725_v6  ;;  %7330 = vpow2.f32 %v3532_v12  ;;  %v14742_v6 = vld [vmem:[#allocation41_spill] sm:$0xff] }
 0x3d0   : > { %3954 = vperm.xlu0 %7261, %v7313_v18   ;;  %v3391_v18 = vsub.f32 %v14740_v45, %v11763_v63  ;;  %7332 = vpow2.f32 %v3558_v37  ;;  %v3393_v24 = vsub.f32 %v14742_v6, %v11763_v63  ;;  %v14743_v45 = vld [vmem:[#allocation158_spill] sm:$0xff] }
 0x3d1   : > { %v3536_v17 = vmul.f32 1.442695, %v3378_v33  ;;  %v7323_v16 = vpop.eup %7322  ;;  %v3382_v12 = vsub.f32 %v14743_v45, %v11763_v63  ;;  %v11801_v33 = vrot.slane %v11699_v1, %v13904_v46 }
 0x3d2   : > { %v3562_v23 = vmul.f32 1.442695, %v3391_v18  ;;  %v3566_v37 = vmul.f32 1.442695, %v3393_v24  ;;  %v14744_v18 = vld [vmem:[#allocation42_spill] sm:$0xff] }
 0x3d3   : > { %3921 = vperm.xlu1 %7260, %v7315_v26   ;;  %v3380_v26 = vsub.f32 %v14741_v28, %v11763_v63  ;;  %7334 = vpow2.f32 %v3536_v17  ;;  %v3544_v17 = vmul.f32 1.442695, %v3382_v12  ;;  %v14748_v12 = vld [vmem:[#allocation85_spill] sm:$0xff] }
 0x3d4   : > { %3960 = vperm.xlu0 %7261, %v7317_v57   ;;  %v7325_v57 = vpop.eup %7324  ;;  %7336 = vpow2.f32 %v3562_v23 }
 0x3d5   : > { %v3540_v27 = vmul.f32 1.442695, %v3380_v26  ;;  %v14745_v26 = vld [vmem:[#allocation162_spill] sm:$0xff] }
 0x3d6   : > { %v3384_v6 = vsub.f32 %v14745_v26, %v11763_v63 }
 0x3d7   : > { %3927 = vperm.xlu1 %7260, %v7319_v29   ;;  %v3395_v29 = vsub.f32 %v14744_v18, %v11763_v63  ;;  %7338 = vpow2.f32 %v3540_v27  ;;  %v14747_v18 = vld [vmem:[#allocation72_spill] sm:$0xff] }
 0x3d8   : > { %3966 = vperm.xlu0 %7261, %v7321_v39   ;;  %v7327_v39 = vpop.eup %7326  ;;  %7340 = vpow2.f32 %v3566_v37  ;;  %v3548_v24 = vmul.f32 1.442695, %v3384_v6  ;;  %v14750_v6 = vld [vmem:[#allocation92_spill] sm:$0xff] }
 0x3d9   : > { %v7329_v28 = vpop.eup %7328  ;;  %7342 = vpow2.f32 %v3544_v17 }
 0x3da   : > { %v7331_v46 = vpop.eup %7330 }
 0x3db   : > { %3933 = vperm.xlu1 %7260, %v7323_v16   ;;  %v3570_v16 = vmul.f32 1.442695, %v3395_v29  ;;  %v7333_v23 = vpop.eup %7332 }
 0x3dc   : > { %3972 = vperm.xlu0 %7261, %v7325_v57   ;;  %v14746_v57 = vld [vmem:[#allocation82_spill] sm:$0xff] }
 0x3dd   : > { %v3397_v45 = vsub.f32 %v14746_v57, %v11801_v33  ;;  %7344 = vpow2.f32 %v3570_v16  ;;  %v7335_v26 = vpop.eup %7334  ;;  %v14749_v57 = vld [vmem:[#allocation79_spill] sm:$0xff] }
 0x3de   : > { %v7337_v37 = vpop.eup %7336  ;;  %7346 = vpow2.f32 %v3548_v24 }
 0x3df   : > { %3939 = vperm.xlu1 %7260, %v7327_v39   ;;  %v3386_v39 = vsub.f32 %v14747_v18, %v11763_v63  ;;  %v3574_v27 = vmul.f32 1.442695, %v3397_v45 }
 0x3e0   : > { %3978 = vperm.xlu0 %7261, %v7329_v28   ;;  %v3399_v28 = vsub.f32 %v14748_v12, %v11801_v33  ;;  %v14751_v12 = vld [vmem:[#allocation36_spill] sm:$0xff] }
 0x3e1   : > { %v3552_v29 = vmul.f32 1.442695, %v3386_v39  ;;  %7348 = vpow2.f32 %v3574_v27  ;;  %v7339_v18 = vpop.eup %7338  ;;  %v14752_v39 = vld [vmem:[#allocation91_spill] sm:$0xff] }
 0x3e2   : > { %v3578_v17 = vmul.f32 1.442695, %v3399_v28  ;;  %v7341_v16 = vpop.eup %7340 }
 0x3e3   : > { %3945 = vperm.xlu1 %7260, %v7331_v46   ;;  %v3388_v46 = vsub.f32 %v14749_v57, %v11763_v63  ;;  %7350 = vpow2.f32 %v3552_v29  ;;  %v7343_v57 = vpop.eup %7342 }
 0x3e4   : > { %3984 = vperm.xlu0 %7261, %v7333_v23   ;;  %v3401_v23 = vsub.f32 %v14750_v6, %v11801_v33  ;;  %7352 = vpow2.f32 %v3578_v17  ;;  %v14753_v6 = vld [vmem:[#allocation39_spill] sm:$0xff] }
 0x3e5   : > { %v3556_v45 = vmul.f32 1.442695, %v3388_v46  ;;  %v14754_v46 = vld [vmem:[#allocation46_spill] sm:$0xff] }
 0x3e6   : > { %v3582_v24 = vmul.f32 1.442695, %v3401_v23 }
 0x3e7   : > { %3951 = vperm.xlu1 %7260, %v7335_v26   ;;  %v3390_v26 = vsub.f32 %v14751_v12, %v11763_v63  ;;  %v7345_v27 = vpop.eup %7344  ;;  %7354 = vpow2.f32 %v3556_v45 }
 0x3e8   : > { %3990 = vperm.xlu0 %7261, %v7337_v37   ;;  %v3403_v37 = vsub.f32 %v14752_v39, %v11801_v33  ;;  %7356 = vpow2.f32 %v3582_v24  ;;  %v7347_v12 = vpop.eup %7346  ;;  %v14755_v39 = vld [vmem:[#allocation88_spill] sm:$0xff] }
 0x3e9   : > { %v3560_v28 = vmul.f32 1.442695, %v3390_v26  ;;  %v14756_v26 = vld [vmem:[#allocation106_spill] sm:$0xff] }
 0x3ea   : > { %v3586_v29 = vmul.f32 1.442695, %v3403_v37 }
 0x3eb   : > { %3957 = vperm.xlu1 %7260, %v7339_v18   ;;  %v3392_v18 = vsub.f32 %v14753_v6, %v11763_v63  ;;  %v7349_v17 = vpop.eup %7348  ;;  %7358 = vpow2.f32 %v3560_v28  ;;  %v13905_v28 = vsub.s32 4, %v14725_v11 }
 0x3ec   : > { %3996 = vperm.xlu0 %7261, %v7341_v16   ;;  %v3405_v16 = vsub.f32 %v14754_v46, %v11801_v33  ;;  %7360 = vpow2.f32 %v3586_v29  ;;  %v14757_v46 = vld [vmem:[#allocation86_spill] sm:$0xff] }
 0x3ed   : > { %v3564_v23 = vmul.f32 1.442695, %v3392_v18  ;;  %v7351_v6 = vpop.eup %7350 }
 0x3ee   : > { %v3590_v45 = vmul.f32 1.442695, %v3405_v16  ;;  %v7353_v24 = vpop.eup %7352 }
 0x3ef   : > { %3963 = vperm.xlu1 %7260, %v7343_v57   ;;  %v3394_v57 = vsub.f32 %v14755_v39, %v11763_v63  ;;  %7362 = vpow2.f32 %v3564_v23  ;;  %v14758_v63 = vld [vmem:[#allocation109_spill] sm:$0xff] }
 0x3f0   : > { %4002 = vperm.xlu0 %7261, %v7345_v27   ;;  %v3407_v27 = vsub.f32 %v14756_v26, %v11801_v33  ;;  %7364 = vpow2.f32 %v3590_v45  ;;  %v3409_v29 = vsub.f32 %v14758_v63, %v11801_v33  ;;  %v14759_v26 = vld [vmem:[#allocation94_spill] sm:$0xff] }
 0x3f1   : > { %v3568_v37 = vmul.f32 1.442695, %v3394_v57  ;;  %v7355_v16 = vpop.eup %7354  ;;  %v3398_v23 = vsub.f32 %v14759_v26, %v11801_v33  ;;  %v11839_v57 = vrot.slane %v11699_v1, %v13905_v28 }
 0x3f2   : > { %v3594_v18 = vmul.f32 1.442695, %v3407_v27  ;;  %v3598_v45 = vmul.f32 1.442695, %v3409_v29  ;;  %v14760_v27 = vld [vmem:[#allocation111_spill] sm:$0xff] }
 0x3f3   : > { %3969 = vperm.xlu1 %7260, %v7347_v12   ;;  %v3396_v12 = vsub.f32 %v14757_v46, %v11801_v33  ;;  %7366 = vpow2.f32 %v3568_v37  ;;  %v3576_v37 = vmul.f32 1.442695, %v3398_v23  ;;  %v14764_v23 = vld [vmem:[#allocation104_spill] sm:$0xff] }
 0x3f4   : > { %4008 = vperm.xlu0 %7261, %v7349_v17   ;;  %v7357_v17 = vpop.eup %7356  ;;  %7368 = vpow2.f32 %v3594_v18 }
 0x3f5   : > { %v3572_v39 = vmul.f32 1.442695, %v3396_v12  ;;  %v14761_v12 = vld [vmem:[#allocation89_spill] sm:$0xff] }
 0x3f6   : > { %v3400_v63 = vsub.f32 %v14761_v12, %v11801_v33 }
 0x3f7   : > { %3975 = vperm.xlu1 %7260, %v7351_v6   ;;  %v3411_v6 = vsub.f32 %v14760_v27, %v11801_v33  ;;  %7370 = vpow2.f32 %v3572_v39  ;;  %v14763_v27 = vld [vmem:[#allocation101_spill] sm:$0xff] }
 0x3f8   : > { %4014 = vperm.xlu0 %7261, %v7353_v24   ;;  %v7359_v24 = vpop.eup %7358  ;;  %7372 = vpow2.f32 %v3598_v45  ;;  %v3580_v29 = vmul.f32 1.442695, %v3400_v63  ;;  %v14766_v63 = vld [vmem:[#allocation121_spill] sm:$0xff] }
 0x3f9   : > { %v7361_v46 = vpop.eup %7360  ;;  %7374 = vpow2.f32 %v3576_v37 }
 0x3fa   : > { %v7363_v28 = vpop.eup %7362 }
 0x3fb   : > { %3981 = vperm.xlu1 %7260, %v7355_v16   ;;  %v3602_v16 = vmul.f32 1.442695, %v3411_v6  ;;  %v7365_v18 = vpop.eup %7364 }
 0x3fc   : > { %4020 = vperm.xlu0 %7261, %v7357_v17   ;;  %v14762_v17 = vld [vmem:[#allocation102_spill] sm:$0xff] }
 0x3fd   : > { %v3413_v26 = vsub.f32 %v14762_v17, %v11839_v57  ;;  %7376 = vpow2.f32 %v3602_v16  ;;  %v7367_v12 = vpop.eup %7366  ;;  %v14765_v17 = vld [vmem:[#allocation44_spill] sm:$0xff] }
 0x3fe   : > { %v7369_v45 = vpop.eup %7368  ;;  %7378 = vpow2.f32 %v3580_v29 }
 0x3ff   : > { %3987 = vperm.xlu1 %7260, %v7359_v24   ;;  %v3402_v24 = vsub.f32 %v14763_v27, %v11801_v33  ;;  %v3606_v39 = vmul.f32 1.442695, %v3413_v26 }
 0x400   : > { %4026 = vperm.xlu0 %7261, %v7361_v46   ;;  %v3415_v46 = vsub.f32 %v14764_v23, %v11839_v57  ;;  %v14767_v23 = vld [vmem:[#allocation107_spill] sm:$0xff] }
 0x401   : > { %v3584_v6 = vmul.f32 1.442695, %v3402_v24  ;;  %7380 = vpow2.f32 %v3606_v39  ;;  %v7371_v27 = vpop.eup %7370  ;;  %v14768_v24 = vld [vmem:[#allocation128_spill] sm:$0xff] }
 0x402   : > { %v3610_v37 = vmul.f32 1.442695, %v3415_v46  ;;  %v7373_v16 = vpop.eup %7372 }
 0x403   : > { %3993 = vperm.xlu1 %7260, %v7363_v28   ;;  %v3404_v28 = vsub.f32 %v14765_v17, %v11801_v33  ;;  %7382 = vpow2.f32 %v3584_v6  ;;  %v7375_v17 = vpop.eup %7374 }
 0x404   : > { %4032 = vperm.xlu0 %7261, %v7365_v18   ;;  %v3417_v18 = vsub.f32 %v14766_v63, %v11839_v57  ;;  %7384 = vpow2.f32 %v3610_v37  ;;  %v14769_v63 = vld [vmem:[#allocation110_spill] sm:$0xff] }
 0x405   : > { %v3588_v26 = vmul.f32 1.442695, %v3404_v28  ;;  %v14770_v28 = vld [vmem:[#allocation52_spill] sm:$0xff] }
 0x406   : > { %v3614_v29 = vmul.f32 1.442695, %v3417_v18 }
 0x407   : > { %3999 = vperm.xlu1 %7260, %v7367_v12   ;;  %v3406_v12 = vsub.f32 %v14767_v23, %v11801_v33  ;;  %v7377_v39 = vpop.eup %7376  ;;  %7386 = vpow2.f32 %v3588_v26 }
 0x408   : > { %4038 = vperm.xlu0 %7261, %v7369_v45   ;;  %v3419_v45 = vsub.f32 %v14768_v24, %v11839_v57  ;;  %7388 = vpow2.f32 %v3614_v29  ;;  %v7379_v23 = vpop.eup %7378  ;;  %v14771_v24 = vld [vmem:[#allocation112_spill] sm:$0xff] }
 0x409   : > { %v3592_v46 = vmul.f32 1.442695, %v3406_v12  ;;  %v14772_v12 = vld [vmem:[#allocation172_spill] sm:$0xff] }
 0x40a   : > { %v3618_v6 = vmul.f32 1.442695, %v3419_v45 }
 0x40b   : > { %4005 = vperm.xlu1 %7260, %v7371_v27   ;;  %v3408_v27 = vsub.f32 %v14769_v63, %v11801_v33  ;;  %v7381_v37 = vpop.eup %7380  ;;  %7390 = vpow2.f32 %v3592_v46  ;;  %v13906_v46 = vsub.s32 5, %v14725_v11 }
 0x40c   : > { %4044 = vperm.xlu0 %7261, %v7373_v16   ;;  %v3421_v16 = vsub.f32 %v14770_v28, %v11839_v57  ;;  %7392 = vpow2.f32 %v3618_v6  ;;  %v14773_v28 = vld [vmem:[#allocation105_spill] sm:$0xff] }
 0x40d   : > { %v3596_v18 = vmul.f32 1.442695, %v3408_v27  ;;  %v7383_v63 = vpop.eup %7382 }
 0x40e   : > { %v3622_v26 = vmul.f32 1.442695, %v3421_v16  ;;  %v7385_v29 = vpop.eup %7384 }
 0x40f   : > { %4011 = vperm.xlu1 %7260, %v7375_v17   ;;  %v3410_v17 = vsub.f32 %v14771_v24, %v11801_v33  ;;  %7394 = vpow2.f32 %v3596_v18  ;;  %v14774_v33 = vld [vmem:[#allocation143_spill] sm:$0xff] }
 0x410   : > { %4050 = vperm.xlu0 %7261, %v7377_v39   ;;  %v3423_v39 = vsub.f32 %v14772_v12, %v11839_v57  ;;  %7396 = vpow2.f32 %v3622_v26  ;;  %v3425_v6 = vsub.f32 %v14774_v33, %v11839_v57  ;;  %v14775_v12 = vld [vmem:[#allocation115_spill] sm:$0xff] }
 0x411   : > { %v3600_v45 = vmul.f32 1.442695, %v3410_v17  ;;  %v7387_v16 = vpop.eup %7386  ;;  %v3414_v18 = vsub.f32 %v14775_v12, %v11839_v57  ;;  %v11877_v17 = vrot.slane %v11699_v1, %v13906_v46 }
 0x412   : > { %v3626_v27 = vmul.f32 1.442695, %v3423_v39  ;;  %v3630_v26 = vmul.f32 1.442695, %v3425_v6  ;;  %v14776_v39 = vld [vmem:[#allocation148_spill] sm:$0xff] }
 0x413   : > { %4017 = vperm.xlu1 %7260, %v7379_v23   ;;  %v3412_v23 = vsub.f32 %v14773_v28, %v11839_v57  ;;  %7398 = vpow2.f32 %v3600_v45  ;;  %v3608_v45 = vmul.f32 1.442695, %v3414_v18 }
 0x414   : > { %4056 = vperm.xlu0 %7261, %v7381_v37   ;;  %v7389_v37 = vpop.eup %7388  ;;  %7400 = vpow2.f32 %v3626_v27  ;;  %v14778_v27 = vld [vmem:[#allocation166_spill] sm:$0xff] }
 0x415   : > { %v3604_v24 = vmul.f32 1.442695, %v3412_v23  ;;  %v14777_v23 = vld [vmem:[#allocation122_spill] sm:$0xff]  ;;  %v3429_v6 = vsub.f32 %v14778_v27, %v11877_v17 }
 0x417   : > { %4023 = vperm.xlu1 %7260, %v7383_v63   ;;  %v3427_v63 = vsub.f32 %v14776_v39, %v11839_v57  ;;  %7402 = vpow2.f32 %v3604_v24  ;;  %v14779_v24 = vld [vmem:[#allocation164_spill] sm:$0xff] }
 0x418   : > { %4062 = vperm.xlu0 %7261, %v7385_v29   ;;  %v7391_v29 = vpop.eup %7390  ;;  %7404 = vpow2.f32 %v3630_v26  ;;  %v3418_v18 = vsub.f32 %v14779_v24, %v11839_v57  ;;  %v14780_v26 = vld [vmem:[#allocation170_spill] sm:$0xff] }
 0x419   : > { %v7393_v33 = vpop.eup %7392  ;;  %v3634_v12 = vmul.f32 1.442695, %v3427_v63  ;;  %7406 = vpow2.f32 %v3608_v45  ;;  %v3431_v63 = vsub.f32 %v14780_v26, %v11877_v17 }
 0x41a   : > { %v7395_v46 = vpop.eup %7394 }
 0x41b   : > { %4029 = vperm.xlu1 %7260, %v7387_v16   ;;  %v7397_v34 = vpop.eup %7396  ;;  %7408 = vpow2.f32 %v3634_v12  ;;  %v14783_v12 = vld [vmem:[#allocation53_spill] sm:$0xff] }
 0x41c   : > { %4068 = vperm.xlu0 %7261, %v7389_v37   ;;  %v3416_v37 = vsub.f32 %v14777_v23, %v11839_v57 }
 0x41d   : > { %v7399_v23 = vpop.eup %7398 }
 0x41e   : > { %v11881_v28 = vpop.permute.xlu1 %3864  ;;  %v7401_v61 = vpop.eup %7400 }
 0x41f   : > { %v11883_v16 = vpop.permute.xlu0 %3861  ;;  %4035 = vperm.xlu1 %7260, %v7391_v29   ;;  %v3612_v29 = vmul.f32 1.442695, %v3416_v37  ;;  %v3642_v37 = vmul.f32 1.442695, %v3431_v63 }
 0x420   : > { %4074 = vperm.xlu0 %7261, %v7393_v33   ;;  %v3638_v33 = vmul.f32 1.442695, %v3429_v6  ;;  %v3433_v6 = vsub.f32 %v14783_v12, %v11877_v17 }
 0x421   : > { %7410 = vpow2.f32 %v3612_v29  ;;  %v7403_v24 = vpop.eup %7402  ;;  %v14785_v29 = vld [vmem:[#allocation134_spill] sm:$0xff] }
 0x422   : > { %v11889_v39 = vpop.permute.xlu1 %3867  ;;  %7412 = vpow2.f32 %v3638_v33  ;;  %v7405_v53 = vpop.eup %7404  ;;  %v14786_v33 = vld [vmem:[#allocation43_spill] sm:$0xff] }
 0x423   : > { %v11891_v43 = vpop.permute.xlu0 %3888  ;;  %4041 = vperm.xlu1 %7260, %v7395_v46   ;;  %v14782_v46 = vld [vmem:[#allocation135_spill] sm:$0xff]  ;;  %v3435_v63 = vsub.f32 %v14786_v33, %v11877_v17 }
 0x424   : > { %4080 = vperm.xlu0 %7261, %v7397_v34   ;;  %v3616_v34 = vmul.f32 1.442695, %v3418_v18  ;;  %v3420_v45 = vsub.f32 %v14782_v46, %v11839_v57  ;;  %v3422_v18 = vsub.f32 %v14785_v29, %v11839_v57  ;;  %v7407_v46 = vpop.eup %7406 }
 0x425   : > { %v7409_v9 = vpop.eup %7408 }
 0x426   : > { %v11897_v27 = vpop.permute.xlu1 %3870  ;;  %7414 = vpow2.f32 %v3616_v34  ;;  %v14788_v34 = vld [vmem:[#allocation173_spill] sm:$0xff] }
 0x427   : > { %v11899_v32 = vpop.permute.xlu0 %3894  ;;  %4047 = vperm.xlu1 %7260, %v7399_v23   ;;  %7416 = vpow2.f32 %v3642_v37  ;;  %v3646_v23 = vmul.f32 1.442695, %v3433_v6  ;;  %v14789_v37 = vld [vmem:[#allocation34_spill] sm:$0xff] }
 0x428   : > { %14781 = vst [vmem:[#allocation113_spill] sm:$0xff] %v11899_v32  ;;  %4086 = vperm.xlu0 %7261, %v7401_v61   ;;  %v3620_v61 = vmul.f32 1.442695, %v3420_v45  ;;  %v3424_v45 = vsub.f32 %v14788_v34, %v11839_v57  ;;  %v3437_v6 = vsub.f32 %v14789_v37, %v11877_v17 }
 0x42a   : > { %v11905_v26 = vpop.permute.xlu1 %3873  ;;  %7418 = vpow2.f32 %v3620_v61  ;;  %v14790_v61 = vld [vmem:[#allocation119_spill] sm:$0xff] }
 0x42b   : > { %v11907_v5 = vpop.permute.xlu0 %3900  ;;  %4053 = vperm.xlu1 %7260, %v7403_v24   ;;  %7420 = vpow2.f32 %v3646_v23  ;;  %v3650_v24 = vmul.f32 1.442695, %v3435_v63  ;;  %v7411_v29 = vpop.eup %7410  ;;  %v14791_v23 = vld [vmem:[#allocation47_spill] sm:$0xff] }
 0x42c   : > { %14784 = vst [vmem:[#allocation116_spill] sm:$0xff] %v11907_v5  ;;  %4092 = vperm.xlu0 %7261, %v7405_v53   ;;  %v3624_v53 = vmul.f32 1.442695, %v3422_v18  ;;  %v7413_v40 = vpop.eup %7412  ;;  %v3426_v18 = vsub.f32 %v14790_v61, %v11839_v57  ;;  %v3439_v63 = vsub.f32 %v14791_v23, %v11877_v17  ;;  %v13922_v57 = vsub.s32 6, %v14725_v11 }
 0x42e   : > { %v11913_v12 = vpop.permute.xlu1 %3876  ;;  %7422 = vpow2.f32 %v3624_v53  ;;  %v14792_v53 = vld [vmem:[#allocation167_spill] sm:$0xff] }
 0x42f   : > { %v11915_v50 = vpop.permute.xlu0 %3906  ;;  %4059 = vperm.xlu1 %7260, %v7407_v46   ;;  %7424 = vpow2.f32 %v3650_v24  ;;  %v3654_v46 = vmul.f32 1.442695, %v3437_v6  ;;  %v3658_v24 = vmul.f32 1.442695, %v3439_v63  ;;  %v14793_v6 = vld [vmem:[#allocation49_spill] sm:$0xff] }
 0x430   : > { %14787 = vst [vmem:[#allocation117_spill] sm:$0xff] %v11915_v50  ;;  %4098 = vperm.xlu0 %7261, %v7409_v9   ;;  %v3628_v9 = vmul.f32 1.442695, %v3424_v45  ;;  %v7415_v34 = vpop.eup %7414  ;;  %v3428_v45 = vsub.f32 %v14792_v53, %v11877_v17 }
 0x431   : > { %v7417_v42 = vpop.eup %7416 }
 0x432   : > { %v11921_v33 = vpop.permute.xlu1 %3879  ;;  %7426 = vpow2.f32 %v3628_v9  ;;  %v14794_v9 = vld [vmem:[#allocation169_spill] sm:$0xff] }
 0x433   : > { %v11923_v47 = vpop.permute.xlu0 %3912  ;;  %4065 = vperm.xlu1 %7260, %v7411_v29   ;;  %7428 = vpow2.f32 %v3654_v46  ;;  %v3441_v29 = vsub.f32 %v14793_v6, %v11877_v17  ;;  %v11947_v46 = vrot.slane %v11699_v1, %v13922_v57 }
 0x434   : > { %4104 = vperm.xlu0 %7261, %v7413_v40   ;;  %v3632_v40 = vmul.f32 1.442695, %v3426_v18  ;;  %v7419_v61 = vpop.eup %7418  ;;  %v3430_v18 = vsub.f32 %v14794_v9, %v11877_v17 }
 0x435   : > { %v7421_v48 = vpop.eup %7420  ;;  %v3662_v63 = vmul.f32 1.442695, %v3441_v29 }
 0x436   : > { %v11929_v37 = vpop.permute.xlu1 %3882  ;;  %7430 = vpow2.f32 %v3632_v40  ;;  %v3640_v40 = vmul.f32 1.442695, %v3430_v18 }
 0x437   : > { %v11931_v41 = vpop.permute.xlu0 %3918  ;;  %4071 = vperm.xlu1 %7260, %v7415_v34   ;;  %7432 = vpow2.f32 %v3658_v24  ;;  %v14795_v34 = vld [vmem:[#allocation103_spill] sm:$0xff] }
 0x438   : > { %4110 = vperm.xlu0 %7261, %v7417_v42   ;;  %v3636_v42 = vmul.f32 1.442695, %v3428_v45  ;;  %v3443_v53 = vsub.f32 %v14795_v34, %v11877_v17  ;;  %v7423_v6 = vpop.eup %7422  ;;  %v14796_v45 = vld [vmem:[#allocation171_spill] sm:$0xff] }
 0x439   : > { %v3432_v9 = vsub.f32 %v14796_v45, %v11877_v17  ;;  %v14797_v24 = vld [vmem:[#allocation175_spill] sm:$0xff] }
 0x43a   : > { %v11938_v23 = vpop.permute.xlu1 %3885  ;;  %7434 = vpow2.f32 %v3636_v42  ;;  %v3666_v57 = vmul.f32 1.442695, %v3443_v53  ;;  %v3445_v29 = vsub.f32 %v14797_v24, %v11947_v46  ;;  %v14799_v42 = vld [vmem:[#allocation174_spill] sm:$0xff] }
 0x43b   : > { %v11940_v44 = vpop.permute.xlu0 %3924  ;;  %4077 = vperm.xlu1 %7260, %v7419_v61   ;;  %v7425_v61 = vpop.eup %7424  ;;  %7436 = vpow2.f32 %v3662_v63  ;;  %v3434_v18 = vsub.f32 %v14799_v42, %v11877_v17  ;;  %v14800_v63 = vld [vmem:[#allocation114_spill] sm:$0xff] }
 0x43c   : > { %4116 = vperm.xlu0 %7261, %v7421_v48   ;;  %v7427_v2 = vpop.eup %7426  ;;  %7438 = vpow2.f32 %v3640_v40  ;;  %v3447_v53 = vsub.f32 %v14800_v63, %v11947_v46 }
 0x43d   : > { %v7429_v20 = vpop.eup %7428  ;;  %7440 = vpow2.f32 %v3666_v57  ;;  %v14804_v57 = vld [vmem:[#allocation149_spill] sm:$0xff] }
 0x43e   : > { %v11951_v35 = vpop.permute.xlu1 %3891 }
 0x43f   : > { %v11953_v48 = vpop.permute.xlu0 %3930  ;;  %4083 = vperm.xlu1 %7260, %v7423_v6   ;;  %v3644_v6 = vmul.f32 1.442695, %v3432_v9  ;;  %v3674_v9 = vmul.f32 1.442695, %v3447_v53 }
 0x440   : > { %4122 = vperm.xlu0 %7261, %v7425_v61   ;;  %v3670_v61 = vmul.f32 1.442695, %v3445_v29  ;;  %v7431_v45 = vpop.eup %7430  ;;  %v3449_v29 = vsub.f32 %v14804_v57, %v11947_v46 }
 0x441   : > { %v7433_v30 = vpop.eup %7432  ;;  %7442 = vpow2.f32 %v3644_v6  ;;  %v14806_v6 = vld [vmem:[#allocation45_spill] sm:$0xff] }
 0x442   : > { %v11959_v34 = vpop.permute.xlu1 %3897  ;;  %7444 = vpow2.f32 %v3670_v61  ;;  %v14807_v61 = vld [vmem:[#allocation182_spill] sm:$0xff] }
 0x443   : > { %14798 = vst [vmem:[#allocation139_spill] sm:$0xff] %v11959_v34  ;;  %v11961_v10 = vpop.permute.xlu0 %3936  ;;  %4089 = vperm.xlu1 %7260, %v7427_v2   ;;  %v14803_v2 = vld [vmem:[#allocation35_spill] sm:$0xff]  ;;  %v3451_v53 = vsub.f32 %v14807_v61, %v11947_v46 }
 0x444   : > { %4128 = vperm.xlu0 %7261, %v7429_v20   ;;  %v3648_v20 = vmul.f32 1.442695, %v3434_v18  ;;  %v3436_v40 = vsub.f32 %v14803_v2, %v11877_v17  ;;  %v7435_v42 = vpop.eup %7434  ;;  %v3438_v18 = vsub.f32 %v14806_v6, %v11877_v17 }
 0x445   : > { %v7437_v7 = vpop.eup %7436 }
 0x446   : > { %v11967_v24 = vpop.permute.xlu1 %3903  ;;  %7446 = vpow2.f32 %v3648_v20  ;;  %v7439_v2 = vpop.eup %7438  ;;  %v14809_v20 = vld [vmem:[#allocation40_spill] sm:$0xff] }
 0x447   : > { %14801 = vst [vmem:[#allocation120_spill] sm:$0xff] %v11967_v24  ;;  %v11969_v59 = vpop.permute.xlu0 %3942  ;;  %4095 = vperm.xlu1 %7260, %v7431_v45   ;;  %7448 = vpow2.f32 %v3674_v9  ;;  %v3678_v45 = vmul.f32 1.442695, %v3449_v29  ;;  %v7441_v52 = vpop.eup %7440  ;;  %v14810_v9 = vld [vmem:[#allocation185_spill] sm:$0xff] }
 0x448   : > { %14802 = vst [vmem:[#allocation144_spill] sm:$0xff] %v11969_v59  ;;  %4134 = vperm.xlu0 %7261, %v7433_v30   ;;  %v3652_v30 = vmul.f32 1.442695, %v3436_v40  ;;  %v3440_v40 = vsub.f32 %v14809_v20, %v11877_v17  ;;  %v3453_v29 = vsub.f32 %v14810_v9, %v11947_v46 }
 0x44a   : > { %v11975_v63 = vpop.permute.xlu1 %3909  ;;  %7450 = vpow2.f32 %v3652_v30  ;;  %v14811_v30 = vld [vmem:[#allocation163_spill] sm:$0xff] }
 0x44b   : > { %v11977_v31 = vpop.permute.xlu0 %3948  ;;  %4101 = vperm.xlu1 %7260, %v7435_v42   ;;  %7452 = vpow2.f32 %v3678_v45  ;;  %v3682_v42 = vmul.f32 1.442695, %v3451_v53  ;;  %v7443_v6 = vpop.eup %7442  ;;  %v14812_v45 = vld [vmem:[#allocation188_spill] sm:$0xff] }
 0x44c   : > { %14805 = vst [vmem:[#allocation123_spill] sm:$0xff] %v11977_v31  ;;  %4140 = vperm.xlu0 %7261, %v7437_v7   ;;  %v3656_v7 = vmul.f32 1.442695, %v3438_v18  ;;  %v7445_v22 = vpop.eup %7444  ;;  %v3442_v18 = vsub.f32 %v14811_v30, %v11877_v17  ;;  %v3455_v53 = vsub.f32 %v14812_v45, %v11947_v46  ;;  %v13935_v17 = vsub.s32 7, %v14725_v11 }
 0x44e   : > { %v11983_v57 = vpop.permute.xlu1 %3915  ;;  %7454 = vpow2.f32 %v3656_v7  ;;  %v14813_v7 = vld [vmem:[#allocation176_spill] sm:$0xff] }
 0x44f   : > { %v11985_v3 = vpop.permute.xlu0 %3954  ;;  %4107 = vperm.xlu1 %7260, %v7439_v2   ;;  %7456 = vpow2.f32 %v3682_v42  ;;  %v3686_v2 = vmul.f32 1.442695, %v3453_v29  ;;  %v3690_v42 = vmul.f32 1.442695, %v3455_v53  ;;  %v14814_v29 = vld [vmem:[#allocation190_spill] sm:$0xff] }
 0x450   : > { %14808 = vst [vmem:[#allocation157_spill] sm:$0xff] %v11985_v3  ;;  %4146 = vperm.xlu0 %7261, %v7441_v52   ;;  %v3660_v52 = vmul.f32 1.442695, %v3440_v40  ;;  %v7447_v20 = vpop.eup %7446  ;;  %v3444_v40 = vsub.f32 %v14813_v7, %v11947_v46 }
 0x451   : > { %v7449_v36 = vpop.eup %7448 }
 0x452   : > { %v11991_v61 = vpop.permute.xlu1 %3921  ;;  %7458 = vpow2.f32 %v3660_v52  ;;  %v14815_v52 = vld [vmem:[#allocation177_spill] sm:$0xff] }
 0x453   : > { %v11993_v0 = vpop.permute.xlu0 %3960  ;;  %4113 = vperm.xlu1 %7260, %v7443_v6   ;;  %7460 = vpow2.f32 %v3686_v2  ;;  %v3457_v6 = vsub.f32 %v14814_v29, %v11947_v46  ;;  %v12017_v2 = vrot.slane %v11699_v1, %v13935_v17 }
 0x454   : > { %4152 = vperm.xlu0 %7261, %v7445_v22   ;;  %v3664_v22 = vmul.f32 1.442695, %v3442_v18  ;;  %v7451_v30 = vpop.eup %7450  ;;  %v3446_v18 = vsub.f32 %v14815_v52, %v11947_v46 }
 0x455   : > { %v7453_v3 = vpop.eup %7452  ;;  %v3694_v53 = vmul.f32 1.442695, %v3457_v6 }
 0x456   : > { %v11999_v9 = vpop.permute.xlu1 %3927  ;;  %7462 = vpow2.f32 %v3664_v22  ;;  %v3672_v22 = vmul.f32 1.442695, %v3446_v18 }
 0x457   : > { %v12001_v55 = vpop.permute.xlu0 %3966  ;;  %4119 = vperm.xlu1 %7260, %v7447_v20   ;;  %7464 = vpow2.f32 %v3690_v42  ;;  %v14816_v20 = vld [vmem:[#allocation193_spill] sm:$0xff]  ;;  %v14818_v42 = vld [vmem:[#allocation178_spill] sm:$0xff] }
 0x458   : > { %4158 = vperm.xlu0 %7261, %v7449_v36   ;;  %v3668_v36 = vmul.f32 1.442695, %v3444_v40  ;;  %v3459_v7 = vsub.f32 %v14816_v20, %v11947_v46  ;;  %v7455_v29 = vpop.eup %7454  ;;  %v14817_v40 = vld [vmem:[#allocation33_spill] sm:$0xff]  ;;  %v3461_v6 = vsub.f32 %v14818_v42, %v12017_v2 }
 0x459   : > { %v3448_v52 = vsub.f32 %v14817_v40, %v11947_v46 }
 0x45a   : > { %v12008_v45 = vpop.permute.xlu1 %3933  ;;  %7466 = vpow2.f32 %v3668_v36  ;;  %v3698_v1 = vmul.f32 1.442695, %v3459_v7  ;;  %v14820_v36 = vld [vmem:[#allocation180_spill] sm:$0xff] }
 0x45b   : > { %v12010_v50 = vpop.permute.xlu0 %3972  ;;  %4125 = vperm.xlu1 %7260, %v7451_v30   ;;  %v7457_v30 = vpop.eup %7456  ;;  %7468 = vpow2.f32 %v3694_v53  ;;  %v3450_v18 = vsub.f32 %v14820_v36, %v11947_v46  ;;  %v14821_v53 = vld [vmem:[#allocation98_spill] sm:$0xff] }
 0x45c   : > { %4164 = vperm.xlu0 %7261, %v7453_v3   ;;  %v7459_v17 = vpop.eup %7458  ;;  %7470 = vpow2.f32 %v3672_v22  ;;  %v3463_v7 = vsub.f32 %v14821_v53, %v12017_v2 }
 0x45d   : > { %v7461_v11 = vpop.eup %7460  ;;  %7472 = vpow2.f32 %v3698_v1  ;;  %v14825_v1 = vld [vmem:[#allocation37_spill] sm:$0xff] }
 0x45e   : > { %v12021_v19 = vpop.permute.xlu1 %3939 }
 0x45f   : > { %v12023_v3 = vpop.permute.xlu0 %3978  ;;  %4131 = vperm.xlu1 %7260, %v7455_v29   ;;  %v3676_v29 = vmul.f32 1.442695, %v3448_v52  ;;  %v3706_v52 = vmul.f32 1.442695, %v3463_v7 }
 0x460   : > { %4170 = vperm.xlu0 %7261, %v7457_v30   ;;  %v3702_v30 = vmul.f32 1.442695, %v3461_v6  ;;  %v7463_v40 = vpop.eup %7462  ;;  %v3465_v6 = vsub.f32 %v14825_v1, %v12017_v2 }
 0x461   : > { %v7465_v5 = vpop.eup %7464  ;;  %7474 = vpow2.f32 %v3676_v29  ;;  %v14827_v29 = vld [vmem:[#allocation186_spill] sm:$0xff] }
 0x462   : > { %v12029_v20 = vpop.permute.xlu1 %3945  ;;  %7476 = vpow2.f32 %v3702_v30  ;;  %v14828_v30 = vld [vmem:[#allocation48_spill] sm:$0xff] }
 0x463   : > { %14819 = vst [vmem:[#allocation127_spill] sm:$0xff] %v12029_v20  ;;  %v12031_v31 = vpop.permute.xlu0 %3984  ;;  %4137 = vperm.xlu1 %7260, %v7459_v17   ;;  %v14824_v17 = vld [vmem:[#allocation183_spill] sm:$0xff]  ;;  %v3467_v7 = vsub.f32 %v14828_v30, %v12017_v2 }
 0x464   : > { %4176 = vperm.xlu0 %7261, %v7461_v11   ;;  %v3680_v11 = vmul.f32 1.442695, %v3450_v18  ;;  %v3452_v22 = vsub.f32 %v14824_v17, %v11947_v46  ;;  %v7467_v36 = vpop.eup %7466  ;;  %v3454_v18 = vsub.f32 %v14827_v29, %v11947_v46 }
 0x465   : > { %v7469_v24 = vpop.eup %7468 }
 0x466   : > { %v12037_v42 = vpop.permute.xlu1 %3951  ;;  %7478 = vpow2.f32 %v3680_v11  ;;  %v7471_v17 = vpop.eup %7470  ;;  %v14830_v11 = vld [vmem:[#allocation165_spill] sm:$0xff] }
 0x467   : > { %14822 = vst [vmem:[#allocation63_spill] sm:$0xff] %v12037_v42  ;;  %v12039_v58 = vpop.permute.xlu0 %3990  ;;  %4143 = vperm.xlu1 %7260, %v7463_v40   ;;  %7480 = vpow2.f32 %v3706_v52  ;;  %v3710_v40 = vmul.f32 1.442695, %v3465_v6  ;;  %v7473_v21 = vpop.eup %7472  ;;  %v14831_v52 = vld [vmem:[#allocation97_spill] sm:$0xff] }
 0x468   : > { %14823 = vst [vmem:[#allocation129_spill] sm:$0xff] %v12039_v58  ;;  %4182 = vperm.xlu0 %7261, %v7465_v5   ;;  %v3684_v5 = vmul.f32 1.442695, %v3452_v22  ;;  %v3456_v22 = vsub.f32 %v14830_v11, %v11947_v46  ;;  %v3469_v6 = vsub.f32 %v14831_v52, %v12017_v2 }
 0x46a   : > { %v12045_v53 = vpop.permute.xlu1 %3957  ;;  %7482 = vpow2.f32 %v3684_v5  ;;  %v14832_v5 = vld [vmem:[#allocation50_spill] sm:$0xff] }
 0x46b   : > { %v12047_v42 = vpop.permute.xlu0 %3996  ;;  %4149 = vperm.xlu1 %7260, %v7467_v36   ;;  %7484 = vpow2.f32 %v3710_v40  ;;  %v3714_v36 = vmul.f32 1.442695, %v3467_v7  ;;  %v7475_v29 = vpop.eup %7474  ;;  %v14833_v40 = vld [vmem:[#allocation191_spill] sm:$0xff] }
 0x46c   : > { %14826 = vst [vmem:[#allocation124_spill] sm:$0xff] %v12047_v42  ;;  %4188 = vperm.xlu0 %7261, %v7469_v24   ;;  %v3688_v24 = vmul.f32 1.442695, %v3454_v18  ;;  %v7477_v42 = vpop.eup %7476  ;;  %v3458_v18 = vsub.f32 %v14832_v5, %v11947_v46  ;;  %v3471_v7 = vsub.f32 %v14833_v40, %v12017_v2 }
 0x46e   : > { %v12053_v1 = vpop.permute.xlu1 %3963  ;;  %7486 = vpow2.f32 %v3688_v24  ;;  %v14835_v24 = vld [vmem:[#allocation179_spill] sm:$0xff]  ;;  %v3722_v46 = vmul.f32 1.442695, %v3471_v7 }
 0x46f   : > { %v12055_v58 = vpop.permute.xlu0 %4002  ;;  %4155 = vperm.xlu1 %7260, %v7471_v17   ;;  %7488 = vpow2.f32 %v3714_v36  ;;  %v3718_v17 = vmul.f32 1.442695, %v3469_v6  ;;  %v14836_v36 = vld [vmem:[#allocation51_spill] sm:$0xff] }
 0x470   : > { %14829 = vst [vmem:[#allocation132_spill] sm:$0xff] %v12055_v58  ;;  %4194 = vperm.xlu0 %7261, %v7473_v21   ;;  %v3692_v21 = vmul.f32 1.442695, %v3456_v22  ;;  %v7479_v11 = vpop.eup %7478  ;;  %v3460_v22 = vsub.f32 %v14835_v24, %v12017_v2  ;;  %v3473_v6 = vsub.f32 %v14836_v36, %v12017_v2 }
 0x471   : > { %v7481_v58 = vpop.eup %7480 }
 0x472   : > { %v12061_v30 = vpop.permute.xlu1 %3969  ;;  %7490 = vpow2.f32 %v3692_v21  ;;  %v14838_v21 = vld [vmem:[#allocation181_spill] sm:$0xff] }
 0x473   : > { %v12063_v59 = vpop.permute.xlu0 %4008  ;;  %4161 = vperm.xlu1 %7260, %v7475_v29   ;;  %7492 = vpow2.f32 %v3718_v17  ;;  %v14839_v17 = vld [vmem:[#allocation95_spill] sm:$0xff] }
 0x474   : > { %4200 = vperm.xlu0 %7261, %v7477_v42   ;;  %v3696_v42 = vmul.f32 1.442695, %v3458_v18  ;;  %v7483_v29 = vpop.eup %7482  ;;  %v3462_v18 = vsub.f32 %v14838_v21, %v12017_v2  ;;  %v3475_v7 = vsub.f32 %v14839_v17, %v12017_v2 }
 0x475   : > { %v7485_v40 = vpop.eup %7484 }
 0x476   : > { %v12069_v52 = vpop.permute.xlu1 %3975  ;;  %7494 = vpow2.f32 %v3696_v42  ;;  %v14841_v42 = vld [vmem:[#allocation184_spill] sm:$0xff] }
 0x477   : > { %v12071_v20 = vpop.permute.xlu0 %4014  ;;  %4167 = vperm.xlu1 %7260, %v7479_v11   ;;  %7496 = vpow2.f32 %v3722_v46  ;;  %v3726_v11 = vmul.f32 1.442695, %v3473_v6 }
 0x478   : > { %14834 = vst [vmem:[#allocation130_spill] sm:$0xff] %v12071_v20  ;;  %4206 = vperm.xlu0 %7261, %v7481_v58   ;;  %v3700_v58 = vmul.f32 1.442695, %v3460_v22  ;;  %v7487_v24 = vpop.eup %7486  ;;  %v3464_v22 = vsub.f32 %v14841_v42, %v12017_v2 }
 0x479   : > { %v7489_v38 = vpop.eup %7488 }
 0x47a   : > { %v12077_v5 = vpop.permute.xlu1 %3981  ;;  %7498 = vpow2.f32 %v3700_v58 }
 0x47b   : > { %v12079_v32 = vpop.permute.xlu0 %4020  ;;  %4173 = vperm.xlu1 %7260, %v7483_v29   ;;  %v3704_v29 = vmul.f32 1.442695, %v3462_v18  ;;  %7500 = vpow2.f32 %v3726_v11 }
 0x47c   : > { %14837 = vst [vmem:[#allocation136_spill] sm:$0xff] %v12079_v32  ;;  %4212 = vperm.xlu0 %7261, %v7485_v40   ;;  %v3730_v40 = vmul.f32 1.442695, %v3475_v7  ;;  %v7491_v46 = vpop.eup %7490  ;;  %v3708_v32 = vmul.f32 1.442695, %v3464_v22 }
 0x47d   : > { %v7493_v21 = vpop.eup %7492  ;;  %7502 = vpow2.f32 %v3704_v29 }
 0x47e   : > { %v12085_v36 = vpop.permute.xlu1 %3987  ;;  %7504 = vpow2.f32 %v3730_v40 }
 0x47f   : > { %v12087_v20 = vpop.permute.xlu0 %4026  ;;  %4179 = vperm.xlu1 %7260, %v7487_v24   ;;  %v14844_v24 = vld [vmem:[#allocation187_spill] sm:$0xff]  ;;  %7506 = vpow2.f32 %v3708_v32 }
 0x480   : > { %14840 = vst [vmem:[#allocation137_spill] sm:$0xff] %v12087_v20  ;;  %4218 = vperm.xlu0 %7261, %v7489_v38   ;;  %v3466_v38 = vsub.f32 %v14844_v24, %v12017_v2  ;;  %v7495_v58 = vpop.eup %7494  ;;  %v14849_v24 = vld [vmem:[#allocation192_spill] sm:$0xff] }
 0x481   : > { %v7497_v42 = vpop.eup %7496 }
 0x482   : > { %v12091_v6 = vpop.permute.xlu1 %3993  ;;  %v3712_v7 = vmul.f32 1.442695, %v3466_v38 }
 0x483   : > { %14842 = vst [vmem:[#allocation140_spill] sm:$0xff] %v12091_v6  ;;  %v12093_v17 = vpop.permute.xlu0 %4032  ;;  %4185 = vperm.xlu1 %7260, %v7491_v46  }
 0x484   : > { %14843 = vst [vmem:[#allocation141_spill] sm:$0xff] %v12093_v17  ;;  %4224 = vperm.xlu0 %7261, %v7493_v21   ;;  %v14847_v17 = vld [vmem:[#allocation189_spill] sm:$0xff]  ;;  %v7499_v21 = vpop.eup %7498  ;;  %7508 = vpow2.f32 %v3712_v7 }
 0x485   : > { %v3468_v46 = vsub.f32 %v14847_v17, %v12017_v2  ;;  %v7501_v22 = vpop.eup %7500 }
 0x486   : > { %v12097_v18 = vpop.permute.xlu1 %3999 }
 0x487   : > { %14845 = vst [vmem:[#allocation150_spill] sm:$0xff] %v12097_v18  ;;  %v12099_v11 = vpop.permute.xlu0 %4038  ;;  %4191 = vperm.xlu1 %7260, %v7495_v58   ;;  %v3716_v40 = vmul.f32 1.442695, %v3468_v46  ;;  %v7503_v58 = vpop.eup %7502  ;;  %v14851_v18 = vld [vmem:[#allocation168_spill] sm:$0xff] }
 0x488   : > { %14846 = vst [vmem:[#allocation145_spill] sm:$0xff] %v12099_v11  ;;  %4230 = vperm.xlu0 %7261, %v7497_v42   ;;  %v3470_v11 = vsub.f32 %v14849_v24, %v12017_v2  ;;  %v7505_v32 = vpop.eup %7504  ;;  %v14853_v24 = vld [vmem:[#allocation118_spill] sm:$0xff] }
 0x489   : > { %7510 = vpow2.f32 %v3716_v40  ;;  %v3474_v6 = vsub.f32 %v14853_v24, %v12017_v2 }
 0x48a   : > { %v12103_v29 = vpop.permute.xlu1 %4005  ;;  %v3720_v17 = vmul.f32 1.442695, %v3470_v11 }
 0x48b   : > { %v12105_v20 = vpop.permute.xlu0 %4044  ;;  %4197 = vperm.xlu1 %7260, %v7499_v21   ;;  %v7507_v21 = vpop.eup %7506  ;;  %v3728_v11 = vmul.f32 1.442695, %v3474_v6 }
 0x48c   : > { %14848 = vst [vmem:[#allocation159_spill] sm:$0xff] %v12105_v20  ;;  %4236 = vperm.xlu0 %7261, %v7501_v22   ;;  %v3472_v20 = vsub.f32 %v14851_v18, %v12017_v2  ;;  %7512 = vpow2.f32 %v3720_v17 }
 0x48e   : > { %v12109_v42 = vpop.permute.xlu1 %4011  ;;  %v3724_v46 = vmul.f32 1.442695, %v3472_v20  ;;  %v7509_v34 = vpop.eup %7508 }
 0x48f   : > { %v12111_v38 = vpop.permute.xlu0 %4050  ;;  %4203 = vperm.xlu1 %7260, %v7503_v58  }
 0x490   : > { %14850 = vst [vmem:[#allocation152_spill] sm:$0xff] %v12111_v38  ;;  %4242 = vperm.xlu0 %7261, %v7505_v32   ;;  %7514 = vpow2.f32 %v3724_v46 }
 0x491   : > { %7516 = vpow2.f32 %v3728_v11 }
 0x492   : > { %v12115_v22 = vpop.permute.xlu1 %4017 }
 0x493   : > { %v12117_v7 = vpop.permute.xlu0 %4056  ;;  %4209 = vperm.xlu1 %7260, %v7507_v21   ;;  %v7511_v18 = vpop.eup %7510 }
 0x494   : > { %14852 = vst [vmem:[#allocation125_spill] sm:$0xff] %v12117_v7 }
 0x496   : > { %v12121_v38 = vpop.permute.xlu1 %4023  ;;  %v7513_v20 = vpop.eup %7512 }
 0x497   : > { %v12123_v58 = vpop.permute.xlu0 %4062  ;;  %4215 = vperm.xlu1 %7260, %v7509_v34  }
 0x498   : > { %14854 = vst [vmem:[#allocation160_spill] sm:$0xff] %v12123_v58 }
 0x49a   : > { %v12125_v40 = vpop.permute.xlu1 %4029  ;;  %v7515_v21 = vpop.eup %7514 }
 0x49b   : > { %v12127_v32 = vpop.permute.xlu0 %4068  ;;  %4221 = vperm.xlu1 %7260, %v7511_v18   ;;  %v7517_v6 = vpop.eup %7516 }
 0x49c   : > { %14855 = vst [vmem:[#allocation126_spill] sm:$0xff] %v12127_v32 }
 0x49e   : > { %v12129_v17 = vpop.permute.xlu1 %4035 }
 0x49f   : > { %v12131_v2 = vpop.permute.xlu0 %4074  ;;  %4227 = vperm.xlu1 %7260, %v7513_v20  }
 0x4a0   : > { %14856 = vst [vmem:[#allocation77_spill] sm:$0xff] %v12131_v2  ;;  %v7778_v2 = vld [vmem:[%s8152_s24] sm:$0xff] }
 0x4a2   : > { %v12133_v24 = vpop.permute.xlu1 %4041 }
 0x4a3   : > { %14857 = vst [vmem:[#allocation131_spill] sm:$0xff] %v12133_v24  ;;  %v12135_v34 = vpop.permute.xlu0 %4080  ;;  %4233 = vperm.xlu1 %7260, %v7515_v21  }
 0x4a4   : > { %14858 = vst [vmem:[#allocation155_spill] sm:$0xff] %v12135_v34 }
 0x4a6   : > { %v12137_v46 = vpop.permute.xlu1 %4047 }
 0x4a7   : > { %14859 = vst [vmem:[#allocation138_spill] sm:$0xff] %v12137_v46  ;;  %v12139_v58 = vpop.permute.xlu0 %4086  ;;  %4239 = vperm.xlu1 %7260, %v7517_v6  }
 0x4a8   : > { %14860 = vst [vmem:[#allocation161_spill] sm:$0xff] %v12139_v58 }
 0x4aa   : > { %v12141_v11 = vpop.permute.xlu1 %4053 }
 0x4ab   : > { %v12143_v18 = vpop.permute.xlu0 %4092 }
 0x4ac   : > { %14861 = vst [vmem:[#allocation142_spill] sm:$0xff] %v12143_v18 }
 0x4ae   : > { %v12145_v32 = vpop.permute.xlu1 %4059 }
 0x4af   : > { %14862 = vst [vmem:[#allocation32_spill] sm:$0xff] %v12145_v32  ;;  %4891 = vmax.xlane.f32.xlu0 %v7778_v2  ;;  %v12148_v20 = vpop.permute.xlu0 %4098 }
 0x4b0   : > { %14863 = vst [vmem:[#allocation146_spill] sm:$0xff] %v12148_v20 }
 0x4b2   : > { %v12150_v24 = vpop.permute.xlu1 %4065 }
 0x4b3   : > { %14864 = vst [vmem:[#allocation80_spill] sm:$0xff] %v12150_v24  ;;  %v12152_v34 = vpop.permute.xlu0 %4104 }
 0x4b4   : > { %14865 = vst [vmem:[#allocation154_spill] sm:$0xff] %v12152_v34 }
 0x4b6   : > { %v12154_v21 = vpop.permute.xlu1 %4071 }
 0x4b7   : > { %14866 = vst [vmem:[#allocation83_spill] sm:$0xff] %v12154_v21  ;;  %v12156_v46 = vpop.permute.xlu0 %4110 }
 0x4b8   : > { %14867 = vst [vmem:[#allocation73_spill] sm:$0xff] %v12156_v46 }
 0x4ba   : > { %v12158_v58 = vpop.permute.xlu1 %4077 }
 0x4bb   : > { %14868 = vst [vmem:[#allocation38_spill] sm:$0xff] %v12158_v58  ;;  %v12160_v6 = vpop.permute.xlu0 %4116 }
 0x4bc   : > { %14869 = vst [vmem:[#allocation156_spill] sm:$0xff] %v12160_v6 }
 0x4be   : > { %v12162_v7 = vpop.permute.xlu1 %4083 }
 0x4bf   : > { %14870 = vst [vmem:[#allocation41_spill] sm:$0xff] %v12162_v7  ;;  %v12164_v18 = vpop.permute.xlu0 %4122 }
 0x4c0   : > { %14871 = vst [vmem:[#allocation158_spill] sm:$0xff] %v12164_v18 }
 0x4c2   : > { %v12166_v32 = vpop.permute.xlu1 %4089 }
 0x4c3   : > { %14872 = vst [vmem:[#allocation42_spill] sm:$0xff] %v12166_v32  ;;  %v12168_v2 = vpop.permute.xlu0 %4128 }
 0x4c4   : > { %14873 = vst [vmem:[#allocation162_spill] sm:$0xff] %v12168_v2 }
 0x4c6   : > { %v12170_v20 = vpop.permute.xlu1 %4095 }
 0x4c7   : > { %14874 = vst [vmem:[#allocation82_spill] sm:$0xff] %v12170_v20  ;;  %v12172_v24 = vpop.permute.xlu0 %4134 }
 0x4c8   : > { %14875 = vst [vmem:[#allocation72_spill] sm:$0xff] %v12172_v24 }
 0x4ca   : > { %v12174_v34 = vpop.permute.xlu1 %4101 }
 0x4cb   : > { %14876 = vst [vmem:[#allocation85_spill] sm:$0xff] %v12174_v34  ;;  %v12176_v21 = vpop.permute.xlu0 %4140 }
 0x4cc   : > { %14877 = vst [vmem:[#allocation79_spill] sm:$0xff] %v12176_v21 }
 0x4ce   : > { %v12178_v46 = vpop.permute.xlu1 %4107 }
 0x4cf   : > { %14878 = vst [vmem:[#allocation92_spill] sm:$0xff] %v12178_v46  ;;  %v12180_v58 = vpop.permute.xlu0 %4146 }
 0x4d0   : > { %14879 = vst [vmem:[#allocation36_spill] sm:$0xff] %v12180_v58  ;;  %v4326_v58 = vrot.slane %v11975_v63, %v9059_v51  ;;  %v4247_v63 = vrot.slane %v11883_v16, %v9059_v51  ;;  %v4261_v16 = vrot.slane %v11897_v27, %v9090_v4  ;;  %v4271_v27 = vrot.slane %v11913_v12, %v9107_v14 }
 0x4d2   : > { %v12182_v6 = vpop.permute.xlu1 %4113 }
 0x4d3   : > { %v12184_v7 = vpop.permute.xlu0 %4152 }
 0x4d6   : > { %v12186_v18 = vpop.permute.xlu1 %4119 }
 0x4d7   : > { %14880 = vst [vmem:[#allocation91_spill] sm:$0xff] %v12186_v18  ;;  %v12188_v32 = vpop.permute.xlu0 %4158  ;;  %v4335_v18 = vrot.slane %v11983_v57, %v9067_v13  ;;  %v4409_v57 = vrot.slane %v11993_v0, %v9041_v15  ;;  %v4340_v0 = vrot.slane %v11931_v41, %v9090_v4 }
 0x4d8   : > { %14881 = vst [vmem:[#allocation39_spill] sm:$0xff] %v12188_v32  ;;  %v4405_v32 = vrot.slane %v12045_v53, %v9059_v51  ;;  %v4256_v53 = vrot.slane %v11889_v39, %v9067_v13 }
 0x4da   : > { %v12190_v2 = vpop.permute.xlu1 %4125 }
 0x4db   : > { %14882 = vst [vmem:[#allocation46_spill] sm:$0xff] %v12190_v2  ;;  %v12192_v20 = vpop.permute.xlu0 %4164 }
 0x4dc   : > { %14883 = vst [vmem:[#allocation88_spill] sm:$0xff] %v12192_v20 }
 0x4de   : > { %v12194_v24 = vpop.permute.xlu1 %4131 }
 0x4df   : > { %14884 = vst [vmem:[#allocation106_spill] sm:$0xff] %v12194_v24  ;;  %v12196_v34 = vpop.permute.xlu0 %4170  ;;  %v4330_v24 = vrot.slane %v11923_v47, %v9041_v15 }
 0x4e0   : > { %14885 = vst [vmem:[#allocation86_spill] sm:$0xff] %v12196_v34  ;;  %v4414_v34 = vrot.slane %v12053_v1, %v9067_v13  ;;  %v4345_v1 = vrot.slane %v11991_v61, %v9110_v25  ;;  %v4266_v61 = vrot.slane %v11905_v26, %v9110_v25 }
 0x4e2   : > { %v12198_v21 = vpop.permute.xlu1 %4137 }
 0x4e3   : > { %14886 = vst [vmem:[#allocation109_spill] sm:$0xff] %v12198_v21  ;;  %v12200_v46 = vpop.permute.xlu0 %4176  ;;  %v4251_v21 = vrot.slane %v11881_v28, %v9041_v15  ;;  %v4410_v28 = vsel %vm1857_vm1, %v4409_v57, %v4405_v32  ;;  %v4419_v32 = vrot.slane %v12001_v55, %v9090_v4  ;;  %v4434_v57 = vrot.slane %v12069_v52, %v9152_v49 }
 0x4e4   : > { %14887 = vst [vmem:[#allocation94_spill] sm:$0xff] %v12200_v46  ;;  %v4415_v39 = vsel %vm1864_vm2, %v4414_v34, %v4410_v28  ;;  %v4276_v34 = vrot.slane %v11921_v33, %v9152_v49 }
 0x4e5   : > { %v4420_v26 = vsel %vm1871_vm3, %v4419_v32, %v4415_v39  ;;  %v4493_v32 = vrot.slane %v12109_v42, %v9067_v13  ;;  %v4375_v42 = vrot.slane %v12021_v19, %v9241_v56 }
 0x4e6   : > { %v12208_v2 = vpop.permute.xlu1 %4143 }
 0x4e7   : > { %14888 = vst [vmem:[#allocation111_spill] sm:$0xff] %v12208_v2  ;;  %v4331_v2 = vsel %vm1857_vm1, %v4330_v24, %v4326_v58  ;;  %v12223_v46 = vpop.permute.xlu0 %4182  ;;  %v4424_v58 = vrot.slane %v12061_v30, %v9110_v25  ;;  %v4252_v24 = vsel %vm1857_vm1, %v4251_v21, %v4247_v63  ;;  %v4355_v21 = vrot.slane %v11999_v9, %v9152_v49 }
 0x4e8   : > { %v4336_v47 = vsel %vm1864_vm2, %v4335_v18, %v4331_v2  ;;  %v4257_v18 = vsel %vm1864_vm2, %v4256_v53, %v4252_v24  ;;  %v4350_v63 = vrot.slane %v11940_v44, %v9107_v14  ;;  %v4281_v9 = vrot.slane %v11929_v37, %v9127_v62 }
 0x4e9   : > { %v4341_v41 = vsel %vm1871_vm3, %v4340_v0, %v4336_v47  ;;  %v4262_v55 = vsel %vm1871_vm3, %v4261_v16, %v4257_v18  ;;  %v4425_v12 = vsel %vm1878_vm4, %v4424_v58, %v4420_v26  ;;  %v4429_v47 = vrot.slane %v12010_v50, %v9107_v14 }
 0x4ea   : > { %v12229_v20 = vpop.permute.xlu1 %4149  ;;  %v4346_v30 = vsel %vm1878_vm4, %v4345_v1, %v4341_v41  ;;  %v4267_v53 = vsel %vm1878_vm4, %v4266_v61, %v4262_v55  ;;  %v4286_v44 = vrot.slane %v11938_v23, %v9170_v8  ;;  %v4365_v0 = vrot.slane %v12008_v45, %v9170_v8 }
 0x4eb   : > { %v12261_v33 = vpop.permute.xlu0 %4188  ;;  %v4272_v1 = vsel %vm1885_vm5, %v4271_v27, %v4267_v53  ;;  %v4351_v28 = vsel %vm1885_vm5, %v4350_v63, %v4346_v30  ;;  %v4430_v39 = vsel %vm1885_vm5, %v4429_v47, %v4425_v12  ;;  %v4360_v50 = vrot.slane %v11953_v48, %v9127_v62  ;;  %v14898_v47 = vld [vmem:[#allocation133_spill] sm:$0xff] }
 0x4ec   : > { %v4277_v16 = vsel %vm14889_vm6, %v4276_v34, %v4272_v1  ;;  %v4356_v52 = vsel %vm14890_vm0, %v4355_v21, %v4351_v28  ;;  %v4435_v58 = vsel %vm14891_vm12, %v4434_v57, %v4430_v39  ;;  %v4444_v23 = vrot.slane %v12077_v5, %v9170_v8  ;;  %v14899_v1 = vld [vmem:[#allocation113_spill] sm:$0xff]  ;;  %v14901_v28 = vld [vmem:[#allocation127_spill] sm:$0xff] }
 0x4ed   : > { %v4484_v24 = vrot.slane %v12103_v29, %v9059_v51  ;;  %v4282_v61 = vsel %vm1899_vm7, %v4281_v9, %v4277_v16  ;;  %v4439_v45 = vrot.slane %v12023_v3, %v9127_v62  ;;  %vm14892_vm6 = vcmask 589312  }
 0x4ee   : > { %v12253_v2 = vpop.permute.xlu1 %4155  ;;  %v4287_v18 = vsel %vm14892_vm6, %v4286_v44, %v4282_v61  ;;  %v4296_v48 = vrot.slane %v11951_v35, %v9241_v56  ;;  %v4361_v27 = vsel %vm1899_vm7, %v4360_v50, %v4356_v52  ;;  %v4488_v5 = vrot.slane %v12063_v59, %v9041_v15  ;;  %vm14893_vm12 = vmmov %vm14892_vm6 }
 0x4ef   : > { %v12297_v41 = vpop.permute.xlu0 %4194  ;;  %v4291_v29 = vrot.slane %v11891_v43, %v9155_v54  ;;  %v4366_v3 = vsel %vm14893_vm12, %v4365_v0, %v4361_v27  ;;  %v4440_v34 = vsel %vm1899_vm7, %v4439_v45, %v4435_v58  ;;  %v4370_v35 = vrot.slane %v11961_v10, %v9155_v54  ;;  %vm14894_vm0 = vmmov %vm14892_vm6  ;;  %v14896_v10 = vld [vmem:[#allocation139_spill] sm:$0xff]  ;;  %v14902_v0 = vld [vmem:[#allocation144_spill] sm:$0xff] }
 0x4f0   : > { %v4445_v21 = vsel %vm14894_vm0, %v4444_v23, %v4440_v34  ;;  %v4454_v59 = vrot.slane %v12085_v36, %v9241_v56  ;;  %v4489_v26 = vsel %vm1857_vm1, %v4488_v5, %v4484_v24  ;;  %v4449_v55 = vrot.slane %v12031_v31, %v9155_v54  ;;  %v14897_v36 = vld [vmem:[#allocation130_spill] sm:$0xff]  ;;  %v14904_v58 = vld [vmem:[#allocation140_spill] sm:$0xff] }
 0x4f1   : > { %v4292_v43 = vsel %vm1913_vm9, %v4291_v29, %v4287_v18  ;;  %v4494_v19 = vsel %vm1864_vm2, %v4493_v32, %v4489_v26  ;;  %v4503_v63 = vrot.slane %v12115_v22, %v9110_v25  ;;  %vm14895_vm6 = vcmask 720512   ;;  %v14905_v32 = vld [vmem:[#allocation129_spill] sm:$0xff]  ;;  %v14911_v26 = vld [vmem:[#allocation116_spill] sm:$0xff] }
 0x4f2   : > { %v12277_v37 = vpop.permute.xlu1 %4161  ;;  %v4297_v12 = vsel %vm14895_vm6, %v4296_v48, %v4292_v43  ;;  %v4306_v57 = vrot.slane %v14896_v10, %v9316_v60  ;;  %v4371_v53 = vsel %vm1913_vm9, %v4370_v35, %v4366_v3  ;;  %v4498_v9 = vrot.slane %v14897_v36, %v9090_v4  ;;  %vm14900_vm12 = vmmov %vm14895_vm6  ;;  %v14907_v29 = vld [vmem:[#allocation153_spill] sm:$0xff]  ;;  %v14908_v3 = vld [vmem:[#allocation120_spill] sm:$0xff] }
 0x4f3   : > { %v4301_v44 = vrot.slane %v14899_v1, %v14898_v47  ;;  %v4376_v31 = vsel %vm14900_vm12, %v4375_v42, %v4371_v53  ;;  %v4385_v16 = vrot.slane %v14901_v28, %v9316_v60  ;;  %v4450_v22 = vsel %vm1913_vm9, %v4449_v55, %v4445_v21  ;;  %vm14903_vm0 = vmmov %vm14895_vm6  ;;  %v12339_v61 = vpop.permute.xlu0 %4200  ;;  %v14909_v35 = vld [vmem:[#allocation136_spill] sm:$0xff]  ;;  %v14914_v10 = vld [vmem:[#allocation123_spill] sm:$0xff] }
 0x4f4   : > { %v4380_v39 = vrot.slane %v14902_v0, %v14898_v47  ;;  %v4455_v50 = vsel %vm14903_vm0, %v4454_v59, %v4450_v22  ;;  %v4464_v23 = vrot.slane %v14904_v58, %v9316_v60  ;;  %v4499_v24 = vsel %vm1871_vm3, %v4498_v9, %v4494_v19  ;;  %v14910_v59 = vld [vmem:[#allocation147_spill] sm:$0xff]  ;;  %v14916_v36 = vld [vmem:[#allocation150_spill] sm:$0xff] }
 0x4f5   : > { %v4302_v45 = vsel %vm1927_vm11, %v4301_v44, %v4297_v12  ;;  %v4459_v18 = vrot.slane %v14905_v32, %v14898_v47  ;;  %v4504_v48 = vsel %vm1878_vm4, %v4503_v63, %v4499_v24  ;;  %v4513_v27 = vrot.slane %v12121_v38, %v9152_v49  ;;  %v14913_v19 = vld [vmem:[#allocation63_spill] sm:$0xff] }
 0x4f6   : > { %v12305_v30 = vpop.permute.xlu1 %4167  ;;  %vm14906_vm6 = vcmask 851712   ;;  %v4316_v42 = vrot.slane %v14908_v3, %v14907_v29  ;;  %v4381_v34 = vsel %vm1927_vm11, %v4380_v39, %v4376_v31  ;;  %v4508_v21 = vrot.slane %v14909_v35, %v9107_v14  ;;  %v14917_v31 = vld [vmem:[#allocation124_spill] sm:$0xff]  ;;  %v14920_v24 = vld [vmem:[#allocation151_spill] sm:$0xff] }
 0x4f7   : > { %v4307_v5 = vsel %vm14906_vm6, %v4306_v57, %v4302_v45  ;;  %v4311_v43 = vrot.slane %v14911_v26, %v14910_v59  ;;  %vm14912_vm12 = vmmov %vm14906_vm6  ;;  %v4395_v63 = vrot.slane %v14913_v19, %v14907_v29  ;;  %v4460_v38 = vsel %vm1927_vm11, %v4459_v18, %v4455_v50  ;;  %v14919_v50 = vld [vmem:[#allocation137_spill] sm:$0xff]  ;;  %v14923_v35 = vld [vmem:[#allocation132_spill] sm:$0xff] }
 0x4f8   : > { %v4386_v55 = vsel %vm14912_vm12, %v4385_v16, %v4381_v34  ;;  %v4390_v57 = vrot.slane %v14914_v10, %v14910_v59  ;;  %vm14915_vm0 = vmmov %vm14906_vm6  ;;  %v4474_v9 = vrot.slane %v14916_v36, %v14907_v29  ;;  %v4509_v1 = vsel %vm1885_vm5, %v4508_v21, %v4504_v48  ;;  %v14921_v45 = vld [vmem:[#allocation117_spill] sm:$0xff]  ;;  %v14927_v36 = vld [vmem:[#allocation159_spill] sm:$0xff] }
 0x4f9   : > { %v4465_v53 = vsel %vm14915_vm0, %v4464_v23, %v4460_v38  ;;  %v4312_v44 = vsel %vm1941_vm13, %v4311_v43, %v4307_v5  ;;  %v4469_v28 = vrot.slane %v14917_v31, %v14910_v59  ;;  %vm14918_vm6 = vcmask 458112   ;;  %v12377_v23 = vpop.permute.xlu0 %4206  ;;  %v14925_v19 = vld [vmem:[#allocation141_spill] sm:$0xff] }
 0x4fa   : > { %v12331_v52 = vpop.permute.xlu1 %4173  ;;  %v4514_v16 = vsel %vm14918_vm6, %v4513_v27, %v4509_v1  ;;  %v4523_v22 = vrot.slane %v12125_v40, %v9170_v8  ;;  %v4317_v0 = vsel %vm1948_vm14, %v4316_v42, %v4312_v44  ;;  %v4391_v39 = vsel %vm1941_vm13, %v4390_v57, %v4386_v55  ;;  %v14922_v40 = vld [vmem:[#allocation157_spill] sm:$0xff] }
 0x4fb   : > { %v4518_v58 = vrot.slane %v14919_v50, %v9127_v62  ;;  %v4321_v32 = vrot.slane %v14921_v45, %v14920_v24  ;;  %v4396_v18 = vsel %vm1948_vm14, %v4395_v63, %v4391_v39  ;;  %v4470_v48 = vsel %vm1941_vm13, %v4469_v28, %v4465_v53  ;;  %v14926_v38 = vld [vmem:[#allocation145_spill] sm:$0xff]  ;;  %v14932_v45 = vld [vmem:[#allocation160_spill] sm:$0xff] }
 0x4fc   : > { %v4400_v5 = vrot.slane %v14922_v40, %v14920_v24  ;;  %v4475_v3 = vsel %vm1948_vm14, %v4474_v9, %v4470_v48  ;;  %v4479_v21 = vrot.slane %v14923_v35, %v14920_v24  ;;  %vm14924_vm12 = vcmask 589312   ;;  %v14929_v44 = vld [vmem:[#allocation85_spill] sm:$0xff]  ;;  %v14934_v48 = vld [vmem:[#allocation154_spill] sm:$0xff]  ;;  %v14936_v35 = vld [vmem:[#allocation131_spill] sm:$0xff] }
 0x4fd   : > { %v4519_v42 = vsel %vm1899_vm7, %v4518_v58, %v4514_v16  ;;  %v12390_v34 = vsel %vm1955_vm15, %v4321_v32, %v4317_v0  ;;  %v4533_v43 = vrot.slane %v12129_v17, %v9241_v56  ;;  %v4528_v63 = vrot.slane %v14925_v19, %v9155_v54  ;;  %v14928_v17 = vld [vmem:[#allocation32_spill] sm:$0xff]  ;;  %v14930_v16 = vld [vmem:[#allocation125_spill] sm:$0xff]  ;;  %v12424_v58 = vpop.permute.xlu0 %4212 }
 0x4fe   : > { %v12359_v12 = vpop.permute.xlu1 %4179  ;;  %v4524_v26 = vsel %vm14924_vm12, %v4523_v22, %v4519_v42  ;;  %v12398_v55 = vsel %vm1955_vm15, %v4400_v5, %v4396_v18  ;;  %v4538_v10 = vrot.slane %v14926_v38, %v14898_v47  ;;  %v4563_v57 = vrot.slane %v12141_v11, %v9059_v51  ;;  %v14931_v11 = vld [vmem:[#allocation92_spill] sm:$0xff]  ;;  %v14937_v19 = vld [vmem:[#allocation77_spill] sm:$0xff] }
 0x4ff   : > { %v12407_v53 = vsel %vm1955_vm15, %v4479_v21, %v4475_v3  ;;  %v4548_v9 = vrot.slane %v14927_v36, %v14910_v59  ;;  %v4572_v1 = vrot.slane %v14928_v17, %v9067_v13  ;;  %v4642_v31 = vrot.slane %v14929_v44, %v9059_v51  ;;  %v14935_v3 = vld [vmem:[#allocation126_spill] sm:$0xff]  ;;  %v14938_v38 = vld [vmem:[#allocation80_spill] sm:$0xff] }
 0x500   : > { %v4567_v22 = vrot.slane %v14930_v16, %v9041_v15  ;;  %v4529_v0 = vsel %vm1913_vm9, %v4528_v63, %v4524_v26  ;;  %v4651_v39 = vrot.slane %v14931_v11, %v9067_v13  ;;  %v4721_v50 = vrot.slane %v12229_v20, %v9059_v51 }
 0x501   : > { %v4577_v32 = vrot.slane %v14932_v45, %v9090_v4  ;;  %vm14933_vm0 = vcmask 720512   ;;  %v4646_v40 = vrot.slane %v14934_v48, %v9041_v15  ;;  %v4730_v5 = vrot.slane %v12253_v2, %v9067_v13  ;;  %v12463_v48 = vpop.permute.xlu0 %4218 }
 0x502   : > { %v12383_v27 = vpop.permute.xlu1 %4185  ;;  %v4534_v18 = vsel %vm14933_vm0, %v4533_v43, %v4529_v0  ;;  %v4587_v42 = vrot.slane %v14935_v3, %v9107_v14  ;;  %v4543_v21 = vrot.slane %v14936_v35, %v9316_v60  ;;  %v4568_v20 = vsel %vm1857_vm1, %v4567_v22, %v4563_v57  ;;  %v14939_v22 = vld [vmem:[#allocation73_spill] sm:$0xff] }
 0x503   : > { %v4725_v26 = vrot.slane %v12184_v7, %v9041_v15  ;;  %v4597_v43 = vrot.slane %v14937_v19, %v9127_v62  ;;  %v4573_v63 = vsel %vm1864_vm2, %v4572_v1, %v4568_v20  ;;  %v4582_v36 = vrot.slane %v14938_v38, %v9110_v25  ;;  %v14945_v38 = vld [vmem:[#allocation156_spill] sm:$0xff] }
 0x504   : > { %v4647_v2 = vsel %vm1857_vm1, %v4646_v40, %v4642_v31  ;;  %v4539_v44 = vsel %vm1927_vm11, %v4538_v10, %v4534_v18  ;;  %v4661_v57 = vrot.slane %v12182_v6, %v9110_v25  ;;  %v4656_v0 = vrot.slane %v14939_v22, %v9090_v4  ;;  %v14941_v10 = vld [vmem:[#allocation155_spill] sm:$0xff] }
 0x505   : > { %v4652_v16 = vsel %vm1864_vm2, %v4651_v39, %v4647_v2  ;;  %v4726_v7 = vsel %vm1857_vm1, %v4725_v26, %v4721_v50  ;;  %v4740_v11 = vrot.slane %v12277_v37, %v9110_v25  ;;  %vm14940_vm6 = vcmask 851712   ;;  %v14942_v6 = vld [vmem:[#allocation39_spill] sm:$0xff] }
 0x506   : > { %v12415_v28 = vpop.permute.xlu1 %4191  ;;  %v4731_v1 = vsel %vm1864_vm2, %v4730_v5, %v4726_v7  ;;  %v4544_v45 = vsel %vm14940_vm6, %v4543_v21, %v4539_v44  ;;  %v4607_v39 = vrot.slane %v14941_v10, %v9155_v54  ;;  %v4578_v18 = vsel %vm1871_vm3, %v4577_v32, %v4573_v63  ;;  %v14943_v5 = vld [vmem:[#allocation83_spill] sm:$0xff] }
 0x507   : > { %v4735_v50 = vrot.slane %v14942_v6, %v9090_v4  ;;  %v4583_v40 = vsel %vm1878_vm4, %v4582_v36, %v4578_v18  ;;  %v4592_v3 = vrot.slane %v14943_v5, %v9152_v49  ;;  %v4657_v37 = vsel %vm1871_vm3, %v4656_v0, %v4652_v16  ;;  %v14944_v32 = vld [vmem:[#allocation91_spill] sm:$0xff]  ;;  %v4225_v6 = vpop.permute.xlu0 %4224 }
 0x508   : > { %v4804_v35 = vrot.slane %v12339_v61, %v9041_v15  ;;  %v4662_v20 = vsel %vm1878_vm4, %v4661_v57, %v4657_v37  ;;  %v4671_v26 = vrot.slane %v14944_v32, %v9152_v49  ;;  %v4666_v36 = vrot.slane %v14945_v38, %v9107_v14  ;;  %v14946_v57 = vld [vmem:[#allocation88_spill] sm:$0xff]  ;;  %v14954_v32 = vld [vmem:[#allocation86_spill] sm:$0xff]  ;;  %v14956_v38 = vld [vmem:[#allocation41_spill] sm:$0xff] }
 0x509   : > { %v4736_v19 = vsel %vm1871_vm3, %v4735_v50, %v4731_v1  ;;  %v12483_v44 = vsel %vm1941_vm13, %v4548_v9, %v4544_v45  ;;  %v4588_v16 = vsel %vm1885_vm5, %v4587_v42, %v4583_v40  ;;  %v4745_v7 = vrot.slane %v14946_v57, %v9107_v14  ;;  %v14948_v1 = vld [vmem:[#allocation38_spill] sm:$0xff] }
 0x50a   : > { %v4198_v17 = vpop.permute.xlu1 %4197  ;;  %v4741_v2 = vsel %vm1878_vm4, %v4740_v11, %v4736_v19  ;;  %vm14947_vm12 = vcmask 458112   ;;  %v4602_v11 = vrot.slane %v14948_v1, %v9170_v8  ;;  %v4667_v10 = vsel %vm1885_vm5, %v4666_v36, %v4662_v20  ;;  %v14950_v42 = vld [vmem:[#allocation46_spill] sm:$0xff] }
 0x50b   : > { %v4800_v31 = vrot.slane %v4198_v17, %v9059_v51  ;;  %v4750_v17 = vrot.slane %v12305_v30, %v9152_v49  ;;  %v4593_v0 = vsel %vm14947_vm12, %v4592_v3, %v4588_v16  ;;  %v4814_v30 = vrot.slane %v12377_v23, %v9090_v4  ;;  %vm14949_vm0 = vmmov %vm14947_vm12  ;;  %v14951_v40 = vld [vmem:[#allocation158_spill] sm:$0xff] }
 0x50c   : > { %v4672_v9 = vsel %vm14949_vm0, %v4671_v26, %v4667_v10  ;;  %v4681_v45 = vrot.slane %v14950_v42, %v9170_v8  ;;  %v4746_v18 = vsel %vm1885_vm5, %v4745_v7, %v4741_v2  ;;  %v4676_v5 = vrot.slane %v14951_v40, %v9127_v62  ;;  %vm14952_vm6 = vmmov %vm14949_vm0  ;;  %v14961_v10 = vld [vmem:[#allocation161_spill] sm:$0xff]  ;;  %v14965_v40 = vld [vmem:[#allocation42_spill] sm:$0xff] }
 0x50d   : > { %v4805_v61 = vsel %vm1857_vm1, %v4804_v35, %v4800_v31  ;;  %v4751_v3 = vsel %vm14952_vm6, %v4750_v17, %v4746_v18  ;;  %v4760_v37 = vrot.slane %v12331_v52, %v9170_v8  ;;  %v14953_v35 = vld [vmem:[#allocation138_spill] sm:$0xff]  ;;  %v4598_v20 = vsel %vm1899_vm7, %v4597_v43, %v4593_v0 }
 0x50e   : > { %v4204_v21 = vpop.permute.xlu1 %4203  ;;  %v4755_v26 = vrot.slane %v14954_v32, %v9127_v62  ;;  %vm14955_vm12 = vcmask 589312   ;;  %v4612_v36 = vrot.slane %v14956_v38, %v9241_v56  ;;  %v4677_v2 = vsel %vm1899_vm7, %v4676_v5, %v4672_v9  ;;  %v14958_v43 = vld [vmem:[#allocation106_spill] sm:$0xff] }
 0x50f   : > { %v4809_v63 = vrot.slane %v4204_v21, %v9067_v13  ;;  %v4553_v21 = vrot.slane %v14953_v35, %v14907_v29  ;;  %v4824_v52 = vrot.slane %v12424_v58, %v9107_v14  ;;  %vm14957_vm0 = vmmov %vm14955_vm12  ;;  %v4691_v16 = vrot.slane %v14958_v43, %v9241_v56  ;;  %v14962_v9 = vld [vmem:[#allocation94_spill] sm:$0xff] }
 0x510   : > { %v4756_v57 = vsel %vm1899_vm7, %v4755_v26, %v4751_v3  ;;  %vm14960_vm6 = vmmov %vm14957_vm0  ;;  %v4765_v42 = vrot.slane %v14962_v9, %v9155_v54  ;;  %v4622_v5 = vrot.slane %v14965_v40, %v9316_v60  ;;  %v4834_v3 = vrot.slane %v12463_v48, %v9127_v62  ;;  %v14968_v26 = vld [vmem:[#allocation72_spill] sm:$0xff] }
 0x511   : > { %v4810_v22 = vsel %vm1864_vm2, %v4809_v63, %v4805_v61  ;;  %v4603_v63 = vsel %vm14955_vm12, %v4602_v11, %v4598_v20  ;;  %v4682_v61 = vsel %vm14957_vm0, %v4681_v45, %v4677_v2  ;;  %v4761_v1 = vsel %vm14960_vm6, %v4760_v37, %v4756_v57  ;;  %v4231_v45 = vpop.permute.xlu0 %4230 }
 0x512   : > { %v4210_v31 = vpop.permute.xlu1 %4209  ;;  %v4815_v23 = vsel %vm1871_vm3, %v4814_v30, %v4810_v22  ;;  %v14959_v22 = vld [vmem:[#allocation162_spill] sm:$0xff]  ;;  %v4770_v11 = vrot.slane %v12359_v12, %v9241_v56  ;;  %v4617_v30 = vrot.slane %v14961_v10, %v14898_v47  ;;  %vm14963_vm12 = vcmask 458112  }
 0x513   : > { %v4819_v50 = vrot.slane %v4210_v31, %v9110_v25  ;;  %v4686_v0 = vrot.slane %v14959_v22, %v9155_v54  ;;  %v4608_v31 = vsel %vm1913_vm9, %v4607_v39, %v4603_v63  ;;  %vm14964_vm0 = vcmask 720512   ;;  %v14967_v39 = vld [vmem:[#allocation109_spill] sm:$0xff] }
 0x514   : > { %vm14966_vm6 = vmmov %vm14964_vm0  ;;  %v4701_v35 = vrot.slane %v14967_v39, %v9316_v60  ;;  %v4766_v20 = vsel %vm1913_vm9, %v4765_v42, %v4761_v1  ;;  %v4780_v38 = vrot.slane %v12383_v27, %v9316_v60  ;;  %v4844_v27 = vrot.slane %v4225_v6, %v9155_v54  ;;  %v14975_v1 = vld [vmem:[#allocation111_spill] sm:$0xff] }
 0x515   : > { %v4820_v19 = vsel %vm1878_vm4, %v4819_v50, %v4815_v23  ;;  %v4613_v50 = vsel %vm14964_vm0, %v4612_v36, %v4608_v31  ;;  %v4687_v12 = vsel %vm1913_vm9, %v4686_v0, %v4682_v61  ;;  %v14970_v36 = vld [vmem:[#allocation142_spill] sm:$0xff]  ;;  %v4790_v42 = vrot.slane %v12415_v28, %v14907_v29 }
 0x516   : > { %v4216_v17 = vpop.permute.xlu1 %4215  ;;  %v4825_v58 = vsel %vm1885_vm5, %v4824_v52, %v4820_v19  ;;  %v4692_v23 = vsel %vm14966_vm6, %v4691_v16, %v4687_v12  ;;  %v4696_v19 = vrot.slane %v14968_v26, %v14898_v47  ;;  %v4627_v2 = vrot.slane %v14970_v36, %v14910_v59  ;;  %v14973_v16 = vld [vmem:[#allocation82_spill] sm:$0xff]  ;;  %v14979_v12 = vld [vmem:[#allocation152_spill] sm:$0xff] }
 0x517   : > { %v4829_v7 = vrot.slane %v4216_v17, %v9152_v49  ;;  %v4618_v52 = vsel %vm1927_vm11, %v4617_v30, %v4613_v50  ;;  %v4775_v17 = vrot.slane %v12223_v46, %v14898_v47  ;;  %vm14972_vm6 = vcmask 851712   ;;  %v4237_v46 = vpop.permute.xlu0 %4236  ;;  %v14976_v30 = vld [vmem:[#allocation79_spill] sm:$0xff]  ;;  %v14981_v26 = vld [vmem:[#allocation36_spill] sm:$0xff] }
 0x518   : > { %v4623_v43 = vsel %vm14972_vm6, %v4622_v5, %v4618_v52  ;;  %v4632_v57 = vrot.slane %v14973_v16, %v14907_v29  ;;  %v4706_v31 = vrot.slane %v14976_v30, %v14910_v59  ;;  %v4785_v40 = vrot.slane %v12261_v33, %v14910_v59 }
 0x519   : > { %v4830_v18 = vsel %vm14963_vm12, %v4829_v7, %v4825_v58  ;;  %vm14969_vm12 = vmmov %vm14964_vm0  ;;  %vm14971_vm0 = vcmask 589312   ;;  %v4697_v7 = vsel %vm1927_vm11, %v4696_v19, %v4692_v23  ;;  %v4628_v50 = vsel %vm1941_vm13, %v4627_v2, %v4623_v43 }
 0x51a   : > { %v4222_v37 = vpop.permute.xlu1 %4221  ;;  %v4771_v63 = vsel %vm14969_vm12, %v4770_v11, %v4766_v20  ;;  %v4835_v48 = vsel %vm1899_vm7, %v4834_v3, %v4830_v18  ;;  %vm14974_vm12 = vmmov %vm14972_vm6  ;;  %v4711_v11 = vrot.slane %v14975_v1, %v14907_v29  ;;  %v4554_v18 = vsel %vm1948_vm14, %v4553_v21, %v12483_v44 }
 0x51b   : > { %v4839_v32 = vrot.slane %v4222_v37, %v9170_v8  ;;  %v4702_v0 = vsel %vm14974_vm12, %v4701_v35, %v4697_v7  ;;  %v4776_v58 = vsel %vm1927_vm11, %v4775_v17, %v4771_v63  ;;  %v4558_v3 = vrot.slane %v14979_v12, %v14920_v24  ;;  %v14980_v35 = vld [vmem:[#allocation146_spill] sm:$0xff]  ;;  %v4243_v2 = vpop.permute.xlu0 %4242 }
 0x51c   : > { %v4633_v37 = vsel %vm1948_vm14, %v4632_v57, %v4628_v50  ;;  %v4707_v23 = vsel %vm1941_vm13, %v4706_v31, %v4702_v0  ;;  %v4854_v28 = vrot.slane %v4231_v45, %v14898_v47  ;;  %v4637_v44 = vrot.slane %v14980_v35, %v14920_v24  ;;  %v14990_v31 = vld [vmem:[#allocation249_spill] sm:$0xff]  ;;  %v14996_v35 = vld [vmem:[#allocation202_spill] sm:$0xff] }
 0x51d   : > { %v4840_v61 = vsel %vm14971_vm0, %v4839_v32, %v4835_v48  ;;  %vm14977_vm0 = vmmov %vm14972_vm6  ;;  %vm14978_vm6 = vcmask 720512   ;;  %v4712_v21 = vsel %vm1948_vm14, %v4711_v11, %v4707_v23  ;;  %v4559_v32 = vsel %vm1955_vm15, %v4558_v3, %v4554_v18  ;;  %v3299_v50 = vld [vmem:[#allocation3] sm:$0xff] }
 0x51e   : > { %v4228_v22 = vpop.permute.xlu1 %4227  ;;  %v4781_v9 = vsel %vm14977_vm0, %v4780_v38, %v4776_v58  ;;  %v4845_v6 = vsel %vm1913_vm9, %v4844_v27, %v4840_v61  ;;  %v4716_v19 = vrot.slane %v14981_v26, %v14920_v24  ;;  %vm14982_vm12 = vcmask 1041409   ;;  %v12617_v58 = vld [vmem:[#allocation4] sm:$0xff] }
 0x51f   : > { %v4849_v10 = vrot.slane %v4228_v22, %v9241_v56  ;;  %v4786_v20 = vsel %vm1941_vm13, %v4785_v40, %v4781_v9  ;;  %v4876_v45 = vsel %vm14982_vm12, %v12398_v55, %v12390_v34  ;;  %v4638_v48 = vsel %vm1955_vm15, %v4637_v44, %v4633_v37  ;;  %14987 = vst [vmem:[#allocation89_spill] sm:$0xff] %v12617_v58  ;;  %v14991_v9 = vld [vmem:[#allocation295_spill] sm:$0xff] }
 0x520   : > { %v4791_v63 = vsel %vm1948_vm14, %v4790_v42, %v4786_v20  ;;  %v4795_v36 = vrot.slane %v12297_v41, %v14920_v24  ;;  %v4864_v61 = vrot.slane %v4237_v46, %v14910_v59  ;;  %v4717_v16 = vsel %vm1955_vm15, %v4716_v19, %v4712_v21  ;;  %v14994_v37 = vld [vmem:[#allocation31_spill] sm:$0xff] }
 0x521   : > { %v4850_v5 = vsel %vm14978_vm6, %v4849_v10, %v4845_v6  ;;  %vm14983_vm6 = vcmask 1042434   ;;  %vm14984_vm12 = vcmask 1043459   ;;  %v4874_v7 = vrot.slane %v4243_v2, %v14920_v24  ;;  %v14997_v21 = vld [vmem:[#allocation207_spill] sm:$0xff] }
 0x522   : > { %v4234_v39 = vpop.permute.xlu1 %4233  ;;  %v4855_v38 = vsel %vm1927_vm11, %v4854_v28, %v4850_v5  ;;  %v4877_v17 = vsel %vm14983_vm6, %v12407_v53, %v4876_v45  ;;  %v4796_v34 = vsel %vm1955_vm15, %v4795_v36, %v4791_v63  ;;  %vm14986_vm6 = vcmask 1047559   ;;  %v14995_v28 = vld [vmem:[#allocation203_spill] sm:$0xff]  ;;  %v15000_v36 = vld [vmem:[#allocation206_spill] sm:$0xff] }
 0x523   : > { %v4859_v33 = vrot.slane %v4234_v39, %v9316_v60  ;;  %v4878_v55 = vsel %vm14984_vm12, %v4559_v32, %v4877_v17  ;;  %vm14989_vm12 = vcmask 7168   ;;  %v14992_v42 = vsub.f32 %v14990_v31, %v14991_v9  ;;  %v15001_v17 = vld [vmem:[#allocation218_spill] sm:$0xff]  ;;  %v15006_v9 = vld [vmem:[#allocation221_spill] sm:$0xff] }
 0x524   : > { %v4879_v27 = vsel %vm2516_vm8, %v4638_v48, %v4878_v55  ;;  %v15003_v55 = vld [vmem:[#allocation222_spill] sm:$0xff] }
 0x525   : > { %v4860_v52 = vsel %vm14977_vm0, %v4859_v33, %v4855_v38  ;;  %v4880_v53 = vsel %vm13945_vm10, %v4717_v16, %v4879_v27  ;;  %vm14985_vm0 = vcmask 1046534   ;;  %v3301_v6 = vmul.f32 1.442695, %v14992_v42  ;;  %v14998_v33 = vld [vmem:[#allocation201_spill] sm:$0xff]  ;;  %v14999_v38 = vld [vmem:[#allocation214_spill] sm:$0xff] }
 0x526   : > { %v4240_v43 = vpop.permute.xlu1 %4239  ;;  %v4865_v41 = vsel %vm1941_vm13, %v4864_v61, %v4860_v52  ;;  %v4881_v1 = vsel %vm14985_vm0, %v4796_v34, %v4880_v53  ;;  %vm14993_vm0 = vmmov %vm14989_vm12  ;;  %v15002_v16 = vld [vmem:[#allocation213_spill] sm:$0xff] }
 0x527   : > { %v4869_v57 = vrot.slane %v4240_v43, %v14907_v29  ;;  %7518 = vpow2.f32 %v3301_v6  ;;  %v15004_v27 = vld [vmem:[#allocation217_spill] sm:$0xff] }
 0x529   : > { %v4870_v22 = vsel %vm1948_vm14, %v4869_v57, %v4865_v41 }
 0x52a   : > { %v4875_v0 = vsel %vm1955_vm15, %v4874_v7, %v4870_v22 }
 0x52b   : > { %v4882_v11 = vsel %vm14986_vm6, %v4875_v0, %v4881_v1  ;;  %vm15126_vm6 = vcmask 458112  }
 0x52c   : > { %4884 = vadd.xlane.f32.xlu1 %v4882_v11  ;;  %v15005_v11 = vld [vmem:[#allocation226_spill] sm:$0xff] }
 0x531   : > { %v7519_v18 = vpop.eup %7518 }
 0x532   : > { %v3303_v40 = vmul.f32 %v7519_v18, %v3299_v50  ;;  %v15007_v50 = vld [vmem:[#allocation100_spill] sm:$0xff] }
 0x53c   : > { %v4892_v46 = vpop.xlane.xlu0 %4891 }
 0x53d   : > { %v12620_v10 = vmax.f32 %v12617_v58, %v4892_v46 }
 0x53f   : > { %14988 = vst [vmem:[#allocation102_spill] sm:$0xff] %v12620_v10  ;;  %6483 = vst.msk [vmem:[#allocation4] sm:$0xff] %vm14989_vm12, %v12620_v10  ;;  %4901 = vperm.xlu0 %7261, %v12620_v10   ;;  %vm15129_vm12 = vcmask 589312  }
 0x5b9   : > { %v4885_v5 = vpop.xlane.xlu1 %4884 }
 0x5ba   : > { %v4886_v12 = vadd.f32 %v4885_v5, %v3303_v40 }
 0x5bc   : > { %4888 = vst.msk [vmem:[#allocation3] sm:$0xff] %vm14993_vm0, %v4886_v12  ;;  %v15008_v12 = vld [vmem:[#allocation230_spill] sm:$0xff]  ;;  %vm15132_vm0 = vcmask 720512  }
 0x5be   : > { %v12631_v3 = vpop.permute.xlu0 %4901 }
 0x5bf   : > { %v12635_v23 = vrot.slane %v12631_v3, %v14994_v37  ;;  %v12663_v40 = vrot.slane %v12631_v3, %v15007_v50 }
 0x5c1   : > { %v4945_v39 = vsub.f32 %v14995_v28, %v12635_v23  ;;  %v4943_v44 = vsub.f32 %v14996_v35, %v12635_v23  ;;  %v4947_v20 = vsub.f32 %v14997_v21, %v12635_v23  ;;  %v4944_v32 = vsub.f32 %v14998_v33, %v12635_v23  ;;  %v15010_v33 = vld [vmem:[#allocation209_spill] sm:$0xff] }
 0x5c2   : > { %v4949_v45 = vsub.f32 %v14999_v38, %v12635_v23  ;;  %v4946_v2 = vsub.f32 %v15000_v36, %v12635_v23  ;;  %v4951_v61 = vsub.f32 %v15001_v17, %v12635_v23  ;;  %v4948_v57 = vsub.f32 %v15002_v16, %v12635_v23  ;;  %v15012_v36 = vld [vmem:[#allocation212_spill] sm:$0xff] }
 0x5c3   : > { %v5075_v26 = vmul.f32 1.442695, %v4945_v39  ;;  %v5071_v19 = vmul.f32 1.442695, %v4943_v44  ;;  %v5079_v63 = vmul.f32 1.442695, %v4947_v20  ;;  %v4953_v7 = vsub.f32 %v15003_v55, %v12635_v23 }
 0x5c4   : > { %v5073_v48 = vmul.f32 1.442695, %v4944_v32  ;;  %v5083_v52 = vmul.f32 1.442695, %v4949_v45  ;;  %v5077_v43 = vmul.f32 1.442695, %v4946_v2  ;;  %v4950_v22 = vsub.f32 %v15004_v27, %v12635_v23 }
 0x5c5   : > { %7520 = vpow2.f32 %v5075_v26  ;;  %v5087_v34 = vmul.f32 1.442695, %v4951_v61  ;;  %v5081_v41 = vmul.f32 1.442695, %v4948_v57  ;;  %v5091_v1 = vmul.f32 1.442695, %v4953_v7 }
 0x5c6   : > { %7522 = vpow2.f32 %v5071_v19  ;;  %v4955_v46 = vsub.f32 %v15005_v11, %v12635_v23  ;;  %v5085_v31 = vmul.f32 1.442695, %v4950_v22  ;;  %v4952_v42 = vsub.f32 %v15006_v9, %v12635_v23  ;;  %v15009_v39 = vld [vmem:[#allocation225_spill] sm:$0xff]  ;;  %v15013_v17 = vld [vmem:[#allocation236_spill] sm:$0xff] }
 0x5c7   : > { %7524 = vpow2.f32 %v5079_v63  ;;  %v4957_v37 = vsub.f32 %v15008_v12, %v12635_v23  ;;  %v4954_v35 = vsub.f32 %v15009_v39, %v12635_v23  ;;  %v4959_v32 = vsub.f32 %v15010_v33, %v12663_v40  ;;  %v15011_v19 = vld [vmem:[#allocation229_spill] sm:$0xff]  ;;  %v15019_v12 = vld [vmem:[#allocation219_spill] sm:$0xff] }
 0x5c8   : > { %7526 = vpow2.f32 %v5073_v48  ;;  %v5095_v5 = vmul.f32 1.442695, %v4955_v46  ;;  %v5089_v28 = vmul.f32 1.442695, %v4952_v42  ;;  %v4956_v63 = vsub.f32 %v15011_v19, %v12635_v23  ;;  %v15017_v46 = vld [vmem:[#allocation215_spill] sm:$0xff] }
 0x5c9   : > { %7528 = vpow2.f32 %v5083_v52  ;;  %v5099_v20 = vmul.f32 1.442695, %v4957_v37  ;;  %v5093_v26 = vmul.f32 1.442695, %v4954_v35  ;;  %v5103_v48 = vmul.f32 1.442695, %v4959_v32 }
 0x5ca   : > { %7530 = vpow2.f32 %v5077_v43  ;;  %v4961_v2 = vsub.f32 %v15012_v36, %v12663_v40  ;;  %v5097_v52 = vmul.f32 1.442695, %v4956_v63  ;;  %v4958_v61 = vsub.f32 %v15013_v17, %v12635_v23  ;;  %v15021_v33 = vld [vmem:[#allocation223_spill] sm:$0xff] }
 0x5cb   : > { %7532 = vpow2.f32 %v5087_v34  ;;  %v15014_v34 = vld [vmem:[#allocation216_spill] sm:$0xff]  ;;  %v4964_v37 = vsub.f32 %v15019_v12, %v12663_v40  ;;  %v4966_v32 = vsub.f32 %v15021_v33, %v12663_v40  ;;  %v15023_v36 = vld [vmem:[#allocation227_spill] sm:$0xff]  ;;  %v15031_v12 = vld [vmem:[#allocation54_spill] sm:$0xff] }
 0x5cc   : > { %7534 = vpow2.f32 %v5081_v41  ;;  %v5107_v57 = vmul.f32 1.442695, %v4961_v2  ;;  %v4963_v55 = vsub.f32 %v15014_v34, %v12663_v40  ;;  %v5101_v7 = vmul.f32 1.442695, %v4958_v61  ;;  %v15015_v41 = vld [vmem:[#allocation208_spill] sm:$0xff]  ;;  %v15024_v61 = vld [vmem:[#allocation30_spill] sm:$0xff] }
 0x5cd   : > { %7536 = vpow2.f32 %v5091_v1  ;;  %v4960_v27 = vsub.f32 %v15015_v41, %v12663_v40  ;;  %v4968_v2 = vsub.f32 %v15023_v36, %v12663_v40  ;;  %v15026_v34 = vld [vmem:[#allocation55_spill] sm:$0xff]  ;;  %v15033_v33 = vld [vmem:[#allocation232_spill] sm:$0xff] }
 0x5ce   : > { %7538 = vpow2.f32 %v5085_v31  ;;  %v5111_v23 = vmul.f32 1.442695, %v4963_v55  ;;  %v4962_v31 = vsub.f32 %v15017_v46, %v12663_v40  ;;  %v4973_v55 = vsub.f32 %v15026_v34, %v12663_v40  ;;  %v15027_v41 = vld [vmem:[#allocation231_spill] sm:$0xff]  ;;  %v15029_v46 = vld [vmem:[#allocation238_spill] sm:$0xff] }
 0x5cf   : > { %v7521_v53 = vpop.eup %7520  ;;  %7540 = vpow2.f32 %v5095_v5  ;;  %v5105_v11 = vmul.f32 1.442695, %v4960_v27  ;;  %v4970_v27 = vsub.f32 %v15027_v41, %v12663_v40 }
 0x5d0   : > { %v7523_v0 = vpop.eup %7522  ;;  %5462 = vperm.xlu0 %7261, %v7521_v53   ;;  %7542 = vpow2.f32 %v5089_v28  ;;  %v5109_v5 = vmul.f32 1.442695, %v4962_v31  ;;  %v4972_v31 = vsub.f32 %v15029_v46, %v12663_v40 }
 0x5d1   : > { %5456 = vperm.xlu1 %7260, %v7523_v0   ;;  %v7525_v6 = vpop.eup %7524  ;;  %7544 = vpow2.f32 %v5099_v20  ;;  %v15016_v0 = vld [vmem:[#allocation220_spill] sm:$0xff]  ;;  %v5113_v20 = vmul.f32 1.442695, %v4964_v37  ;;  %v4974_v37 = vsub.f32 %v15031_v12, %v12663_v40 }
 0x5d2   : > { %v7527_v18 = vpop.eup %7526  ;;  %7546 = vpow2.f32 %v5093_v26  ;;  %v4965_v1 = vsub.f32 %v15016_v0, %v12663_v40  ;;  %v15028_v0 = vld [vmem:[#allocation233_spill] sm:$0xff] }
 0x5d3   : > { %v7529_v44 = vpop.eup %7528  ;;  %7548 = vpow2.f32 %v5103_v48  ;;  %v5117_v48 = vmul.f32 1.442695, %v4966_v32 }
 0x5d4   : > { %5468 = vperm.xlu0 %7261, %v7525_v6   ;;  %v7531_v21 = vpop.eup %7530  ;;  %7550 = vpow2.f32 %v5097_v52  ;;  %v5115_v6 = vmul.f32 1.442695, %v4965_v1 }
 0x5d5   : > { %5459 = vperm.xlu1 %7260, %v7527_v18   ;;  %v7533_v38 = vpop.eup %7532  ;;  %7552 = vpow2.f32 %v5107_v57  ;;  %v15018_v18 = vld [vmem:[#allocation224_spill] sm:$0xff] }
 0x5d6   : > { %v7535_v45 = vpop.eup %7534  ;;  %7554 = vpow2.f32 %v5101_v7  ;;  %v4967_v50 = vsub.f32 %v15018_v18, %v12663_v40  ;;  %v5121_v7 = vmul.f32 1.442695, %v4968_v2  ;;  %v15030_v18 = vld [vmem:[#allocation234_spill] sm:$0xff] }
 0x5d7   : > { %v7537_v43 = vpop.eup %7536  ;;  %7556 = vpow2.f32 %v5111_v23  ;;  %v5131_v23 = vmul.f32 1.442695, %v4973_v55  ;;  %v15037_v55 = vld [vmem:[#allocation56_spill] sm:$0xff] }
 0x5d8   : > { %5474 = vperm.xlu0 %7261, %v7529_v44   ;;  %v7539_v16 = vpop.eup %7538  ;;  %7558 = vpow2.f32 %v5105_v11  ;;  %v5119_v35 = vmul.f32 1.442695, %v4967_v50  ;;  %v15020_v44 = vld [vmem:[#allocation228_spill] sm:$0xff]  ;;  %v5125_v11 = vmul.f32 1.442695, %v4970_v27 }
 0x5d9   : > { %5465 = vperm.xlu1 %7260, %v7531_v21   ;;  %v7541_v22 = vpop.eup %7540  ;;  %7560 = vpow2.f32 %v5115_v6  ;;  %v4969_v21 = vsub.f32 %v15020_v44, %v12663_v40  ;;  %v15032_v44 = vld [vmem:[#allocation57_spill] sm:$0xff] }
 0x5da   : > { %v7543_v53 = vpop.eup %7542  ;;  %7562 = vpow2.f32 %v5109_v5  ;;  %v5129_v5 = vmul.f32 1.442695, %v4972_v31 }
 0x5db   : > { %v7545_v9 = vpop.eup %7544  ;;  %7564 = vpow2.f32 %v5119_v35  ;;  %v5123_v63 = vmul.f32 1.442695, %v4969_v21 }
 0x5dc   : > { %5480 = vperm.xlu0 %7261, %v7533_v38   ;;  %v7547_v42 = vpop.eup %7546  ;;  %v15022_v38 = vld [vmem:[#allocation235_spill] sm:$0xff]  ;;  %7566 = vpow2.f32 %v5113_v20  ;;  %v5133_v20 = vmul.f32 1.442695, %v4974_v37 }
 0x5dd   : > { %5471 = vperm.xlu1 %7260, %v7535_v45   ;;  %v7549_v28 = vpop.eup %7548  ;;  %v4971_v45 = vsub.f32 %v15022_v38, %v12663_v40  ;;  %7568 = vpow2.f32 %v5123_v63  ;;  %v15034_v63 = vld [vmem:[#allocation59_spill] sm:$0xff] }
 0x5de   : > { %v7551_v39 = vpop.eup %7550  ;;  %7570 = vpow2.f32 %v5117_v48  ;;  %v15035_v48 = vld [vmem:[#allocation237_spill] sm:$0xff] }
 0x5df   : > { %v7553_v26 = vpop.eup %7552  ;;  %v5127_v57 = vmul.f32 1.442695, %v4971_v45 }
 0x5e0   : > { %5486 = vperm.xlu0 %7261, %v7537_v43   ;;  %v7555_v19 = vpop.eup %7554  ;;  %v15025_v43 = vsub.s32 2, %v15024_v61 }
 0x5e1   : > { %5477 = vperm.xlu1 %7260, %v7539_v16   ;;  %v7557_v52 = vpop.eup %7556  ;;  %7572 = vpow2.f32 %v5127_v57 }
 0x5e2   : > { %v7559_v17 = vpop.eup %7558  ;;  %v12700_v16 = vrot.slane %v12631_v3, %v15025_v43  ;;  %7574 = vpow2.f32 %v5121_v7  ;;  %v15036_v43 = vld [vmem:[#allocation61_spill] sm:$0xff] }
 0x5e3   : > { %7576 = vpow2.f32 %v5131_v23 }
 0x5e4   : > { %5492 = vperm.xlu0 %7261, %v7541_v22   ;;  %v7561_v22 = vpop.eup %7560  ;;  %v4975_v1 = vsub.f32 %v15028_v0, %v12700_v16  ;;  %v4977_v50 = vsub.f32 %v15030_v18, %v12700_v16  ;;  %7578 = vpow2.f32 %v5125_v11  ;;  %v4979_v21 = vsub.f32 %v15032_v44, %v12700_v16  ;;  %v15043_v44 = vld [vmem:[#allocation68_spill] sm:$0xff] }
 0x5e5   : > { %5483 = vperm.xlu1 %7260, %v7543_v53   ;;  %v7563_v53 = vpop.eup %7562  ;;  %v4976_v32 = vsub.f32 %v15033_v33, %v12700_v16  ;;  %v4981_v38 = vsub.f32 %v15034_v63, %v12700_v16  ;;  %v4978_v36 = vsub.f32 %v15035_v48, %v12700_v16  ;;  %v4983_v57 = vsub.f32 %v15036_v43, %v12700_v16  ;;  %v15044_v33 = vld [vmem:[#allocation62_spill] sm:$0xff]  ;;  %v15046_v48 = vld [vmem:[#allocation65_spill] sm:$0xff] }
 0x5e6   : > { %v5135_v6 = vmul.f32 1.442695, %v4975_v1  ;;  %v5139_v35 = vmul.f32 1.442695, %v4977_v50  ;;  %v5143_v40 = vmul.f32 1.442695, %v4979_v21  ;;  %v4980_v7 = vsub.f32 %v15037_v55, %v12700_v16 }
 0x5e7   : > { %v5137_v45 = vmul.f32 1.442695, %v4976_v32  ;;  %v5141_v34 = vmul.f32 1.442695, %v4978_v36  ;;  %v15039_v1 = vld [vmem:[#allocation58_spill] sm:$0xff]  ;;  %v15041_v50 = vld [vmem:[#allocation60_spill] sm:$0xff]  ;;  %v4989_v21 = vsub.f32 %v15043_v44, %v12700_v16  ;;  %v4986_v32 = vsub.f32 %v15044_v33, %v12700_v16 }
 0x5e8   : > { %5498 = vperm.xlu0 %7261, %v7545_v9   ;;  %v7565_v9 = vpop.eup %7564  ;;  %7580 = vpow2.f32 %v5135_v6  ;;  %v5145_v0 = vmul.f32 1.442695, %v4980_v7  ;;  %v4982_v11 = vsub.f32 %v15039_v1, %v12700_v16  ;;  %v15045_v63 = vld [vmem:[#allocation70_spill] sm:$0xff]  ;;  %v4988_v36 = vsub.f32 %v15046_v48, %v12700_v16  ;;  %v15048_v55 = vld [vmem:[#allocation67_spill] sm:$0xff]  ;;  %v15050_v1 = vld [vmem:[#allocation69_spill] sm:$0xff] }
 0x5e9   : > { %5489 = vperm.xlu1 %7260, %v7547_v42   ;;  %v7567_v42 = vpop.eup %7566  ;;  %7582 = vpow2.f32 %v5129_v5  ;;  %v4984_v5 = vsub.f32 %v15041_v50, %v12700_v16  ;;  %v15047_v43 = vld [vmem:[#allocation74_spill] sm:$0xff]  ;;  %v4990_v7 = vsub.f32 %v15048_v55, %v12700_v16 }
 0x5ea   : > { %7584 = vpow2.f32 %v5139_v35  ;;  %v5149_v18 = vmul.f32 1.442695, %v4982_v11 }
 0x5eb   : > { %7586 = vpow2.f32 %v5133_v20  ;;  %v5153_v20 = vmul.f32 1.442695, %v4984_v5 }
 0x5ec   : > { %5504 = vperm.xlu0 %7261, %v7549_v28   ;;  %v7569_v28 = vpop.eup %7568  ;;  %7588 = vpow2.f32 %v5143_v40  ;;  %v5163_v40 = vmul.f32 1.442695, %v4989_v21  ;;  %v15054_v21 = vld [vmem:[#allocation243_spill] sm:$0xff] }
 0x5ed   : > { %5495 = vperm.xlu1 %7260, %v7551_v39   ;;  %v7571_v39 = vpop.eup %7570  ;;  %7590 = vpow2.f32 %v5137_v45  ;;  %v5157_v45 = vmul.f32 1.442695, %v4986_v32 }
 0x5f0   : > { %5510 = vperm.xlu0 %7261, %v7553_v26   ;;  %v7573_v26 = vpop.eup %7572 }
 0x5f1   : > { %5501 = vperm.xlu1 %7260, %v7555_v19   ;;  %v7575_v19 = vpop.eup %7574 }
 0x5f2   : > { %v7577_v2 = vpop.eup %7576 }
 0x5f4   : > { %5516 = vperm.xlu0 %7261, %v7557_v52   ;;  %v7579_v52 = vpop.eup %7578 }
 0x5f5   : > { %5507 = vperm.xlu1 %7260, %v7559_v17   ;;  %v5147_v17 = vmul.f32 1.442695, %v4981_v38  ;;  %v7581_v41 = vpop.eup %7580 }
 0x5f6   : > { %v7583_v27 = vpop.eup %7582 }
 0x5f7   : > { %7592 = vpow2.f32 %v5147_v17  ;;  %v7585_v46 = vpop.eup %7584 }
 0x5f8   : > { %5522 = vperm.xlu0 %7261, %v7561_v22   ;;  %v5151_v22 = vmul.f32 1.442695, %v4983_v57  ;;  %7594 = vpow2.f32 %v5141_v34  ;;  %v7587_v31 = vpop.eup %7586  ;;  %v5161_v34 = vmul.f32 1.442695, %v4988_v36 }
 0x5f9   : > { %5513 = vperm.xlu1 %7260, %v7563_v53   ;;  %v15038_v53 = vld [vmem:[#allocation64_spill] sm:$0xff]  ;;  %v7589_v12 = vpop.eup %7588 }
 0x5fa   : > { %v4985_v23 = vsub.f32 %v15038_v53, %v12700_v16  ;;  %7596 = vpow2.f32 %v5151_v22  ;;  %v7591_v37 = vpop.eup %7590  ;;  %v15049_v53 = vld [vmem:[#allocation240_spill] sm:$0xff] }
 0x5fb   : > { %7598 = vpow2.f32 %v5145_v0  ;;  %v5165_v0 = vmul.f32 1.442695, %v4990_v7 }
 0x5fc   : > { %5528 = vperm.xlu0 %7261, %v7565_v9   ;;  %v5155_v9 = vmul.f32 1.442695, %v4985_v23 }
 0x5fd   : > { %5519 = vperm.xlu1 %7260, %v7567_v42   ;;  %v15040_v42 = vld [vmem:[#allocation66_spill] sm:$0xff] }
 0x5fe   : > { %v4987_v6 = vsub.f32 %v15040_v42, %v12700_v16  ;;  %7600 = vpow2.f32 %v5155_v9  ;;  %v15051_v9 = vld [vmem:[#allocation244_spill] sm:$0xff] }
 0x5ff   : > { %7602 = vpow2.f32 %v5149_v18  ;;  %v15052_v18 = vld [vmem:[#allocation71_spill] sm:$0xff] }
 0x600   : > { %5534 = vperm.xlu0 %7261, %v7569_v28   ;;  %v15042_v28 = vsub.s32 3, %v15024_v61  ;;  %v5159_v35 = vmul.f32 1.442695, %v4987_v6 }
 0x601   : > { %5525 = vperm.xlu1 %7260, %v7571_v39  }
 0x602   : > { %v12737_v39 = vrot.slane %v12631_v3, %v15042_v28  ;;  %7604 = vpow2.f32 %v5159_v35  ;;  %v15053_v28 = vld [vmem:[#allocation78_spill] sm:$0xff] }
 0x603   : > { %7606 = vpow2.f32 %v5153_v20 }
 0x604   : > { %5540 = vperm.xlu0 %7261, %v7573_v26   ;;  %v7593_v26 = vpop.eup %7592  ;;  %v4991_v38 = vsub.f32 %v15045_v63, %v12737_v39  ;;  %7608 = vpow2.f32 %v5163_v40  ;;  %v4993_v57 = vsub.f32 %v15047_v43, %v12737_v39  ;;  %v4995_v23 = vsub.f32 %v15049_v53, %v12737_v39  ;;  %v15060_v53 = vld [vmem:[#allocation96_spill] sm:$0xff] }
 0x605   : > { %5531 = vperm.xlu1 %7260, %v7575_v19   ;;  %v7595_v19 = vpop.eup %7594  ;;  %7610 = vpow2.f32 %v5157_v45  ;;  %v4992_v11 = vsub.f32 %v15050_v1, %v12737_v39  ;;  %v4997_v42 = vsub.f32 %v15051_v9, %v12737_v39  ;;  %v4994_v50 = vsub.f32 %v15052_v18, %v12737_v39  ;;  %v15061_v1 = vld [vmem:[#allocation81_spill] sm:$0xff]  ;;  %v15062_v9 = vld [vmem:[#allocation246_spill] sm:$0xff]  ;;  %v15063_v18 = vld [vmem:[#allocation87_spill] sm:$0xff] }
 0x606   : > { %v5167_v17 = vmul.f32 1.442695, %v4991_v38  ;;  %v5171_v22 = vmul.f32 1.442695, %v4993_v57  ;;  %v5175_v16 = vmul.f32 1.442695, %v4995_v23  ;;  %v4999_v35 = vsub.f32 %v15053_v28, %v12737_v39 }
 0x607   : > { %v5169_v6 = vmul.f32 1.442695, %v4992_v11  ;;  %v5173_v44 = vmul.f32 1.442695, %v4994_v50  ;;  %v4996_v20 = vsub.f32 %v15054_v21, %v12737_v39  ;;  %v15056_v38 = vld [vmem:[#allocation75_spill] sm:$0xff]  ;;  %v15058_v57 = vld [vmem:[#allocation76_spill] sm:$0xff]  ;;  %v5005_v23 = vsub.f32 %v15060_v53, %v12737_v39 }
 0x608   : > { %5546 = vperm.xlu0 %7261, %v7577_v2   ;;  %v7597_v2 = vpop.eup %7596  ;;  %7612 = vpow2.f32 %v5167_v17  ;;  %v4998_v45 = vsub.f32 %v15056_v38, %v12737_v39  ;;  %v5002_v11 = vsub.f32 %v15061_v1, %v12737_v39  ;;  %v5004_v50 = vsub.f32 %v15063_v18, %v12737_v39  ;;  %v15064_v28 = vld [vmem:[#allocation247_spill] sm:$0xff]  ;;  %v15065_v21 = vld [vmem:[#allocation93_spill] sm:$0xff] }
 0x609   : > { %5537 = vperm.xlu1 %7260, %v7579_v52   ;;  %v7599_v52 = vpop.eup %7598  ;;  %7614 = vpow2.f32 %v5161_v34  ;;  %v5177_v63 = vmul.f32 1.442695, %v4996_v20  ;;  %v5000_v34 = vsub.f32 %v15058_v57, %v12737_v39  ;;  %v5006_v20 = vsub.f32 %v15065_v21, %v12737_v39  ;;  %v15067_v38 = vld [vmem:[#allocation245_spill] sm:$0xff] }
 0x60a   : > { %7616 = vpow2.f32 %v5171_v22  ;;  %v5181_v43 = vmul.f32 1.442695, %v4998_v45  ;;  %v15075_v21 = vld [vmem:[#allocation197_spill] sm:$0xff] }
 0x60b   : > { %7618 = vpow2.f32 %v5165_v0  ;;  %v5185_v0 = vmul.f32 1.442695, %v5000_v34 }
 0x60c   : > { %5552 = vperm.xlu0 %7261, %v7581_v41   ;;  %v7601_v41 = vpop.eup %7600  ;;  %7620 = vpow2.f32 %v5175_v16  ;;  %v5195_v16 = vmul.f32 1.442695, %v5005_v23  ;;  %v15071_v23 = vld [vmem:[#allocation194_spill] sm:$0xff] }
 0x60d   : > { %5543 = vperm.xlu1 %7260, %v7583_v27   ;;  %v7603_v27 = vpop.eup %7602  ;;  %7622 = vpow2.f32 %v5169_v6  ;;  %v5189_v6 = vmul.f32 1.442695, %v5002_v11 }
 0x610   : > { %5558 = vperm.xlu0 %7261, %v7585_v46   ;;  %v7605_v46 = vpop.eup %7604 }
 0x611   : > { %5549 = vperm.xlu1 %7260, %v7587_v31   ;;  %v7607_v31 = vpop.eup %7606 }
 0x612   : > { %v7609_v5 = vpop.eup %7608 }
 0x614   : > { %5564 = vperm.xlu0 %7261, %v7589_v12   ;;  %v7611_v12 = vpop.eup %7610 }
 0x615   : > { %5555 = vperm.xlu1 %7260, %v7591_v37   ;;  %v5179_v37 = vmul.f32 1.442695, %v4997_v42  ;;  %v7613_v33 = vpop.eup %7612 }
 0x616   : > { %v7615_v32 = vpop.eup %7614 }
 0x617   : > { %7624 = vpow2.f32 %v5179_v37  ;;  %v7617_v48 = vpop.eup %7616 }
 0x618   : > { %5570 = vperm.xlu0 %7261, %v7593_v26   ;;  %v5183_v26 = vmul.f32 1.442695, %v4999_v35  ;;  %7626 = vpow2.f32 %v5173_v44  ;;  %v7619_v36 = vpop.eup %7618  ;;  %v5193_v44 = vmul.f32 1.442695, %v5004_v50 }
 0x619   : > { %5561 = vperm.xlu1 %7260, %v7595_v19   ;;  %v15055_v19 = vld [vmem:[#allocation84_spill] sm:$0xff]  ;;  %v7621_v55 = vpop.eup %7620 }
 0x61a   : > { %v5001_v40 = vsub.f32 %v15055_v19, %v12737_v39  ;;  %7628 = vpow2.f32 %v5183_v26  ;;  %v7623_v7 = vpop.eup %7622  ;;  %v15066_v19 = vld [vmem:[#allocation195_spill] sm:$0xff] }
 0x61b   : > { %7630 = vpow2.f32 %v5177_v63  ;;  %v5197_v63 = vmul.f32 1.442695, %v5006_v20 }
 0x61c   : > { %5576 = vperm.xlu0 %7261, %v7597_v2   ;;  %v5187_v2 = vmul.f32 1.442695, %v5001_v40 }
 0x61d   : > { %5567 = vperm.xlu1 %7260, %v7599_v52   ;;  %v15057_v52 = vld [vmem:[#allocation90_spill] sm:$0xff] }
 0x61e   : > { %v5003_v17 = vsub.f32 %v15057_v52, %v12737_v39  ;;  %7632 = vpow2.f32 %v5187_v2  ;;  %v15068_v2 = vld [vmem:[#allocation248_spill] sm:$0xff] }
 0x61f   : > { %7634 = vpow2.f32 %v5181_v43  ;;  %v15069_v43 = vld [vmem:[#allocation99_spill] sm:$0xff] }
 0x620   : > { %5582 = vperm.xlu0 %7261, %v7601_v41   ;;  %v15059_v41 = vsub.s32 4, %v15024_v61  ;;  %v5191_v22 = vmul.f32 1.442695, %v5003_v17 }
 0x621   : > { %5573 = vperm.xlu1 %7260, %v7603_v27  }
 0x622   : > { %v12774_v27 = vrot.slane %v12631_v3, %v15059_v41  ;;  %7636 = vpow2.f32 %v5191_v22  ;;  %v15070_v41 = vld [vmem:[#allocation198_spill] sm:$0xff] }
 0x623   : > { %7638 = vpow2.f32 %v5185_v0 }
 0x624   : > { %5588 = vperm.xlu0 %7261, %v7605_v46   ;;  %v7625_v46 = vpop.eup %7624  ;;  %v5007_v42 = vsub.f32 %v15062_v9, %v12774_v27  ;;  %7640 = vpow2.f32 %v5195_v16  ;;  %v5009_v35 = vsub.f32 %v15064_v28, %v12774_v27  ;;  %v5011_v40 = vsub.f32 %v15066_v19, %v12774_v27  ;;  %v15074_v28 = vld [vmem:[#allocation205_spill] sm:$0xff] }
 0x625   : > { %5579 = vperm.xlu1 %7260, %v7607_v31   ;;  %v7627_v31 = vpop.eup %7626  ;;  %7642 = vpow2.f32 %v5189_v6  ;;  %v5008_v45 = vsub.f32 %v15067_v38, %v12774_v27  ;;  %v5013_v52 = vsub.f32 %v15068_v2, %v12774_v27  ;;  %v5010_v57 = vsub.f32 %v15069_v43, %v12774_v27 }
 0x626   : > { %v5199_v37 = vmul.f32 1.442695, %v5007_v42  ;;  %v5203_v26 = vmul.f32 1.442695, %v5009_v35  ;;  %v5207_v39 = vmul.f32 1.442695, %v5011_v40  ;;  %v5015_v22 = vsub.f32 %v15070_v41, %v12774_v27 }
 0x627   : > { %v5201_v17 = vmul.f32 1.442695, %v5008_v45  ;;  %v5205_v53 = vmul.f32 1.442695, %v5010_v57  ;;  %v5012_v0 = vsub.f32 %v15071_v23, %v12774_v27  ;;  %v15073_v42 = vld [vmem:[#allocation196_spill] sm:$0xff]  ;;  %v5019_v35 = vsub.f32 %v15074_v28, %v12774_v27  ;;  %v15077_v45 = vld [vmem:[#allocation211_spill] sm:$0xff] }
 0x628   : > { %5594 = vperm.xlu0 %7261, %v7609_v5   ;;  %v7629_v5 = vpop.eup %7628  ;;  %7644 = vpow2.f32 %v5199_v37  ;;  %v5014_v6 = vsub.f32 %v15073_v42, %v12774_v27  ;;  %v5016_v20 = vsub.f32 %v15075_v21, %v12774_v27  ;;  %v15076_v40 = vsub.s32 5, %v15024_v61  ;;  %v15082_v42 = vld [vmem:[#allocation210_spill] sm:$0xff] }
 0x629   : > { %5585 = vperm.xlu1 %7260, %v7611_v12   ;;  %v7631_v12 = vpop.eup %7630  ;;  %7646 = vpow2.f32 %v5193_v44  ;;  %v5209_v9 = vmul.f32 1.442695, %v5012_v0  ;;  %v5223_v38 = vmul.f32 1.442695, %v5019_v35 }
 0x62a   : > { %7648 = vpow2.f32 %v5203_v26  ;;  %v5213_v44 = vmul.f32 1.442695, %v5014_v6  ;;  %v5022_v6 = vsub.f32 %v15082_v42, %v12774_v27 }
 0x62b   : > { %7650 = vpow2.f32 %v5197_v63  ;;  %v12819_v63 = vrot.slane %v12631_v3, %v15076_v40 }
 0x62c   : > { %5600 = vperm.xlu0 %7261, %v7613_v33   ;;  %v7633_v33 = vpop.eup %7632  ;;  %7652 = vpow2.f32 %v5207_v39  ;;  %v15078_v39 = vld [vmem:[#allocation199_spill] sm:$0xff] }
 0x62d   : > { %5591 = vperm.xlu1 %7260, %v7615_v32   ;;  %v7635_v32 = vpop.eup %7634  ;;  %7654 = vpow2.f32 %v5201_v17  ;;  %v5018_v2 = vsub.f32 %v15078_v39, %v12774_v27 }
 0x62f   : > { %v5221_v41 = vmul.f32 1.442695, %v5018_v2 }
 0x630   : > { %5606 = vperm.xlu0 %7261, %v7617_v48   ;;  %v7637_v48 = vpop.eup %7636 }
 0x631   : > { %5597 = vperm.xlu1 %7260, %v7619_v36   ;;  %v7639_v36 = vpop.eup %7638 }
 0x632   : > { %v7641_v34 = vpop.eup %7640 }
 0x634   : > { %5612 = vperm.xlu0 %7261, %v7621_v55   ;;  %v7643_v55 = vpop.eup %7642 }
 0x635   : > { %5603 = vperm.xlu1 %7260, %v7623_v7   ;;  %v5211_v7 = vmul.f32 1.442695, %v5013_v52  ;;  %v7645_v1 = vpop.eup %7644 }
 0x636   : > { %v7647_v11 = vpop.eup %7646 }
 0x637   : > { %7656 = vpow2.f32 %v5211_v7  ;;  %v7649_v18 = vpop.eup %7648 }
 0x638   : > { %5618 = vperm.xlu0 %7261, %v7625_v46   ;;  %v5215_v46 = vmul.f32 1.442695, %v5015_v22  ;;  %7658 = vpow2.f32 %v5205_v53  ;;  %v15080_v22 = vld [vmem:[#allocation204_spill] sm:$0xff] }
 0x639   : > { %5609 = vperm.xlu1 %7260, %v7627_v31   ;;  %v15072_v31 = vld [vmem:[#allocation200_spill] sm:$0xff]  ;;  %v5020_v53 = vsub.f32 %v15080_v22, %v12774_v27 }
 0x63a   : > { %v5017_v16 = vsub.f32 %v15072_v31, %v12774_v27  ;;  %7660 = vpow2.f32 %v5215_v46  ;;  %v15081_v31 = vld [vmem:[#allocation252_spill] sm:$0xff] }
 0x63b   : > { %7662 = vpow2.f32 %v5209_v9  ;;  %v5225_v9 = vmul.f32 1.442695, %v5020_v53  ;;  %v15090_v53 = vld [vmem:[#allocation265_spill] sm:$0xff] }
 0x63c   : > { %5624 = vperm.xlu0 %7261, %v7629_v5   ;;  %v7651_v5 = vpop.eup %7650  ;;  %v5219_v37 = vmul.f32 1.442695, %v5017_v16  ;;  %v5025_v16 = vsub.f32 %v15081_v31, %v12819_v63 }
 0x63d   : > { %5615 = vperm.xlu1 %7260, %v7631_v12  }
 0x63e   : > { %7664 = vpow2.f32 %v5219_v37  ;;  %v5235_v35 = vmul.f32 1.442695, %v5025_v16 }
 0x63f   : > { %7666 = vpow2.f32 %v5213_v44  ;;  %v15084_v44 = vld [vmem:[#allocation254_spill] sm:$0xff] }
 0x640   : > { %5630 = vperm.xlu0 %7261, %v7633_v33   ;;  %v7653_v33 = vpop.eup %7652  ;;  %7668 = vpow2.f32 %v5223_v38  ;;  %v5027_v21 = vsub.f32 %v15084_v44, %v12819_v63 }
 0x641   : > { %5621 = vperm.xlu1 %7260, %v7635_v32   ;;  %v7655_v26 = vpop.eup %7654 }
 0x642   : > { %v7657_v52 = vpop.eup %7656 }
 0x643   : > { %v7659_v43 = vpop.eup %7658 }
 0x644   : > { %5636 = vperm.xlu0 %7261, %v7637_v48   ;;  %v5021_v48 = vsub.f32 %v15077_v45, %v12774_v27  ;;  %v7661_v23 = vpop.eup %7660 }
 0x645   : > { %5627 = vperm.xlu1 %7260, %v7639_v36   ;;  %v5217_v36 = vmul.f32 1.442695, %v5016_v20  ;;  %v5229_v20 = vmul.f32 1.442695, %v5022_v6 }
 0x647   : > { %7670 = vpow2.f32 %v5217_v36  ;;  %v15087_v36 = vld [vmem:[#allocation259_spill] sm:$0xff] }
 0x648   : > { %5642 = vperm.xlu0 %7261, %v7641_v34   ;;  %v5227_v34 = vmul.f32 1.442695, %v5021_v48  ;;  %v5239_v48 = vmul.f32 1.442695, %v5027_v21  ;;  %v5029_v39 = vsub.f32 %v15087_v36, %v12819_v63  ;;  %v15094_v21 = vld [vmem:[#allocation262_spill] sm:$0xff]  ;;  %v15096_v36 = vld [vmem:[#allocation281_spill] sm:$0xff] }
 0x649   : > { %5633 = vperm.xlu1 %7260, %v7643_v55   ;;  %v15079_v55 = vld [vmem:[#allocation251_spill] sm:$0xff] }
 0x64a   : > { %v5023_v7 = vsub.f32 %v15079_v55, %v12819_v63  ;;  %7672 = vpow2.f32 %v5227_v34  ;;  %v5243_v22 = vmul.f32 1.442695, %v5029_v39  ;;  %v5035_v39 = vsub.f32 %v15096_v36, %v12819_v63 }
 0x64b   : > { %7674 = vpow2.f32 %v5221_v41 }
 0x64c   : > { %5648 = vperm.xlu0 %7261, %v7645_v1   ;;  %v7663_v1 = vpop.eup %7662  ;;  %v5231_v46 = vmul.f32 1.442695, %v5023_v7 }
 0x64d   : > { %5639 = vperm.xlu1 %7260, %v7647_v11  }
 0x64e   : > { %7676 = vpow2.f32 %v5231_v46  ;;  %v15091_v46 = vld [vmem:[#allocation257_spill] sm:$0xff] }
 0x64f   : > { %v12804_v50 = vpop.permute.xlu0 %5462  ;;  %7678 = vpow2.f32 %v5225_v9  ;;  %v5028_v31 = vsub.f32 %v15091_v46, %v12819_v63  ;;  %v5255_v46 = vmul.f32 1.442695, %v5035_v39  ;;  %v15102_v39 = vld [vmem:[#allocation239_spill] sm:$0xff] }
 0x650   : > { %v12806_v12 = vpop.permute.xlu1 %5456  ;;  %5654 = vperm.xlu0 %7261, %v7649_v18   ;;  %v7665_v18 = vpop.eup %7664  ;;  %7680 = vpow2.f32 %v5235_v35 }
 0x651   : > { %5645 = vperm.xlu1 %7260, %v7651_v5   ;;  %v7667_v37 = vpop.eup %7666  ;;  %7682 = vpow2.f32 %v5229_v20  ;;  %v5241_v44 = vmul.f32 1.442695, %v5028_v31  ;;  %v5030_v20 = vsub.f32 %v15094_v21, %v12819_v63  ;;  %v15099_v31 = vld [vmem:[#allocation242_spill] sm:$0xff] }
 0x652   : > { %v7669_v40 = vpop.eup %7668  ;;  %7684 = vpow2.f32 %v5239_v48 }
 0x653   : > { %v12812_v32 = vpop.permute.xlu0 %5468  ;;  %v7671_v38 = vpop.eup %7670 }
 0x654   : > { %v12814_v19 = vpop.permute.xlu1 %5459  ;;  %5660 = vperm.xlu0 %7261, %v7653_v33   ;;  %v15085_v33 = vld [vmem:[#allocation250_spill] sm:$0xff]  ;;  %v7673_v34 = vpop.eup %7672 }
 0x655   : > { %5651 = vperm.xlu1 %7260, %v7655_v26   ;;  %v5024_v26 = vsub.f32 %v15085_v33, %v12819_v63  ;;  %v7675_v7 = vpop.eup %7674 }
 0x657   : > { %v12825_v17 = vpop.permute.xlu0 %5474  ;;  %v5233_v2 = vmul.f32 1.442695, %v5024_v26 }
 0x658   : > { %v12827_v57 = vpop.permute.xlu1 %5465  ;;  %5666 = vperm.xlu0 %7261, %v7657_v52   ;;  %v15088_v52 = vld [vmem:[#allocation253_spill] sm:$0xff]  ;;  %v7677_v16 = vpop.eup %7676 }
 0x659   : > { %5657 = vperm.xlu1 %7260, %v7659_v43   ;;  %v5026_v43 = vsub.f32 %v15088_v52, %v12819_v63  ;;  %7686 = vpow2.f32 %v5233_v2  ;;  %v7679_v42 = vpop.eup %7678  ;;  %v5245_v2 = vmul.f32 1.442695, %v5030_v20  ;;  %v15097_v52 = vld [vmem:[#allocation268_spill] sm:$0xff] }
 0x65a   : > { %7688 = vpow2.f32 %v5243_v22  ;;  %v7681_v33 = vpop.eup %7680 }
 0x65b   : > { %v12833_v0 = vpop.permute.xlu0 %5480 }
 0x65c   : > { %v12835_v11 = vpop.permute.xlu1 %5471  ;;  %5672 = vperm.xlu0 %7261, %v7661_v23   ;;  %v5031_v23 = vsub.f32 %v15090_v53, %v12819_v63 }
 0x65d   : > { %5663 = vperm.xlu1 %7260, %v7663_v1   ;;  %v5237_v1 = vmul.f32 1.442695, %v5026_v43  ;;  %v5032_v43 = vsub.f32 %v15097_v52, %v12819_v63 }
 0x65f   : > { %v12841_v5 = vpop.permute.xlu0 %5486  ;;  %7690 = vpow2.f32 %v5237_v1 }
 0x660   : > { %15083 = vst [vmem:[#allocation101_spill] sm:$0xff] %v12841_v5  ;;  %v12843_v28 = vpop.permute.xlu1 %5477  ;;  %5678 = vperm.xlu0 %7261, %v7665_v18   ;;  %v5247_v18 = vmul.f32 1.442695, %v5031_v23  ;;  %v15098_v23 = vsub.s32 6, %v15024_v61 }
 0x661   : > { %5669 = vperm.xlu1 %7260, %v7667_v37   ;;  %v15093_v37 = vld [vmem:[#allocation273_spill] sm:$0xff] }
 0x662   : > { %v5033_v35 = vsub.f32 %v15093_v37, %v12819_v63  ;;  %7692 = vpow2.f32 %v5247_v18  ;;  %v12888_v1 = vrot.slane %v12631_v3, %v15098_v23  ;;  %v15100_v18 = vld [vmem:[#allocation278_spill] sm:$0xff] }
 0x663   : > { %v12849_v27 = vpop.permute.xlu0 %5492  ;;  %7694 = vpow2.f32 %v5241_v44  ;;  %v5034_v37 = vsub.f32 %v15100_v18, %v12819_v63 }
 0x664   : > { %15086 = vst [vmem:[#allocation104_spill] sm:$0xff] %v12849_v27  ;;  %v12851_v45 = vpop.permute.xlu1 %5483  ;;  %5684 = vperm.xlu0 %7261, %v7669_v40   ;;  %v7683_v40 = vpop.eup %7682  ;;  %v5251_v48 = vmul.f32 1.442695, %v5033_v35 }
 0x665   : > { %5675 = vperm.xlu1 %7260, %v7671_v38   ;;  %v5253_v36 = vmul.f32 1.442695, %v5034_v37 }
 0x666   : > { %7696 = vpow2.f32 %v5251_v48 }
 0x667   : > { %v12857_v55 = vpop.permute.xlu0 %5498  ;;  %7698 = vpow2.f32 %v5245_v2  ;;  %v5036_v2 = vsub.f32 %v15102_v39, %v12819_v63 }
 0x668   : > { %15089 = vst [vmem:[#allocation44_spill] sm:$0xff] %v12857_v55  ;;  %v12859_v41 = vpop.permute.xlu1 %5489  ;;  %5690 = vperm.xlu0 %7261, %v7673_v34   ;;  %v7685_v34 = vpop.eup %7684  ;;  %7700 = vpow2.f32 %v5255_v46  ;;  %v15103_v46 = vld [vmem:[#allocation258_spill] sm:$0xff] }
 0x669   : > { %5681 = vperm.xlu1 %7260, %v7675_v7   ;;  %v7687_v22 = vpop.eup %7686 }
 0x66a   : > { %v7689_v35 = vpop.eup %7688 }
 0x66b   : > { %v12865_v9 = vpop.permute.xlu0 %5504  ;;  %v7691_v21 = vpop.eup %7690 }
 0x66c   : > { %v12867_v6 = vpop.permute.xlu1 %5495  ;;  %5696 = vperm.xlu0 %7261, %v7677_v16   ;;  %v5037_v16 = vsub.f32 %v15099_v31, %v12819_v63  ;;  %v7693_v52 = vpop.eup %7692  ;;  %v5041_v31 = vsub.f32 %v15103_v46, %v12888_v1 }
 0x66d   : > { %15092 = vst [vmem:[#allocation121_spill] sm:$0xff] %v12867_v6  ;;  %5687 = vperm.xlu1 %7260, %v7679_v42   ;;  %v5249_v42 = vmul.f32 1.442695, %v5032_v43  ;;  %v15119_v6 = vsub.s32 7, %v15024_v61 }
 0x66e   : > { %v5267_v39 = vmul.f32 1.442695, %v5041_v31 }
 0x66f   : > { %v12873_v26 = vpop.permute.xlu0 %5510  ;;  %7702 = vpow2.f32 %v5249_v42  ;;  %v15104_v42 = vld [vmem:[#allocation241_spill] sm:$0xff] }
 0x670   : > { %v12875_v38 = vpop.permute.xlu1 %5501  ;;  %5702 = vperm.xlu0 %7261, %v7681_v33   ;;  %v5259_v33 = vmul.f32 1.442695, %v5037_v16  ;;  %v5257_v16 = vmul.f32 1.442695, %v5036_v2  ;;  %v5038_v18 = vsub.f32 %v15104_v42, %v12819_v63 }
 0x671   : > { %15095 = vst [vmem:[#allocation107_spill] sm:$0xff] %v12875_v38  ;;  %5693 = vperm.xlu1 %7260, %v7683_v40   ;;  %v15101_v40 = vld [vmem:[#allocation256_spill] sm:$0xff] }
 0x672   : > { %v5039_v48 = vsub.f32 %v15101_v40, %v12888_v1  ;;  %7704 = vpow2.f32 %v5259_v33  ;;  %v15105_v33 = vld [vmem:[#allocation261_spill] sm:$0xff] }
 0x673   : > { %v12881_v7 = vpop.permute.xlu0 %5516  ;;  %7706 = vpow2.f32 %v5253_v36  ;;  %v15106_v36 = vld [vmem:[#allocation255_spill] sm:$0xff] }
 0x674   : > { %v12883_v53 = vpop.permute.xlu1 %5507  ;;  %5708 = vperm.xlu0 %7261, %v7685_v34   ;;  %v7695_v34 = vpop.eup %7694  ;;  %v5263_v23 = vmul.f32 1.442695, %v5039_v48  ;;  %v5043_v48 = vsub.f32 %v15105_v33, %v12888_v1  ;;  %v5040_v2 = vsub.f32 %v15106_v36, %v12888_v1 }
 0x675   : > { %5699 = vperm.xlu1 %7260, %v7687_v22   ;;  %v7697_v37 = vpop.eup %7696 }
 0x676   : > { %7708 = vpow2.f32 %v5263_v23  ;;  %v15108_v23 = vld [vmem:[#allocation267_spill] sm:$0xff] }
 0x677   : > { %v12894_v44 = vpop.permute.xlu0 %5522  ;;  %7710 = vpow2.f32 %v5257_v16  ;;  %v5045_v31 = vsub.f32 %v15108_v23, %v12888_v1  ;;  %v15109_v16 = vld [vmem:[#allocation260_spill] sm:$0xff] }
 0x678   : > { %v12896_v20 = vpop.permute.xlu1 %5513  ;;  %5714 = vperm.xlu0 %7261, %v7689_v35   ;;  %7712 = vpow2.f32 %v5267_v39  ;;  %v15111_v39 = vld [vmem:[#allocation272_spill] sm:$0xff] }
 0x679   : > { %5705 = vperm.xlu1 %7260, %v7691_v21   ;;  %v7699_v21 = vpop.eup %7698 }
 0x67b   : > { %v12902_v43 = vpop.permute.xlu0 %5528 }
 0x67c   : > { %v12904_v22 = vpop.permute.xlu1 %5519  ;;  %5720 = vperm.xlu0 %7261, %v7693_v52   ;;  %v5261_v52 = vmul.f32 1.442695, %v5038_v18  ;;  %v5042_v18 = vsub.f32 %v15109_v16, %v12888_v1 }
 0x67d   : > { %5711 = vperm.xlu1 %7260, %v7695_v34   ;;  %v7701_v34 = vpop.eup %7700 }
 0x67e   : > { %v7703_v46 = vpop.eup %7702  ;;  %7714 = vpow2.f32 %v5261_v52  ;;  %v15112_v52 = vld [vmem:[#allocation266_spill] sm:$0xff] }
 0x67f   : > { %v12910_v35 = vpop.permute.xlu0 %5534  ;;  %v7705_v33 = vpop.eup %7704 }
 0x680   : > { %v12912_v40 = vpop.permute.xlu1 %5525  ;;  %5726 = vperm.xlu0 %7261, %v7697_v37   ;;  %v5271_v37 = vmul.f32 1.442695, %v5043_v48  ;;  %v7707_v30 = vpop.eup %7706  ;;  %v5047_v48 = vsub.f32 %v15111_v39, %v12888_v1 }
 0x681   : > { %5717 = vperm.xlu1 %7260, %v7699_v21   ;;  %v5265_v21 = vmul.f32 1.442695, %v5040_v2  ;;  %v5044_v2 = vsub.f32 %v15112_v52, %v12888_v1  ;;  %v7709_v23 = vpop.eup %7708 }
 0x682   : > { %7716 = vpow2.f32 %v5271_v37  ;;  %v7711_v58 = vpop.eup %7710 }
 0x683   : > { %v12918_v63 = vpop.permute.xlu0 %5540  ;;  %7718 = vpow2.f32 %v5265_v21  ;;  %v15115_v21 = vld [vmem:[#allocation271_spill] sm:$0xff]  ;;  %v7713_v39 = vpop.eup %7712 }
 0x684   : > { %15107 = vst [vmem:[#allocation128_spill] sm:$0xff] %v12918_v63  ;;  %v12920_v42 = vpop.permute.xlu1 %5531  ;;  %5732 = vperm.xlu0 %7261, %v7701_v34   ;;  %v5275_v34 = vmul.f32 1.442695, %v5045_v31  ;;  %v5273_v31 = vmul.f32 1.442695, %v5044_v2  ;;  %v12949_v63 = vrot.slane %v12631_v3, %v15119_v6 }
 0x685   : > { %5723 = vperm.xlu1 %7260, %v7703_v46   ;;  %v5269_v46 = vmul.f32 1.442695, %v5042_v18  ;;  %v5046_v18 = vsub.f32 %v15115_v21, %v12888_v1 }
 0x686   : > { %7720 = vpow2.f32 %v5275_v34 }
 0x687   : > { %v12926_v36 = vpop.permute.xlu0 %5546  ;;  %7722 = vpow2.f32 %v5269_v46  ;;  %v15118_v46 = vld [vmem:[#allocation276_spill] sm:$0xff] }
 0x688   : > { %15110 = vst [vmem:[#allocation110_spill] sm:$0xff] %v12926_v36  ;;  %v12928_v10 = vpop.permute.xlu1 %5537  ;;  %5738 = vperm.xlu0 %7261, %v7705_v33   ;;  %v5279_v33 = vmul.f32 1.442695, %v5047_v48  ;;  %v7715_v52 = vpop.eup %7714  ;;  %v5277_v48 = vmul.f32 1.442695, %v5046_v18  ;;  %v5048_v2 = vsub.f32 %v15118_v46, %v12888_v1  ;;  %v15121_v46 = vld [vmem:[#allocation282_spill] sm:$0xff] }
 0x689   : > { %5729 = vperm.xlu1 %7260, %v7707_v30   ;;  %v15114_v30 = vld [vmem:[#allocation277_spill] sm:$0xff]  ;;  %v5050_v61 = vsub.f32 %v15121_v46, %v12888_v1 }
 0x68a   : > { %v5049_v37 = vsub.f32 %v15114_v30, %v12888_v1  ;;  %7724 = vpow2.f32 %v5279_v33  ;;  %v15120_v33 = vld [vmem:[#allocation287_spill] sm:$0xff] }
 0x68b   : > { %v5553_v16 = vpop.permute.xlu0 %5552  ;;  %7726 = vpow2.f32 %v5273_v31 }
 0x68c   : > { %v12934_v55 = vpop.permute.xlu1 %5543  ;;  %5744 = vperm.xlu0 %7261, %v7709_v23   ;;  %v5283_v23 = vmul.f32 1.442695, %v5049_v37  ;;  %v7717_v30 = vpop.eup %7716  ;;  %v5053_v37 = vsub.f32 %v15120_v33, %v12888_v1 }
 0x68d   : > { %15113 = vst [vmem:[#allocation52_spill] sm:$0xff] %v12934_v55  ;;  %5735 = vperm.xlu1 %7260, %v7711_v58   ;;  %v15117_v58 = vld [vmem:[#allocation283_spill] sm:$0xff]  ;;  %v7719_v21 = vpop.eup %7718 }
 0x68e   : > { %v5051_v34 = vsub.f32 %v15117_v58, %v12888_v1  ;;  %7728 = vpow2.f32 %v5283_v23  ;;  %v5281_v58 = vmul.f32 1.442695, %v5048_v2 }
 0x68f   : > { %v5559_v38 = vpop.permute.xlu0 %5558  ;;  %7730 = vpow2.f32 %v5277_v48  ;;  %v15123_v48 = vld [vmem:[#allocation286_spill] sm:$0xff] }
 0x690   : > { %v12940_v36 = vpop.permute.xlu1 %5549  ;;  %5750 = vperm.xlu0 %7261, %v7713_v39   ;;  %v5287_v18 = vmul.f32 1.442695, %v5051_v34  ;;  %v6009_v55 = vrot.slane %v5559_v38, %v9067_v13  ;;  %v5291_v34 = vmul.f32 1.442695, %v5053_v37  ;;  %v5052_v2 = vsub.f32 %v15123_v48, %v12888_v1 }
 0x691   : > { %15116 = vst [vmem:[#allocation112_spill] sm:$0xff] %v12940_v36  ;;  %5741 = vperm.xlu1 %7260, %v7715_v52   ;;  %v6000_v52 = vrot.slane %v5553_v16, %v9059_v51  ;;  %v7721_v36 = vpop.eup %7720  ;;  %v15122_v16 = vld [vmem:[#allocation264_spill] sm:$0xff] }
 0x692   : > { %7732 = vpow2.f32 %v5287_v18 }
 0x693   : > { %v5565_v27 = vpop.permute.xlu0 %5564  ;;  %7734 = vpow2.f32 %v5281_v58  ;;  %v5289_v58 = vmul.f32 1.442695, %v5052_v2 }
 0x694   : > { %v5556_v39 = vpop.permute.xlu1 %5555  ;;  %5756 = vperm.xlu0 %7261, %v7717_v30   ;;  %v7723_v30 = vpop.eup %7722  ;;  %7736 = vpow2.f32 %v5291_v34 }
 0x695   : > { %v6004_v31 = vrot.slane %v5556_v39, %v9041_v15  ;;  %5747 = vperm.xlu1 %7260, %v7719_v21   ;;  %v5055_v39 = vsub.f32 %v15122_v16, %v12949_v63  ;;  %v6019_v21 = vrot.slane %v5565_v27, %v9110_v25  ;;  %v7725_v38 = vpop.eup %7724  ;;  %v15124_v27 = vld [vmem:[#allocation269_spill] sm:$0xff] }
 0x696   : > { %v7727_v5 = vpop.eup %7726 }
 0x697   : > { %v6005_v3 = vsel %vm1857_vm1, %v6004_v31, %v6000_v52  ;;  %v5571_v6 = vpop.permute.xlu0 %5570  ;;  %v5285_v31 = vmul.f32 1.442695, %v5050_v61  ;;  %v5295_v18 = vmul.f32 1.442695, %v5055_v39  ;;  %v15125_v61 = vld [vmem:[#allocation290_spill] sm:$0xff] }
 0x698   : > { %v5562_v33 = vpop.permute.xlu1 %5561  ;;  %5762 = vperm.xlu0 %7261, %v7721_v36   ;;  %v6010_v52 = vsel %vm1864_vm2, %v6009_v55, %v6005_v3  ;;  %v6029_v55 = vrot.slane %v5571_v6, %v9152_v49  ;;  %v5054_v3 = vsub.f32 %v15125_v61, %v12888_v1  ;;  %v15127_v6 = vld [vmem:[#allocation274_spill] sm:$0xff] }
 0x699   : > { %v6014_v23 = vrot.slane %v5562_v33, %v9090_v4  ;;  %5753 = vperm.xlu1 %7260, %v7723_v30   ;;  %v5057_v30 = vsub.f32 %v15124_v27, %v12949_v63  ;;  %7738 = vpow2.f32 %v5285_v31  ;;  %v5059_v2 = vsub.f32 %v15127_v6, %v12949_v63 }
 0x69a   : > { %7740 = vpow2.f32 %v5295_v18  ;;  %v5293_v1 = vmul.f32 1.442695, %v5054_v3 }
 0x69b   : > { %v6015_v36 = vsel %vm1871_vm3, %v6014_v23, %v6010_v52  ;;  %v5577_v46 = vpop.permute.xlu0 %5576  ;;  %v7729_v23 = vpop.eup %7728  ;;  %v5299_v34 = vmul.f32 1.442695, %v5057_v30  ;;  %7742 = vpow2.f32 %v5289_v58  ;;  %v5303_v30 = vmul.f32 1.442695, %v5059_v2 }
 0x69c   : > { %v6020_v16 = vsel %vm1878_vm4, %v6019_v21, %v6015_v36  ;;  %v5568_v33 = vpop.permute.xlu1 %5567  ;;  %5768 = vperm.xlu0 %7261, %v7725_v38   ;;  %v7731_v52 = vpop.eup %7730  ;;  %v6039_v31 = vrot.slane %v5577_v46, %v9170_v8  ;;  %v15128_v36 = vld [vmem:[#allocation263_spill] sm:$0xff] }
 0x69d   : > { %v6024_v37 = vrot.slane %v5568_v33, %v9107_v14  ;;  %5759 = vperm.xlu1 %7260, %v7727_v5   ;;  %v7733_v33 = vpop.eup %7732  ;;  %7744 = vpow2.f32 %v5299_v34  ;;  %v15130_v46 = vld [vmem:[#allocation279_spill] sm:$0xff] }
 0x69e   : > { %v5061_v58 = vsub.f32 %v15130_v46, %v12949_v63  ;;  %7746 = vpow2.f32 %v5293_v1 }
 0x69f   : > { %v6025_v48 = vsel %vm1885_vm5, %v6024_v37, %v6020_v16  ;;  %v5583_v21 = vpop.permute.xlu0 %5582  ;;  %v5056_v16 = vsub.f32 %v15128_v36, %v12949_v63  ;;  %7748 = vpow2.f32 %v5303_v30  ;;  %v15136_v30 = vld [vmem:[#allocation288_spill] sm:$0xff] }
 0x6a0   : > { %v6030_v38 = vsel %vm15126_vm6, %v6029_v55, %v6025_v48  ;;  %v5574_v5 = vpop.permute.xlu1 %5573  ;;  %5774 = vperm.xlu0 %7261, %v7729_v23   ;;  %v7735_v55 = vpop.eup %7734  ;;  %v6049_v3 = vrot.slane %v5583_v21, %v9241_v56  ;;  %v5307_v2 = vmul.f32 1.442695, %v5061_v58  ;;  %v15133_v21 = vld [vmem:[#allocation284_spill] sm:$0xff]  ;;  %vm15135_vm6 = vcmask 851712  }
 0x6a1   : > { %v6034_v39 = vrot.slane %v5574_v5, %v9127_v62  ;;  %5765 = vperm.xlu1 %7260, %v7731_v52   ;;  %v5297_v48 = vmul.f32 1.442695, %v5056_v16  ;;  %v15131_v52 = vld [vmem:[#allocation270_spill] sm:$0xff]  ;;  %v7737_v5 = vpop.eup %7736  ;;  %v5063_v1 = vsub.f32 %v15133_v21, %v12949_v63  ;;  %v5065_v58 = vsub.f32 %v15136_v30, %v12949_v63  ;;  %v15139_v21 = vld [vmem:[#allocation285_spill] sm:$0xff] }
 0x6a3   : > { %v6035_v37 = vsel %vm1899_vm7, %v6034_v39, %v6030_v38  ;;  %v5589_v27 = vpop.permute.xlu0 %5588  ;;  %v5058_v38 = vsub.f32 %v15131_v52, %v12949_v63  ;;  %7750 = vpow2.f32 %v5297_v48  ;;  %v5315_v30 = vmul.f32 1.442695, %v5065_v58 }
 0x6a4   : > { %v6040_v61 = vsel %vm15129_vm12, %v6039_v31, %v6035_v37  ;;  %v5580_v23 = vpop.permute.xlu1 %5579  ;;  %5780 = vperm.xlu0 %7261, %v7733_v33   ;;  %v7739_v31 = vpop.eup %7738  ;;  %v6059_v16 = vrot.slane %v5589_v27, %v9316_v60  ;;  %7752 = vpow2.f32 %v5307_v2  ;;  %v5842_v58 = vrot.slane %v12806_v12, %v9059_v51  ;;  %v15142_v12 = vld [vmem:[#allocation292_spill] sm:$0xff] }
 0x6a5   : > { %v6044_v18 = vrot.slane %v5580_v23, %v9155_v54  ;;  %5771 = vperm.xlu1 %7260, %v7735_v55   ;;  %v5301_v37 = vmul.f32 1.442695, %v5058_v38  ;;  %v15134_v55 = vld [vmem:[#allocation275_spill] sm:$0xff]  ;;  %v7741_v23 = vpop.eup %7740  ;;  %v5311_v38 = vmul.f32 1.442695, %v5063_v1  ;;  %vm15144_vm12 = vcmask 458112  }
 0x6a7   : > { %v6045_v39 = vsel %vm1913_vm9, %v6044_v18, %v6040_v61  ;;  %v5595_v6 = vpop.permute.xlu0 %5594  ;;  %v5060_v61 = vsub.f32 %v15134_v55, %v12949_v63  ;;  %7754 = vpow2.f32 %v5301_v37  ;;  %v5921_v37 = vrot.slane %v12865_v9, %v9059_v51 }
 0x6a8   : > { %v6050_v36 = vsel %vm15132_vm0, %v6049_v3, %v6045_v39  ;;  %v5586_v33 = vpop.permute.xlu1 %5585  ;;  %5786 = vperm.xlu0 %7261, %v7737_v5   ;;  %v7743_v3 = vpop.eup %7742  ;;  %v15137_v39 = vld [vmem:[#allocation280_spill] sm:$0xff]  ;;  %7756 = vpow2.f32 %v5311_v38 }
 0x6a9   : > { %v6054_v34 = vrot.slane %v5586_v33, %v14898_v47  ;;  %5777 = vperm.xlu1 %7260, %v7739_v31   ;;  %v5062_v27 = vsub.f32 %v15137_v39, %v12949_v63  ;;  %v15138_v31 = vld [vmem:[#allocation291_spill] sm:$0xff]  ;;  %v6069_v33 = vrot.slane %v5595_v6, %v14907_v29  ;;  %v7745_v55 = vpop.eup %7744  ;;  %v5846_v6 = vrot.slane %v12814_v19, %v9041_v15 }
 0x6aa   : > { %v5935_v19 = vrot.slane %v12896_v20, %v9090_v4  ;;  %v5856_v20 = vrot.slane %v12827_v57, %v9090_v4 }
 0x6ab   : > { %v6055_v18 = vsel %vm1927_vm11, %v6054_v34, %v6050_v36  ;;  %v5601_v46 = vpop.permute.xlu0 %5600  ;;  %v5067_v36 = vsub.f32 %v15138_v31, %v12949_v63  ;;  %v5305_v34 = vmul.f32 1.442695, %v5060_v61  ;;  %v5309_v39 = vmul.f32 1.442695, %v5062_v27 }
 0x6ac   : > { %v6060_v52 = vsel %vm15135_vm6, %v6059_v16, %v6055_v18  ;;  %v5592_v5 = vpop.permute.xlu1 %5591  ;;  %5792 = vperm.xlu0 %7261, %v7741_v23   ;;  %v5064_v16 = vsub.f32 %v15139_v21, %v12949_v63  ;;  %v5925_v23 = vrot.slane %v12883_v53, %v9041_v15  ;;  %vm15145_vm6 = vmmov %vm15144_vm12 }
 0x6ad   : > { %v6064_v48 = vrot.slane %v5592_v5, %v14910_v59  ;;  %5783 = vperm.xlu1 %7260, %v7743_v3   ;;  %v7747_v3 = vpop.eup %7746  ;;  %7758 = vpow2.f32 %v5305_v34  ;;  %v5319_v53 = vmul.f32 1.442695, %v5067_v36  ;;  %v5930_v36 = vrot.slane %v12873_v26, %v9067_v13  ;;  %vm15146_vm10 = vmmov %vm15145_vm6 }
 0x6ae   : > { %v5926_v27 = vsel %vm1857_vm1, %v5925_v23, %v5921_v37  ;;  %7760 = vpow2.f32 %v5315_v30  ;;  %v5068_v23 = vsub.f32 %v15142_v12, %v12949_v63  ;;  %v5851_v26 = vrot.slane %v12804_v50, %v9067_v13 }
 0x6af   : > { %v6065_v18 = vsel %vm1941_vm13, %v6064_v48, %v6060_v52  ;;  %v5607_v5 = vpop.permute.xlu0 %5606  ;;  %v5313_v52 = vmul.f32 1.442695, %v5064_v16  ;;  %v15140_v48 = vld [vmem:[#allocation293_spill] sm:$0xff]  ;;  %7762 = vpow2.f32 %v5309_v39  ;;  %v5940_v50 = vrot.slane %v12881_v7, %v9110_v25 }
 0x6b0   : > { %v6070_v2 = vsel %vm1948_vm14, %v6069_v33, %v6065_v18  ;;  %v5598_v1 = vpop.permute.xlu1 %5597  ;;  %5798 = vperm.xlu0 %7261, %v7745_v55   ;;  %v5069_v31 = vsub.f32 %v15140_v48, %v12949_v63  ;;  %v7749_v33 = vpop.eup %7748  ;;  %v15141_v16 = vld [vmem:[#allocation289_spill] sm:$0xff]  ;;  %v5847_v18 = vsel %vm1857_vm1, %v5846_v6, %v5842_v58  ;;  %v6088_v30 = vrot.slane %v5607_v5, %v9067_v13 }
 0x6b1   : > { %v6074_v61 = vrot.slane %v5598_v1, %v14920_v24  ;;  %5789 = vperm.xlu1 %7260, %v7747_v3   ;;  %v7751_v38 = vpop.eup %7750  ;;  %v5066_v55 = vsub.f32 %v15141_v16, %v12949_v63  ;;  %v6079_v3 = vrot.slane %v5601_v46, %v9059_v51  ;;  %v5931_v1 = vsel %vm1864_vm2, %v5930_v36, %v5926_v27 }
 0x6b2   : > { %v7753_v37 = vpop.eup %7752  ;;  %v5945_v6 = vrot.slane %v12904_v22, %v9107_v14  ;;  %v5323_v48 = vmul.f32 1.442695, %v5069_v31  ;;  %v5852_v58 = vsel %vm1864_vm2, %v5851_v26, %v5847_v18  ;;  %v5866_v22 = vrot.slane %v12835_v11, %v9107_v14 }
 0x6b3   : > { %v13027_v9 = vsel %vm1955_vm15, %v6074_v61, %v6070_v2  ;;  %v5613_v21 = vpop.permute.xlu0 %5612  ;;  %v5936_v61 = vsel %vm1871_vm3, %v5935_v19, %v5931_v1  ;;  %v5317_v39 = vmul.f32 1.442695, %v5066_v55  ;;  %v5857_v19 = vsel %vm1871_vm3, %v5856_v20, %v5852_v58 }
 0x6b4   : > { %v5604_v34 = vpop.permute.xlu1 %5603  ;;  %5804 = vperm.xlu0 %7261, %v7749_v33   ;;  %v7755_v33 = vpop.eup %7754  ;;  %7764 = vpow2.f32 %v5319_v53  ;;  %v5861_v31 = vrot.slane %v12812_v32, %v9110_v25  ;;  %v5941_v7 = vsel %vm1878_vm4, %v5940_v50, %v5936_v61  ;;  %v6098_v36 = vrot.slane %v5613_v21, %v9110_v25  ;;  %v15143_v53 = vld [vmem:[#allocation294_spill] sm:$0xff] }
 0x6b5   : > { %v6083_v2 = vrot.slane %v5604_v34, %v9041_v15  ;;  %5795 = vperm.xlu1 %7260, %v7751_v38   ;;  %7766 = vpow2.f32 %v5313_v52  ;;  %v7757_v34 = vpop.eup %7756  ;;  %v5946_v16 = vsel %vm1885_vm5, %v5945_v6, %v5941_v7  ;;  %v5955_v55 = vrot.slane %v12912_v40, %v9127_v62 }
 0x6b6   : > { %v5070_v18 = vsub.f32 %v15143_v53, %v12949_v63  ;;  %v5862_v32 = vsel %vm1878_vm4, %v5861_v31, %v5857_v19  ;;  %v5321_v26 = vmul.f32 1.442695, %v5068_v23  ;;  %v5876_v1 = vrot.slane %v12843_v28, %v9127_v62 }
 0x6b7   : > { %v6084_v57 = vsel %vm1857_vm1, %v6083_v2, %v6079_v3  ;;  %v5619_v46 = vpop.permute.xlu0 %5618  ;;  %v7759_v20 = vpop.eup %7758  ;;  %v5950_v3 = vrot.slane %v12894_v44, %v9152_v49  ;;  %v6484_v2 = vld [vmem:[%s8138_s17] sm:$0xff]  ;;  %v5867_v40 = vsel %vm1885_vm5, %v5866_v22, %v5862_v32  ;;  %7768 = vpow2.f32 %v5323_v48 }
 0x6b8   : > { %v6089_v27 = vsel %vm1864_vm2, %v6088_v30, %v6084_v57  ;;  %v5610_v5 = vpop.permute.xlu1 %5609  ;;  %5810 = vperm.xlu0 %7261, %v7753_v37   ;;  %v7761_v63 = vpop.eup %7760  ;;  %v5871_v37 = vrot.slane %v12825_v17, %v9152_v49  ;;  %v6108_v61 = vrot.slane %v5619_v46, %v9152_v49  ;;  %7770 = vpow2.f32 %v5317_v39 }
 0x6b9   : > { %v6093_v38 = vrot.slane %v5610_v5, %v9090_v4  ;;  %5801 = vperm.xlu1 %7260, %v7755_v33   ;;  %v5951_v44 = vsel %vm15144_vm12, %v5950_v3, %v5946_v16  ;;  %v5965_v6 = vrot.slane %v12920_v42, %v9155_v54  ;;  %vm6485_vm0 = vcmp.gt.s32.totalorder %v6484_v2, 0  ;;  %v7763_v33 = vpop.eup %7762  ;;  %v6489_v3 = vld [vmem:[%s8144_s20] sm:$0xff] }
 0x6ba   : > { %v5956_v23 = vsel %vm1899_vm7, %v5955_v55, %v5951_v44  ;;  %v5872_v48 = vsel %vm15145_vm6, %v5871_v37, %v5867_v40  ;;  %v5960_v17 = vrot.slane %v12902_v43, %v9170_v8  ;;  %v5325_v46 = vmul.f32 1.442695, %v5070_v18  ;;  %v15150_v18 = vld [vmem:[#allocation101_spill] sm:$0xff] }
 0x6bb   : > { %v6094_v11 = vsel %vm1871_vm3, %v6093_v38, %v6089_v27  ;;  %v5625_v12 = vpop.permute.xlu0 %5624  ;;  %v5877_v27 = vsel %vm1899_vm7, %v5876_v1, %v5872_v48  ;;  %v5886_v42 = vrot.slane %v12851_v45, %v9155_v54  ;;  %7772 = vpow2.f32 %v5321_v26  ;;  %v15157_v48 = vld [vmem:[#allocation104_spill] sm:$0xff] }
 0x6bc   : > { %v6099_v52 = vsel %vm1878_vm4, %v6098_v36, %v6094_v11  ;;  %v5616_v21 = vpop.permute.xlu1 %5615  ;;  %5816 = vperm.xlu0 %7261, %v7757_v34   ;;  %v5881_v39 = vrot.slane %v12833_v0, %v9170_v8  ;;  %vm15147_vm12 = vcmask 589312   ;;  %v6118_v43 = vrot.slane %v5625_v12, %v9170_v8 }
 0x6bd   : > { %v6103_v30 = vrot.slane %v5616_v21, %v9107_v14  ;;  %5807 = vperm.xlu1 %7260, %v7759_v20   ;;  %v5961_v19 = vsel %vm15147_vm12, %v5960_v17, %v5956_v23  ;;  %v6486_v22 = vsel %vm6485_vm0, %v6484_v2, 0  ;;  %v5975_v7 = vrot.slane %v12928_v10, %v14898_v47  ;;  %v15152_v2 = vld [vmem:[#allocation52_spill] sm:$0xff] }
 0x6be   : > { %v7765_v38 = vpop.eup %7764  ;;  %v5966_v31 = vsel %vm1913_vm9, %v5965_v6, %v5961_v19  ;;  %v5970_v0 = vrot.slane %v12910_v35, %v9241_v56  ;;  %v5896_v53 = vrot.slane %v12859_v41, %v14898_v47  ;;  %vm6487_vm0 = vcmp.lt.s32.totalorder %v6486_v22, 256 }
 0x6bf   : > { %v6104_v28 = vsel %vm1885_vm5, %v6103_v30, %v6099_v52  ;;  %v5631_v57 = vpop.permute.xlu0 %5630  ;;  %v7767_v34 = vpop.eup %7766  ;;  %v5891_v20 = vrot.slane %v15150_v18, %v9241_v56  ;;  %7774 = vpow2.f32 %v5325_v46  ;;  %v5985_v26 = vrot.slane %v15152_v2, %v14910_v59 }
 0x6c0   : > { %v6109_v58 = vsel %vm15146_vm10, %v6108_v61, %v6104_v28  ;;  %v5622_v50 = vpop.permute.xlu1 %5621  ;;  %5822 = vperm.xlu0 %7261, %v7761_v63   ;;  %vm15148_vm10 = vmmov %vm15147_vm12  ;;  %vm15151_vm12 = vcmask 720512   ;;  %v6128_v35 = vrot.slane %v5631_v57, %v9241_v56  ;;  %v15154_v63 = vld [vmem:[#allocation128_spill] sm:$0xff]  ;;  %v6488_v23 = vsel %vm6487_vm0, %v6486_v22, 256  ;;  %v15156_v28 = vld [vmem:[#allocation121_spill] sm:$0xff] }
 0x6c1   : > { %v6113_v5 = vrot.slane %v5622_v50, %v9127_v62  ;;  %5813 = vperm.xlu1 %7260, %v7763_v33   ;;  %v5882_v16 = vsel %vm15148_vm10, %v5881_v39, %v5877_v27  ;;  %vm15149_vm6 = vmmov %vm15148_vm10  ;;  %v5971_v32 = vsel %vm15151_vm12, %v5970_v0, %v5966_v31  ;;  %v7769_v52 = vpop.eup %7768  ;;  %v5980_v37 = vrot.slane %v15154_v63, %v9316_v60  ;;  %v15161_v22 = vld [vmem:[#allocation110_spill] sm:$0xff] }
 0x6c2   : > { %v5887_v12 = vsel %vm1913_vm9, %v5886_v42, %v5882_v16  ;;  %v5976_v21 = vsel %vm1927_vm11, %v5975_v7, %v5971_v32  ;;  %v7771_v1 = vpop.eup %7770  ;;  %vm15153_vm10 = vmmov %vm15151_vm12  ;;  %v5906_v57 = vrot.slane %v15156_v28, %v14910_v59  ;;  %vm6490_vm12 = vcmp.gt.s32.totalorder %v6489_v3, 0  ;;  %v15159_v42 = vld [vmem:[#allocation112_spill] sm:$0xff] }
 0x6c3   : > { %v6114_v45 = vsel %vm1899_vm7, %v6113_v5, %v6109_v58  ;;  %v5637_v36 = vpop.permute.xlu0 %5636  ;;  %v5892_v30 = vsel %vm15153_vm10, %v5891_v20, %v5887_v12  ;;  %v5901_v17 = vrot.slane %v15157_v48, %v9316_v60  ;;  %v5995_v5 = vrot.slane %v15159_v42, %v14920_v24 }
 0x6c4   : > { %v6119_v55 = vsel %vm15149_vm6, %v6118_v43, %v6114_v45  ;;  %v5628_v11 = vpop.permute.xlu1 %5627  ;;  %5828 = vperm.xlu0 %7261, %v7765_v38   ;;  %vm15155_vm6 = vmmov %vm15153_vm10  ;;  %v5897_v6 = vsel %vm1927_vm11, %v5896_v53, %v5892_v30  ;;  %vm15158_vm10 = vcmask 851712   ;;  %v6138_v50 = vrot.slane %v5637_v36, %v9316_v60 }
 0x6c5   : > { %v6123_v10 = vrot.slane %v5628_v11, %v9155_v54  ;;  %5819 = vperm.xlu1 %7260, %v7767_v34   ;;  %v5981_v58 = vsel %vm15158_vm10, %v5980_v37, %v5976_v21  ;;  %v7773_v46 = vpop.eup %7772  ;;  %vm15160_vm0 = vmmov %vm15158_vm10  ;;  %v5990_v38 = vrot.slane %v15161_v22, %v14907_v29  ;;  %v6491_v45 = vsel %vm6490_vm12, %v6489_v3, 0  ;;  %v15163_v34 = vld [vmem:[#allocation107_spill] sm:$0xff] }
 0x6c6   : > { %v5986_v27 = vsel %vm1941_vm13, %v5985_v26, %v5981_v58  ;;  %v5902_v43 = vsel %vm15160_vm0, %v5901_v17, %v5897_v6  ;;  %v5916_v16 = vrot.slane %v15163_v34, %v14920_v24  ;;  %vm6492_vm12 = vcmp.lt.s32.totalorder %v6491_v45, 256 }
 0x6c7   : > { %v6124_v41 = vsel %vm1913_vm9, %v6123_v10, %v6119_v55  ;;  %v5643_v40 = vpop.permute.xlu0 %5642  ;;  %v5907_v36 = vsel %vm1941_vm13, %v5906_v57, %v5902_v43  ;;  %v15164_v55 = vld [vmem:[#allocation44_spill] sm:$0xff]  ;;  %v5991_v12 = vsel %vm1948_vm14, %v5990_v38, %v5986_v27  ;;  %vm15165_vm10 = vcmask 1041409  }
 0x6c8   : > { %v6129_v44 = vsel %vm15155_vm6, %v6128_v35, %v6124_v41  ;;  %v5634_v61 = vpop.permute.xlu1 %5633  ;;  %5834 = vperm.xlu0 %7261, %v7769_v52   ;;  %vm15162_vm6 = vmmov %vm15160_vm0  ;;  %v5911_v11 = vrot.slane %v15164_v55, %v14907_v29  ;;  %v6148_v53 = vrot.slane %v5643_v40, %v14907_v29  ;;  %v5996_v10 = vsel %vm1955_vm15, %v5995_v5, %v5991_v12 }
 0x6c9   : > { %v6133_v33 = vrot.slane %v5634_v61, %v14898_v47  ;;  %5825 = vperm.xlu1 %7260, %v7771_v1   ;;  %v7775_v32 = vpop.eup %7774  ;;  %v6493_v41 = vsel %vm6492_vm12, %v6491_v45, 256  ;;  %vm15166_vm0 = vcmask 1042434   ;;  %vm15168_vm12 = vcmask 458112  }
 0x6ca   : > { %v5912_v35 = vsel %vm1948_vm14, %v5911_v11, %v5907_v36 }
 0x6cb   : > { %v6134_v39 = vsel %vm1927_vm11, %v6133_v33, %v6129_v44  ;;  %v5649_v19 = vpop.permute.xlu0 %5648  ;;  %v5917_v21 = vsel %vm1955_vm15, %v5916_v16, %v5912_v35 }
 0x6cc   : > { %v6139_v31 = vsel %vm15162_vm6, %v6138_v50, %v6134_v39  ;;  %v5640_v7 = vpop.permute.xlu1 %5639  ;;  %6499 = vperm.xlu0 %7261, %v6488_v23   ;;  %v6471_v26 = vsel %vm15165_vm10, %v5996_v10, %v5917_v21  ;;  %vm15167_vm6 = vcmask 1043459   ;;  %v6158_v44 = vrot.slane %v5649_v19, %v9059_v51 }
 0x6cd   : > { %v6143_v0 = vrot.slane %v5640_v7, %v14910_v59  ;;  %5831 = vperm.xlu1 %7260, %v7773_v46   ;;  %v6472_v40 = vsel %vm15166_vm0, %v13027_v9, %v6471_v26  ;;  %vm15169_vm10 = vcmask 589312   ;;  %vm15170_vm0 = vcmask 720512  }
 0x6cf   : > { %v6144_v18 = vsel %vm1941_vm13, %v6143_v0, %v6139_v31  ;;  %v5655_v20 = vpop.permute.xlu0 %5654 }
 0x6d0   : > { %v6149_v3 = vsel %vm1948_vm14, %v6148_v53, %v6144_v18  ;;  %v5646_v52 = vpop.permute.xlu1 %5645  ;;  %v6167_v23 = vrot.slane %v5655_v20, %v9067_v13 }
 0x6d1   : > { %v6153_v2 = vrot.slane %v5646_v52, %v14920_v24  ;;  %5837 = vperm.xlu1 %7260, %v7775_v32  }
 0x6d3   : > { %v6154_v1 = vsel %vm1955_vm15, %v6153_v2, %v6149_v3  ;;  %v5661_v30 = vpop.permute.xlu0 %5660 }
 0x6d4   : > { %v6473_v63 = vsel %vm15167_vm6, %v6154_v1, %v6472_v40  ;;  %v5652_v37 = vpop.permute.xlu1 %5651  ;;  %v6177_v48 = vrot.slane %v5661_v30, %v9110_v25  ;;  %vm15171_vm6 = vcmask 851712  }
 0x6d5   : > { %v6162_v61 = vrot.slane %v5652_v37, %v9041_v15  ;;  %6509 = vperm.xlu1 %7260, %v6493_v41  }
 0x6d7   : > { %v6163_v6 = vsel %vm1857_vm1, %v6162_v61, %v6158_v44  ;;  %v5667_v28 = vpop.permute.xlu0 %5666 }
 0x6d8   : > { %v6168_v57 = vsel %vm1864_vm2, %v6167_v23, %v6163_v6  ;;  %v5658_v33 = vpop.permute.xlu1 %5657  ;;  %v6187_v42 = vrot.slane %v5667_v28, %v9152_v49 }
 0x6d9   : > { %v6172_v9 = vrot.slane %v5658_v33, %v9090_v4 }
 0x6db   : > { %v6173_v17 = vsel %vm1871_vm3, %v6172_v9, %v6168_v57  ;;  %v5673_v58 = vpop.permute.xlu0 %5672 }
 0x6dc   : > { %v6178_v50 = vsel %vm1878_vm4, %v6177_v48, %v6173_v17  ;;  %v5664_v46 = vpop.permute.xlu1 %5663  ;;  %v6197_v38 = vrot.slane %v5673_v58, %v9170_v8 }
 0x6dd   : > { %v6182_v27 = vrot.slane %v5664_v46, %v9107_v14 }
 0x6df   : > { %v6183_v5 = vsel %vm1885_vm5, %v6182_v27, %v6178_v50  ;;  %v5679_v39 = vpop.permute.xlu0 %5678 }
 0x6e0   : > { %v6188_v19 = vsel %vm15168_vm12, %v6187_v42, %v6183_v5  ;;  %v5670_v43 = vpop.permute.xlu1 %5669  ;;  %v6207_v16 = vrot.slane %v5679_v39, %v9241_v56 }
 0x6e1   : > { %v6192_v22 = vrot.slane %v5670_v43, %v9127_v62 }
 0x6e3   : > { %v6193_v31 = vsel %vm1899_vm7, %v6192_v22, %v6188_v19  ;;  %v5685_v7 = vpop.permute.xlu0 %5684 }
 0x6e4   : > { %v6198_v45 = vsel %vm15169_vm10, %v6197_v38, %v6193_v31  ;;  %v5676_v36 = vpop.permute.xlu1 %5675  ;;  %v6217_v10 = vrot.slane %v5685_v7, %v9316_v60 }
 0x6e5   : > { %v6202_v34 = vrot.slane %v5676_v36, %v9155_v54 }
 0x6e7   : > { %v6203_v0 = vsel %vm1913_vm9, %v6202_v34, %v6198_v45  ;;  %v5691_v55 = vpop.permute.xlu0 %5690 }
 0x6e8   : > { %v6208_v11 = vsel %vm15170_vm0, %v6207_v16, %v6203_v0  ;;  %v5682_v12 = vpop.permute.xlu1 %5681  ;;  %v6227_v52 = vrot.slane %v5691_v55, %v14907_v29 }
 0x6e9   : > { %v6212_v53 = vrot.slane %v5682_v12, %v14898_v47 }
 0x6eb   : > { %v6213_v18 = vsel %vm1927_vm11, %v6212_v53, %v6208_v11  ;;  %v5697_v20 = vpop.permute.xlu0 %5696 }
 0x6ec   : > { %v6218_v32 = vsel %vm15171_vm6, %v6217_v10, %v6213_v18  ;;  %v5688_v35 = vpop.permute.xlu1 %5687  ;;  %v6237_v61 = vrot.slane %v5697_v20, %v9059_v51 }
 0x6ed   : > { %v6222_v3 = vrot.slane %v5688_v35, %v14910_v59 }
 0x6ef   : > { %v6223_v21 = vsel %vm1941_vm13, %v6222_v3, %v6218_v32  ;;  %v5703_v2 = vpop.permute.xlu0 %5702 }
 0x6f0   : > { %v6228_v26 = vsel %vm1948_vm14, %v6227_v52, %v6223_v21  ;;  %v5694_v41 = vpop.permute.xlu1 %5693  ;;  %v6246_v6 = vrot.slane %v5703_v2, %v9067_v13 }
 0x6f1   : > { %v6232_v40 = vrot.slane %v5694_v41, %v14920_v24 }
 0x6f3   : > { %v6233_v1 = vsel %vm1955_vm15, %v6232_v40, %v6228_v26  ;;  %v5709_v30 = vpop.permute.xlu0 %5708 }
 0x6f4   : > { %v6474_v37 = vsel %vm2516_vm8, %v6233_v1, %v6473_v63  ;;  %v5700_v44 = vpop.permute.xlu1 %5699  ;;  %v6256_v17 = vrot.slane %v5709_v30, %v9110_v25  ;;  %vm15172_vm8 = vmmov %vm15168_vm12 }
 0x6f5   : > { %v6241_v23 = vrot.slane %v5700_v44, %v9041_v15  ;;  %vm15173_vm12 = vmmov %vm15169_vm10 }
 0x6f6   : > { %vm15174_vm10 = vmmov %vm15170_vm0 }
 0x6f7   : > { %v6242_v28 = vsel %vm1857_vm1, %v6241_v23, %v6237_v61  ;;  %v5715_v57 = vpop.permute.xlu0 %5714  ;;  %vm15175_vm0 = vmmov %vm15171_vm6  ;;  %vm15176_vm6 = vcmask 1045509  }
 0x6f8   : > { %v6247_v33 = vsel %vm1864_vm2, %v6246_v6, %v6242_v28  ;;  %v5706_v9 = vpop.permute.xlu1 %5705  ;;  %v6266_v42 = vrot.slane %v5715_v57, %v9152_v49 }
 0x6f9   : > { %v6251_v48 = vrot.slane %v5706_v9, %v9090_v4 }
 0x6fb   : > { %v6252_v58 = vsel %vm1871_vm3, %v6251_v48, %v6247_v33  ;;  %v5721_v63 = vpop.permute.xlu0 %5720 }
 0x6fc   : > { %v6257_v50 = vsel %vm1878_vm4, %v6256_v17, %v6252_v58  ;;  %v5712_v46 = vpop.permute.xlu1 %5711  ;;  %v6276_v38 = vrot.slane %v5721_v63, %v9170_v8 }
 0x6fd   : > { %v6261_v27 = vrot.slane %v5712_v46, %v9107_v14 }
 0x6ff   : > { %v6262_v5 = vsel %vm1885_vm5, %v6261_v27, %v6257_v50  ;;  %v5727_v39 = vpop.permute.xlu0 %5726 }
 0x700   : > { %v6267_v19 = vsel %vm15172_vm8, %v6266_v42, %v6262_v5  ;;  %v5718_v43 = vpop.permute.xlu1 %5717  ;;  %v6286_v16 = vrot.slane %v5727_v39, %v9241_v56 }
 0x701   : > { %v6271_v22 = vrot.slane %v5718_v43, %v9127_v62 }
 0x703   : > { %v6272_v31 = vsel %vm1899_vm7, %v6271_v22, %v6267_v19  ;;  %v5733_v7 = vpop.permute.xlu0 %5732 }
 0x704   : > { %v6277_v45 = vsel %vm15173_vm12, %v6276_v38, %v6272_v31  ;;  %v5724_v36 = vpop.permute.xlu1 %5723  ;;  %v6296_v10 = vrot.slane %v5733_v7, %v9316_v60 }
 0x705   : > { %v6281_v34 = vrot.slane %v5724_v36, %v9155_v54 }
 0x707   : > { %v6282_v0 = vsel %vm1913_vm9, %v6281_v34, %v6277_v45  ;;  %v5739_v55 = vpop.permute.xlu0 %5738 }
 0x708   : > { %v6287_v11 = vsel %vm15174_vm10, %v6286_v16, %v6282_v0  ;;  %v5730_v12 = vpop.permute.xlu1 %5729  ;;  %v6306_v52 = vrot.slane %v5739_v55, %v14907_v29 }
 0x709   : > { %v6291_v53 = vrot.slane %v5730_v12, %v14898_v47 }
 0x70b   : > { %v6292_v18 = vsel %vm1927_vm11, %v6291_v53, %v6287_v11  ;;  %v5745_v20 = vpop.permute.xlu0 %5744 }
 0x70c   : > { %v6297_v32 = vsel %vm15175_vm0, %v6296_v10, %v6292_v18  ;;  %v5736_v35 = vpop.permute.xlu1 %5735  ;;  %v6316_v5 = vrot.slane %v5745_v20, %v9059_v51 }
 0x70d   : > { %v6301_v3 = vrot.slane %v5736_v35, %v14910_v59 }
 0x70f   : > { %v6302_v21 = vsel %vm1941_vm13, %v6301_v3, %v6297_v32  ;;  %v5751_v2 = vpop.permute.xlu0 %5750 }
 0x710   : > { %v6307_v26 = vsel %vm1948_vm14, %v6306_v52, %v6302_v21  ;;  %v5742_v41 = vpop.permute.xlu1 %5741  ;;  %v6325_v38 = vrot.slane %v5751_v2, %v9067_v13 }
 0x711   : > { %v6311_v40 = vrot.slane %v5742_v41, %v14920_v24 }
 0x713   : > { %v6312_v1 = vsel %vm1955_vm15, %v6311_v40, %v6307_v26  ;;  %v5757_v30 = vpop.permute.xlu0 %5756 }
 0x714   : > { %v5748_v44 = vpop.permute.xlu1 %5747  ;;  %v13221_v61 = vsel %vm15176_vm6, %v6312_v1, %v6474_v37  ;;  %v6335_v12 = vrot.slane %v5757_v30, %v9110_v25 }
 0x715   : > { %v6320_v37 = vrot.slane %v5748_v44, %v9041_v15 }
 0x717   : > { %v5763_v23 = vpop.permute.xlu0 %5762  ;;  %v6321_v19 = vsel %vm1857_vm1, %v6320_v37, %v6316_v5 }
 0x718   : > { %v5754_v6 = vpop.permute.xlu1 %5753  ;;  %v6326_v45 = vsel %vm1864_vm2, %v6325_v38, %v6321_v19  ;;  %v6345_v3 = vrot.slane %v5763_v23, %v9152_v49 }
 0x719   : > { %v6330_v43 = vrot.slane %v5754_v6, %v9090_v4 }
 0x71b   : > { %v5769_v28 = vpop.permute.xlu0 %5768  ;;  %v6331_v16 = vsel %vm1871_vm3, %v6330_v43, %v6326_v45 }
 0x71c   : > { %v5760_v57 = vpop.permute.xlu1 %5759 }
 0x71d   : > { %v6340_v0 = vrot.slane %v5760_v57, %v9107_v14 }
 0x71f   : > { %v13223_v33 = vpop.permute.xlu0 %5774 }
 0x720   : > { %v5766_v9 = vpop.permute.xlu1 %5765 }
 0x721   : > { %v6350_v32 = vrot.slane %v5766_v9, %v9127_v62 }
 0x723   : > { %v13225_v48 = vpop.permute.xlu0 %5780 }
 0x724   : > { %v5772_v17 = vpop.permute.xlu1 %5771 }
 0x725   : > { %v6360_v40 = vrot.slane %v5772_v17, %v9155_v54 }
 0x727   : > { %v13227_v58 = vpop.permute.xlu0 %5786 }
 0x728   : > { %v5778_v63 = vpop.permute.xlu1 %5777 }
 0x72b   : > { %v5793_v50 = vpop.permute.xlu0 %5792 }
 0x72c   : > { %v13229_v46 = vpop.permute.xlu1 %5783  ;;  %v6395_v31 = vrot.slane %v5793_v50, %v9059_v51  ;;  %v6370_v50 = vrot.slane %v5778_v63, %v14898_v47 }
 0x72d   : > { %v6380_v63 = vrot.slane %v13229_v46, %v14910_v59 }
 0x72f   : > { %v5799_v27 = vpop.permute.xlu0 %5798 }
 0x730   : > { %v13232_v42 = vpop.permute.xlu1 %5789  ;;  %v6404_v55 = vrot.slane %v5799_v27, %v9067_v13  ;;  %v6495_v27 = vstv %s6819_s30 }
 0x733   : > { %v5805_v39 = vpop.permute.xlu0 %5804 }
 0x734   : > { %v5796_v22 = vpop.permute.xlu1 %5795  ;;  %v6414_v35 = vrot.slane %v5805_v39, %v9110_v25  ;;  %v6355_v25 = vrot.slane %v5769_v28, %v9170_v8  ;;  %v6365_v28 = vrot.slane %v13223_v33, %v9241_v56  ;;  %v15182_v33 = vld [vmem:[#allocation108_spill] sm:$0xff] }
 0x735   : > { %v6399_v7 = vrot.slane %v5796_v22, %v9041_v15  ;;  %v6336_v15 = vsel %vm1878_vm4, %v6335_v12, %v6331_v16  ;;  %v6496_v38 = vadd.s32 %v6495_v27, %v15182_v33 }
 0x736   : > { %v6341_v20 = vsel %vm1885_vm5, %v6340_v0, %v6336_v15 }
 0x737   : > { %v6400_v36 = vsel %vm1857_vm1, %v6399_v7, %v6395_v31  ;;  %v5811_v34 = vpop.permute.xlu0 %5810  ;;  %vm15177_vm1 = vmmov %vm15172_vm8 }
 0x738   : > { %v5802_v11 = vpop.permute.xlu1 %5801  ;;  %v6405_v51 = vsel %vm1864_vm2, %v6404_v55, %v6400_v36  ;;  %v6346_v21 = vsel %vm15177_vm1, %v6345_v3, %v6341_v20  ;;  %v6424_v1 = vrot.slane %v5811_v34, %v9152_v49  ;;  %vm15178_vm2 = vmmov %vm15177_vm1  ;;  %v15188_v3 = vld [vmem:[#allocation89_spill] sm:$0xff] }
 0x739   : > { %v6409_v53 = vrot.slane %v5802_v11, %v9090_v4  ;;  %v6351_v41 = vsel %vm1899_vm7, %v6350_v32, %v6346_v21 }
 0x73b   : > { %v6410_v10 = vsel %vm1871_vm3, %v6409_v53, %v6405_v51  ;;  %v5817_v18 = vpop.permute.xlu0 %5816  ;;  %vm15179_vm3 = vmmov %vm15173_vm12 }
 0x73c   : > { %v5808_v13 = vpop.permute.xlu1 %5807  ;;  %v6415_v4 = vsel %vm1878_vm4, %v6414_v35, %v6410_v10  ;;  %v6356_v23 = vsel %vm15179_vm3, %v6355_v25, %v6351_v41  ;;  %v6434_v17 = vrot.slane %v5817_v18, %v9170_v8  ;;  %vm15180_vm4 = vmmov %vm15179_vm3  ;;  %v7780_v35 = vld [vmem:[%s8152_s24] sm:$0xff] }
 0x73d   : > { %v6419_v52 = vrot.slane %v5808_v13, %v9107_v14  ;;  %v6361_v9 = vsel %vm1913_vm9, %v6360_v40, %v6356_v23  ;;  %vm15185_vm12 = vmmov %vm15175_vm0  ;;  %v6539_v23 = vld [vmem:[%s8144_s20] sm:$0xff] (!%p6820_p9) }
 0x73e   : > { %vm6540_vm1 = vcmp.gt.s32.totalorder (!%p6820_p9), %v6539_v23, 0 }
 0x73f   : > { %v6420_v2 = vsel %vm1885_vm5, %v6419_v52, %v6415_v4  ;;  %v5823_v26 = vpop.permute.xlu0 %5822  ;;  %vm15181_vm5 = vmmov %vm15174_vm10  ;;  %vm15187_vm10 = vcmask 1047559  }
 0x740   : > { %v5814_v30 = vpop.permute.xlu1 %5813  ;;  %v6425_v14 = vsel %vm15178_vm2, %v6424_v1, %v6420_v2  ;;  %v6366_v5 = vsel %vm15181_vm5, %v6365_v28, %v6361_v9  ;;  %v6444_v8 = vrot.slane %v5823_v26, %v9241_v56  ;;  %v6390_v56 = vrot.slane %v13232_v42, %v14920_v24 }
 0x741   : > { %v6429_v44 = vrot.slane %v5814_v30, %v9127_v62  ;;  %v6371_v43 = vsel %vm1927_vm11, %v6370_v50, %v6366_v5  ;;  %v6507_v30 = vld [vmem:[#allocation7] sm:$0xff]  ;;  %v6541_v9 = vsel (!%p6820_p9), %vm6540_vm1, %v6539_v23, 0 }
 0x742   : > { %vm6542_vm3 = vcmp.lt.s32.totalorder (!%p6820_p9), %v6541_v9, 256 }
 0x743   : > { %v6430_v6 = vsel %vm1899_vm7, %v6429_v44, %v6425_v14  ;;  %v5829_v57 = vpop.permute.xlu0 %5828  ;;  %vm15183_vm7 = vmmov %vm15181_vm5  ;;  %v6531_v14 = vld [vmem:[%s8138_s17] sm:$0xff] (!%p6820_p9)  ;;  %s7949_s17 = smov (!%p6820_p9), 2  }
 0x744   : > { %v5820_v49 = vpop.permute.xlu1 %5819  ;;  %v6435_v37 = vsel %vm15180_vm4, %v6434_v17, %v6430_v6  ;;  %v6454_v16 = vrot.slane %v5829_v57, %v9316_v60  ;;  %vm6532_vm6 = vcmp.gt.s32.totalorder (!%p6820_p9), %v6531_v14, 0  ;;  %v6543_v17 = vsel (!%p6820_p9), %vm6542_vm3, %v6541_v9, 256 }
 0x745   : > { %v6439_v62 = vrot.slane %v5820_v49, %v9155_v54  ;;  %v6375_v54 = vrot.slane %v13225_v48, %v9316_v60  ;;  %v6385_v48 = vrot.slane %v13227_v58, %v14907_v29  ;;  %v6533_v57 = vsel (!%p6820_p9), %vm6532_vm6, %v6531_v14, 0 }
 0x746   : > { %vm6534_vm2 = vcmp.lt.s32.totalorder (!%p6820_p9), %v6533_v57, 256  ;;  %vm6544_vm5 = vcmp.lt.s32.totalorder (!%p6820_p9), %v6543_v17, 256  ;;  %v7946_v49 = vmov (!%p6820_p9), 0.0  }
 0x747   : > { %v6440_v39 = vsel %vm1913_vm9, %v6439_v62, %v6435_v37  ;;  %v5835_v19 = vpop.permute.xlu0 %5834  ;;  %vm15184_vm9 = vmmov %vm15175_vm0  ;;  %v6535_v50 = vsel (!%p6820_p9), %vm6534_vm2, %v6533_v57, 256  ;;  %v6822_v62 = vsel (!%p6820_p9), %vm6544_vm5, 1.0, %v7946_v49  ;;  %v6526_v37 = vld [vmem:[#allocation4] sm:$0xff] (!%p6820_p9) }
 0x748   : > { %v5826_v22 = vpop.permute.xlu1 %5825  ;;  %v6445_v7 = vsel %vm15183_vm7, %v6444_v8, %v6440_v39  ;;  %v6376_v45 = vsel %vm15184_vm9, %v6375_v54, %v6371_v43  ;;  %v6464_v60 = vrot.slane %v5835_v19, %v14907_v29  ;;  %v15189_v29 = vld [vmem:[#allocation102_spill] sm:$0xff]  ;;  %vm6536_vm4 = vcmp.lt.s32.totalorder (!%p6820_p9), %v6535_v50, 256  ;;  %v6522_v8 = vld [vmem:[#allocation3] sm:$0xff] (!%p6820_p9) }
 0x749   : > { %v6449_v31 = vrot.slane %v5826_v22, %v14898_v47  ;;  %v6381_v46 = vsel %vm1941_vm13, %v6380_v63, %v6376_v45  ;;  %v7779_v47 = vld [vmem:[%s8150_s13] sm:$0xff]  ;;  %v15190_v52 = vsub.f32 %v15188_v3, %v15189_v29  ;;  %v6821_v28 = vsel (!%p6820_p9), %vm6536_vm4, 1.0, %v7946_v49 }
 0x74a   : > { %v6386_v53 = vsel %vm1948_vm14, %v6385_v48, %v6381_v46  ;;  %vm6551_vm7 = vcmp.gt.f32.partialorder (!%p6820_p9), %v6822_v62, 0.0  ;;  %vm6547_vm9 = vcmp.gt.f32.partialorder (!%p6820_p9), %v6821_v28, 0.0 }
 0x74b   : > { %v6450_v36 = vsel %vm1927_vm11, %v6449_v31, %v6445_v7  ;;  %v6500_v34 = vpop.permute.xlu0 %6499  ;;  %v6391_v42 = vsel %vm1955_vm15, %v6390_v56, %v6386_v53  ;;  %vm15186_vm11 = vcmask 1046534   ;;  %v4896_v4 = vmul.f32 1.442695, %v15190_v52 }
 0x74c   : > { %vm6501_vm8 = vcmp.eq.s32.totalorder %v6496_v38, %v6500_v34  ;;  %v5832_v0 = vpop.permute.xlu1 %5831  ;;  %v6455_v12 = vsel %vm15185_vm12, %v6454_v16, %v6450_v36  ;;  %vm6570_vm12 = vcmask (!%p6820_p9), 23552  }
 0x74d   : > { %v6502_v55 = vsel %vm6501_vm8, %v7779_v47, 0.0  ;;  %v6459_v11 = vrot.slane %v5832_v0, %v14910_v59  ;;  %v6476_v59 = vsel %vm15186_vm11, %v6391_v42, %v13221_v61  ;;  %7776 = vpow2.f32 %v4896_v4  ;;  %v4894_v61 = vld [vmem:[#allocation5] sm:$0xff] }
 0x74e   : > { %6503 = vadd.xlane.f32.xlu1 %v6502_v55  ;;  %vm6568_vm8 = vcmask (!%p6820_p9), 15360   ;;  %vm15194_vm11 = vcmask (!%p6820_p9), 7168  }
 0x74f   : > { %v6460_v51 = vsel %vm1941_vm13, %v6459_v11, %v6455_v12  ;;  %vm15191_vm13 = vcmask 7168  }
 0x750   : > { %v5838_v15 = vpop.permute.xlu1 %5837  ;;  %v6465_v58 = vsel %vm1948_vm14, %v6464_v60, %v6460_v51  ;;  %vm15192_vm14 = vmmov %vm15191_vm13 }
 0x751   : > { %v6469_v10 = vrot.slane %v5838_v15, %v14920_v24  ;;  %v6497_v24 = vld [vmem:[#allocation6] sm:$0xff] }
 0x753   : > { %v6470_v18 = vsel %vm1955_vm15, %v6469_v10, %v6465_v58  ;;  %vm15193_vm15 = vmmov %vm15191_vm13 }
 0x754   : > { %v6510_v20 = vpop.permute.xlu1 %6509  ;;  %v6477_v32 = vsel %vm15187_vm10, %v6470_v18, %v6476_v59  ;;  %vm6572_vm10 = vcmask (!%p6820_p9), 31744  }
 0x755   : > { %vm6511_vm0 = vcmp.eq.s32.totalorder %v6496_v38, %v6510_v20  ;;  %6479 = vadd.xlane.f32.xlu0 %v6477_v32  ;;  %v6521_v38 = vld [vmem:[#allocation2] sm:$0xff] (!%p6820_p9) }
 0x756   : > { %v6512_v13 = vsel %vm6511_vm0, %v7780_v35, 0.0 }
 0x757   : > { %v7777_v26 = vpop.eup %7776 }
 0x758   : > { %v4898_v41 = vmul.f32 %v7777_v26, %v4894_v61 }
 0x759   : > { %6513 = vadd.xlane.f32.xlu0 %v6512_v13 }
 0x75f   : > { %6564 = vrot.lane.b32.xlu1 (!%p6820_p9), %v6822_v62, %s7948_s23 }
 0x76f   : > { %6556 = vrot.lane.b32.xlu0 (!%p6820_p9), %v6821_v28, %s7947_s21 }
 0x7db   : > { %v6504_v21 = vpop.xlane.xlu1 %6503 }
 0x7dc   : > { %v6505_v2 = vadd.f32 %v6504_v21, %v6497_v24 }
 0x7de   : > { %6506 = vst.msk [vmem:[#allocation6] sm:$0xff] %vm15191_vm13, %v6505_v2 }
 0x7df   : > { %v6565_v34 = vpop.permute.xlu1 (!%p6820_p9), %6564 }
 0x7e2   : > { %v6480_v40 = vpop.xlane.xlu0 %6479 }
 0x7e3   : > { %v6481_v1 = vadd.f32 %v6480_v40, %v4898_v41  ;;  %6520 = sbr.rel (%p6820_p9) target bundleno = 2165 (0x875), region = 56 }
 0x7e5   : > { %6482 = vst.msk [vmem:[#allocation5] sm:$0xff] %vm15192_vm14, %v6481_v1  ;;  %v6548_v31 = vld [vmem:[#allocation6] sm:$0xff] (!%p6820_p9) }
 0x7e6   : > { %v6514_v25 = vpop.xlane.xlu0 %6513 }
 0x7e7   : > { %v6515_v44 = vadd.f32 %v6514_v25, %v6507_v30 }
 0x7e9   : > { %6516 = vst.msk [vmem:[#allocation7] sm:$0xff] %vm15193_vm15, %v6515_v44 }
 0x7ea   : > { %v6557_v45 = vpop.permute.xlu0 %6556 }
 0x7ec   : > { %v6527_v6 = vld [vmem:[#allocation5] sm:$0xff] }
 0x7ed   : > { %7781 = vlog2.f32 %v6527_v6 }
 0x7ee   : > { %7783 = vlog2.f32 %v6522_v8 }
 0x7f0   : > { %v6552_v39 = vld [vmem:[#allocation7] sm:$0xff] }
 0x7f7   : > { %v7782_v27 = vpop.eup %7781 }
 0x7f8   : > { %v6529_v5 = vmul.f32 0.6931472, %v7782_v27  ;;  %v7784_v22 = vpop.eup %7783 }
 0x7f9   : > { %v6524_v33 = vmul.f32 0.6931472, %v7784_v22 }
 0x7fa   : > { %v6530_v19 = vadd.f32 %v6529_v5, %v6526_v37 }
 0x7fb   : > { %v6525_v54 = vadd.f32 %v6524_v33, %v6521_v38 }
 0x7fc   : > { %v6553_v43 = vsub.f32 %v6530_v19, %v6552_v39 }
 0x7fd   : > { %v6549_v7 = vsub.f32 %v6525_v54, %v6548_v31 }
 0x7fe   : > { %v6554_v63 = vsel %vm6551_vm7, %v6553_v43, 0.0 }
 0x7ff   : > { %6560 = vrot.lane.b32.xlu0 %v6554_v63, %s7949_s17  ;;  %v6550_v36 = vsel %vm6547_vm9, %v6549_v7, 0.0 }
 0x800   : > { %v6567_v46 = vsel %vm15194_vm11, %v6550_v36, %v6557_v45 }
 0x871   : > { %v6561_v56 = vpop.permute.xlu0 %6560 }
 0x872   : > { %v6569_v16 = vsel %vm6568_vm8, %v6567_v46, %v6561_v56 }
 0x873   : > { %v6571_v0 = vsel %vm6570_vm12, %v6569_v16, %v6565_v34 }
 0x874   : > { %6573 = vst.msk [vmem:[%s413_s22] sm:$0xff] %vm6572_vm10, %v6571_v0 }
 0x875 PF: > { %s6825_s20 = sshll.u32 %s7922_s28, 1  ;;  %s6599_s10 = sshll.u32 %s8150_s13, 4  ;;  %s13328_s10 = int_to_ptr.vmem [resolvable:$true] %s6599_s10 }
 0x876   : > { %s13324_s9 = sadd.s32 %s7918_s27, %s6825_s20  ;;  %s6575_s22 = scalar_lea.sflag [#allocation10], %s8115_s29 }
 0x877   : > { %s6826_s12 = sshll.u32 %s13324_s9, 7  ;;  %s7800_s4 = scalar_lea.vmem %s13328_s10, 128 }
 0x878   : > { %s6597_s15 = scalar_lea.hbm %s13411_s5, %s6826_s12  ;;  %p7801_p13 = scmp.ne.s32.totalorder %s13328_s10, %s7800_s4 }
 0x879   : > { %p15195_p2 = scmp.ne.s32.totalorder %s13955_s18, 0  ;;  %s7950_s27 = smov [#allocation13]  }
 0x87a   : > { %s7804_s28 = sshll.u32 %s7950_s27, 4  ;;  %s7805_s28 = int_to_ptr.vmem [resolvable:$false] %s7804_s28 }
 0x87b   : > { %p7802_p1 = pnand %p7801_p13, %p15195_p2  ;;  %s7806_s13 = scalar_lea.vmem %s7805_s28, 256 }
 0x87c   : > { %p7807_p5 = scmp.lt.s32.totalorder %s13328_s10, %s7805_s28  ;;  %p7808_p7 = scmp.lt.s32.totalorder %s7806_s13, %s7800_s4 }
 0x87d   : > { %p7803_p4 = pneg %p7802_p1 }
 0x87e   : > { %p7809_p10 = por %p7808_p7, %p7807_p5 }
 0x880   : > { %p7810_p12 = pnand %p7809_p10, %p7803_p4 }
 0x882   : > { %7813 = shalt.err (!%p7810_p12)
}
 0x883   : > { %s7814_s30 = scalar_lea.hbm %s6597_s15, 128  ;;  %s7818_s17 = scalar_lea.hbm %s13411_s5, 512 }
 0x884   : > { %p7815_p11 = scmp.ne.s32.totalorder %s6597_s15, %s7814_s30  ;;  %p7819_p3 = scmp.lt.u32.totalorder %s6597_s15, %s13411_s5 }
 0x885   : > { %p7820_p6 = scmp.lt.u32.totalorder %s7818_s17, %s7814_s30  ;;  %p7822_p13 = scmp.lt.u32.totalorder %s7814_s30, %s6597_s15 }
 0x886   : > { %p7816_p0 = pnand %p7815_p11, %p15195_p2 }
 0x887   : > { %p7821_p9 = por %p7820_p6, %p7819_p3 }
 0x888   : > { %p7817_p8 = pneg %p7816_p0 }
 0x889   : > { %p7823_p1 = por %p7822_p13, %p7821_p9 }
 0x88b   : > { %p7824_p4 = pnand %p7823_p1, %p7817_p8 }
 0x88d   : > { %7827 = shalt.err (!%p7824_p4)
}
 0x88e   : > { %7164 = dma.vmem_to_hbm [thread:$0]  (%p15195_p2), %s13328_s10, 128, %s6597_s15, %s6575_s22  }
 0x88f   : > { %s13357_s19 = scalar_lea.hbm %s13412_s6, %s6826_s12  ;;  %s6614_s4 = sshll.u32 %s8152_s24, 4  ;;  %s6615_s4 = int_to_ptr.vmem [resolvable:$true] %s6614_s4 }
 0x890   : > { %s6580_s27 = scalar_lea.sflag [#allocation15], %s8115_s29  ;;  %s7828_s28 = scalar_lea.vmem %s6615_s4, 128 }
 0x891   : > { %p7829_p5 = scmp.ne.s32.totalorder %s6615_s4, %s7828_s28  ;;  %s7951_s13 = smov [#allocation14]  }
 0x892   : > { %s7832_s30 = sshll.u32 %s7951_s13, 4  ;;  %s7833_s30 = int_to_ptr.vmem [resolvable:$false] %s7832_s30 }
 0x893   : > { %p7830_p7 = pnand %p7829_p5, %p15195_p2  ;;  %s7834_s21 = scalar_lea.vmem %s7833_s30, 256 }
 0x894   : > { %p7835_p12 = scmp.lt.s32.totalorder %s6615_s4, %s7833_s30  ;;  %p7836_p11 = scmp.lt.s32.totalorder %s7834_s21, %s7828_s28 }
 0x895   : > { %p7831_p10 = pneg %p7830_p7 }
 0x896   : > { %p7837_p0 = por %p7836_p11, %p7835_p12 }
 0x898   : > { %p7838_p8 = pnand %p7837_p0, %p7831_p10 }
 0x89a   : > { %7841 = shalt.err (!%p7838_p8)
}
 0x89b   : > { %s7842_s29 = scalar_lea.hbm %s13357_s19, 128  ;;  %s7846_s10 = scalar_lea.hbm %s13412_s6, 512 }
 0x89c   : > { %p7843_p3 = scmp.ne.s32.totalorder %s13357_s19, %s7842_s29  ;;  %p7847_p13 = scmp.lt.u32.totalorder %s13357_s19, %s13412_s6 }
 0x89d   : > { %p7848_p1 = scmp.lt.u32.totalorder %s7846_s10, %s7842_s29  ;;  %p7850_p5 = scmp.lt.u32.totalorder %s7842_s29, %s13357_s19 }
 0x89e   : > { %p7844_p6 = pnand %p7843_p3, %p15195_p2 }
 0x89f   : > { %p7849_p4 = por %p7848_p1, %p7847_p13 }
 0x8a0   : > { %p7845_p9 = pneg %p7844_p6 }
 0x8a1   : > { %p7851_p7 = por %p7850_p5, %p7849_p4 }
 0x8a3   : > { %p7852_p10 = pnand %p7851_p7, %p7845_p9 }
 0x8a5   : > { %7855 = shalt.err (!%p7852_p10)
}
 0x8a6   : > { %7165 = dma.vmem_to_hbm [thread:$0]  (%p15195_p2), %s6615_s4, 128, %s13357_s19, %s6580_s27  }
 0x8a7 PF: > { %s15196_s22 = sld [smem:[#allocation23_spill]]  ;;  %s15197_s23 = sld [smem:[#allocation28_spill]] }
 0x8a8   : > { %p7181_p12 = scmp.ge.s32.totalorder %s7934_s8, 2 }
 0x8ad   : > { %s6629_s17 = sand.u32 1, %s15196_s22   ;;  %p15198_p11 = scmp.ne.s32.totalorder %s15197_s23, 0 }
 0x8ae   : > { %s6630_s11 = scalar_lea.sflag [#allocation10], %s6629_s17 }
 0x8af   : > { %p7173_p0 = pnand %p7181_p12, %p15198_p11 }
 0x8b1   : > { %7897 = dma.done.wait (!%p7173_p0), %s6630_s11, 128  }
 0x8b2   : > { %7899 = vsyncadd (!%p7173_p0), %s6630_s11, 4294967168  ;;  %s6639_s16 = scalar_lea.sflag [#allocation15], %s6629_s17 }
 0x8b3   : > { %7901 = dma.done.wait (!%p7173_p0), %s6639_s16, 128  }
 0x8b4   : > { %7903 = vsyncadd (!%p7173_p0), %s6639_s16, 4294967168  ;;  %s28_s8 = sadd.s32 1, %s7934_s8   ;;  %s15199_s18 = sld [smem:[#allocation29_spill]] }
 0x8b5   : > { %p25_p8 = scmp.ge.s32.totalorder %s28_s8, 6   ;;  %s15200_s27 = sld [smem:[#allocation24_spill]] }
 0x8b6   : > { %s15201_s28 = sld [smem:[#allocation25_spill]]  ;;  %s15202_s29 = sld [smem:[#allocation26_spill]] }
 0x8b7   : > { %s15203_s30 = sld [smem:[#allocation27_spill]]  ;;  %s15204_s24 = smov %s7910_s25 }
 0x8b8   : > { %s15205_s25 = smov %s7914_s26  ;;  %27 = sbr.rel (!%p25_p8) target bundleno = 12 (0xc), region = 138 }
 0x8ba   : > { %s15206_s26 = smov %s15199_s18 }
 0x8bf   :  { %6651 = vsyncpa [#allocation9], 1 }
 0x8c0   :  { %6653 = vsyncpa [#allocation9 + $0x1], 1 }
 0x8c1   :  { %6654 = vsyncpa [#allocation10], 1 }
 0x8c2   :  { %6656 = vsyncpa [#allocation10 + $0x1], 1 }
 0x8c3   :  { %6657 = vsyncpa [#allocation15], 1 }
 0x8c4   :  { %6659 = vsyncpa [#allocation15 + $0x1], 1 }
 0x8c5   :  { %6660 = vsyncpa [#allocation11], 1 }
 0x8c6   :  { %6662 = vsyncpa [#allocation11 + $0x1], 1 }

</bundles_post_ra>
